<compile_context>
chip_gen: v5e
topology: v5e:2x2
jax: 0.10.0
libtpu: 0.0.40
codegen_flags: <defaults>
</compile_context>

<pallas_src>
import functools

import jax
import jax.numpy as jnp
from jax import lax
from jax.experimental import pallas as pl
from jax.experimental.pallas import tpu as pltpu


VMEM_LIMIT_BYTES = 32 * 1024 * 1024  # explicit scoped-VMEM limit (safe on v5e/v6e/v7x)


# ----------------------------------------------------------------------------
# GRU stack kernel: grid = (num_directions,), whole sequence per grid step.
# Fused gate weights: wi (E, 3H), wh (H, 3H), biases (1, 3H); gate order [r,z,n].
# ----------------------------------------------------------------------------
def gru_seq_kernel(rev_ref,                       # SMEM (ndir,) int32: 1 => reversed time
                   x_ref,                         # (T, B, E)   time-major input
                   wi_ref, wh_ref,                # (E, 3H), (H, 3H)
                   bi_ref, bh_ref,                # (1, 3H), (1, 3H)
                   h0_ref,                        # (B, H)      initial hidden
                   out_ref,                       # (T, B, H)   per-step hidden
                   hlast_ref,                     # (B, H)      final hidden
                   xi_ref,                        # VMEM scratch (T, B, 3H)
                   h_ref):                        # VMEM scratch (B, H)
    T, B, E = x_ref.shape
    H = h0_ref.shape[-1]
    rev = rev_ref[pl.program_id(0)]

    # Hoisted input projection for all timesteps: one (T*B, E) @ (E, 3H) matmul.
    xi = jnp.dot(x_ref[...].reshape(T * B, E), wi_ref[...],
                 preferred_element_type=jnp.float32) + bi_ref[...]
    xi_ref[...] = xi.reshape(T, B, 3 * H)

    wh = wh_ref[...]
    bh = bh_ref[...]
    h_ref[...] = h0_ref[...]

    def step(t, carry):
        # Forward direction reads/writes time index t; backward reads/writes T-1-t.
        tau = jnp.where(rev > 0, T - 1 - t, t)
        h = h_ref[...]
        gx = xi_ref[tau]                                             # (B, 3H)
        gh = jnp.dot(h, wh, preferred_element_type=jnp.float32) + bh  # (B, 3H)
        r = jax.nn.sigmoid(gx[:, 0:H] + gh[:, 0:H])
        z = jax.nn.sigmoid(gx[:, H:2 * H] + gh[:, H:2 * H])
        n = jnp.tanh(gx[:, 2 * H:3 * H] + r * gh[:, 2 * H:3 * H])
        h_new = (1.0 - z) * n + z * h
        h_ref[...] = h_new
        out_ref[tau] = h_new
        return carry

    lax.fori_loop(0, T, step, 0, unroll=True)
    hlast_ref[...] = h_ref[...]


def gru_stack_run(x_tbE, wi, wh, bi, bh, h0, rev):
    """Run `ndir` independent GRUs over the same time-major input.

    x_tbE: (T, B, E); wi: (ndir, E, 3H); wh: (ndir, H, 3H); bi/bh: (ndir, 1, 3H);
    h0: (ndir, B, H); rev: (ndir,) int32 (1 => process time reversed).
    Returns out (ndir, T, B, H) and h_last (ndir, B, H).
    """
    ndir, E, H3 = wi.shape
    T, B, _ = x_tbE.shape
    H = H3 // 3
    out, hlast = pl.pallas_call(
        gru_seq_kernel,
        out_shape=(jax.ShapeDtypeStruct((ndir, T, B, H), jnp.float32),
                   jax.ShapeDtypeStruct((ndir, B, H), jnp.float32)),
        grid_spec=pltpu.PrefetchScalarGridSpec(
            num_scalar_prefetch=1,
            grid=(ndir,),
            in_specs=[
                pl.BlockSpec((T, B, E), lambda d, _r: (0, 0, 0)),
                pl.BlockSpec((None, E, H3), lambda d, _r: (d, 0, 0)),
                pl.BlockSpec((None, H, H3), lambda d, _r: (d, 0, 0)),
                pl.BlockSpec((None, 1, H3), lambda d, _r: (d, 0, 0)),
                pl.BlockSpec((None, 1, H3), lambda d, _r: (d, 0, 0)),
                pl.BlockSpec((None, B, H), lambda d, _r: (d, 0, 0)),
            ],
            out_specs=(pl.BlockSpec((None, T, B, H), lambda d, _r: (d, 0, 0, 0)),
                       pl.BlockSpec((None, B, H), lambda d, _r: (d, 0, 0))),
            scratch_shapes=[pltpu.VMEM((T, B, H3), jnp.float32),
                            pltpu.VMEM((B, H), jnp.float32)],
        ),
        compiler_params=pltpu.CompilerParams(
            dimension_semantics=("parallel",),       # directions are independent
            vmem_limit_bytes=VMEM_LIMIT_BYTES,
        ),
    )(rev, x_tbE, wi, wh, bi, bh, h0)
    return out, hlast


# ----------------------------------------------------------------------------
# Attention + linear_out(tanh) + vocab projection + log_softmax.
# Single invocation: whole batch; (B*Tx)/(B*Ty) rows flattened for the big
# matmuls; mask built in-kernel from the length vectors.
# ----------------------------------------------------------------------------
def attn_decode_kernel(dec_ref,      # (B, Ty, Hd)  decoder GRU outputs
                       ctx_ref,      # (B, Tx, 2*He) encoder outputs
                       xlen_ref,     # (B, 1) int32
                       ylen_ref,     # (B, 1) int32
                       win_ref,      # (2He, Hd)   linear_in (no bias)
                       woutc_ref,    # (2He, Hd)   linear_out, context half
                       woutd_ref,    # (Hd, Hd)    linear_out, decoder half
                       bout_ref,     # (1, Hd)
                       wv_ref,       # (Hd, V)     vocab projection
                       bv_ref,       # (1, V)
                       out_ref,      # (B, Ty, V)  log-probs
                       attn_ref):    # (B, Ty, Tx) attention weights
    B, Ty, Hd = dec_ref.shape
    Tx, C2 = ctx_ref.shape[1], ctx_ref.shape[2]
    V = wv_ref.shape[-1]

    dec = dec_ref[...]
    ctx = ctx_ref[...]

    # linear_in over all (B*Tx) rows at once: (B*Tx, 2He) @ (2He, Hd)
    ctx_in = jnp.dot(ctx.reshape(B * Tx, C2), win_ref[...],
                     preferred_element_type=jnp.float32).reshape(B, Tx, Hd)

    # scores[b, ty, tx] = dec[b, ty] . ctx_in[b, tx]
    scores = jnp.einsum("btd,bsd->bts", dec, ctx_in,
                        preferred_element_type=jnp.float32)

    # Length mask built in-kernel (no (B,Ty,Tx) HBM tensor): invalid -> -1e6.
    ty_idx = lax.broadcasted_iota(jnp.int32, (B, Ty, Tx), 1)
    tx_idx = lax.broadcasted_iota(jnp.int32, (B, Ty, Tx), 2)
    y_valid = ty_idx < ylen_ref[...][:, :, None]
    x_valid = tx_idx < xlen_ref[...][:, :, None]
    scores = jnp.where(y_valid & x_valid, scores, jnp.float32(-1e6))

    # softmax over the context axis
    m = jnp.max(scores, axis=-1, keepdims=True)
    e = jnp.exp(scores - m)
    attn = e / jnp.sum(e, axis=-1, keepdims=True)
    attn_ref[...] = attn

    # weighted context: (B, Ty, 2He)
    wctx = jnp.einsum("bts,bsc->btc", attn, ctx,
                      preferred_element_type=jnp.float32)

    # tanh(linear_out(cat([context, dec]))) == tanh(ctx@Wc + dec@Wd + b), flattened rows
    h = jnp.tanh(
        jnp.dot(wctx.reshape(B * Ty, C2), woutc_ref[...],
                preferred_element_type=jnp.float32)
        + jnp.dot(dec.reshape(B * Ty, Hd), woutd_ref[...],
                  preferred_element_type=jnp.float32)
        + bout_ref[...])

    # vocab projection + log_softmax, one (B*Ty, Hd) @ (Hd, V) matmul
    logits = jnp.dot(h, wv_ref[...], preferred_element_type=jnp.float32) + bv_ref[...]
    lm = jnp.max(logits, axis=-1, keepdims=True)
    lse = lm + jnp.log(jnp.sum(jnp.exp(logits - lm), axis=-1, keepdims=True))
    out_ref[...] = (logits - lse).reshape(B, Ty, V)


def attn_decode(dec_out, ctx, xlen, ylen, params):
    B, Ty, _ = dec_out.shape
    Tx = ctx.shape[1]
    V = params["out_w"].shape[-1]
    return pl.pallas_call(
        attn_decode_kernel,
        out_shape=(jax.ShapeDtypeStruct((B, Ty, V), jnp.float32),
                   jax.ShapeDtypeStruct((B, Ty, Tx), jnp.float32)),
        compiler_params=pltpu.CompilerParams(vmem_limit_bytes=VMEM_LIMIT_BYTES),
    )(dec_out, ctx, xlen, ylen, params["attn_win"], params["attn_woutc"],
      params["attn_woutd"], params["attn_bout"], params["out_w"], params["out_b"])


# ----------------------------------------------------------------------------
# Full forward (tiny glue in plain JAX; all heavy ops in the Pallas kernels)
# ----------------------------------------------------------------------------
def seq2seq_forward(params, x, x_lengths, y, y_lengths):
    B, Tx = x.shape
    Ty = y.shape[1]
    He = params["enc_wh"].shape[1]

    # Embedding lookups gathered directly into time-major layout (no (B,T,E) transpose).
    x_emb = jnp.take(params["emb_src"], x.T, axis=0)   # (Tx, B, E)
    y_emb = jnp.take(params["emb_tgt"], y.T, axis=0)   # (Ty, B, E)

    # ---- Encoder: fwd + bwd GRU fused in one pallas_call (direction axis parallel) ----
    h0 = jnp.zeros((2, B, He), jnp.float32)
    enc_rev = jnp.array([0, 1], jnp.int32)
    enc_seq, enc_hlast = gru_stack_run(x_emb, params["enc_wi"], params["enc_wh"],
                                       params["enc_bi"], params["enc_bh"], h0, enc_rev)
    # enc_seq: (2, Tx, B, He) -> ctx (B, Tx, 2He)  (small layout glue, few KB)
    ctx = jnp.transpose(jnp.concatenate([enc_seq[0], enc_seq[1]], axis=-1), (1, 0, 2))

    # hid = tanh(fc(cat([h_fwd, h_bwd])))  -- tiny glue linear
    hid = jnp.tanh(jnp.concatenate([enc_hlast[0], enc_hlast[1]], axis=-1)
                   @ params["fc_w"] + params["fc_b"])          # (B, Hd)

    # ---- Decoder GRU (single direction) ----
    dec_rev = jnp.array([0], jnp.int32)
    dec_seq, _ = gru_stack_run(y_emb, params["dec_wi"], params["dec_wh"],
                               params["dec_bi"], params["dec_bh"], hid[None], dec_rev)
    dec_out = jnp.transpose(dec_seq[0], (1, 0, 2))             # (B, Ty, Hd)

    # ---- Attention + output projection + log_softmax (Pallas, one call) ----
    xlen = x_lengths.reshape(B, 1).astype(jnp.int32)
    ylen = y_lengths.reshape(B, 1).astype(jnp.int32)
    output, attn = attn_decode(dec_out, ctx, xlen, ylen, params)
    return output, attn


# ----------------------------------------------------------------------------
# Deterministic synthetic parameters (fused-gate layout)
# ----------------------------------------------------------------------------
def init_params(key, v_src, v_tgt, E, He, Hd):
    ks = jax.random.split(key, 22)

    def w(k, shape, scale=0.1):
        return (scale * jax.random.normal(k, shape)).astype(jnp.float32)

    return dict(
        emb_src=w(ks[0], (v_src, E)),
        emb_tgt=w(ks[1], (v_tgt, E)),
        # encoder: fwd/bwd stacked along a leading direction axis, gates fused (3H)
        enc_wi=w(ks[2], (2, E, 3 * He)), enc_wh=w(ks[3], (2, He, 3 * He)),
        enc_bi=w(ks[4], (2, 1, 3 * He)), enc_bh=w(ks[5], (2, 1, 3 * He)),
        fc_w=w(ks[10], (2 * He, Hd)), fc_b=w(ks[11], (Hd,)),
        # decoder GRU (single direction), gates fused
        dec_wi=w(ks[12], (1, E, 3 * Hd)), dec_wh=w(ks[13], (1, Hd, 3 * Hd)),
        dec_bi=w(ks[14], (1, 1, 3 * Hd)), dec_bh=w(ks[15], (1, 1, 3 * Hd)),
        attn_win=w(ks[16], (2 * He, Hd)),
        attn_woutc=w(ks[17], (2 * He, Hd)),
        attn_woutd=w(ks[18], (Hd, Hd)),
        attn_bout=w(ks[19], (1, Hd)),
        out_w=w(ks[20], (Hd, v_tgt)),
        out_b=w(ks[21], (1, v_tgt)),
    )


if __name__ == "__main__":
    # Lane/sublane-friendly small sizes: B multiple of 8, hidden/vocab multiples of 128.
    B, Tx, Ty = 8, 8, 8
    V_SRC, V_TGT, E, He, Hd = 256, 256, 128, 128, 128

    key = jax.random.PRNGKey(0)
    kp, kx, ky = jax.random.split(key, 3)
    params = init_params(kp, V_SRC, V_TGT, E, He, Hd)

    x = jax.random.randint(kx, (B, Tx), 0, V_SRC, dtype=jnp.int32)
    y = jax.random.randint(ky, (B, Ty), 0, V_TGT, dtype=jnp.int32)
    x_lengths = jnp.full((B,), Tx, dtype=jnp.int32)
    y_lengths = jnp.full((B,), Ty, dtype=jnp.int32)

    fwd = jax.jit(functools.partial(seq2seq_forward, params))
    output, attn = fwd(x, x_lengths, y, y_lengths)
    jax.block_until_ready((output, attn))

    assert output.shape == (B, Ty, V_TGT), output.shape
    assert attn.shape == (B, Ty, Tx), attn.shape
    # log_softmax rows should sum (in prob space) to ~1; attention rows sum to ~1
    assert bool(jnp.all(jnp.abs(jnp.sum(jnp.exp(output), axis=-1) - 1.0) < 1e-3))
    assert bool(jnp.all(jnp.abs(jnp.sum(attn, axis=-1) - 1.0) < 1e-3))
    assert bool(jnp.all(jnp.isfinite(output))) and bool(jnp.all(jnp.isfinite(attn)))
    print("KERNEL_OK")
</pallas_src>

<mosaic_0001>
module attributes {stable_mosaic.version = 11 : i64} {
  func.func @gru_seq_kernel(%arg0: i32, %arg1: memref<2xi32, #tpu.memory_space<smem>>, %arg2: memref<8x8x128xf32, #tpu.memory_space<vmem>>, %arg3: memref<1x128x384xf32, #tpu.memory_space<vmem>>, %arg4: memref<1x128x384xf32, #tpu.memory_space<vmem>>, %arg5: memref<1x1x384xf32, #tpu.memory_space<vmem>>, %arg6: memref<1x1x384xf32, #tpu.memory_space<vmem>>, %arg7: memref<1x8x128xf32, #tpu.memory_space<vmem>>, %arg8: memref<1x8x8x128xf32, #tpu.memory_space<vmem>>, %arg9: memref<1x8x128xf32, #tpu.memory_space<vmem>>, %arg10: memref<8x8x384xf32, #tpu.memory_space<vmem>>, %arg11: memref<8x128xf32, #tpu.memory_space<vmem>>) attributes {dimension_semantics = [#tpu.dimension_semantics<parallel>], iteration_bounds = array<i64: 2>, scalar_prefetch = 1 : i64, scratch_operands = 2 : i64, tpu.core_type = #tpu.core_type<tc>, window_params = [{pipeline_mode = #tpu.pipeline_mode<synchronous>, transform_indices = @transform_0, window_bounds = array<i64: 8, 8, 128>}, {transform_indices = @transform_1, window_bounds = array<i64: 1, 128, 384>}, {transform_indices = @transform_2, window_bounds = array<i64: 1, 128, 384>}, {transform_indices = @transform_3, window_bounds = array<i64: 1, 1, 384>}, {transform_indices = @transform_4, window_bounds = array<i64: 1, 1, 384>}, {transform_indices = @transform_5, window_bounds = array<i64: 1, 8, 128>}, {transform_indices = @transform_6, window_bounds = array<i64: 1, 8, 8, 128>}, {transform_indices = @transform_7, window_bounds = array<i64: 1, 8, 128>}]} {
    %0 = arith.index_cast %arg0 : i32 to index
    %1 = memref.load %arg1[%0] : memref<2xi32, #tpu.memory_space<smem>>
    %c0 = arith.constant 0 : index
    %c0_0 = arith.constant 0 : index
    %c0_1 = arith.constant 0 : index
    %2 = vector.load %arg2[%c0, %c0_0, %c0_1] : memref<8x8x128xf32, #tpu.memory_space<vmem>>, vector<8x8x128xf32>
    %3 = vector.shape_cast %2 : vector<8x8x128xf32> to vector<64x128xf32>
    %c0_2 = arith.constant 0 : index
    %c0_3 = arith.constant 0 : index
    %c0_4 = arith.constant 0 : index
    %4 = vector.load %arg3[%c0_2, %c0_3, %c0_4] : memref<1x128x384xf32, #tpu.memory_space<vmem>>, vector<1x128x384xf32>
    %5 = vector.shape_cast %4 : vector<1x128x384xf32> to vector<128x384xf32>
    %cst = arith.constant dense<0.000000e+00> : vector<64x384xf32>
    %6 = tpu.matmul %3, %5, %cst {dimension_numbers = #tpu.dot_dimension_numbers<[1], [0], [0], [1], [0, 0, 1, 1], [], []>} : vector<64x128xf32>, vector<128x384xf32>, vector<64x384xf32> -> vector<64x384xf32>
    %c0_5 = arith.constant 0 : index
    %c0_6 = arith.constant 0 : index
    %c0_7 = arith.constant 0 : index
    %7 = vector.load %arg5[%c0_5, %c0_6, %c0_7] : memref<1x1x384xf32, #tpu.memory_space<vmem>>, vector<1x1x384xf32>
    %8 = vector.shape_cast %7 : vector<1x1x384xf32> to vector<1x384xf32>
    %9 = vector.broadcast %8 : vector<1x384xf32> to vector<64x384xf32>
    %10 = arith.addf %6, %9 : vector<64x384xf32>
    %11 = vector.shape_cast %10 : vector<64x384xf32> to vector<8x8x384xf32>
    %c0_8 = arith.constant 0 : index
    %c0_9 = arith.constant 0 : index
    %c0_10 = arith.constant 0 : index
    %12 = vector.load %arg10[%c0_8, %c0_9, %c0_10] : memref<8x8x384xf32, #tpu.memory_space<vmem>>, vector<8x8x384xf32>
    tpu.vector_store %arg10[%c0_8, %c0_9, %c0_10], %11 {strides = array<i32>} : memref<8x8x384xf32, #tpu.memory_space<vmem>>, vector<8x8x384xf32>,
    %c0_11 = arith.constant 0 : index
    %c0_12 = arith.constant 0 : index
    %c0_13 = arith.constant 0 : index
    %13 = vector.load %arg4[%c0_11, %c0_12, %c0_13] : memref<1x128x384xf32, #tpu.memory_space<vmem>>, vector<1x128x384xf32>
    %14 = vector.shape_cast %13 : vector<1x128x384xf32> to vector<128x384xf32>
    %c0_14 = arith.constant 0 : index
    %c0_15 = arith.constant 0 : index
    %c0_16 = arith.constant 0 : index
    %15 = vector.load %arg6[%c0_14, %c0_15, %c0_16] : memref<1x1x384xf32, #tpu.memory_space<vmem>>, vector<1x1x384xf32>
    %16 = vector.shape_cast %15 : vector<1x1x384xf32> to vector<1x384xf32>
    %c0_17 = arith.constant 0 : index
    %c0_18 = arith.constant 0 : index
    %c0_19 = arith.constant 0 : index
    %17 = vector.load %arg7[%c0_17, %c0_18, %c0_19] : memref<1x8x128xf32, #tpu.memory_space<vmem>>, vector<1x8x128xf32>
    %18 = vector.shape_cast %17 : vector<1x8x128xf32> to vector<8x128xf32>
    %c0_20 = arith.constant 0 : index
    %c0_21 = arith.constant 0 : index
    %19 = vector.load %arg11[%c0_20, %c0_21] : memref<8x128xf32, #tpu.memory_space<vmem>>, vector<8x128xf32>
    tpu.vector_store %arg11[%c0_20, %c0_21], %18 {strides = array<i32>} : memref<8x128xf32, #tpu.memory_space<vmem>>, vector<8x128xf32>,
    %c0_i32 = arith.constant 0 : i32
    %c0_i32_22 = arith.constant 0 : i32
    %20 = arith.cmpi sgt, %1, %c0_i32_22 : i32
    %c7_i32 = arith.constant 7 : i32
    %21 = arith.subi %c7_i32, %c0_i32 : i32
    %22 = arith.select %20, %21, %c0_i32 : i32
    %c0_23 = arith.constant 0 : index
    %c0_24 = arith.constant 0 : index
    %23 = vector.load %arg11[%c0_23, %c0_24] : memref<8x128xf32, #tpu.memory_space<vmem>>, vector<8x128xf32>
    %24 = arith.index_cast %22 : i32 to index
    %c0_25 = arith.constant 0 : index
    %c0_26 = arith.constant 0 : index
    %25 = vector.load %arg10[%24, %c0_25, %c0_26] : memref<8x8x384xf32, #tpu.memory_space<vmem>>, vector<1x8x384xf32>
    %26 = vector.shape_cast %25 : vector<1x8x384xf32> to vector<8x384xf32>
    %cst_27 = arith.constant dense<0.000000e+00> : vector<8x384xf32>
    %27 = tpu.matmul %23, %14, %cst_27 {dimension_numbers = #tpu.dot_dimension_numbers<[1], [0], [0], [1], [0, 0, 1, 1], [], []>} : vector<8x128xf32>, vector<128x384xf32>, vector<8x384xf32> -> vector<8x384xf32>
    %28 = vector.broadcast %16 : vector<1x384xf32> to vector<8x384xf32>
    %29 = arith.addf %27, %28 : vector<8x384xf32>
    %30 = vector.extract_strided_slice %26 {offsets = [0, 0], sizes = [8, 128], strides = [1, 1]} : vector<8x384xf32> to vector<8x128xf32>
    %31 = vector.extract_strided_slice %29 {offsets = [0, 0], sizes = [8, 128], strides = [1, 1]} : vector<8x384xf32> to vector<8x128xf32>
    %32 = arith.addf %30, %31 : vector<8x128xf32>
    %33 = arith.negf %32 : vector<8x128xf32>
    %34 = math.exp %33 : vector<8x128xf32>
    %cst_28 = arith.constant 1.000000e+00 : f32
    %35 = vector.broadcast %cst_28 : f32 to vector<8x128xf32>
    %36 = arith.addf %35, %34 : vector<8x128xf32>
    %37 = arith.divf %35, %36 : vector<8x128xf32>
    %38 = vector.extract_strided_slice %26 {offsets = [0, 128], sizes = [8, 128], strides = [1, 1]} : vector<8x384xf32> to vector<8x128xf32>
    %39 = vector.extract_strided_slice %29 {offsets = [0, 128], sizes = [8, 128], strides = [1, 1]} : vector<8x384xf32> to vector<8x128xf32>
    %40 = arith.addf %38, %39 : vector<8x128xf32>
    %41 = arith.negf %40 : vector<8x128xf32>
    %42 = math.exp %41 : vector<8x128xf32>
    %cst_29 = arith.constant 1.000000e+00 : f32
    %43 = vector.broadcast %cst_29 : f32 to vector<8x128xf32>
    %44 = arith.addf %43, %42 : vector<8x128xf32>
    %45 = arith.divf %43, %44 : vector<8x128xf32>
    %46 = vector.extract_strided_slice %26 {offsets = [0, 256], sizes = [8, 128], strides = [1, 1]} : vector<8x384xf32> to vector<8x128xf32>
    %47 = vector.extract_strided_slice %29 {offsets = [0, 256], sizes = [8, 128], strides = [1, 1]} : vector<8x384xf32> to vector<8x128xf32>
    %48 = arith.mulf %37, %47 : vector<8x128xf32>
    %49 = arith.addf %46, %48 : vector<8x128xf32>
    %50 = math.tanh %49 : vector<8x128xf32>
    %cst_30 = arith.constant 1.000000e+00 : f32
    %51 = vector.broadcast %cst_30 : f32 to vector<8x128xf32>
    %52 = arith.subf %51, %45 : vector<8x128xf32>
    %53 = arith.mulf %52, %50 : vector<8x128xf32>
    %54 = arith.mulf %45, %23 : vector<8x128xf32>
    %55 = arith.addf %53, %54 : vector<8x128xf32>
    %c0_31 = arith.constant 0 : index
    %c0_32 = arith.constant 0 : index
    %56 = vector.load %arg11[%c0_31, %c0_32] : memref<8x128xf32, #tpu.memory_space<vmem>>, vector<8x128xf32>
    tpu.vector_store %arg11[%c0_31, %c0_32], %55 {strides = array<i32>} : memref<8x128xf32, #tpu.memory_space<vmem>>, vector<8x128xf32>,
    %c0_33 = arith.constant 0 : index
    %57 = arith.index_cast %22 : i32 to index
    %c0_34 = arith.constant 0 : index
    %c0_35 = arith.constant 0 : index
    %58 = vector.load %arg8[%c0_33, %57, %c0_34, %c0_35] : memref<1x8x8x128xf32, #tpu.memory_space<vmem>>, vector<1x1x8x128xf32>
    %59 = vector.shape_cast %58 : vector<1x1x8x128xf32> to vector<8x128xf32>
    %60 = vector.shape_cast %55 : vector<8x128xf32> to vector<1x1x8x128xf32>
    tpu.vector_store %arg8[%c0_33, %57, %c0_34, %c0_35], %60 {strides = array<i32>} : memref<1x8x8x128xf32, #tpu.memory_space<vmem>>, vector<1x1x8x128xf32>,
    %c1_i32 = arith.constant 1 : i32
    %c0_i32_36 = arith.constant 0 : i32
    %61 = arith.cmpi sgt, %1, %c0_i32_36 : i32
    %c7_i32_37 = arith.constant 7 : i32
    %62 = arith.subi %c7_i32_37, %c1_i32 : i32
    %63 = arith.select %61, %62, %c1_i32 : i32
    %c0_38 = arith.constant 0 : index
    %c0_39 = arith.constant 0 : index
    %64 = vector.load %arg11[%c0_38, %c0_39] : memref<8x128xf32, #tpu.memory_space<vmem>>, vector<8x128xf32>
    %65 = arith.index_cast %63 : i32 to index
    %c0_40 = arith.constant 0 : index
    %c0_41 = arith.constant 0 : index
    %66 = vector.load %arg10[%65, %c0_40, %c0_41] : memref<8x8x384xf32, #tpu.memory_space<vmem>>, vector<1x8x384xf32>
    %67 = vector.shape_cast %66 : vector<1x8x384xf32> to vector<8x384xf32>
    %cst_42 = arith.constant dense<0.000000e+00> : vector<8x384xf32>
    %68 = tpu.matmul %64, %14, %cst_42 {dimension_numbers = #tpu.dot_dimension_numbers<[1], [0], [0], [1], [0, 0, 1, 1], [], []>} : vector<8x128xf32>, vector<128x384xf32>, vector<8x384xf32> -> vector<8x384xf32>
    %69 = vector.broadcast %16 : vector<1x384xf32> to vector<8x384xf32>
    %70 = arith.addf %68, %69 : vector<8x384xf32>
    %71 = vector.extract_strided_slice %67 {offsets = [0, 0], sizes = [8, 128], strides = [1, 1]} : vector<8x384xf32> to vector<8x128xf32>
    %72 = vector.extract_strided_slice %70 {offsets = [0, 0], sizes = [8, 128], strides = [1, 1]} : vector<8x384xf32> to vector<8x128xf32>
    %73 = arith.addf %71, %72 : vector<8x128xf32>
    %74 = arith.negf %73 : vector<8x128xf32>
    %75 = math.exp %74 : vector<8x128xf32>
    %cst_43 = arith.constant 1.000000e+00 : f32
    %76 = vector.broadcast %cst_43 : f32 to vector<8x128xf32>
    %77 = arith.addf %76, %75 : vector<8x128xf32>
    %78 = arith.divf %76, %77 : vector<8x128xf32>
    %79 = vector.extract_strided_slice %67 {offsets = [0, 128], sizes = [8, 128], strides = [1, 1]} : vector<8x384xf32> to vector<8x128xf32>
    %80 = vector.extract_strided_slice %70 {offsets = [0, 128], sizes = [8, 128], strides = [1, 1]} : vector<8x384xf32> to vector<8x128xf32>
    %81 = arith.addf %79, %80 : vector<8x128xf32>
    %82 = arith.negf %81 : vector<8x128xf32>
    %83 = math.exp %82 : vector<8x128xf32>
    %cst_44 = arith.constant 1.000000e+00 : f32
    %84 = vector.broadcast %cst_44 : f32 to vector<8x128xf32>
    %85 = arith.addf %84, %83 : vector<8x128xf32>
    %86 = arith.divf %84, %85 : vector<8x128xf32>
    %87 = vector.extract_strided_slice %67 {offsets = [0, 256], sizes = [8, 128], strides = [1, 1]} : vector<8x384xf32> to vector<8x128xf32>
    %88 = vector.extract_strided_slice %70 {offsets = [0, 256], sizes = [8, 128], strides = [1, 1]} : vector<8x384xf32> to vector<8x128xf32>
    %89 = arith.mulf %78, %88 : vector<8x128xf32>
    %90 = arith.addf %87, %89 : vector<8x128xf32>
    %91 = math.tanh %90 : vector<8x128xf32>
    %cst_45 = arith.constant 1.000000e+00 : f32
    %92 = vector.broadcast %cst_45 : f32 to vector<8x128xf32>
    %93 = arith.subf %92, %86 : vector<8x128xf32>
    %94 = arith.mulf %93, %91 : vector<8x128xf32>
    %95 = arith.mulf %86, %64 : vector<8x128xf32>
    %96 = arith.addf %94, %95 : vector<8x128xf32>
    %c0_46 = arith.constant 0 : index
    %c0_47 = arith.constant 0 : index
    %97 = vector.load %arg11[%c0_46, %c0_47] : memref<8x128xf32, #tpu.memory_space<vmem>>, vector<8x128xf32>
    tpu.vector_store %arg11[%c0_46, %c0_47], %96 {strides = array<i32>} : memref<8x128xf32, #tpu.memory_space<vmem>>, vector<8x128xf32>,
    %c0_48 = arith.constant 0 : index
    %98 = arith.index_cast %63 : i32 to index
    %c0_49 = arith.constant 0 : index
    %c0_50 = arith.constant 0 : index
    %99 = vector.load %arg8[%c0_48, %98, %c0_49, %c0_50] : memref<1x8x8x128xf32, #tpu.memory_space<vmem>>, vector<1x1x8x128xf32>
    %100 = vector.shape_cast %99 : vector<1x1x8x128xf32> to vector<8x128xf32>
    %101 = vector.shape_cast %96 : vector<8x128xf32> to vector<1x1x8x128xf32>
    tpu.vector_store %arg8[%c0_48, %98, %c0_49, %c0_50], %101 {strides = array<i32>} : memref<1x8x8x128xf32, #tpu.memory_space<vmem>>, vector<1x1x8x128xf32>,
    %c2_i32 = arith.constant 2 : i32
    %c0_i32_51 = arith.constant 0 : i32
    %102 = arith.cmpi sgt, %1, %c0_i32_51 : i32
    %c7_i32_52 = arith.constant 7 : i32
    %103 = arith.subi %c7_i32_52, %c2_i32 : i32
    %104 = arith.select %102, %103, %c2_i32 : i32
    %c0_53 = arith.constant 0 : index
    %c0_54 = arith.constant 0 : index
    %105 = vector.load %arg11[%c0_53, %c0_54] : memref<8x128xf32, #tpu.memory_space<vmem>>, vector<8x128xf32>
    %106 = arith.index_cast %104 : i32 to index
    %c0_55 = arith.constant 0 : index
    %c0_56 = arith.constant 0 : index
    %107 = vector.load %arg10[%106, %c0_55, %c0_56] : memref<8x8x384xf32, #tpu.memory_space<vmem>>, vector<1x8x384xf32>
    %108 = vector.shape_cast %107 : vector<1x8x384xf32> to vector<8x384xf32>
    %cst_57 = arith.constant dense<0.000000e+00> : vector<8x384xf32>
    %109 = tpu.matmul %105, %14, %cst_57 {dimension_numbers = #tpu.dot_dimension_numbers<[1], [0], [0], [1], [0, 0, 1, 1], [], []>} : vector<8x128xf32>, vector<128x384xf32>, vector<8x384xf32> -> vector<8x384xf32>
    %110 = vector.broadcast %16 : vector<1x384xf32> to vector<8x384xf32>
    %111 = arith.addf %109, %110 : vector<8x384xf32>
    %112 = vector.extract_strided_slice %108 {offsets = [0, 0], sizes = [8, 128], strides = [1, 1]} : vector<8x384xf32> to vector<8x128xf32>
    %113 = vector.extract_strided_slice %111 {offsets = [0, 0], sizes = [8, 128], strides = [1, 1]} : vector<8x384xf32> to vector<8x128xf32>
    %114 = arith.addf %112, %113 : vector<8x128xf32>
    %115 = arith.negf %114 : vector<8x128xf32>
    %116 = math.exp %115 : vector<8x128xf32>
    %cst_58 = arith.constant 1.000000e+00 : f32
    %117 = vector.broadcast %cst_58 : f32 to vector<8x128xf32>
    %118 = arith.addf %117, %116 : vector<8x128xf32>
    %119 = arith.divf %117, %118 : vector<8x128xf32>
    %120 = vector.extract_strided_slice %108 {offsets = [0, 128], sizes = [8, 128], strides = [1, 1]} : vector<8x384xf32> to vector<8x128xf32>
    %121 = vector.extract_strided_slice %111 {offsets = [0, 128], sizes = [8, 128], strides = [1, 1]} : vector<8x384xf32> to vector<8x128xf32>
    %122 = arith.addf %120, %121 : vector<8x128xf32>
    %123 = arith.negf %122 : vector<8x128xf32>
    %124 = math.exp %123 : vector<8x128xf32>
    %cst_59 = arith.constant 1.000000e+00 : f32
    %125 = vector.broadcast %cst_59 : f32 to vector<8x128xf32>
    %126 = arith.addf %125, %124 : vector<8x128xf32>
    %127 = arith.divf %125, %126 : vector<8x128xf32>
    %128 = vector.extract_strided_slice %108 {offsets = [0, 256], sizes = [8, 128], strides = [1, 1]} : vector<8x384xf32> to vector<8x128xf32>
    %129 = vector.extract_strided_slice %111 {offsets = [0, 256], sizes = [8, 128], strides = [1, 1]} : vector<8x384xf32> to vector<8x128xf32>
    %130 = arith.mulf %119, %129 : vector<8x128xf32>
    %131 = arith.addf %128, %130 : vector<8x128xf32>
    %132 = math.tanh %131 : vector<8x128xf32>
    %cst_60 = arith.constant 1.000000e+00 : f32
    %133 = vector.broadcast %cst_60 : f32 to vector<8x128xf32>
    %134 = arith.subf %133, %127 : vector<8x128xf32>
    %135 = arith.mulf %134, %132 : vector<8x128xf32>
    %136 = arith.mulf %127, %105 : vector<8x128xf32>
    %137 = arith.addf %135, %136 : vector<8x128xf32>
    %c0_61 = arith.constant 0 : index
    %c0_62 = arith.constant 0 : index
    %138 = vector.load %arg11[%c0_61, %c0_62] : memref<8x128xf32, #tpu.memory_space<vmem>>, vector<8x128xf32>
    tpu.vector_store %arg11[%c0_61, %c0_62], %137 {strides = array<i32>} : memref<8x128xf32, #tpu.memory_space<vmem>>, vector<8x128xf32>,
    %c0_63 = arith.constant 0 : index
    %139 = arith.index_cast %104 : i32 to index
    %c0_64 = arith.constant 0 : index
    %c0_65 = arith.constant 0 : index
    %140 = vector.load %arg8[%c0_63, %139, %c0_64, %c0_65] : memref<1x8x8x128xf32, #tpu.memory_space<vmem>>, vector<1x1x8x128xf32>
    %141 = vector.shape_cast %140 : vector<1x1x8x128xf32> to vector<8x128xf32>
    %142 = vector.shape_cast %137 : vector<8x128xf32> to vector<1x1x8x128xf32>
    tpu.vector_store %arg8[%c0_63, %139, %c0_64, %c0_65], %142 {strides = array<i32>} : memref<1x8x8x128xf32, #tpu.memory_space<vmem>>, vector<1x1x8x128xf32>,
    %c3_i32 = arith.constant 3 : i32
    %c0_i32_66 = arith.constant 0 : i32
    %143 = arith.cmpi sgt, %1, %c0_i32_66 : i32
    %c7_i32_67 = arith.constant 7 : i32
    %144 = arith.subi %c7_i32_67, %c3_i32 : i32
    %145 = arith.select %143, %144, %c3_i32 : i32
    %c0_68 = arith.constant 0 : index
    %c0_69 = arith.constant 0 : index
    %146 = vector.load %arg11[%c0_68, %c0_69] : memref<8x128xf32, #tpu.memory_space<vmem>>, vector<8x128xf32>
    %147 = arith.index_cast %145 : i32 to index
    %c0_70 = arith.constant 0 : index
    %c0_71 = arith.constant 0 : index
    %148 = vector.load %arg10[%147, %c0_70, %c0_71] : memref<8x8x384xf32, #tpu.memory_space<vmem>>, vector<1x8x384xf32>
    %149 = vector.shape_cast %148 : vector<1x8x384xf32> to vector<8x384xf32>
    %cst_72 = arith.constant dense<0.000000e+00> : vector<8x384xf32>
    %150 = tpu.matmul %146, %14, %cst_72 {dimension_numbers = #tpu.dot_dimension_numbers<[1], [0], [0], [1], [0, 0, 1, 1], [], []>} : vector<8x128xf32>, vector<128x384xf32>, vector<8x384xf32> -> vector<8x384xf32>
    %151 = vector.broadcast %16 : vector<1x384xf32> to vector<8x384xf32>
    %152 = arith.addf %150, %151 : vector<8x384xf32>
    %153 = vector.extract_strided_slice %149 {offsets = [0, 0], sizes = [8, 128], strides = [1, 1]} : vector<8x384xf32> to vector<8x128xf32>
    %154 = vector.extract_strided_slice %152 {offsets = [0, 0], sizes = [8, 128], strides = [1, 1]} : vector<8x384xf32> to vector<8x128xf32>
    %155 = arith.addf %153, %154 : vector<8x128xf32>
    %156 = arith.negf %155 : vector<8x128xf32>
    %157 = math.exp %156 : vector<8x128xf32>
    %cst_73 = arith.constant 1.000000e+00 : f32
    %158 = vector.broadcast %cst_73 : f32 to vector<8x128xf32>
    %159 = arith.addf %158, %157 : vector<8x128xf32>
    %160 = arith.divf %158, %159 : vector<8x128xf32>
    %161 = vector.extract_strided_slice %149 {offsets = [0, 128], sizes = [8, 128], strides = [1, 1]} : vector<8x384xf32> to vector<8x128xf32>
    %162 = vector.extract_strided_slice %152 {offsets = [0, 128], sizes = [8, 128], strides = [1, 1]} : vector<8x384xf32> to vector<8x128xf32>
    %163 = arith.addf %161, %162 : vector<8x128xf32>
    %164 = arith.negf %163 : vector<8x128xf32>
    %165 = math.exp %164 : vector<8x128xf32>
    %cst_74 = arith.constant 1.000000e+00 : f32
    %166 = vector.broadcast %cst_74 : f32 to vector<8x128xf32>
    %167 = arith.addf %166, %165 : vector<8x128xf32>
    %168 = arith.divf %166, %167 : vector<8x128xf32>
    %169 = vector.extract_strided_slice %149 {offsets = [0, 256], sizes = [8, 128], strides = [1, 1]} : vector<8x384xf32> to vector<8x128xf32>
    %170 = vector.extract_strided_slice %152 {offsets = [0, 256], sizes = [8, 128], strides = [1, 1]} : vector<8x384xf32> to vector<8x128xf32>
    %171 = arith.mulf %160, %170 : vector<8x128xf32>
    %172 = arith.addf %169, %171 : vector<8x128xf32>
    %173 = math.tanh %172 : vector<8x128xf32>
    %cst_75 = arith.constant 1.000000e+00 : f32
    %174 = vector.broadcast %cst_75 : f32 to vector<8x128xf32>
    %175 = arith.subf %174, %168 : vector<8x128xf32>
    %176 = arith.mulf %175, %173 : vector<8x128xf32>
    %177 = arith.mulf %168, %146 : vector<8x128xf32>
    %178 = arith.addf %176, %177 : vector<8x128xf32>
    %c0_76 = arith.constant 0 : index
    %c0_77 = arith.constant 0 : index
    %179 = vector.load %arg11[%c0_76, %c0_77] : memref<8x128xf32, #tpu.memory_space<vmem>>, vector<8x128xf32>
    tpu.vector_store %arg11[%c0_76, %c0_77], %178 {strides = array<i32>} : memref<8x128xf32, #tpu.memory_space<vmem>>, vector<8x128xf32>,
    %c0_78 = arith.constant 0 : index
    %180 = arith.index_cast %145 : i32 to index
    %c0_79 = arith.constant 0 : index
    %c0_80 = arith.constant 0 : index
    %181 = vector.load %arg8[%c0_78, %180, %c0_79, %c0_80] : memref<1x8x8x128xf32, #tpu.memory_space<vmem>>, vector<1x1x8x128xf32>
    %182 = vector.shape_cast %181 : vector<1x1x8x128xf32> to vector<8x128xf32>
    %183 = vector.shape_cast %178 : vector<8x128xf32> to vector<1x1x8x128xf32>
    tpu.vector_store %arg8[%c0_78, %180, %c0_79, %c0_80], %183 {strides = array<i32>} : memref<1x8x8x128xf32, #tpu.memory_space<vmem>>, vector<1x1x8x128xf32>,
    %c4_i32 = arith.constant 4 : i32
    %c0_i32_81 = arith.constant 0 : i32
    %184 = arith.cmpi sgt, %1, %c0_i32_81 : i32
    %c7_i32_82 = arith.constant 7 : i32
    %185 = arith.subi %c7_i32_82, %c4_i32 : i32
    %186 = arith.select %184, %185, %c4_i32 : i32
    %c0_83 = arith.constant 0 : index
    %c0_84 = arith.constant 0 : index
    %187 = vector.load %arg11[%c0_83, %c0_84] : memref<8x128xf32, #tpu.memory_space<vmem>>, vector<8x128xf32>
    %188 = arith.index_cast %186 : i32 to index
    %c0_85 = arith.constant 0 : index
    %c0_86 = arith.constant 0 : index
    %189 = vector.load %arg10[%188, %c0_85, %c0_86] : memref<8x8x384xf32, #tpu.memory_space<vmem>>, vector<1x8x384xf32>
    %190 = vector.shape_cast %189 : vector<1x8x384xf32> to vector<8x384xf32>
    %cst_87 = arith.constant dense<0.000000e+00> : vector<8x384xf32>
    %191 = tpu.matmul %187, %14, %cst_87 {dimension_numbers = #tpu.dot_dimension_numbers<[1], [0], [0], [1], [0, 0, 1, 1], [], []>} : vector<8x128xf32>, vector<128x384xf32>, vector<8x384xf32> -> vector<8x384xf32>
    %192 = vector.broadcast %16 : vector<1x384xf32> to vector<8x384xf32>
    %193 = arith.addf %191, %192 : vector<8x384xf32>
    %194 = vector.extract_strided_slice %190 {offsets = [0, 0], sizes = [8, 128], strides = [1, 1]} : vector<8x384xf32> to vector<8x128xf32>
    %195 = vector.extract_strided_slice %193 {offsets = [0, 0], sizes = [8, 128], strides = [1, 1]} : vector<8x384xf32> to vector<8x128xf32>
    %196 = arith.addf %194, %195 : vector<8x128xf32>
    %197 = arith.negf %196 : vector<8x128xf32>
    %198 = math.exp %197 : vector<8x128xf32>
    %cst_88 = arith.constant 1.000000e+00 : f32
    %199 = vector.broadcast %cst_88 : f32 to vector<8x128xf32>
    %200 = arith.addf %199, %198 : vector<8x128xf32>
    %201 = arith.divf %199, %200 : vector<8x128xf32>
    %202 = vector.extract_strided_slice %190 {offsets = [0, 128], sizes = [8, 128], strides = [1, 1]} : vector<8x384xf32> to vector<8x128xf32>
    %203 = vector.extract_strided_slice %193 {offsets = [0, 128], sizes = [8, 128], strides = [1, 1]} : vector<8x384xf32> to vector<8x128xf32>
    %204 = arith.addf %202, %203 : vector<8x128xf32>
    %205 = arith.negf %204 : vector<8x128xf32>
    %206 = math.exp %205 : vector<8x128xf32>
    %cst_89 = arith.constant 1.000000e+00 : f32
    %207 = vector.broadcast %cst_89 : f32 to vector<8x128xf32>
    %208 = arith.addf %207, %206 : vector<8x128xf32>
    %209 = arith.divf %207, %208 : vector<8x128xf32>
    %210 = vector.extract_strided_slice %190 {offsets = [0, 256], sizes = [8, 128], strides = [1, 1]} : vector<8x384xf32> to vector<8x128xf32>
    %211 = vector.extract_strided_slice %193 {offsets = [0, 256], sizes = [8, 128], strides = [1, 1]} : vector<8x384xf32> to vector<8x128xf32>
    %212 = arith.mulf %201, %211 : vector<8x128xf32>
    %213 = arith.addf %210, %212 : vector<8x128xf32>
    %214 = math.tanh %213 : vector<8x128xf32>
    %cst_90 = arith.constant 1.000000e+00 : f32
    %215 = vector.broadcast %cst_90 : f32 to vector<8x128xf32>
    %216 = arith.subf %215, %209 : vector<8x128xf32>
    %217 = arith.mulf %216, %214 : vector<8x128xf32>
    %218 = arith.mulf %209, %187 : vector<8x128xf32>
    %219 = arith.addf %217, %218 : vector<8x128xf32>
    %c0_91 = arith.constant 0 : index
    %c0_92 = arith.constant 0 : index
    %220 = vector.load %arg11[%c0_91, %c0_92] : memref<8x128xf32, #tpu.memory_space<vmem>>, vector<8x128xf32>
    tpu.vector_store %arg11[%c0_91, %c0_92], %219 {strides = array<i32>} : memref<8x128xf32, #tpu.memory_space<vmem>>, vector<8x128xf32>,
    %c0_93 = arith.constant 0 : index
    %221 = arith.index_cast %186 : i32 to index
    %c0_94 = arith.constant 0 : index
    %c0_95 = arith.constant 0 : index
    %222 = vector.load %arg8[%c0_93, %221, %c0_94, %c0_95] : memref<1x8x8x128xf32, #tpu.memory_space<vmem>>, vector<1x1x8x128xf32>
    %223 = vector.shape_cast %222 : vector<1x1x8x128xf32> to vector<8x128xf32>
    %224 = vector.shape_cast %219 : vector<8x128xf32> to vector<1x1x8x128xf32>
    tpu.vector_store %arg8[%c0_93, %221, %c0_94, %c0_95], %224 {strides = array<i32>} : memref<1x8x8x128xf32, #tpu.memory_space<vmem>>, vector<1x1x8x128xf32>,
    %c5_i32 = arith.constant 5 : i32
    %c0_i32_96 = arith.constant 0 : i32
    %225 = arith.cmpi sgt, %1, %c0_i32_96 : i32
    %c7_i32_97 = arith.constant 7 : i32
    %226 = arith.subi %c7_i32_97, %c5_i32 : i32
    %227 = arith.select %225, %226, %c5_i32 : i32
    %c0_98 = arith.constant 0 : index
    %c0_99 = arith.constant 0 : index
    %228 = vector.load %arg11[%c0_98, %c0_99] : memref<8x128xf32, #tpu.memory_space<vmem>>, vector<8x128xf32>
    %229 = arith.index_cast %227 : i32 to index
    %c0_100 = arith.constant 0 : index
    %c0_101 = arith.constant 0 : index
    %230 = vector.load %arg10[%229, %c0_100, %c0_101] : memref<8x8x384xf32, #tpu.memory_space<vmem>>, vector<1x8x384xf32>
    %231 = vector.shape_cast %230 : vector<1x8x384xf32> to vector<8x384xf32>
    %cst_102 = arith.constant dense<0.000000e+00> : vector<8x384xf32>
    %232 = tpu.matmul %228, %14, %cst_102 {dimension_numbers = #tpu.dot_dimension_numbers<[1], [0], [0], [1], [0, 0, 1, 1], [], []>} : vector<8x128xf32>, vector<128x384xf32>, vector<8x384xf32> -> vector<8x384xf32>
    %233 = vector.broadcast %16 : vector<1x384xf32> to vector<8x384xf32>
    %234 = arith.addf %232, %233 : vector<8x384xf32>
    %235 = vector.extract_strided_slice %231 {offsets = [0, 0], sizes = [8, 128], strides = [1, 1]} : vector<8x384xf32> to vector<8x128xf32>
    %236 = vector.extract_strided_slice %234 {offsets = [0, 0], sizes = [8, 128], strides = [1, 1]} : vector<8x384xf32> to vector<8x128xf32>
    %237 = arith.addf %235, %236 : vector<8x128xf32>
    %238 = arith.negf %237 : vector<8x128xf32>
    %239 = math.exp %238 : vector<8x128xf32>
    %cst_103 = arith.constant 1.000000e+00 : f32
    %240 = vector.broadcast %cst_103 : f32 to vector<8x128xf32>
    %241 = arith.addf %240, %239 : vector<8x128xf32>
    %242 = arith.divf %240, %241 : vector<8x128xf32>
    %243 = vector.extract_strided_slice %231 {offsets = [0, 128], sizes = [8, 128], strides = [1, 1]} : vector<8x384xf32> to vector<8x128xf32>
    %244 = vector.extract_strided_slice %234 {offsets = [0, 128], sizes = [8, 128], strides = [1, 1]} : vector<8x384xf32> to vector<8x128xf32>
    %245 = arith.addf %243, %244 : vector<8x128xf32>
    %246 = arith.negf %245 : vector<8x128xf32>
    %247 = math.exp %246 : vector<8x128xf32>
    %cst_104 = arith.constant 1.000000e+00 : f32
    %248 = vector.broadcast %cst_104 : f32 to vector<8x128xf32>
    %249 = arith.addf %248, %247 : vector<8x128xf32>
    %250 = arith.divf %248, %249 : vector<8x128xf32>
    %251 = vector.extract_strided_slice %231 {offsets = [0, 256], sizes = [8, 128], strides = [1, 1]} : vector<8x384xf32> to vector<8x128xf32>
    %252 = vector.extract_strided_slice %234 {offsets = [0, 256], sizes = [8, 128], strides = [1, 1]} : vector<8x384xf32> to vector<8x128xf32>
    %253 = arith.mulf %242, %252 : vector<8x128xf32>
    %254 = arith.addf %251, %253 : vector<8x128xf32>
    %255 = math.tanh %254 : vector<8x128xf32>
    %cst_105 = arith.constant 1.000000e+00 : f32
    %256 = vector.broadcast %cst_105 : f32 to vector<8x128xf32>
    %257 = arith.subf %256, %250 : vector<8x128xf32>
    %258 = arith.mulf %257, %255 : vector<8x128xf32>
    %259 = arith.mulf %250, %228 : vector<8x128xf32>
    %260 = arith.addf %258, %259 : vector<8x128xf32>
    %c0_106 = arith.constant 0 : index
    %c0_107 = arith.constant 0 : index
    %261 = vector.load %arg11[%c0_106, %c0_107] : memref<8x128xf32, #tpu.memory_space<vmem>>, vector<8x128xf32>
    tpu.vector_store %arg11[%c0_106, %c0_107], %260 {strides = array<i32>} : memref<8x128xf32, #tpu.memory_space<vmem>>, vector<8x128xf32>,
    %c0_108 = arith.constant 0 : index
    %262 = arith.index_cast %227 : i32 to index
    %c0_109 = arith.constant 0 : index
    %c0_110 = arith.constant 0 : index
    %263 = vector.load %arg8[%c0_108, %262, %c0_109, %c0_110] : memref<1x8x8x128xf32, #tpu.memory_space<vmem>>, vector<1x1x8x128xf32>
    %264 = vector.shape_cast %263 : vector<1x1x8x128xf32> to vector<8x128xf32>
    %265 = vector.shape_cast %260 : vector<8x128xf32> to vector<1x1x8x128xf32>
    tpu.vector_store %arg8[%c0_108, %262, %c0_109, %c0_110], %265 {strides = array<i32>} : memref<1x8x8x128xf32, #tpu.memory_space<vmem>>, vector<1x1x8x128xf32>,
    %c6_i32 = arith.constant 6 : i32
    %c0_i32_111 = arith.constant 0 : i32
    %266 = arith.cmpi sgt, %1, %c0_i32_111 : i32
    %c7_i32_112 = arith.constant 7 : i32
    %267 = arith.subi %c7_i32_112, %c6_i32 : i32
    %268 = arith.select %266, %267, %c6_i32 : i32
    %c0_113 = arith.constant 0 : index
    %c0_114 = arith.constant 0 : index
    %269 = vector.load %arg11[%c0_113, %c0_114] : memref<8x128xf32, #tpu.memory_space<vmem>>, vector<8x128xf32>
    %270 = arith.index_cast %268 : i32 to index
    %c0_115 = arith.constant 0 : index
    %c0_116 = arith.constant 0 : index
    %271 = vector.load %arg10[%270, %c0_115, %c0_116] : memref<8x8x384xf32, #tpu.memory_space<vmem>>, vector<1x8x384xf32>
    %272 = vector.shape_cast %271 : vector<1x8x384xf32> to vector<8x384xf32>
    %cst_117 = arith.constant dense<0.000000e+00> : vector<8x384xf32>
    %273 = tpu.matmul %269, %14, %cst_117 {dimension_numbers = #tpu.dot_dimension_numbers<[1], [0], [0], [1], [0, 0, 1, 1], [], []>} : vector<8x128xf32>, vector<128x384xf32>, vector<8x384xf32> -> vector<8x384xf32>
    %274 = vector.broadcast %16 : vector<1x384xf32> to vector<8x384xf32>
    %275 = arith.addf %273, %274 : vector<8x384xf32>
    %276 = vector.extract_strided_slice %272 {offsets = [0, 0], sizes = [8, 128], strides = [1, 1]} : vector<8x384xf32> to vector<8x128xf32>
    %277 = vector.extract_strided_slice %275 {offsets = [0, 0], sizes = [8, 128], strides = [1, 1]} : vector<8x384xf32> to vector<8x128xf32>
    %278 = arith.addf %276, %277 : vector<8x128xf32>
    %279 = arith.negf %278 : vector<8x128xf32>
    %280 = math.exp %279 : vector<8x128xf32>
    %cst_118 = arith.constant 1.000000e+00 : f32
    %281 = vector.broadcast %cst_118 : f32 to vector<8x128xf32>
    %282 = arith.addf %281, %280 : vector<8x128xf32>
    %283 = arith.divf %281, %282 : vector<8x128xf32>
    %284 = vector.extract_strided_slice %272 {offsets = [0, 128], sizes = [8, 128], strides = [1, 1]} : vector<8x384xf32> to vector<8x128xf32>
    %285 = vector.extract_strided_slice %275 {offsets = [0, 128], sizes = [8, 128], strides = [1, 1]} : vector<8x384xf32> to vector<8x128xf32>
    %286 = arith.addf %284, %285 : vector<8x128xf32>
    %287 = arith.negf %286 : vector<8x128xf32>
    %288 = math.exp %287 : vector<8x128xf32>
    %cst_119 = arith.constant 1.000000e+00 : f32
    %289 = vector.broadcast %cst_119 : f32 to vector<8x128xf32>
    %290 = arith.addf %289, %288 : vector<8x128xf32>
    %291 = arith.divf %289, %290 : vector<8x128xf32>
    %292 = vector.extract_strided_slice %272 {offsets = [0, 256], sizes = [8, 128], strides = [1, 1]} : vector<8x384xf32> to vector<8x128xf32>
    %293 = vector.extract_strided_slice %275 {offsets = [0, 256], sizes = [8, 128], strides = [1, 1]} : vector<8x384xf32> to vector<8x128xf32>
    %294 = arith.mulf %283, %293 : vector<8x128xf32>
    %295 = arith.addf %292, %294 : vector<8x128xf32>
    %296 = math.tanh %295 : vector<8x128xf32>
    %cst_120 = arith.constant 1.000000e+00 : f32
    %297 = vector.broadcast %cst_120 : f32 to vector<8x128xf32>
    %298 = arith.subf %297, %291 : vector<8x128xf32>
    %299 = arith.mulf %298, %296 : vector<8x128xf32>
    %300 = arith.mulf %291, %269 : vector<8x128xf32>
    %301 = arith.addf %299, %300 : vector<8x128xf32>
    %c0_121 = arith.constant 0 : index
    %c0_122 = arith.constant 0 : index
    %302 = vector.load %arg11[%c0_121, %c0_122] : memref<8x128xf32, #tpu.memory_space<vmem>>, vector<8x128xf32>
    tpu.vector_store %arg11[%c0_121, %c0_122], %301 {strides = array<i32>} : memref<8x128xf32, #tpu.memory_space<vmem>>, vector<8x128xf32>,
    %c0_123 = arith.constant 0 : index
    %303 = arith.index_cast %268 : i32 to index
    %c0_124 = arith.constant 0 : index
    %c0_125 = arith.constant 0 : index
    %304 = vector.load %arg8[%c0_123, %303, %c0_124, %c0_125] : memref<1x8x8x128xf32, #tpu.memory_space<vmem>>, vector<1x1x8x128xf32>
    %305 = vector.shape_cast %304 : vector<1x1x8x128xf32> to vector<8x128xf32>
    %306 = vector.shape_cast %301 : vector<8x128xf32> to vector<1x1x8x128xf32>
    tpu.vector_store %arg8[%c0_123, %303, %c0_124, %c0_125], %306 {strides = array<i32>} : memref<1x8x8x128xf32, #tpu.memory_space<vmem>>, vector<1x1x8x128xf32>,
    %c7_i32_126 = arith.constant 7 : i32
    %c0_i32_127 = arith.constant 0 : i32
    %307 = arith.cmpi sgt, %1, %c0_i32_127 : i32
    %c7_i32_128 = arith.constant 7 : i32
    %308 = arith.subi %c7_i32_128, %c7_i32_126 : i32
    %309 = arith.select %307, %308, %c7_i32_126 : i32
    %c0_129 = arith.constant 0 : index
    %c0_130 = arith.constant 0 : index
    %310 = vector.load %arg11[%c0_129, %c0_130] : memref<8x128xf32, #tpu.memory_space<vmem>>, vector<8x128xf32>
    %311 = arith.index_cast %309 : i32 to index
    %c0_131 = arith.constant 0 : index
    %c0_132 = arith.constant 0 : index
    %312 = vector.load %arg10[%311, %c0_131, %c0_132] : memref<8x8x384xf32, #tpu.memory_space<vmem>>, vector<1x8x384xf32>
    %313 = vector.shape_cast %312 : vector<1x8x384xf32> to vector<8x384xf32>
    %cst_133 = arith.constant dense<0.000000e+00> : vector<8x384xf32>
    %314 = tpu.matmul %310, %14, %cst_133 {dimension_numbers = #tpu.dot_dimension_numbers<[1], [0], [0], [1], [0, 0, 1, 1], [], []>} : vector<8x128xf32>, vector<128x384xf32>, vector<8x384xf32> -> vector<8x384xf32>
    %315 = vector.broadcast %16 : vector<1x384xf32> to vector<8x384xf32>
    %316 = arith.addf %314, %315 : vector<8x384xf32>
    %317 = vector.extract_strided_slice %313 {offsets = [0, 0], sizes = [8, 128], strides = [1, 1]} : vector<8x384xf32> to vector<8x128xf32>
    %318 = vector.extract_strided_slice %316 {offsets = [0, 0], sizes = [8, 128], strides = [1, 1]} : vector<8x384xf32> to vector<8x128xf32>
    %319 = arith.addf %317, %318 : vector<8x128xf32>
    %320 = arith.negf %319 : vector<8x128xf32>
    %321 = math.exp %320 : vector<8x128xf32>
    %cst_134 = arith.constant 1.000000e+00 : f32
    %322 = vector.broadcast %cst_134 : f32 to vector<8x128xf32>
    %323 = arith.addf %322, %321 : vector<8x128xf32>
    %324 = arith.divf %322, %323 : vector<8x128xf32>
    %325 = vector.extract_strided_slice %313 {offsets = [0, 128], sizes = [8, 128], strides = [1, 1]} : vector<8x384xf32> to vector<8x128xf32>
    %326 = vector.extract_strided_slice %316 {offsets = [0, 128], sizes = [8, 128], strides = [1, 1]} : vector<8x384xf32> to vector<8x128xf32>
    %327 = arith.addf %325, %326 : vector<8x128xf32>
    %328 = arith.negf %327 : vector<8x128xf32>
    %329 = math.exp %328 : vector<8x128xf32>
    %cst_135 = arith.constant 1.000000e+00 : f32
    %330 = vector.broadcast %cst_135 : f32 to vector<8x128xf32>
    %331 = arith.addf %330, %329 : vector<8x128xf32>
    %332 = arith.divf %330, %331 : vector<8x128xf32>
    %333 = vector.extract_strided_slice %313 {offsets = [0, 256], sizes = [8, 128], strides = [1, 1]} : vector<8x384xf32> to vector<8x128xf32>
    %334 = vector.extract_strided_slice %316 {offsets = [0, 256], sizes = [8, 128], strides = [1, 1]} : vector<8x384xf32> to vector<8x128xf32>
    %335 = arith.mulf %324, %334 : vector<8x128xf32>
    %336 = arith.addf %333, %335 : vector<8x128xf32>
    %337 = math.tanh %336 : vector<8x128xf32>
    %cst_136 = arith.constant 1.000000e+00 : f32
    %338 = vector.broadcast %cst_136 : f32 to vector<8x128xf32>
    %339 = arith.subf %338, %332 : vector<8x128xf32>
    %340 = arith.mulf %339, %337 : vector<8x128xf32>
    %341 = arith.mulf %332, %310 : vector<8x128xf32>
    %342 = arith.addf %340, %341 : vector<8x128xf32>
    %c0_137 = arith.constant 0 : index
    %c0_138 = arith.constant 0 : index
    %343 = vector.load %arg11[%c0_137, %c0_138] : memref<8x128xf32, #tpu.memory_space<vmem>>, vector<8x128xf32>
    tpu.vector_store %arg11[%c0_137, %c0_138], %342 {strides = array<i32>} : memref<8x128xf32, #tpu.memory_space<vmem>>, vector<8x128xf32>,
    %c0_139 = arith.constant 0 : index
    %344 = arith.index_cast %309 : i32 to index
    %c0_140 = arith.constant 0 : index
    %c0_141 = arith.constant 0 : index
    %345 = vector.load %arg8[%c0_139, %344, %c0_140, %c0_141] : memref<1x8x8x128xf32, #tpu.memory_space<vmem>>, vector<1x1x8x128xf32>
    %346 = vector.shape_cast %345 : vector<1x1x8x128xf32> to vector<8x128xf32>
    %347 = vector.shape_cast %342 : vector<8x128xf32> to vector<1x1x8x128xf32>
    tpu.vector_store %arg8[%c0_139, %344, %c0_140, %c0_141], %347 {strides = array<i32>} : memref<1x8x8x128xf32, #tpu.memory_space<vmem>>, vector<1x1x8x128xf32>,
    %c8_i32 = arith.constant 8 : i32
    %c0_142 = arith.constant 0 : index
    %c0_143 = arith.constant 0 : index
    %348 = vector.load %arg11[%c0_142, %c0_143] : memref<8x128xf32, #tpu.memory_space<vmem>>, vector<8x128xf32>
    %c0_144 = arith.constant 0 : index
    %c0_145 = arith.constant 0 : index
    %c0_146 = arith.constant 0 : index
    %349 = vector.load %arg9[%c0_144, %c0_145, %c0_146] : memref<1x8x128xf32, #tpu.memory_space<vmem>>, vector<1x8x128xf32>
    %350 = vector.shape_cast %349 : vector<1x8x128xf32> to vector<8x128xf32>
    %351 = vector.shape_cast %348 : vector<8x128xf32> to vector<1x8x128xf32>
    tpu.vector_store %arg9[%c0_144, %c0_145, %c0_146], %351 {strides = array<i32>} : memref<1x8x128xf32, #tpu.memory_space<vmem>>, vector<1x8x128xf32>,
    return
  }
  func.func @transform_0(%arg0: i32, %arg1: memref<2xi32, #tpu.memory_space<smem>>) -> (i32, i32, i32) {
    %c0_i32 = arith.constant 0 : i32
    %c0_i32_0 = arith.constant 0 : i32
    %c0_i32_1 = arith.constant 0 : i32
    %c0_i32_2 = arith.constant 0 : i32
    return %c0_i32, %c0_i32_0, %c0_i32_1 : i32, i32, i32
  }
  func.func @transform_1(%arg0: i32, %arg1: memref<2xi32, #tpu.memory_space<smem>>) -> (i32, i32, i32) {
    %c0_i32 = arith.constant 0 : i32
    %c0_i32_0 = arith.constant 0 : i32
    %c0_i32_1 = arith.constant 0 : i32
    return %arg0, %c0_i32, %c0_i32_0 : i32, i32, i32
  }
  func.func @transform_2(%arg0: i32, %arg1: memref<2xi32, #tpu.memory_space<smem>>) -> (i32, i32, i32) {
    %c0_i32 = arith.constant 0 : i32
    %c0_i32_0 = arith.constant 0 : i32
    %c0_i32_1 = arith.constant 0 : i32
    return %arg0, %c0_i32, %c0_i32_0 : i32, i32, i32
  }
  func.func @transform_3(%arg0: i32, %arg1: memref<2xi32, #tpu.memory_space<smem>>) -> (i32, i32, i32) {
    %c0_i32 = arith.constant 0 : i32
    %c0_i32_0 = arith.constant 0 : i32
    %c0_i32_1 = arith.constant 0 : i32
    return %arg0, %c0_i32, %c0_i32_0 : i32, i32, i32
  }
  func.func @transform_4(%arg0: i32, %arg1: memref<2xi32, #tpu.memory_space<smem>>) -> (i32, i32, i32) {
    %c0_i32 = arith.constant 0 : i32
    %c0_i32_0 = arith.constant 0 : i32
    %c0_i32_1 = arith.constant 0 : i32
    return %arg0, %c0_i32, %c0_i32_0 : i32, i32, i32
  }
  func.func @transform_5(%arg0: i32, %arg1: memref<2xi32, #tpu.memory_space<smem>>) -> (i32, i32, i32) {
    %c0_i32 = arith.constant 0 : i32
    %c0_i32_0 = arith.constant 0 : i32
    %c0_i32_1 = arith.constant 0 : i32
    return %arg0, %c0_i32, %c0_i32_0 : i32, i32, i32
  }
  func.func @transform_6(%arg0: i32, %arg1: memref<2xi32, #tpu.memory_space<smem>>) -> (i32, i32, i32, i32) {
    %c0_i32 = arith.constant 0 : i32
    %c0_i32_0 = arith.constant 0 : i32
    %c0_i32_1 = arith.constant 0 : i32
    %c0_i32_2 = arith.constant 0 : i32
    return %arg0, %c0_i32, %c0_i32_0, %c0_i32_1 : i32, i32, i32, i32
  }
  func.func @transform_7(%arg0: i32, %arg1: memref<2xi32, #tpu.memory_space<smem>>) -> (i32, i32, i32) {
    %c0_i32 = arith.constant 0 : i32
    %c0_i32_0 = arith.constant 0 : i32
    %c0_i32_1 = arith.constant 0 : i32
    return %arg0, %c0_i32, %c0_i32_0 : i32, i32, i32
  }
}

module attributes {stable_mosaic.version = 11 : i64} {
  func.func @attn_decode_kernel(%arg0: memref<8x8x128xf32, #tpu.memory_space<vmem>>, %arg1: memref<8x8x256xf32, #tpu.memory_space<vmem>>, %arg2: memref<8x1xi32, #tpu.memory_space<vmem>>, %arg3: memref<8x1xi32, #tpu.memory_space<vmem>>, %arg4: memref<256x128xf32, #tpu.memory_space<vmem>>, %arg5: memref<256x128xf32, #tpu.memory_space<vmem>>, %arg6: memref<128x128xf32, #tpu.memory_space<vmem>>, %arg7: memref<1x128xf32, #tpu.memory_space<vmem>>, %arg8: memref<128x256xf32, #tpu.memory_space<vmem>>, %arg9: memref<1x256xf32, #tpu.memory_space<vmem>>, %arg10: memref<8x8x256xf32, #tpu.memory_space<vmem>>, %arg11: memref<8x8x8xf32, #tpu.memory_space<vmem>>) attributes {dimension_semantics = [], scalar_prefetch = 0 : i64, scratch_operands = 0 : i64, tpu.core_type = #tpu.core_type<tc>} {
    %c0 = arith.constant 0 : index
    %c0_0 = arith.constant 0 : index
    %c0_1 = arith.constant 0 : index
    %0 = vector.load %arg0[%c0, %c0_0, %c0_1] : memref<8x8x128xf32, #tpu.memory_space<vmem>>, vector<8x8x128xf32>
    %c0_2 = arith.constant 0 : index
    %c0_3 = arith.constant 0 : index
    %c0_4 = arith.constant 0 : index
    %1 = vector.load %arg1[%c0_2, %c0_3, %c0_4] : memref<8x8x256xf32, #tpu.memory_space<vmem>>, vector<8x8x256xf32>
    %2 = vector.shape_cast %1 : vector<8x8x256xf32> to vector<64x256xf32>
    %c0_5 = arith.constant 0 : index
    %c0_6 = arith.constant 0 : index
    %3 = vector.load %arg4[%c0_5, %c0_6] : memref<256x128xf32, #tpu.memory_space<vmem>>, vector<256x128xf32>
    %cst = arith.constant dense<0.000000e+00> : vector<64x128xf32>
    %4 = tpu.matmul %2, %3, %cst {dimension_numbers = #tpu.dot_dimension_numbers<[1], [0], [0], [1], [0, 0, 1, 1], [], []>} : vector<64x256xf32>, vector<256x128xf32>, vector<64x128xf32> -> vector<64x128xf32>
    %5 = vector.shape_cast %4 : vector<64x128xf32> to vector<8x8x128xf32>
    "tpu.trace_start"() <{level = 10 : i32, message = "btd,bsd->bts"}> : () -> ()
    %cst_7 = arith.constant dense<0.000000e+00> : vector<8x8x8xf32>
    %6 = tpu.matmul %0, %5, %cst_7 {dimension_numbers = #tpu.dot_dimension_numbers<[2], [2], [1], [1], [0, 0, 0, 1, 1, 1], [0], [0]>} : vector<8x8x128xf32>, vector<8x8x128xf32>, vector<8x8x8xf32> -> vector<8x8x8xf32>
    "tpu.trace_stop"() : () -> ()
    %7 = tpu.iota {dimensions = array<i32: 1>} : vector<8x8x8xi32>
    %8 = tpu.iota {dimensions = array<i32: 2>} : vector<8x8x8xi32>
    %c0_8 = arith.constant 0 : index
    %c0_9 = arith.constant 0 : index
    %9 = vector.load %arg3[%c0_8, %c0_9] : memref<8x1xi32, #tpu.memory_space<vmem>>, vector<8x1xi32>
    %10 = vector.shape_cast %9 : vector<8x1xi32> to vector<8x1x1xi32>
    %11 = vector.broadcast %10 : vector<8x1x1xi32> to vector<8x8x8xi32>
    %12 = arith.cmpi slt, %7, %11 : vector<8x8x8xi32>
    %c0_10 = arith.constant 0 : index
    %c0_11 = arith.constant 0 : index
    %13 = vector.load %arg2[%c0_10, %c0_11] : memref<8x1xi32, #tpu.memory_space<vmem>>, vector<8x1xi32>
    %14 = vector.shape_cast %13 : vector<8x1xi32> to vector<8x1x1xi32>
    %15 = vector.broadcast %14 : vector<8x1x1xi32> to vector<8x8x8xi32>
    %16 = arith.cmpi slt, %8, %15 : vector<8x8x8xi32>
    %17 = arith.andi %12, %16 : vector<8x8x8xi1>
    %cst_12 = arith.constant -1.000000e+06 : f32
    %18 = vector.broadcast %cst_12 : f32 to vector<8x8x8xf32>
    %19 = arith.select %17, %6, %18 : vector<8x8x8xi1>, vector<8x8x8xf32>
    %cst_13 = arith.constant dense<0xFF800000> : vector<8x8xf32>
    %20 = vector.multi_reduction <maximumf>, %19, %cst_13 [2] : vector<8x8x8xf32> to vector<8x8xf32>
    %21 = vector.shape_cast %20 : vector<8x8xf32> to vector<8x8x1xf32>
    %22 = vector.broadcast %21 : vector<8x8x1xf32> to vector<8x8x8xf32>
    %23 = arith.subf %19, %22 : vector<8x8x8xf32>
    %24 = math.exp %23 : vector<8x8x8xf32>
    %cst_14 = arith.constant dense<0.000000e+00> : vector<8x8xf32>
    %25 = vector.multi_reduction <add>, %24, %cst_14 [2] : vector<8x8x8xf32> to vector<8x8xf32>
    %26 = vector.shape_cast %25 : vector<8x8xf32> to vector<8x8x1xf32>
    %27 = vector.broadcast %26 : vector<8x8x1xf32> to vector<8x8x8xf32>
    %28 = arith.divf %24, %27 : vector<8x8x8xf32>
    %c0_15 = arith.constant 0 : index
    %c0_16 = arith.constant 0 : index
    %c0_17 = arith.constant 0 : index
    %29 = vector.load %arg11[%c0_15, %c0_16, %c0_17] : memref<8x8x8xf32, #tpu.memory_space<vmem>>, vector<8x8x8xf32>
    tpu.vector_store %arg11[%c0_15, %c0_16, %c0_17], %28 {strides = array<i32>} : memref<8x8x8xf32, #tpu.memory_space<vmem>>, vector<8x8x8xf32>,
    "tpu.trace_start"() <{level = 10 : i32, message = "bts,bsc->btc"}> : () -> ()
    %cst_18 = arith.constant dense<0.000000e+00> : vector<8x8x256xf32>
    %30 = tpu.matmul %28, %1, %cst_18 {dimension_numbers = #tpu.dot_dimension_numbers<[2], [1], [1], [2], [0, 0, 0, 1, 1, 2], [0], [0]>} : vector<8x8x8xf32>, vector<8x8x256xf32>, vector<8x8x256xf32> -> vector<8x8x256xf32>
    "tpu.trace_stop"() : () -> ()
    %31 = vector.shape_cast %30 : vector<8x8x256xf32> to vector<64x256xf32>
    %c0_19 = arith.constant 0 : index
    %c0_20 = arith.constant 0 : index
    %32 = vector.load %arg5[%c0_19, %c0_20] : memref<256x128xf32, #tpu.memory_space<vmem>>, vector<256x128xf32>
    %cst_21 = arith.constant dense<0.000000e+00> : vector<64x128xf32>
    %33 = tpu.matmul %31, %32, %cst_21 {dimension_numbers = #tpu.dot_dimension_numbers<[1], [0], [0], [1], [0, 0, 1, 1], [], []>} : vector<64x256xf32>, vector<256x128xf32>, vector<64x128xf32> -> vector<64x128xf32>
    %34 = vector.shape_cast %0 : vector<8x8x128xf32> to vector<64x128xf32>
    %c0_22 = arith.constant 0 : index
    %c0_23 = arith.constant 0 : index
    %35 = vector.load %arg6[%c0_22, %c0_23] : memref<128x128xf32, #tpu.memory_space<vmem>>, vector<128x128xf32>
    %cst_24 = arith.constant dense<0.000000e+00> : vector<64x128xf32>
    %36 = tpu.matmul %34, %35, %cst_24 {dimension_numbers = #tpu.dot_dimension_numbers<[1], [0], [0], [1], [0, 0, 1, 1], [], []>} : vector<64x128xf32>, vector<128x128xf32>, vector<64x128xf32> -> vector<64x128xf32>
    %37 = arith.addf %33, %36 : vector<64x128xf32>
    %c0_25 = arith.constant 0 : index
    %c0_26 = arith.constant 0 : index
    %38 = vector.load %arg7[%c0_25, %c0_26] : memref<1x128xf32, #tpu.memory_space<vmem>>, vector<1x128xf32>
    %39 = vector.broadcast %38 : vector<1x128xf32> to vector<64x128xf32>
    %40 = arith.addf %37, %39 : vector<64x128xf32>
    %41 = math.tanh %40 : vector<64x128xf32>
    %c0_27 = arith.constant 0 : index
    %c0_28 = arith.constant 0 : index
    %42 = vector.load %arg8[%c0_27, %c0_28] : memref<128x256xf32, #tpu.memory_space<vmem>>, vector<128x256xf32>
    %cst_29 = arith.constant dense<0.000000e+00> : vector<64x256xf32>
    %43 = tpu.matmul %41, %42, %cst_29 {dimension_numbers = #tpu.dot_dimension_numbers<[1], [0], [0], [1], [0, 0, 1, 1], [], []>} : vector<64x128xf32>, vector<128x256xf32>, vector<64x256xf32> -> vector<64x256xf32>
    %c0_30 = arith.constant 0 : index
    %c0_31 = arith.constant 0 : index
    %44 = vector.load %arg9[%c0_30, %c0_31] : memref<1x256xf32, #tpu.memory_space<vmem>>, vector<1x256xf32>
    %45 = vector.broadcast %44 : vector<1x256xf32> to vector<64x256xf32>
    %46 = arith.addf %43, %45 : vector<64x256xf32>
    %cst_32 = arith.constant dense<0xFF800000> : vector<64xf32>
    %47 = vector.multi_reduction <maximumf>, %46, %cst_32 [1] : vector<64x256xf32> to vector<64xf32>
    %48 = vector.shape_cast %47 : vector<64xf32> to vector<64x1xf32>
    %49 = vector.broadcast %48 : vector<64x1xf32> to vector<64x256xf32>
    %50 = arith.subf %46, %49 : vector<64x256xf32>
    %51 = math.exp %50 : vector<64x256xf32>
    %cst_33 = arith.constant dense<0.000000e+00> : vector<64xf32>
    %52 = vector.multi_reduction <add>, %51, %cst_33 [1] : vector<64x256xf32> to vector<64xf32>
    %53 = vector.shape_cast %52 : vector<64xf32> to vector<64x1xf32>
    %54 = math.log %53 : vector<64x1xf32>
    %55 = arith.addf %48, %54 : vector<64x1xf32>
    %56 = vector.broadcast %55 : vector<64x1xf32> to vector<64x256xf32>
    %57 = arith.subf %46, %56 : vector<64x256xf32>
    %58 = vector.shape_cast %57 : vector<64x256xf32> to vector<8x8x256xf32>
    %c0_34 = arith.constant 0 : index
    %c0_35 = arith.constant 0 : index
    %c0_36 = arith.constant 0 : index
    %59 = vector.load %arg10[%c0_34, %c0_35, %c0_36] : memref<8x8x256xf32, #tpu.memory_space<vmem>>, vector<8x8x256xf32>
    tpu.vector_store %arg10[%c0_34, %c0_35, %c0_36], %58 {strides = array<i32>} : memref<8x8x256xf32, #tpu.memory_space<vmem>>, vector<8x8x256xf32>,
    return
  }
}

module attributes {stable_mosaic.version = 11 : i64} {
  func.func @gru_seq_kernel(%arg0: i32, %arg1: memref<1xi32, #tpu.memory_space<smem>>, %arg2: memref<8x8x128xf32, #tpu.memory_space<vmem>>, %arg3: memref<1x128x384xf32, #tpu.memory_space<vmem>>, %arg4: memref<1x128x384xf32, #tpu.memory_space<vmem>>, %arg5: memref<1x1x384xf32, #tpu.memory_space<vmem>>, %arg6: memref<1x1x384xf32, #tpu.memory_space<vmem>>, %arg7: memref<1x8x128xf32, #tpu.memory_space<vmem>>, %arg8: memref<1x8x8x128xf32, #tpu.memory_space<vmem>>, %arg9: memref<1x8x128xf32, #tpu.memory_space<vmem>>, %arg10: memref<8x8x384xf32, #tpu.memory_space<vmem>>, %arg11: memref<8x128xf32, #tpu.memory_space<vmem>>) attributes {dimension_semantics = [#tpu.dimension_semantics<parallel>], iteration_bounds = array<i64: 1>, scalar_prefetch = 1 : i64, scratch_operands = 2 : i64, tpu.core_type = #tpu.core_type<tc>, window_params = [{pipeline_mode = #tpu.pipeline_mode<synchronous>, transform_indices = @transform_0, window_bounds = array<i64: 8, 8, 128>}, {transform_indices = @transform_1, window_bounds = array<i64: 1, 128, 384>}, {transform_indices = @transform_2, window_bounds = array<i64: 1, 128, 384>}, {transform_indices = @transform_3, window_bounds = array<i64: 1, 1, 384>}, {transform_indices = @transform_4, window_bounds = array<i64: 1, 1, 384>}, {transform_indices = @transform_5, window_bounds = array<i64: 1, 8, 128>}, {transform_indices = @transform_6, window_bounds = array<i64: 1, 8, 8, 128>}, {transform_indices = @transform_7, window_bounds = array<i64: 1, 8, 128>}]} {
    %0 = arith.index_cast %arg0 : i32 to index
    %1 = memref.load %arg1[%0] : memref<1xi32, #tpu.memory_space<smem>>
    %c0 = arith.constant 0 : index
    %c0_0 = arith.constant 0 : index
    %c0_1 = arith.constant 0 : index
    %2 = vector.load %arg2[%c0, %c0_0, %c0_1] : memref<8x8x128xf32, #tpu.memory_space<vmem>>, vector<8x8x128xf32>
    %3 = vector.shape_cast %2 : vector<8x8x128xf32> to vector<64x128xf32>
    %c0_2 = arith.constant 0 : index
    %c0_3 = arith.constant 0 : index
    %c0_4 = arith.constant 0 : index
    %4 = vector.load %arg3[%c0_2, %c0_3, %c0_4] : memref<1x128x384xf32, #tpu.memory_space<vmem>>, vector<1x128x384xf32>
    %5 = vector.shape_cast %4 : vector<1x128x384xf32> to vector<128x384xf32>
    %cst = arith.constant dense<0.000000e+00> : vector<64x384xf32>
    %6 = tpu.matmul %3, %5, %cst {dimension_numbers = #tpu.dot_dimension_numbers<[1], [0], [0], [1], [0, 0, 1, 1], [], []>} : vector<64x128xf32>, vector<128x384xf32>, vector<64x384xf32> -> vector<64x384xf32>
    %c0_5 = arith.constant 0 : index
    %c0_6 = arith.constant 0 : index
    %c0_7 = arith.constant 0 : index
    %7 = vector.load %arg5[%c0_5, %c0_6, %c0_7] : memref<1x1x384xf32, #tpu.memory_space<vmem>>, vector<1x1x384xf32>
    %8 = vector.shape_cast %7 : vector<1x1x384xf32> to vector<1x384xf32>
    %9 = vector.broadcast %8 : vector<1x384xf32> to vector<64x384xf32>
    %10 = arith.addf %6, %9 : vector<64x384xf32>
    %11 = vector.shape_cast %10 : vector<64x384xf32> to vector<8x8x384xf32>
    %c0_8 = arith.constant 0 : index
    %c0_9 = arith.constant 0 : index
    %c0_10 = arith.constant 0 : index
    %12 = vector.load %arg10[%c0_8, %c0_9, %c0_10] : memref<8x8x384xf32, #tpu.memory_space<vmem>>, vector<8x8x384xf32>
    tpu.vector_store %arg10[%c0_8, %c0_9, %c0_10], %11 {strides = array<i32>} : memref<8x8x384xf32, #tpu.memory_space<vmem>>, vector<8x8x384xf32>,
    %c0_11 = arith.constant 0 : index
    %c0_12 = arith.constant 0 : index
    %c0_13 = arith.constant 0 : index
    %13 = vector.load %arg4[%c0_11, %c0_12, %c0_13] : memref<1x128x384xf32, #tpu.memory_space<vmem>>, vector<1x128x384xf32>
    %14 = vector.shape_cast %13 : vector<1x128x384xf32> to vector<128x384xf32>
    %c0_14 = arith.constant 0 : index
    %c0_15 = arith.constant 0 : index
    %c0_16 = arith.constant 0 : index
    %15 = vector.load %arg6[%c0_14, %c0_15, %c0_16] : memref<1x1x384xf32, #tpu.memory_space<vmem>>, vector<1x1x384xf32>
    %16 = vector.shape_cast %15 : vector<1x1x384xf32> to vector<1x384xf32>
    %c0_17 = arith.constant 0 : index
    %c0_18 = arith.constant 0 : index
    %c0_19 = arith.constant 0 : index
    %17 = vector.load %arg7[%c0_17, %c0_18, %c0_19] : memref<1x8x128xf32, #tpu.memory_space<vmem>>, vector<1x8x128xf32>
    %18 = vector.shape_cast %17 : vector<1x8x128xf32> to vector<8x128xf32>
    %c0_20 = arith.constant 0 : index
    %c0_21 = arith.constant 0 : index
    %19 = vector.load %arg11[%c0_20, %c0_21] : memref<8x128xf32, #tpu.memory_space<vmem>>, vector<8x128xf32>
    tpu.vector_store %arg11[%c0_20, %c0_21], %18 {strides = array<i32>} : memref<8x128xf32, #tpu.memory_space<vmem>>, vector<8x128xf32>,
    %c0_i32 = arith.constant 0 : i32
    %c0_i32_22 = arith.constant 0 : i32
    %20 = arith.cmpi sgt, %1, %c0_i32_22 : i32
    %c7_i32 = arith.constant 7 : i32
    %21 = arith.subi %c7_i32, %c0_i32 : i32
    %22 = arith.select %20, %21, %c0_i32 : i32
    %c0_23 = arith.constant 0 : index
    %c0_24 = arith.constant 0 : index
    %23 = vector.load %arg11[%c0_23, %c0_24] : memref<8x128xf32, #tpu.memory_space<vmem>>, vector<8x128xf32>
    %24 = arith.index_cast %22 : i32 to index
    %c0_25 = arith.constant 0 : index
    %c0_26 = arith.constant 0 : index
    %25 = vector.load %arg10[%24, %c0_25, %c0_26] : memref<8x8x384xf32, #tpu.memory_space<vmem>>, vector<1x8x384xf32>
    %26 = vector.shape_cast %25 : vector<1x8x384xf32> to vector<8x384xf32>
    %cst_27 = arith.constant dense<0.000000e+00> : vector<8x384xf32>
    %27 = tpu.matmul %23, %14, %cst_27 {dimension_numbers = #tpu.dot_dimension_numbers<[1], [0], [0], [1], [0, 0, 1, 1], [], []>} : vector<8x128xf32>, vector<128x384xf32>, vector<8x384xf32> -> vector<8x384xf32>
    %28 = vector.broadcast %16 : vector<1x384xf32> to vector<8x384xf32>
    %29 = arith.addf %27, %28 : vector<8x384xf32>
    %30 = vector.extract_strided_slice %26 {offsets = [0, 0], sizes = [8, 128], strides = [1, 1]} : vector<8x384xf32> to vector<8x128xf32>
    %31 = vector.extract_strided_slice %29 {offsets = [0, 0], sizes = [8, 128], strides = [1, 1]} : vector<8x384xf32> to vector<8x128xf32>
    %32 = arith.addf %30, %31 : vector<8x128xf32>
    %33 = arith.negf %32 : vector<8x128xf32>
    %34 = math.exp %33 : vector<8x128xf32>
    %cst_28 = arith.constant 1.000000e+00 : f32
    %35 = vector.broadcast %cst_28 : f32 to vector<8x128xf32>
    %36 = arith.addf %35, %34 : vector<8x128xf32>
    %37 = arith.divf %35, %36 : vector<8x128xf32>
    %38 = vector.extract_strided_slice %26 {offsets = [0, 128], sizes = [8, 128], strides = [1, 1]} : vector<8x384xf32> to vector<8x128xf32>
    %39 = vector.extract_strided_slice %29 {offsets = [0, 128], sizes = [8, 128], strides = [1, 1]} : vector<8x384xf32> to vector<8x128xf32>
    %40 = arith.addf %38, %39 : vector<8x128xf32>
    %41 = arith.negf %40 : vector<8x128xf32>
    %42 = math.exp %41 : vector<8x128xf32>
    %cst_29 = arith.constant 1.000000e+00 : f32
    %43 = vector.broadcast %cst_29 : f32 to vector<8x128xf32>
    %44 = arith.addf %43, %42 : vector<8x128xf32>
    %45 = arith.divf %43, %44 : vector<8x128xf32>
    %46 = vector.extract_strided_slice %26 {offsets = [0, 256], sizes = [8, 128], strides = [1, 1]} : vector<8x384xf32> to vector<8x128xf32>
    %47 = vector.extract_strided_slice %29 {offsets = [0, 256], sizes = [8, 128], strides = [1, 1]} : vector<8x384xf32> to vector<8x128xf32>
    %48 = arith.mulf %37, %47 : vector<8x128xf32>
    %49 = arith.addf %46, %48 : vector<8x128xf32>
    %50 = math.tanh %49 : vector<8x128xf32>
    %cst_30 = arith.constant 1.000000e+00 : f32
    %51 = vector.broadcast %cst_30 : f32 to vector<8x128xf32>
    %52 = arith.subf %51, %45 : vector<8x128xf32>
    %53 = arith.mulf %52, %50 : vector<8x128xf32>
    %54 = arith.mulf %45, %23 : vector<8x128xf32>
    %55 = arith.addf %53, %54 : vector<8x128xf32>
    %c0_31 = arith.constant 0 : index
    %c0_32 = arith.constant 0 : index
    %56 = vector.load %arg11[%c0_31, %c0_32] : memref<8x128xf32, #tpu.memory_space<vmem>>, vector<8x128xf32>
    tpu.vector_store %arg11[%c0_31, %c0_32], %55 {strides = array<i32>} : memref<8x128xf32, #tpu.memory_space<vmem>>, vector<8x128xf32>,
    %c0_33 = arith.constant 0 : index
    %57 = arith.index_cast %22 : i32 to index
    %c0_34 = arith.constant 0 : index
    %c0_35 = arith.constant 0 : index
    %58 = vector.load %arg8[%c0_33, %57, %c0_34, %c0_35] : memref<1x8x8x128xf32, #tpu.memory_space<vmem>>, vector<1x1x8x128xf32>
    %59 = vector.shape_cast %58 : vector<1x1x8x128xf32> to vector<8x128xf32>
    %60 = vector.shape_cast %55 : vector<8x128xf32> to vector<1x1x8x128xf32>
    tpu.vector_store %arg8[%c0_33, %57, %c0_34, %c0_35], %60 {strides = array<i32>} : memref<1x8x8x128xf32, #tpu.memory_space<vmem>>, vector<1x1x8x128xf32>,
    %c1_i32 = arith.constant 1 : i32
    %c0_i32_36 = arith.constant 0 : i32
    %61 = arith.cmpi sgt, %1, %c0_i32_36 : i32
    %c7_i32_37 = arith.constant 7 : i32
    %62 = arith.subi %c7_i32_37, %c1_i32 : i32
    %63 = arith.select %61, %62, %c1_i32 : i32
    %c0_38 = arith.constant 0 : index
    %c0_39 = arith.constant 0 : index
    %64 = vector.load %arg11[%c0_38, %c0_39] : memref<8x128xf32, #tpu.memory_space<vmem>>, vector<8x128xf32>
    %65 = arith.index_cast %63 : i32 to index
    %c0_40 = arith.constant 0 : index
    %c0_41 = arith.constant 0 : index
    %66 = vector.load %arg10[%65, %c0_40, %c0_41] : memref<8x8x384xf32, #tpu.memory_space<vmem>>, vector<1x8x384xf32>
    %67 = vector.shape_cast %66 : vector<1x8x384xf32> to vector<8x384xf32>
    %cst_42 = arith.constant dense<0.000000e+00> : vector<8x384xf32>
    %68 = tpu.matmul %64, %14, %cst_42 {dimension_numbers = #tpu.dot_dimension_numbers<[1], [0], [0], [1], [0, 0, 1, 1], [], []>} : vector<8x128xf32>, vector<128x384xf32>, vector<8x384xf32> -> vector<8x384xf32>
    %69 = vector.broadcast %16 : vector<1x384xf32> to vector<8x384xf32>
    %70 = arith.addf %68, %69 : vector<8x384xf32>
    %71 = vector.extract_strided_slice %67 {offsets = [0, 0], sizes = [8, 128], strides = [1, 1]} : vector<8x384xf32> to vector<8x128xf32>
    %72 = vector.extract_strided_slice %70 {offsets = [0, 0], sizes = [8, 128], strides = [1, 1]} : vector<8x384xf32> to vector<8x128xf32>
    %73 = arith.addf %71, %72 : vector<8x128xf32>
    %74 = arith.negf %73 : vector<8x128xf32>
    %75 = math.exp %74 : vector<8x128xf32>
    %cst_43 = arith.constant 1.000000e+00 : f32
    %76 = vector.broadcast %cst_43 : f32 to vector<8x128xf32>
    %77 = arith.addf %76, %75 : vector<8x128xf32>
    %78 = arith.divf %76, %77 : vector<8x128xf32>
    %79 = vector.extract_strided_slice %67 {offsets = [0, 128], sizes = [8, 128], strides = [1, 1]} : vector<8x384xf32> to vector<8x128xf32>
    %80 = vector.extract_strided_slice %70 {offsets = [0, 128], sizes = [8, 128], strides = [1, 1]} : vector<8x384xf32> to vector<8x128xf32>
    %81 = arith.addf %79, %80 : vector<8x128xf32>
    %82 = arith.negf %81 : vector<8x128xf32>
    %83 = math.exp %82 : vector<8x128xf32>
    %cst_44 = arith.constant 1.000000e+00 : f32
    %84 = vector.broadcast %cst_44 : f32 to vector<8x128xf32>
    %85 = arith.addf %84, %83 : vector<8x128xf32>
    %86 = arith.divf %84, %85 : vector<8x128xf32>
    %87 = vector.extract_strided_slice %67 {offsets = [0, 256], sizes = [8, 128], strides = [1, 1]} : vector<8x384xf32> to vector<8x128xf32>
    %88 = vector.extract_strided_slice %70 {offsets = [0, 256], sizes = [8, 128], strides = [1, 1]} : vector<8x384xf32> to vector<8x128xf32>
    %89 = arith.mulf %78, %88 : vector<8x128xf32>
    %90 = arith.addf %87, %89 : vector<8x128xf32>
    %91 = math.tanh %90 : vector<8x128xf32>
    %cst_45 = arith.constant 1.000000e+00 : f32
    %92 = vector.broadcast %cst_45 : f32 to vector<8x128xf32>
    %93 = arith.subf %92, %86 : vector<8x128xf32>
    %94 = arith.mulf %93, %91 : vector<8x128xf32>
    %95 = arith.mulf %86, %64 : vector<8x128xf32>
    %96 = arith.addf %94, %95 : vector<8x128xf32>
    %c0_46 = arith.constant 0 : index
    %c0_47 = arith.constant 0 : index
    %97 = vector.load %arg11[%c0_46, %c0_47] : memref<8x128xf32, #tpu.memory_space<vmem>>, vector<8x128xf32>
    tpu.vector_store %arg11[%c0_46, %c0_47], %96 {strides = array<i32>} : memref<8x128xf32, #tpu.memory_space<vmem>>, vector<8x128xf32>,
    %c0_48 = arith.constant 0 : index
    %98 = arith.index_cast %63 : i32 to index
    %c0_49 = arith.constant 0 : index
    %c0_50 = arith.constant 0 : index
    %99 = vector.load %arg8[%c0_48, %98, %c0_49, %c0_50] : memref<1x8x8x128xf32, #tpu.memory_space<vmem>>, vector<1x1x8x128xf32>
    %100 = vector.shape_cast %99 : vector<1x1x8x128xf32> to vector<8x128xf32>
    %101 = vector.shape_cast %96 : vector<8x128xf32> to vector<1x1x8x128xf32>
    tpu.vector_store %arg8[%c0_48, %98, %c0_49, %c0_50], %101 {strides = array<i32>} : memref<1x8x8x128xf32, #tpu.memory_space<vmem>>, vector<1x1x8x128xf32>,
    %c2_i32 = arith.constant 2 : i32
    %c0_i32_51 = arith.constant 0 : i32
    %102 = arith.cmpi sgt, %1, %c0_i32_51 : i32
    %c7_i32_52 = arith.constant 7 : i32
    %103 = arith.subi %c7_i32_52, %c2_i32 : i32
    %104 = arith.select %102, %103, %c2_i32 : i32
    %c0_53 = arith.constant 0 : index
    %c0_54 = arith.constant 0 : index
    %105 = vector.load %arg11[%c0_53, %c0_54] : memref<8x128xf32, #tpu.memory_space<vmem>>, vector<8x128xf32>
    %106 = arith.index_cast %104 : i32 to index
    %c0_55 = arith.constant 0 : index
    %c0_56 = arith.constant 0 : index
    %107 = vector.load %arg10[%106, %c0_55, %c0_56] : memref<8x8x384xf32, #tpu.memory_space<vmem>>, vector<1x8x384xf32>
    %108 = vector.shape_cast %107 : vector<1x8x384xf32> to vector<8x384xf32>
    %cst_57 = arith.constant dense<0.000000e+00> : vector<8x384xf32>
    %109 = tpu.matmul %105, %14, %cst_57 {dimension_numbers = #tpu.dot_dimension_numbers<[1], [0], [0], [1], [0, 0, 1, 1], [], []>} : vector<8x128xf32>, vector<128x384xf32>, vector<8x384xf32> -> vector<8x384xf32>
    %110 = vector.broadcast %16 : vector<1x384xf32> to vector<8x384xf32>
    %111 = arith.addf %109, %110 : vector<8x384xf32>
    %112 = vector.extract_strided_slice %108 {offsets = [0, 0], sizes = [8, 128], strides = [1, 1]} : vector<8x384xf32> to vector<8x128xf32>
    %113 = vector.extract_strided_slice %111 {offsets = [0, 0], sizes = [8, 128], strides = [1, 1]} : vector<8x384xf32> to vector<8x128xf32>
    %114 = arith.addf %112, %113 : vector<8x128xf32>
    %115 = arith.negf %114 : vector<8x128xf32>
    %116 = math.exp %115 : vector<8x128xf32>
    %cst_58 = arith.constant 1.000000e+00 : f32
    %117 = vector.broadcast %cst_58 : f32 to vector<8x128xf32>
    %118 = arith.addf %117, %116 : vector<8x128xf32>
    %119 = arith.divf %117, %118 : vector<8x128xf32>
    %120 = vector.extract_strided_slice %108 {offsets = [0, 128], sizes = [8, 128], strides = [1, 1]} : vector<8x384xf32> to vector<8x128xf32>
    %121 = vector.extract_strided_slice %111 {offsets = [0, 128], sizes = [8, 128], strides = [1, 1]} : vector<8x384xf32> to vector<8x128xf32>
    %122 = arith.addf %120, %121 : vector<8x128xf32>
    %123 = arith.negf %122 : vector<8x128xf32>
    %124 = math.exp %123 : vector<8x128xf32>
    %cst_59 = arith.constant 1.000000e+00 : f32
    %125 = vector.broadcast %cst_59 : f32 to vector<8x128xf32>
    %126 = arith.addf %125, %124 : vector<8x128xf32>
    %127 = arith.divf %125, %126 : vector<8x128xf32>
    %128 = vector.extract_strided_slice %108 {offsets = [0, 256], sizes = [8, 128], strides = [1, 1]} : vector<8x384xf32> to vector<8x128xf32>
    %129 = vector.extract_strided_slice %111 {offsets = [0, 256], sizes = [8, 128], strides = [1, 1]} : vector<8x384xf32> to vector<8x128xf32>
    %130 = arith.mulf %119, %129 : vector<8x128xf32>
    %131 = arith.addf %128, %130 : vector<8x128xf32>
    %132 = math.tanh %131 : vector<8x128xf32>
    %cst_60 = arith.constant 1.000000e+00 : f32
    %133 = vector.broadcast %cst_60 : f32 to vector<8x128xf32>
    %134 = arith.subf %133, %127 : vector<8x128xf32>
    %135 = arith.mulf %134, %132 : vector<8x128xf32>
    %136 = arith.mulf %127, %105 : vector<8x128xf32>
    %137 = arith.addf %135, %136 : vector<8x128xf32>
    %c0_61 = arith.constant 0 : index
    %c0_62 = arith.constant 0 : index
    %138 = vector.load %arg11[%c0_61, %c0_62] : memref<8x128xf32, #tpu.memory_space<vmem>>, vector<8x128xf32>
    tpu.vector_store %arg11[%c0_61, %c0_62], %137 {strides = array<i32>} : memref<8x128xf32, #tpu.memory_space<vmem>>, vector<8x128xf32>,
    %c0_63 = arith.constant 0 : index
    %139 = arith.index_cast %104 : i32 to index
    %c0_64 = arith.constant 0 : index
    %c0_65 = arith.constant 0 : index
    %140 = vector.load %arg8[%c0_63, %139, %c0_64, %c0_65] : memref<1x8x8x128xf32, #tpu.memory_space<vmem>>, vector<1x1x8x128xf32>
    %141 = vector.shape_cast %140 : vector<1x1x8x128xf32> to vector<8x128xf32>
    %142 = vector.shape_cast %137 : vector<8x128xf32> to vector<1x1x8x128xf32>
    tpu.vector_store %arg8[%c0_63, %139, %c0_64, %c0_65], %142 {strides = array<i32>} : memref<1x8x8x128xf32, #tpu.memory_space<vmem>>, vector<1x1x8x128xf32>,
    %c3_i32 = arith.constant 3 : i32
    %c0_i32_66 = arith.constant 0 : i32
    %143 = arith.cmpi sgt, %1, %c0_i32_66 : i32
    %c7_i32_67 = arith.constant 7 : i32
    %144 = arith.subi %c7_i32_67, %c3_i32 : i32
    %145 = arith.select %143, %144, %c3_i32 : i32
    %c0_68 = arith.constant 0 : index
    %c0_69 = arith.constant 0 : index
    %146 = vector.load %arg11[%c0_68, %c0_69] : memref<8x128xf32, #tpu.memory_space<vmem>>, vector<8x128xf32>
    %147 = arith.index_cast %145 : i32 to index
    %c0_70 = arith.constant 0 : index
    %c0_71 = arith.constant 0 : index
    %148 = vector.load %arg10[%147, %c0_70, %c0_71] : memref<8x8x384xf32, #tpu.memory_space<vmem>>, vector<1x8x384xf32>
    %149 = vector.shape_cast %148 : vector<1x8x384xf32> to vector<8x384xf32>
    %cst_72 = arith.constant dense<0.000000e+00> : vector<8x384xf32>
    %150 = tpu.matmul %146, %14, %cst_72 {dimension_numbers = #tpu.dot_dimension_numbers<[1], [0], [0], [1], [0, 0, 1, 1], [], []>} : vector<8x128xf32>, vector<128x384xf32>, vector<8x384xf32> -> vector<8x384xf32>
    %151 = vector.broadcast %16 : vector<1x384xf32> to vector<8x384xf32>
    %152 = arith.addf %150, %151 : vector<8x384xf32>
    %153 = vector.extract_strided_slice %149 {offsets = [0, 0], sizes = [8, 128], strides = [1, 1]} : vector<8x384xf32> to vector<8x128xf32>
    %154 = vector.extract_strided_slice %152 {offsets = [0, 0], sizes = [8, 128], strides = [1, 1]} : vector<8x384xf32> to vector<8x128xf32>
    %155 = arith.addf %153, %154 : vector<8x128xf32>
    %156 = arith.negf %155 : vector<8x128xf32>
    %157 = math.exp %156 : vector<8x128xf32>
    %cst_73 = arith.constant 1.000000e+00 : f32
    %158 = vector.broadcast %cst_73 : f32 to vector<8x128xf32>
    %159 = arith.addf %158, %157 : vector<8x128xf32>
    %160 = arith.divf %158, %159 : vector<8x128xf32>
    %161 = vector.extract_strided_slice %149 {offsets = [0, 128], sizes = [8, 128], strides = [1, 1]} : vector<8x384xf32> to vector<8x128xf32>
    %162 = vector.extract_strided_slice %152 {offsets = [0, 128], sizes = [8, 128], strides = [1, 1]} : vector<8x384xf32> to vector<8x128xf32>
    %163 = arith.addf %161, %162 : vector<8x128xf32>
    %164 = arith.negf %163 : vector<8x128xf32>
    %165 = math.exp %164 : vector<8x128xf32>
    %cst_74 = arith.constant 1.000000e+00 : f32
    %166 = vector.broadcast %cst_74 : f32 to vector<8x128xf32>
    %167 = arith.addf %166, %165 : vector<8x128xf32>
    %168 = arith.divf %166, %167 : vector<8x128xf32>
    %169 = vector.extract_strided_slice %149 {offsets = [0, 256], sizes = [8, 128], strides = [1, 1]} : vector<8x384xf32> to vector<8x128xf32>
    %170 = vector.extract_strided_slice %152 {offsets = [0, 256], sizes = [8, 128], strides = [1, 1]} : vector<8x384xf32> to vector<8x128xf32>
    %171 = arith.mulf %160, %170 : vector<8x128xf32>
    %172 = arith.addf %169, %171 : vector<8x128xf32>
    %173 = math.tanh %172 : vector<8x128xf32>
    %cst_75 = arith.constant 1.000000e+00 : f32
    %174 = vector.broadcast %cst_75 : f32 to vector<8x128xf32>
    %175 = arith.subf %174, %168 : vector<8x128xf32>
    %176 = arith.mulf %175, %173 : vector<8x128xf32>
    %177 = arith.mulf %168, %146 : vector<8x128xf32>
    %178 = arith.addf %176, %177 : vector<8x128xf32>
    %c0_76 = arith.constant 0 : index
    %c0_77 = arith.constant 0 : index
    %179 = vector.load %arg11[%c0_76, %c0_77] : memref<8x128xf32, #tpu.memory_space<vmem>>, vector<8x128xf32>
    tpu.vector_store %arg11[%c0_76, %c0_77], %178 {strides = array<i32>} : memref<8x128xf32, #tpu.memory_space<vmem>>, vector<8x128xf32>,
    %c0_78 = arith.constant 0 : index
    %180 = arith.index_cast %145 : i32 to index
    %c0_79 = arith.constant 0 : index
    %c0_80 = arith.constant 0 : index
    %181 = vector.load %arg8[%c0_78, %180, %c0_79, %c0_80] : memref<1x8x8x128xf32, #tpu.memory_space<vmem>>, vector<1x1x8x128xf32>
    %182 = vector.shape_cast %181 : vector<1x1x8x128xf32> to vector<8x128xf32>
    %183 = vector.shape_cast %178 : vector<8x128xf32> to vector<1x1x8x128xf32>
    tpu.vector_store %arg8[%c0_78, %180, %c0_79, %c0_80], %183 {strides = array<i32>} : memref<1x8x8x128xf32, #tpu.memory_space<vmem>>, vector<1x1x8x128xf32>,
    %c4_i32 = arith.constant 4 : i32
    %c0_i32_81 = arith.constant 0 : i32
    %184 = arith.cmpi sgt, %1, %c0_i32_81 : i32
    %c7_i32_82 = arith.constant 7 : i32
    %185 = arith.subi %c7_i32_82, %c4_i32 : i32
    %186 = arith.select %184, %185, %c4_i32 : i32
    %c0_83 = arith.constant 0 : index
    %c0_84 = arith.constant 0 : index
    %187 = vector.load %arg11[%c0_83, %c0_84] : memref<8x128xf32, #tpu.memory_space<vmem>>, vector<8x128xf32>
    %188 = arith.index_cast %186 : i32 to index
    %c0_85 = arith.constant 0 : index
    %c0_86 = arith.constant 0 : index
    %189 = vector.load %arg10[%188, %c0_85, %c0_86] : memref<8x8x384xf32, #tpu.memory_space<vmem>>, vector<1x8x384xf32>
    %190 = vector.shape_cast %189 : vector<1x8x384xf32> to vector<8x384xf32>
    %cst_87 = arith.constant dense<0.000000e+00> : vector<8x384xf32>
    %191 = tpu.matmul %187, %14, %cst_87 {dimension_numbers = #tpu.dot_dimension_numbers<[1], [0], [0], [1], [0, 0, 1, 1], [], []>} : vector<8x128xf32>, vector<128x384xf32>, vector<8x384xf32> -> vector<8x384xf32>
    %192 = vector.broadcast %16 : vector<1x384xf32> to vector<8x384xf32>
    %193 = arith.addf %191, %192 : vector<8x384xf32>
    %194 = vector.extract_strided_slice %190 {offsets = [0, 0], sizes = [8, 128], strides = [1, 1]} : vector<8x384xf32> to vector<8x128xf32>
    %195 = vector.extract_strided_slice %193 {offsets = [0, 0], sizes = [8, 128], strides = [1, 1]} : vector<8x384xf32> to vector<8x128xf32>
    %196 = arith.addf %194, %195 : vector<8x128xf32>
    %197 = arith.negf %196 : vector<8x128xf32>
    %198 = math.exp %197 : vector<8x128xf32>
    %cst_88 = arith.constant 1.000000e+00 : f32
    %199 = vector.broadcast %cst_88 : f32 to vector<8x128xf32>
    %200 = arith.addf %199, %198 : vector<8x128xf32>
    %201 = arith.divf %199, %200 : vector<8x128xf32>
    %202 = vector.extract_strided_slice %190 {offsets = [0, 128], sizes = [8, 128], strides = [1, 1]} : vector<8x384xf32> to vector<8x128xf32>
    %203 = vector.extract_strided_slice %193 {offsets = [0, 128], sizes = [8, 128], strides = [1, 1]} : vector<8x384xf32> to vector<8x128xf32>
    %204 = arith.addf %202, %203 : vector<8x128xf32>
    %205 = arith.negf %204 : vector<8x128xf32>
    %206 = math.exp %205 : vector<8x128xf32>
    %cst_89 = arith.constant 1.000000e+00 : f32
    %207 = vector.broadcast %cst_89 : f32 to vector<8x128xf32>
    %208 = arith.addf %207, %206 : vector<8x128xf32>
    %209 = arith.divf %207, %208 : vector<8x128xf32>
    %210 = vector.extract_strided_slice %190 {offsets = [0, 256], sizes = [8, 128], strides = [1, 1]} : vector<8x384xf32> to vector<8x128xf32>
    %211 = vector.extract_strided_slice %193 {offsets = [0, 256], sizes = [8, 128], strides = [1, 1]} : vector<8x384xf32> to vector<8x128xf32>
    %212 = arith.mulf %201, %211 : vector<8x128xf32>
    %213 = arith.addf %210, %212 : vector<8x128xf32>
    %214 = math.tanh %213 : vector<8x128xf32>
    %cst_90 = arith.constant 1.000000e+00 : f32
    %215 = vector.broadcast %cst_90 : f32 to vector<8x128xf32>
    %216 = arith.subf %215, %209 : vector<8x128xf32>
    %217 = arith.mulf %216, %214 : vector<8x128xf32>
    %218 = arith.mulf %209, %187 : vector<8x128xf32>
    %219 = arith.addf %217, %218 : vector<8x128xf32>
    %c0_91 = arith.constant 0 : index
    %c0_92 = arith.constant 0 : index
    %220 = vector.load %arg11[%c0_91, %c0_92] : memref<8x128xf32, #tpu.memory_space<vmem>>, vector<8x128xf32>
    tpu.vector_store %arg11[%c0_91, %c0_92], %219 {strides = array<i32>} : memref<8x128xf32, #tpu.memory_space<vmem>>, vector<8x128xf32>,
    %c0_93 = arith.constant 0 : index
    %221 = arith.index_cast %186 : i32 to index
    %c0_94 = arith.constant 0 : index
    %c0_95 = arith.constant 0 : index
    %222 = vector.load %arg8[%c0_93, %221, %c0_94, %c0_95] : memref<1x8x8x128xf32, #tpu.memory_space<vmem>>, vector<1x1x8x128xf32>
    %223 = vector.shape_cast %222 : vector<1x1x8x128xf32> to vector<8x128xf32>
    %224 = vector.shape_cast %219 : vector<8x128xf32> to vector<1x1x8x128xf32>
    tpu.vector_store %arg8[%c0_93, %221, %c0_94, %c0_95], %224 {strides = array<i32>} : memref<1x8x8x128xf32, #tpu.memory_space<vmem>>, vector<1x1x8x128xf32>,
    %c5_i32 = arith.constant 5 : i32
    %c0_i32_96 = arith.constant 0 : i32
    %225 = arith.cmpi sgt, %1, %c0_i32_96 : i32
    %c7_i32_97 = arith.constant 7 : i32
    %226 = arith.subi %c7_i32_97, %c5_i32 : i32
    %227 = arith.select %225, %226, %c5_i32 : i32
    %c0_98 = arith.constant 0 : index
    %c0_99 = arith.constant 0 : index
    %228 = vector.load %arg11[%c0_98, %c0_99] : memref<8x128xf32, #tpu.memory_space<vmem>>, vector<8x128xf32>
    %229 = arith.index_cast %227 : i32 to index
    %c0_100 = arith.constant 0 : index
    %c0_101 = arith.constant 0 : index
    %230 = vector.load %arg10[%229, %c0_100, %c0_101] : memref<8x8x384xf32, #tpu.memory_space<vmem>>, vector<1x8x384xf32>
    %231 = vector.shape_cast %230 : vector<1x8x384xf32> to vector<8x384xf32>
    %cst_102 = arith.constant dense<0.000000e+00> : vector<8x384xf32>
    %232 = tpu.matmul %228, %14, %cst_102 {dimension_numbers = #tpu.dot_dimension_numbers<[1], [0], [0], [1], [0, 0, 1, 1], [], []>} : vector<8x128xf32>, vector<128x384xf32>, vector<8x384xf32> -> vector<8x384xf32>
    %233 = vector.broadcast %16 : vector<1x384xf32> to vector<8x384xf32>
    %234 = arith.addf %232, %233 : vector<8x384xf32>
    %235 = vector.extract_strided_slice %231 {offsets = [0, 0], sizes = [8, 128], strides = [1, 1]} : vector<8x384xf32> to vector<8x128xf32>
    %236 = vector.extract_strided_slice %234 {offsets = [0, 0], sizes = [8, 128], strides = [1, 1]} : vector<8x384xf32> to vector<8x128xf32>
    %237 = arith.addf %235, %236 : vector<8x128xf32>
    %238 = arith.negf %237 : vector<8x128xf32>
    %239 = math.exp %238 : vector<8x128xf32>
    %cst_103 = arith.constant 1.000000e+00 : f32
    %240 = vector.broadcast %cst_103 : f32 to vector<8x128xf32>
    %241 = arith.addf %240, %239 : vector<8x128xf32>
    %242 = arith.divf %240, %241 : vector<8x128xf32>
    %243 = vector.extract_strided_slice %231 {offsets = [0, 128], sizes = [8, 128], strides = [1, 1]} : vector<8x384xf32> to vector<8x128xf32>
    %244 = vector.extract_strided_slice %234 {offsets = [0, 128], sizes = [8, 128], strides = [1, 1]} : vector<8x384xf32> to vector<8x128xf32>
    %245 = arith.addf %243, %244 : vector<8x128xf32>
    %246 = arith.negf %245 : vector<8x128xf32>
    %247 = math.exp %246 : vector<8x128xf32>
    %cst_104 = arith.constant 1.000000e+00 : f32
    %248 = vector.broadcast %cst_104 : f32 to vector<8x128xf32>
    %249 = arith.addf %248, %247 : vector<8x128xf32>
    %250 = arith.divf %248, %249 : vector<8x128xf32>
    %251 = vector.extract_strided_slice %231 {offsets = [0, 256], sizes = [8, 128], strides = [1, 1]} : vector<8x384xf32> to vector<8x128xf32>
    %252 = vector.extract_strided_slice %234 {offsets = [0, 256], sizes = [8, 128], strides = [1, 1]} : vector<8x384xf32> to vector<8x128xf32>
    %253 = arith.mulf %242, %252 : vector<8x128xf32>
    %254 = arith.addf %251, %253 : vector<8x128xf32>
    %255 = math.tanh %254 : vector<8x128xf32>
    %cst_105 = arith.constant 1.000000e+00 : f32
    %256 = vector.broadcast %cst_105 : f32 to vector<8x128xf32>
    %257 = arith.subf %256, %250 : vector<8x128xf32>
    %258 = arith.mulf %257, %255 : vector<8x128xf32>
    %259 = arith.mulf %250, %228 : vector<8x128xf32>
    %260 = arith.addf %258, %259 : vector<8x128xf32>
    %c0_106 = arith.constant 0 : index
    %c0_107 = arith.constant 0 : index
    %261 = vector.load %arg11[%c0_106, %c0_107] : memref<8x128xf32, #tpu.memory_space<vmem>>, vector<8x128xf32>
    tpu.vector_store %arg11[%c0_106, %c0_107], %260 {strides = array<i32>} : memref<8x128xf32, #tpu.memory_space<vmem>>, vector<8x128xf32>,
    %c0_108 = arith.constant 0 : index
    %262 = arith.index_cast %227 : i32 to index
    %c0_109 = arith.constant 0 : index
    %c0_110 = arith.constant 0 : index
    %263 = vector.load %arg8[%c0_108, %262, %c0_109, %c0_110] : memref<1x8x8x128xf32, #tpu.memory_space<vmem>>, vector<1x1x8x128xf32>
    %264 = vector.shape_cast %263 : vector<1x1x8x128xf32> to vector<8x128xf32>
    %265 = vector.shape_cast %260 : vector<8x128xf32> to vector<1x1x8x128xf32>
    tpu.vector_store %arg8[%c0_108, %262, %c0_109, %c0_110], %265 {strides = array<i32>} : memref<1x8x8x128xf32, #tpu.memory_space<vmem>>, vector<1x1x8x128xf32>,
    %c6_i32 = arith.constant 6 : i32
    %c0_i32_111 = arith.constant 0 : i32
    %266 = arith.cmpi sgt, %1, %c0_i32_111 : i32
    %c7_i32_112 = arith.constant 7 : i32
    %267 = arith.subi %c7_i32_112, %c6_i32 : i32
    %268 = arith.select %266, %267, %c6_i32 : i32
    %c0_113 = arith.constant 0 : index
    %c0_114 = arith.constant 0 : index
    %269 = vector.load %arg11[%c0_113, %c0_114] : memref<8x128xf32, #tpu.memory_space<vmem>>, vector<8x128xf32>
    %270 = arith.index_cast %268 : i32 to index
    %c0_115 = arith.constant 0 : index
    %c0_116 = arith.constant 0 : index
    %271 = vector.load %arg10[%270, %c0_115, %c0_116] : memref<8x8x384xf32, #tpu.memory_space<vmem>>, vector<1x8x384xf32>
    %272 = vector.shape_cast %271 : vector<1x8x384xf32> to vector<8x384xf32>
    %cst_117 = arith.constant dense<0.000000e+00> : vector<8x384xf32>
    %273 = tpu.matmul %269, %14, %cst_117 {dimension_numbers = #tpu.dot_dimension_numbers<[1], [0], [0], [1], [0, 0, 1, 1], [], []>} : vector<8x128xf32>, vector<128x384xf32>, vector<8x384xf32> -> vector<8x384xf32>
    %274 = vector.broadcast %16 : vector<1x384xf32> to vector<8x384xf32>
    %275 = arith.addf %273, %274 : vector<8x384xf32>
    %276 = vector.extract_strided_slice %272 {offsets = [0, 0], sizes = [8, 128], strides = [1, 1]} : vector<8x384xf32> to vector<8x128xf32>
    %277 = vector.extract_strided_slice %275 {offsets = [0, 0], sizes = [8, 128], strides = [1, 1]} : vector<8x384xf32> to vector<8x128xf32>
    %278 = arith.addf %276, %277 : vector<8x128xf32>
    %279 = arith.negf %278 : vector<8x128xf32>
    %280 = math.exp %279 : vector<8x128xf32>
    %cst_118 = arith.constant 1.000000e+00 : f32
    %281 = vector.broadcast %cst_118 : f32 to vector<8x128xf32>
    %282 = arith.addf %281, %280 : vector<8x128xf32>
    %283 = arith.divf %281, %282 : vector<8x128xf32>
    %284 = vector.extract_strided_slice %272 {offsets = [0, 128], sizes = [8, 128], strides = [1, 1]} : vector<8x384xf32> to vector<8x128xf32>
    %285 = vector.extract_strided_slice %275 {offsets = [0, 128], sizes = [8, 128], strides = [1, 1]} : vector<8x384xf32> to vector<8x128xf32>
    %286 = arith.addf %284, %285 : vector<8x128xf32>
    %287 = arith.negf %286 : vector<8x128xf32>
    %288 = math.exp %287 : vector<8x128xf32>
    %cst_119 = arith.constant 1.000000e+00 : f32
    %289 = vector.broadcast %cst_119 : f32 to vector<8x128xf32>
    %290 = arith.addf %289, %288 : vector<8x128xf32>
    %291 = arith.divf %289, %290 : vector<8x128xf32>
    %292 = vector.extract_strided_slice %272 {offsets = [0, 256], sizes = [8, 128], strides = [1, 1]} : vector<8x384xf32> to vector<8x128xf32>
    %293 = vector.extract_strided_slice %275 {offsets = [0, 256], sizes = [8, 128], strides = [1, 1]} : vector<8x384xf32> to vector<8x128xf32>
    %294 = arith.mulf %283, %293 : vector<8x128xf32>
    %295 = arith.addf %292, %294 : vector<8x128xf32>
    %296 = math.tanh %295 : vector<8x128xf32>
    %cst_120 = arith.constant 1.000000e+00 : f32
    %297 = vector.broadcast %cst_120 : f32 to vector<8x128xf32>
    %298 = arith.subf %297, %291 : vector<8x128xf32>
    %299 = arith.mulf %298, %296 : vector<8x128xf32>
    %300 = arith.mulf %291, %269 : vector<8x128xf32>
    %301 = arith.addf %299, %300 : vector<8x128xf32>
    %c0_121 = arith.constant 0 : index
    %c0_122 = arith.constant 0 : index
    %302 = vector.load %arg11[%c0_121, %c0_122] : memref<8x128xf32, #tpu.memory_space<vmem>>, vector<8x128xf32>
    tpu.vector_store %arg11[%c0_121, %c0_122], %301 {strides = array<i32>} : memref<8x128xf32, #tpu.memory_space<vmem>>, vector<8x128xf32>,
    %c0_123 = arith.constant 0 : index
    %303 = arith.index_cast %268 : i32 to index
    %c0_124 = arith.constant 0 : index
    %c0_125 = arith.constant 0 : index
    %304 = vector.load %arg8[%c0_123, %303, %c0_124, %c0_125] : memref<1x8x8x128xf32, #tpu.memory_space<vmem>>, vector<1x1x8x128xf32>
    %305 = vector.shape_cast %304 : vector<1x1x8x128xf32> to vector<8x128xf32>
    %306 = vector.shape_cast %301 : vector<8x128xf32> to vector<1x1x8x128xf32>
    tpu.vector_store %arg8[%c0_123, %303, %c0_124, %c0_125], %306 {strides = array<i32>} : memref<1x8x8x128xf32, #tpu.memory_space<vmem>>, vector<1x1x8x128xf32>,
    %c7_i32_126 = arith.constant 7 : i32
    %c0_i32_127 = arith.constant 0 : i32
    %307 = arith.cmpi sgt, %1, %c0_i32_127 : i32
    %c7_i32_128 = arith.constant 7 : i32
    %308 = arith.subi %c7_i32_128, %c7_i32_126 : i32
    %309 = arith.select %307, %308, %c7_i32_126 : i32
    %c0_129 = arith.constant 0 : index
    %c0_130 = arith.constant 0 : index
    %310 = vector.load %arg11[%c0_129, %c0_130] : memref<8x128xf32, #tpu.memory_space<vmem>>, vector<8x128xf32>
    %311 = arith.index_cast %309 : i32 to index
    %c0_131 = arith.constant 0 : index
    %c0_132 = arith.constant 0 : index
    %312 = vector.load %arg10[%311, %c0_131, %c0_132] : memref<8x8x384xf32, #tpu.memory_space<vmem>>, vector<1x8x384xf32>
    %313 = vector.shape_cast %312 : vector<1x8x384xf32> to vector<8x384xf32>
    %cst_133 = arith.constant dense<0.000000e+00> : vector<8x384xf32>
    %314 = tpu.matmul %310, %14, %cst_133 {dimension_numbers = #tpu.dot_dimension_numbers<[1], [0], [0], [1], [0, 0, 1, 1], [], []>} : vector<8x128xf32>, vector<128x384xf32>, vector<8x384xf32> -> vector<8x384xf32>
    %315 = vector.broadcast %16 : vector<1x384xf32> to vector<8x384xf32>
    %316 = arith.addf %314, %315 : vector<8x384xf32>
    %317 = vector.extract_strided_slice %313 {offsets = [0, 0], sizes = [8, 128], strides = [1, 1]} : vector<8x384xf32> to vector<8x128xf32>
    %318 = vector.extract_strided_slice %316 {offsets = [0, 0], sizes = [8, 128], strides = [1, 1]} : vector<8x384xf32> to vector<8x128xf32>
    %319 = arith.addf %317, %318 : vector<8x128xf32>
    %320 = arith.negf %319 : vector<8x128xf32>
    %321 = math.exp %320 : vector<8x128xf32>
    %cst_134 = arith.constant 1.000000e+00 : f32
    %322 = vector.broadcast %cst_134 : f32 to vector<8x128xf32>
    %323 = arith.addf %322, %321 : vector<8x128xf32>
    %324 = arith.divf %322, %323 : vector<8x128xf32>
    %325 = vector.extract_strided_slice %313 {offsets = [0, 128], sizes = [8, 128], strides = [1, 1]} : vector<8x384xf32> to vector<8x128xf32>
    %326 = vector.extract_strided_slice %316 {offsets = [0, 128], sizes = [8, 128], strides = [1, 1]} : vector<8x384xf32> to vector<8x128xf32>
    %327 = arith.addf %325, %326 : vector<8x128xf32>
    %328 = arith.negf %327 : vector<8x128xf32>
    %329 = math.exp %328 : vector<8x128xf32>
    %cst_135 = arith.constant 1.000000e+00 : f32
    %330 = vector.broadcast %cst_135 : f32 to vector<8x128xf32>
    %331 = arith.addf %330, %329 : vector<8x128xf32>
    %332 = arith.divf %330, %331 : vector<8x128xf32>
    %333 = vector.extract_strided_slice %313 {offsets = [0, 256], sizes = [8, 128], strides = [1, 1]} : vector<8x384xf32> to vector<8x128xf32>
    %334 = vector.extract_strided_slice %316 {offsets = [0, 256], sizes = [8, 128], strides = [1, 1]} : vector<8x384xf32> to vector<8x128xf32>
    %335 = arith.mulf %324, %334 : vector<8x128xf32>
    %336 = arith.addf %333, %335 : vector<8x128xf32>
    %337 = math.tanh %336 : vector<8x128xf32>
    %cst_136 = arith.constant 1.000000e+00 : f32
    %338 = vector.broadcast %cst_136 : f32 to vector<8x128xf32>
    %339 = arith.subf %338, %332 : vector<8x128xf32>
    %340 = arith.mulf %339, %337 : vector<8x128xf32>
    %341 = arith.mulf %332, %310 : vector<8x128xf32>
    %342 = arith.addf %340, %341 : vector<8x128xf32>
    %c0_137 = arith.constant 0 : index
    %c0_138 = arith.constant 0 : index
    %343 = vector.load %arg11[%c0_137, %c0_138] : memref<8x128xf32, #tpu.memory_space<vmem>>, vector<8x128xf32>
    tpu.vector_store %arg11[%c0_137, %c0_138], %342 {strides = array<i32>} : memref<8x128xf32, #tpu.memory_space<vmem>>, vector<8x128xf32>,
    %c0_139 = arith.constant 0 : index
    %344 = arith.index_cast %309 : i32 to index
    %c0_140 = arith.constant 0 : index
    %c0_141 = arith.constant 0 : index
    %345 = vector.load %arg8[%c0_139, %344, %c0_140, %c0_141] : memref<1x8x8x128xf32, #tpu.memory_space<vmem>>, vector<1x1x8x128xf32>
    %346 = vector.shape_cast %345 : vector<1x1x8x128xf32> to vector<8x128xf32>
    %347 = vector.shape_cast %342 : vector<8x128xf32> to vector<1x1x8x128xf32>
    tpu.vector_store %arg8[%c0_139, %344, %c0_140, %c0_141], %347 {strides = array<i32>} : memref<1x8x8x128xf32, #tpu.memory_space<vmem>>, vector<1x1x8x128xf32>,
    %c8_i32 = arith.constant 8 : i32
    %c0_142 = arith.constant 0 : index
    %c0_143 = arith.constant 0 : index
    %348 = vector.load %arg11[%c0_142, %c0_143] : memref<8x128xf32, #tpu.memory_space<vmem>>, vector<8x128xf32>
    %c0_144 = arith.constant 0 : index
    %c0_145 = arith.constant 0 : index
    %c0_146 = arith.constant 0 : index
    %349 = vector.load %arg9[%c0_144, %c0_145, %c0_146] : memref<1x8x128xf32, #tpu.memory_space<vmem>>, vector<1x8x128xf32>
    %350 = vector.shape_cast %349 : vector<1x8x128xf32> to vector<8x128xf32>
    %351 = vector.shape_cast %348 : vector<8x128xf32> to vector<1x8x128xf32>
    tpu.vector_store %arg9[%c0_144, %c0_145, %c0_146], %351 {strides = array<i32>} : memref<1x8x128xf32, #tpu.memory_space<vmem>>, vector<1x8x128xf32>,
    return
  }
  func.func @transform_0(%arg0: i32, %arg1: memref<1xi32, #tpu.memory_space<smem>>) -> (i32, i32, i32) {
    %c0_i32 = arith.constant 0 : i32
    %c0_i32_0 = arith.constant 0 : i32
    %c0_i32_1 = arith.constant 0 : i32
    %c0_i32_2 = arith.constant 0 : i32
    return %c0_i32, %c0_i32_0, %c0_i32_1 : i32, i32, i32
  }
  func.func @transform_1(%arg0: i32, %arg1: memref<1xi32, #tpu.memory_space<smem>>) -> (i32, i32, i32) {
    %c0_i32 = arith.constant 0 : i32
    %c0_i32_0 = arith.constant 0 : i32
    %c0_i32_1 = arith.constant 0 : i32
    return %arg0, %c0_i32, %c0_i32_0 : i32, i32, i32
  }
  func.func @transform_2(%arg0: i32, %arg1: memref<1xi32, #tpu.memory_space<smem>>) -> (i32, i32, i32) {
    %c0_i32 = arith.constant 0 : i32
    %c0_i32_0 = arith.constant 0 : i32
    %c0_i32_1 = arith.constant 0 : i32
    return %arg0, %c0_i32, %c0_i32_0 : i32, i32, i32
  }
  func.func @transform_3(%arg0: i32, %arg1: memref<1xi32, #tpu.memory_space<smem>>) -> (i32, i32, i32) {
    %c0_i32 = arith.constant 0 : i32
    %c0_i32_0 = arith.constant 0 : i32
    %c0_i32_1 = arith.constant 0 : i32
    return %arg0, %c0_i32, %c0_i32_0 : i32, i32, i32
  }
  func.func @transform_4(%arg0: i32, %arg1: memref<1xi32, #tpu.memory_space<smem>>) -> (i32, i32, i32) {
    %c0_i32 = arith.constant 0 : i32
    %c0_i32_0 = arith.constant 0 : i32
    %c0_i32_1 = arith.constant 0 : i32
    return %arg0, %c0_i32, %c0_i32_0 : i32, i32, i32
  }
  func.func @transform_5(%arg0: i32, %arg1: memref<1xi32, #tpu.memory_space<smem>>) -> (i32, i32, i32) {
    %c0_i32 = arith.constant 0 : i32
    %c0_i32_0 = arith.constant 0 : i32
    %c0_i32_1 = arith.constant 0 : i32
    return %arg0, %c0_i32, %c0_i32_0 : i32, i32, i32
  }
  func.func @transform_6(%arg0: i32, %arg1: memref<1xi32, #tpu.memory_space<smem>>) -> (i32, i32, i32, i32) {
    %c0_i32 = arith.constant 0 : i32
    %c0_i32_0 = arith.constant 0 : i32
    %c0_i32_1 = arith.constant 0 : i32
    %c0_i32_2 = arith.constant 0 : i32
    return %arg0, %c0_i32, %c0_i32_0, %c0_i32_1 : i32, i32, i32, i32
  }
  func.func @transform_7(%arg0: i32, %arg1: memref<1xi32, #tpu.memory_space<smem>>) -> (i32, i32, i32) {
    %c0_i32 = arith.constant 0 : i32
    %c0_i32_0 = arith.constant 0 : i32
    %c0_i32_1 = arith.constant 0 : i32
    return %arg0, %c0_i32, %c0_i32_0 : i32, i32, i32
  }
}

</mosaic_0001>

<bundles_post_ra>
// kernel: seq2seq_forward.5
= control target key start
LH: loop header
LB: loop body
LE: loop exit
PB: predicated region body
PF: predicated region fallthrough
CT: control target
= control target key end

     0   :  { %17 = vsyncpa [#allocation3], 0  ;;  %s2441_s0 = inlined_call_operand.vmem [shape: f32[8,8,128], index: 0, kind: input, shape index: {}]   ;;  %s2442_s1 = inlined_call_operand.vmem [shape: f32[8,8,256], index: 1, kind: input, shape index: {}]   ;;  %s2443_s2 = inlined_call_operand.vmem [shape: s32[8,1], index: 2, kind: input, shape index: {}]   ;;  %s2444_s3 = inlined_call_operand.vmem [shape: s32[8,1], index: 3, kind: input, shape index: {}]   ;;  %s2445_s4 = inlined_call_operand.hbm [shape: f32[256,128], index: 4, kind: input, shape index: {}]   ;;  %s2446_s5 = inlined_call_operand.hbm [shape: f32[256,128], index: 5, kind: input, shape index: {}]   ;;  %s2447_s6 = inlined_call_operand.vmem [shape: f32[128,128], index: 6, kind: input, shape index: {}]   ;;  %s2448_s7 = inlined_call_operand.vmem [shape: f32[1,128], index: 7, kind: input, shape index: {}]   ;;  %s2449_s8 = inlined_call_operand.vmem [shape: f32[128,256], index: 8, kind: input, shape index: {}]   ;;  %s2450_s9 = inlined_call_operand.vmem [shape: f32[1,256], index: 9, kind: input, shape index: {}]   ;;  %s2451_s10 = inlined_call_operand.hbm [shape: f32[8,8,256], index: 10, kind: output, shape index: {0}]   ;;  %s2452_s11 = inlined_call_operand.hbm [shape: f32[8,8,8], index: 11, kind: output, shape index: {1}]  }
   0x1   :  { %18 = vsyncpa [#allocation6], 0 }
   0x2   :  { %19 = vsyncpa [#allocation4], 0 }
   0x3   :  { %20 = vsyncpa [#allocation9], 0  ;;  %s33_s19 = sshll.u32 %s2445_s4, 4  ;;  %s1776_s20 = smov [#allocation2]   ;;  %s34_s19 = int_to_ptr.hbm [resolvable:$true] %s33_s19 }
   0x4   :  { %s35_s21 = sshll.u32 %s1776_s20, 4  ;;  %s46_s24 = sshll.u32 %s2446_s5, 4  ;;  %s36_s21 = int_to_ptr.vmem [resolvable:$true] %s35_s21  ;;  %s47_s24 = int_to_ptr.hbm [resolvable:$true] %s46_s24 }
   0x5   :  { %s1777_s25 = smov 128   ;;  %s1778_s26 = smov 8  }
   0x6   :  { %41 = dma.hbm_to_vmem [thread:$0]  %s34_s19, 4096, %s36_s21, [#allocation3], %s1777_s25, %s1777_s25, %s1778_s26  }
   0x7   :  { %s1779_s27 = smov [#allocation5]  }
   0x8   :  { %s48_s28 = sshll.u32 %s1779_s27, 4  ;;  %s49_s28 = int_to_ptr.vmem [resolvable:$true] %s48_s28 }
   0x9   :  { %54 = dma.hbm_to_vmem [thread:$0]  %s47_s24, 4096, %s49_s28, [#allocation6], %s1777_s25, %s1777_s25, %s1778_s26  }
   0xa   :  { %1768 = dma.done.wait [#allocation3], 4096  }
   0xb   :  { %1769 = vsyncadd [#allocation3], 4294963200 }
   0xc   :  { %1770 = dma.done.wait [#allocation6], 4096  }
   0xd   :  { %1771 = vsyncadd [#allocation6], 4294963200  ;;  %v110_v0 = vld [vmem:[#allocation2 + $0x78] sm:$0xff]  ;;  %v109_v1 = vld [vmem:[#allocation2 + $0x70] sm:$0xff]  ;;  %v1780_v52 = vmov 0   ;;  %vm485_vm2 = vcmask 64512  }
   0xe   :  { %1547 = vmatpush.msra.mxu1 %v110_v0  ;;  %127 = vmatpush.msra.mxu0 %v110_v0  ;;  %v108_v2 = vld [vmem:[#allocation2 + $0x68] sm:$0xff]  ;;  %v107_v3 = vld [vmem:[#allocation2 + $0x60] sm:$0xff]  ;;  %v106_v4 = vld [vmem:[#allocation2 + $0x58] sm:$0xff]  ;;  %s1512_s24 = sshll.u32 %s2452_s11, 4  ;;  %s1782_s11 = smov [#allocation7]   ;;  %s1513_s24 = int_to_ptr.hbm [resolvable:$true] %s1512_s24 }
   0xf   :  { %v105_v5 = vld [vmem:[#allocation2 + $0x50] sm:$0xff]  ;;  %v104_v6 = vld [vmem:[#allocation2 + $0x48] sm:$0xff]  ;;  %v103_v7 = vld [vmem:[#allocation2 + $0x40] sm:$0xff]  ;;  %1573 = vset.pattern.permute.xlu1 %v1780_v52  ;;  %1572 = vset.pattern.permute.xlu0 %v1780_v52 }
  0x10   :  { %1548 = vmatpush.msra.mxu1 %v109_v1  ;;  %128 = vmatpush.msra.mxu0 %v109_v1  ;;  %v102_v8 = vld [vmem:[#allocation2 + $0x38] sm:$0xff]  ;;  %v101_v9 = vld [vmem:[#allocation2 + $0x30] sm:$0xff]  ;;  %v100_v10 = vld [vmem:[#allocation2 + $0x28] sm:$0xff] }
  0x11   :  { %v99_v11 = vld [vmem:[#allocation2 + $0x20] sm:$0xff]  ;;  %v98_v12 = vld [vmem:[#allocation2 + $0x18] sm:$0xff]  ;;  %v97_v13 = vld [vmem:[#allocation2 + $0x10] sm:$0xff]  ;;  %1574 = vset.pattern.permute.xlu2 %v1780_v52 }
  0x12   :  { %1549 = vmatpush.msra.mxu1 %v108_v2  ;;  %129 = vmatpush.msra.mxu0 %v108_v2  ;;  %v96_v14 = vld [vmem:[#allocation2 + $0x8] sm:$0xff]  ;;  %v95_v15 = vld [vmem:[#allocation2] sm:$0xff]  ;;  %v126_v17 = vld [vmem:[#allocation2 + $0xf8] sm:$0xff] }
  0x13   :  { %v1860_v16 = vld [vmem:[%s2442_s1 + $0x40] sm:$0xff]  ;;  %v125_v19 = vld [vmem:[#allocation2 + $0xf0] sm:$0xff]  ;;  %v124_v20 = vld [vmem:[#allocation2 + $0xe8] sm:$0xff] }
  0x14   :  { %1550 = vmatpush.msra.mxu1 %v107_v3  ;;  %130 = vmatpush.msra.mxu0 %v107_v3  ;;  %v1865_v18 = vld [vmem:[%s2442_s1] sm:$0xff]  ;;  %v1872_v22 = vld [vmem:[%s2442_s1 + $0x50] sm:$0xff]  ;;  %v122_v24 = vld [vmem:[#allocation2 + $0xd8] sm:$0xff] }
  0x15   :  { %v123_v21 = vld [vmem:[#allocation2 + $0xe0] sm:$0xff]  ;;  %v1877_v23 = vld [vmem:[%s2442_s1 + $0x10] sm:$0xff]  ;;  %v120_v26 = vld [vmem:[#allocation2 + $0xc8] sm:$0xff] }
  0x16   :  { %1551 = vmatpush.msra.mxu1 %v106_v4  ;;  %131 = vmatpush.msra.mxu0 %v106_v4  ;;  %v121_v25 = vld [vmem:[#allocation2 + $0xd0] sm:$0xff]  ;;  %v119_v27 = vld [vmem:[#allocation2 + $0xc0] sm:$0xff]  ;;  %v118_v30 = vld [vmem:[#allocation2 + $0xb8] sm:$0xff] }
  0x17   :  { %v1884_v28 = vld [vmem:[%s2442_s1 + $0x60] sm:$0xff]  ;;  %v117_v31 = vld [vmem:[#allocation2 + $0xb0] sm:$0xff]  ;;  %v116_v32 = vld [vmem:[#allocation2 + $0xa8] sm:$0xff] }
  0x18   :  { %1552 = vmatpush.msra.mxu1 %v105_v5  ;;  %132 = vmatpush.msra.mxu0 %v105_v5  ;;  %v1889_v29 = vld [vmem:[%s2442_s1 + $0x20] sm:$0xff]  ;;  %v1896_v34 = vld [vmem:[%s2442_s1 + $0x70] sm:$0xff]  ;;  %v114_v36 = vld [vmem:[#allocation2 + $0x98] sm:$0xff] }
  0x19   :  { %v115_v33 = vld [vmem:[#allocation2 + $0xa0] sm:$0xff]  ;;  %v1901_v35 = vld [vmem:[%s2442_s1 + $0x30] sm:$0xff]  ;;  %v112_v38 = vld [vmem:[#allocation2 + $0x88] sm:$0xff] }
  0x1a   :  { %1553 = vmatpush.msra.mxu1 %v104_v6  ;;  %133 = vmatpush.msra.mxu0 %v104_v6  ;;  %v113_v37 = vld [vmem:[#allocation2 + $0x90] sm:$0xff]  ;;  %v111_v39 = vld [vmem:[#allocation2 + $0x80] sm:$0xff]  ;;  %v1908_v40 = vld [vmem:[%s2442_s1 + $0x8] sm:$0xff] }
  0x1b   :  { %v1914_v41 = vld [vmem:[%s2442_s1 + $0x18] sm:$0xff]  ;;  %v1920_v42 = vld [vmem:[%s2442_s1 + $0x28] sm:$0xff]  ;;  %v373_v48 = vld [vmem:[%s2444_s3] sm:$0xff]  ;;  %s1784_s3 = smov 16  }
  0x1c   :  { %1554 = vmatpush.msra.mxu1 %v103_v7  ;;  %134 = vmatpush.msra.mxu0 %v103_v7  ;;  %v1926_v43 = vld [vmem:[%s2442_s1 + $0x38] sm:$0xff]  ;;  %v1932_v44 = vld [vmem:[%s2442_s1 + $0x48] sm:$0xff]  ;;  %v374_v49 = vrot.slane %v373_v48, 1  ;;  %v381_v50 = vperm.slane %v373_v48, 0  ;;  %v421_v53 = vld [vmem:[%s2443_s2] sm:$0xff]  ;;  %v376_v58 = vrot.slane %v373_v48, 3 }
  0x1d   :  { %v1938_v45 = vld [vmem:[%s2442_s1 + $0x58] sm:$0xff]  ;;  %v1944_v46 = vld [vmem:[%s2442_s1 + $0x68] sm:$0xff]  ;;  %v422_v54 = vrot.slane %v421_v53, 1  ;;  %v429_v55 = vperm.slane %v421_v53, 0  ;;  %v375_v59 = vrot.slane %v373_v48, 2  ;;  %v424_v60 = vrot.slane %v421_v53, 3 }
  0x1e   :  { %1555 = vmatpush.msra.mxu1 %v102_v8  ;;  %135 = vmatpush.msra.mxu0 %v102_v8  ;;  %v1950_v47 = vld [vmem:[%s2442_s1 + $0x78] sm:$0xff]  ;;  %v382_v51 = vperm.slane %v374_v49, 0  ;;  %v384_v61 = vperm.slane %v376_v58, 0  ;;  %v425_v1 = vrot.slane %v421_v53, 4  ;;  %v423_v2 = vrot.slane %v421_v53, 2  ;;  %s1499_s2 = sshll.u32 %s2451_s10, 4  ;;  %s1500_s2 = int_to_ptr.hbm [resolvable:$true] %s1499_s2 }
  0x1f   :  { %390 = vperm.xlu0 %1572, %v381_v50   ;;  %v430_v56 = vperm.slane %v422_v54, 0  ;;  %v383_v62 = vperm.slane %v375_v59, 0  ;;  %v432_v63 = vperm.slane %v424_v60, 0  ;;  %v378_v3 = vrot.slane %v373_v48, 5  ;;  %v1982_v52 = vld [vmem:[%s2441_s0 + $0x18] sm:$0xff]  ;;  %v1995_v59 = vld [vmem:[%s2441_s0 + $0x28] sm:$0xff] }
  0x20   :  { %1556 = vmatpush.msra.mxu1 %v101_v9  ;;  %136 = vmatpush.msra.mxu0 %v101_v9  ;;  %v433_v4 = vperm.slane %v425_v1, 0  ;;  %v431_v5 = vperm.slane %v423_v2, 0  ;;  %v377_v8 = vrot.slane %v373_v48, 4  ;;  %v379_v9 = vrot.slane %v373_v48, 6 }
  0x21   :  { %393 = vperm.xlu1 %1573, %v382_v51   ;;  %396 = vperm.xlu2 %1574, %v383_v62   ;;  %v386_v6 = vperm.slane %v378_v3, 0 }
  0x22   :  { %1557 = vmatpush.msra.mxu1 %v100_v10  ;;  %137 = vmatpush.msra.mxu0 %v100_v10  ;;  %v385_v10 = vperm.slane %v377_v8, 0 }
  0x24   :  { %1558 = vmatpush.msra.mxu1 %v99_v11  ;;  %138 = vmatpush.msra.mxu0 %v99_v11  ;;  %v387_v11 = vperm.slane %v379_v9, 0 }
  0x26   :  { %1559 = vmatpush.msra.mxu1 %v98_v12  ;;  %139 = vmatpush.msra.mxu0 %v98_v12 }
  0x27   :  { %438 = vperm.xlu0 %1572, %v429_v55   ;;  %v1989_v55 = vld [vmem:[%s2441_s0 + $0x20] sm:$0xff] }
  0x28   :  { %1560 = vmatpush.msra.mxu1 %v97_v13  ;;  %140 = vmatpush.msra.mxu0 %v97_v13 }
  0x29   :  { %441 = vperm.xlu1 %1573, %v430_v56   ;;  %444 = vperm.xlu2 %1574, %v431_v5  }
  0x2a   :  { %1561 = vmatpush.msra.mxu1 %v96_v14  ;;  %141 = vmatpush.msra.mxu0 %v96_v14  ;;  %v426_v14 = vrot.slane %v421_v53, 5 }
  0x2c   :  { %1562 = vmatpush.msra.mxu1 %v95_v15  ;;  %142 = vmatpush.msra.mxu0 %v95_v15  ;;  %v434_v15 = vperm.slane %v426_v14, 0 }
  0x2d   :  { %155 = vmatmul.f32.vlgmr.msra.gmra.mxu1 %v1860_v16  ;;  %143 = vmatmul.f32.vlgmr.msra.gmra.mxu0 %v1865_v18 }
  0x2e   :  { %168 = vmatpush.msrb.mxu1 %v126_v17 }
  0x2f   :  { %399 = vperm.xlu0 %1572, %v384_v61   ;;  %v2001_v61 = vld [vmem:[%s2441_s0 + $0x30] sm:$0xff] }
  0x30   :  { %169 = vmatpush.msrb.mxu1 %v125_v19 }
  0x31   :  { %447 = vperm.xlu1 %1573, %v432_v63   ;;  %402 = vperm.xlu2 %1574, %v385_v10  }
  0x32   :  { %170 = vmatpush.msrb.mxu1 %v124_v20  ;;  %v427_v20 = vrot.slane %v421_v53, 6 }
  0x34   :  { %171 = vmatpush.msrb.mxu1 %v123_v21 }
  0x35   :  { %158 = vmatmul.f32.gmra.mxu1 %v1872_v22  ;;  %146 = vmatmul.f32.gmra.mxu0 %v1877_v23 }
  0x36   :  { %172 = vmatpush.msrb.mxu1 %v122_v24  ;;  %v1964_v24 = vld [vmem:[%s2441_s0] sm:$0xff] }
  0x37   :  { %450 = vperm.xlu0 %1572, %v433_v4  }
  0x38   :  { %173 = vmatpush.msrb.mxu1 %v121_v25  ;;  %v435_v25 = vperm.slane %v427_v20, 0 }
  0x39   :  { %405 = vperm.xlu1 %1573, %v386_v6   ;;  %453 = vperm.xlu2 %1574, %v434_v15  }
  0x3a   :  { %174 = vmatpush.msrb.mxu1 %v120_v26 }
  0x3c   :  { %175 = vmatpush.msrb.mxu1 %v119_v27 }
  0x3d   :  { %161 = vmatmul.f32.gmra.mxu1 %v1884_v28  ;;  %149 = vmatmul.f32.gmra.mxu0 %v1889_v29 }
  0x3e   :  { %176 = vmatpush.msrb.mxu1 %v118_v30  ;;  %v380_v30 = vrot.slane %v373_v48, 7 }
  0x40   :  { %177 = vmatpush.msrb.mxu1 %v117_v31  ;;  %v1970_v31 = vld [vmem:[%s2441_s0 + $0x8] sm:$0xff] }
  0x41   :  { %408 = vperm.xlu1 %1573, %v387_v11   ;;  %456 = vperm.xlu2 %1574, %v435_v25  }
  0x42   :  { %178 = vmatpush.msrb.mxu1 %v116_v32  ;;  %v388_v32 = vperm.slane %v380_v30, 0 }
  0x44   :  { %179 = vmatpush.msrb.mxu1 %v115_v33 }
  0x45   :  { %164 = vmatmul.f32.gmra.mxu1 %v1896_v34  ;;  %152 = vmatmul.f32.gmra.mxu0 %v1901_v35 }
  0x46   :  { %180 = vmatpush.msrb.mxu1 %v114_v36 }
  0x48   :  { %181 = vmatpush.msrb.mxu1 %v113_v37 }
  0x49   :  { %411 = vperm.xlu2 %1574, %v388_v32  }
  0x4a   :  { %182 = vmatpush.msrb.mxu1 %v112_v38  ;;  %v428_v38 = vrot.slane %v421_v53, 7 }
  0x4c   :  { %183 = vmatpush.msrb.mxu1 %v111_v39  ;;  %v1976_v39 = vld [vmem:[%s2441_s0 + $0x10] sm:$0xff]  ;;  %v436_v48 = vperm.slane %v428_v38, 0 }
  0x4d   :  { %184 = vmatmul.f32.vlgmr.msrb.gmra.mxu1 %v1908_v40 }
  0x51   :  { %459 = vperm.xlu2 %1574, %v436_v48  }
  0x55   :  { %187 = vmatmul.f32.gmra.mxu1 %v1914_v41 }
  0x5d   :  { %190 = vmatmul.f32.gmra.mxu1 %v1920_v42 }
  0x65   :  { %193 = vmatmul.f32.gmra.mxu1 %v1926_v43 }
  0x6d   :  { %196 = vmatmul.f32.gmra.mxu1 %v1932_v44 }
  0x75   :  { %199 = vmatmul.f32.gmra.mxu1 %v1938_v45 }
  0x7b   :  { %v397_v2 = vpop.permute.xlu2 %396 }
  0x7d   :  { %202 = vmatmul.f32.gmra.mxu1 %v1944_v46 }
  0x83   :  { %v445_v6 = vpop.permute.xlu2 %444 }
  0x85   :  { %205 = vmatmul.f32.gmra.mxu1 %v1950_v47 }
  0x8b   :  { %v403_v11 = vpop.permute.xlu2 %402 }
  0x91   :  { %v391_v1 = vpop.permute.xlu0 %390 }
  0x93   :  { %v394_v4 = vpop.permute.xlu1 %393 }
  0x99   :  { %v439_v5 = vpop.permute.xlu0 %438 }
  0x9b   :  { %v442_v8 = vpop.permute.xlu1 %441 }
  0xa3   :  { %v448_v20 = vpop.permute.xlu1 %447 }
  0xaa   :  { %v1959_v57 = vpop.f32.mrf.mxu1  ;;  %v144_v13 = vpop.f32.mrf.mxu0 }
  0xab   :  { %v406_v32 = vpop.permute.xlu1 %405 }
  0xb2   :  { %v159_v0 = vpop.f32.mrf.mxu1  ;;  %v147_v21 = vpop.f32.mrf.mxu0 }
  0xba   :  { %v162_v7 = vpop.f32.mrf.mxu1  ;;  %v150_v33 = vpop.f32.mrf.mxu0 }
  0xc2   :  { %v165_v12 = vpop.f32.mrf.mxu1  ;;  %v153_v49 = vpop.f32.mrf.mxu0 }
  0xca   :  { %v185_v17 = vpop.f32.mrf.mxu1 }
  0xcb   :  { %v186_v19 = vadd.f32 %v185_v17, %v144_v13  ;;  %v400_v13 = vpop.permute.xlu0 %399 }
  0xcd   :  { %224 = vmatpush.xpose.msra.mxu2 %v186_v19  ;;  %v454_v19 = vpop.permute.xlu2 %453 }
  0xd0   :  { %225 = vmatmul.f32.vlgmr.msra.gmra.mxu2 %v1964_v24 }
  0xd2   :  { %v188_v26 = vpop.f32.mrf.mxu1 }
  0xd3   :  { %v189_v27 = vadd.f32 %v188_v26, %v147_v21  ;;  %v451_v26 = vpop.permute.xlu0 %450 }
  0xd5   :  { %244 = vmatpush.xpose.msra.mxu3 %v189_v27  ;;  %v457_v30 = vpop.permute.xlu2 %456 }
  0xd8   :  { %245 = vmatmul.f32.vlgmr.msra.gmra.mxu3 %v1970_v31 }
  0xda   :  { %v191_v36 = vpop.f32.mrf.mxu1 }
  0xdb   :  { %v192_v37 = vadd.f32 %v191_v36, %v150_v33 }
  0xdd   :  { %264 = vmatpush.xpose.msrb.mxu2 %v192_v37  ;;  %v412_v38 = vpop.permute.xlu2 %411 }
  0xe0   :  { %265 = vmatmul.f32.vlgmr.msrb.gmra.mxu2 %v1976_v39 }
  0xe2   :  { %v194_v50 = vpop.f32.mrf.mxu1 }
  0xe3   :  { %v195_v51 = vadd.f32 %v194_v50, %v153_v49  ;;  %v409_v50 = vpop.permute.xlu1 %408 }
  0xe5   :  { %284 = vmatpush.xpose.msrb.mxu3 %v195_v51 }
  0xe8   :  { %285 = vmatmul.f32.vlgmr.msrb.gmra.mxu3 %v1982_v52 }
  0xea   :  { %v197_v53 = vpop.f32.mrf.mxu1 }
  0xeb   :  { %v198_v54 = vadd.f32 %v197_v53, %v1959_v57 }
  0xed   :  { %304 = vmatpush.xpose.msra.mxu2 %v198_v54 }
  0xf0   :  { %305 = vmatmul.f32.vlgmr.msra.gmra.mxu2 %v1989_v55 }
  0xf2   :  { %v200_v56 = vpop.f32.mrf.mxu1 }
  0xf3   :  { %v201_v58 = vadd.f32 %v200_v56, %v159_v0  ;;  %v2009_v0 = vld [vmem:[%s2441_s0 + $0x38] sm:$0xff]  ;;  %v460_v56 = vpop.permute.xlu2 %459 }
  0xf5   :  { %324 = vmatpush.xpose.msra.mxu3 %v201_v58 }
  0xf8   :  { %325 = vmatmul.f32.vlgmr.msra.gmra.mxu3 %v1995_v59 }
  0xfa   :  { %v203_v60 = vpop.f32.mrf.mxu1 }
  0xfb   :  { %v204_v57 = vadd.f32 %v203_v60, %v162_v7 }
  0xfd   :  { %344 = vmatpush.xpose.msrb.mxu2 %v204_v57 }
 0x100   :  { %345 = vmatmul.f32.vlgmr.msrb.gmra.mxu2 %v2001_v61 }
 0x101   :  { %704 = vmatpush.msra.mxu2 %v1865_v18  ;;  %v369_v18 = vlaneseq }
 0x102   :  { %v206_v62 = vpop.f32.mrf.mxu1 }
 0x103   :  { %747 = vmatpush.msrb.mxu2 %v1877_v23  ;;  %v207_v63 = vadd.f32 %v206_v62, %v165_v12  ;;  %v2014_v3 = vshrl.u32 %v369_v18, 7  ;;  %v2016_v23 = vand.u32 127, %v369_v18 }
 0x105   :  { %364 = vmatpush.xpose.msrb.mxu3 %v207_v63  ;;  %vm413_vm0 = vcmp.lt.s32.totalorder %v2014_v3, %v391_v1  ;;  %vm461_vm1 = vcmp.lt.s32.totalorder %v2016_v23, %v439_v5  ;;  %vm414_vm4 = vcmp.lt.s32.totalorder %v2014_v3, %v394_v4  ;;  %vm462_vm5 = vcmp.lt.s32.totalorder %v2016_v23, %v442_v8 }
 0x106   :  { %vm469_vm3 = vmand %vm413_vm0, %vm461_vm1  ;;  %vm415_vm7 = vcmp.lt.s32.totalorder %v2014_v3, %v397_v2  ;;  %vm463_vm8 = vcmp.lt.s32.totalorder %v2016_v23, %v445_v6  ;;  %vm416_vm10 = vcmp.lt.s32.totalorder %v2014_v3, %v400_v13  ;;  %vm464_vm11 = vcmp.lt.s32.totalorder %v2016_v23, %v448_v20 }
 0x107   :  { %vm470_vm6 = vmand %vm414_vm4, %vm462_vm5  ;;  %vm417_vm13 = vcmp.lt.s32.totalorder %v2014_v3, %v403_v11  ;;  %vm465_vm14 = vcmp.lt.s32.totalorder %v2016_v23, %v451_v26  ;;  %vm466_vm0 = vcmp.lt.s32.totalorder %v2016_v23, %v454_v19  ;;  %vm418_vm1 = vcmp.lt.s32.totalorder %v2014_v3, %v406_v32 }
 0x108   :  { %365 = vmatmul.f32.vlgmr.msrb.gmra.mxu3 %v2009_v0  ;;  %vm471_vm9 = vmand %vm415_vm7, %vm463_vm8  ;;  %vm467_vm4 = vcmp.lt.s32.totalorder %v2016_v23, %v457_v30  ;;  %vm419_vm5 = vcmp.lt.s32.totalorder %v2014_v3, %v409_v50  ;;  %vm420_vm7 = vcmp.lt.s32.totalorder %v2014_v3, %v412_v38  ;;  %vm468_vm8 = vcmp.lt.s32.totalorder %v2016_v23, %v460_v56 }
 0x109   :  { %724 = vmatpush.msra.mxu3 %v1908_v40  ;;  %vm472_vm12 = vmand %vm416_vm10, %vm464_vm11 }
 0x10a   :  { %vm473_vm15 = vmand %vm417_vm13, %vm465_vm14 }
 0x10b   :  { %767 = vmatpush.msrb.mxu3 %v1914_v41 }
 0x153   :  { %v226_v40 = vpop.f32.mrf.mxu2 }
 0x154   :  { %v2020_v7 = vsel %vm469_vm3, %v226_v40, -1000000.0  ;;  %vm474_vm3 = vmand %vm418_vm1, %vm466_vm0 }
 0x155   :  { %v486_v41 = vsel %vm485_vm2, %v2020_v7, -inf }
 0x156   :  { %487 = vmax.xlane.f32.xlu0 %v486_v41 }
 0x15b   :  { %v246_v9 = vpop.f32.mrf.mxu3 }
 0x15c   :  { %v478_v10 = vsel %vm470_vm6, %v246_v9, -1000000.0  ;;  %vm475_vm6 = vmand %vm419_vm5, %vm467_vm4 }
 0x15d   :  { %v489_v12 = vsel %vm485_vm2, %v478_v10, -inf }
 0x15e   :  { %490 = vmax.xlane.f32.xlu1 %v489_v12 }
 0x163   :  { %v266_v14 = vpop.f32.mrf.mxu2 }
 0x164   :  { %v479_v15 = vsel %vm471_vm9, %v266_v14, -1000000.0  ;;  %vm476_vm9 = vmand %vm420_vm7, %vm468_vm8 }
 0x165   :  { %v492_v17 = vsel %vm485_vm2, %v479_v15, -inf }
 0x166   :  { %493 = vmax.xlane.f32.xlu2 %v492_v17 }
 0x16b   :  { %v286_v21 = vpop.f32.mrf.mxu3 }
 0x16c   :  { %v480_v25 = vsel %vm472_vm12, %v286_v21, -1000000.0 }
 0x16d   :  { %v495_v27 = vsel %vm485_vm2, %v480_v25, -inf }
 0x16e   :  { %496 = vmax.xlane.f32.xlu0 %v495_v27 }
 0x173   :  { %v306_v33 = vpop.f32.mrf.mxu2 }
 0x174   :  { %v481_v36 = vsel %vm473_vm15, %v306_v33, -1000000.0 }
 0x175   :  { %v498_v37 = vsel %vm485_vm2, %v481_v36, -inf }
 0x176   :  { %499 = vmax.xlane.f32.xlu0 %v498_v37 }
 0x17b   :  { %v326_v48 = vpop.f32.mrf.mxu3 }
 0x17c   :  { %v482_v49 = vsel %vm474_vm3, %v326_v48, -1000000.0 }
 0x17d   :  { %v501_v51 = vsel %vm485_vm2, %v482_v49, -inf }
 0x17e   :  { %502 = vmax.xlane.f32.xlu1 %v501_v51 }
 0x183   :  { %v346_v53 = vpop.f32.mrf.mxu2 }
 0x184   :  { %v483_v54 = vsel %vm475_vm6, %v346_v53, -1000000.0 }
 0x185   :  { %v504_v58 = vsel %vm485_vm2, %v483_v54, -inf }
 0x186   :  { %505 = vmax.xlane.f32.xlu0 %v504_v58 }
 0x18b   :  { %v366_v60 = vpop.f32.mrf.mxu3 }
 0x18c   :  { %v484_v57 = vsel %vm476_vm9, %v366_v60, -1000000.0 }
 0x18d   :  { %v507_v62 = vsel %vm485_vm2, %v484_v57, -inf }
 0x18e   :  { %508 = vmax.xlane.f32.xlu2 %v507_v62 }
 0x1c9   :  { %v488_v63 = vpop.xlane.xlu0 %487 }
 0x1ca   :  { %v510_v1 = vsub.f32 %v2020_v7, %v488_v63 }
 0x1cc   :  { %v518_v18 = vmul.f32 1.442695, %v510_v1 }
 0x1ce   :  { %1576 = vpow2.f32 %v518_v18 }
 0x1d1   :  { %v491_v2 = vpop.xlane.xlu1 %490 }
 0x1d2   :  { %v511_v4 = vsub.f32 %v478_v10, %v491_v2 }
 0x1d4   :  { %v2046_v5 = vpop.eup %1576  ;;  %v520_v6 = vmul.f32 1.442695, %v511_v4 }
 0x1d5   :  { %v534_v3 = vsel %vm485_vm2, %v2046_v5, 0.0 }
 0x1d6   :  { %1578 = vpow2.f32 %v520_v6  ;;  %535 = vadd.xlane.f32.xlu1 %v534_v3 }
 0x1d9   :  { %v494_v23 = vpop.xlane.xlu2 %493 }
 0x1da   :  { %v512_v40 = vsub.f32 %v479_v15, %v494_v23 }
 0x1dc   :  { %v2050_v41 = vpop.eup %1578  ;;  %v522_v8 = vmul.f32 1.442695, %v512_v40 }
 0x1dd   :  { %v537_v7 = vsel %vm485_vm2, %v2050_v41, 0.0 }
 0x1de   :  { %1580 = vpow2.f32 %v522_v8  ;;  %538 = vadd.xlane.f32.xlu0 %v537_v7 }
 0x1e1   :  { %v497_v9 = vpop.xlane.xlu0 %496 }
 0x1e2   :  { %v513_v10 = vsub.f32 %v480_v25, %v497_v9 }
 0x1e4   :  { %v2054_v11 = vpop.eup %1580  ;;  %v524_v12 = vmul.f32 1.442695, %v513_v10 }
 0x1e5   :  { %v540_v13 = vsel %vm485_vm2, %v2054_v11, 0.0 }
 0x1e6   :  { %1582 = vpow2.f32 %v524_v12  ;;  %541 = vadd.xlane.f32.xlu1 %v540_v13 }
 0x1e9   :  { %v500_v14 = vpop.xlane.xlu0 %499 }
 0x1ea   :  { %v514_v15 = vsub.f32 %v481_v36, %v500_v14 }
 0x1ec   :  { %v2058_v17 = vpop.eup %1582  ;;  %v526_v19 = vmul.f32 1.442695, %v514_v15 }
 0x1ed   :  { %v543_v20 = vsel %vm485_vm2, %v2058_v17, 0.0 }
 0x1ee   :  { %1584 = vpow2.f32 %v526_v19  ;;  %544 = vadd.xlane.f32.xlu2 %v543_v20 }
 0x1f1   :  { %v503_v21 = vpop.xlane.xlu1 %502 }
 0x1f2   :  { %v515_v25 = vsub.f32 %v482_v49, %v503_v21 }
 0x1f4   :  { %v2062_v26 = vpop.eup %1584  ;;  %v528_v27 = vmul.f32 1.442695, %v515_v25 }
 0x1f5   :  { %v546_v30 = vsel %vm485_vm2, %v2062_v26, 0.0 }
 0x1f6   :  { %1586 = vpow2.f32 %v528_v27  ;;  %547 = vadd.xlane.f32.xlu0 %v546_v30 }
 0x1f9   :  { %v506_v32 = vpop.xlane.xlu0 %505 }
 0x1fa   :  { %v516_v33 = vsub.f32 %v483_v54, %v506_v32 }
 0x1fc   :  { %v2066_v36 = vpop.eup %1586  ;;  %v530_v37 = vmul.f32 1.442695, %v516_v33 }
 0x1fd   :  { %v549_v38 = vsel %vm485_vm2, %v2066_v36, 0.0 }
 0x1fe   :  { %1588 = vpow2.f32 %v530_v37  ;;  %550 = vadd.xlane.f32.xlu1 %v549_v38 }
 0x201   :  { %v509_v48 = vpop.xlane.xlu2 %508 }
 0x202   :  { %v517_v49 = vsub.f32 %v484_v57, %v509_v48 }
 0x204   :  { %v2070_v50 = vpop.eup %1588  ;;  %v532_v51 = vmul.f32 1.442695, %v517_v49 }
 0x205   :  { %v552_v53 = vsel %vm485_vm2, %v2070_v50, 0.0 }
 0x206   :  { %1590 = vpow2.f32 %v532_v51  ;;  %553 = vadd.xlane.f32.xlu2 %v552_v53 }
 0x20c   :  { %v2074_v56 = vpop.eup %1590 }
 0x20d   :  { %v555_v54 = vsel %vm485_vm2, %v2074_v56, 0.0 }
 0x20e   :  { %556 = vadd.xlane.f32.xlu0 %v555_v54 }
 0x249   :  { %v536_v58 = vpop.xlane.xlu1 %535 }
 0x24a   :  { %1592 = vrcp.f32 %v536_v58  ;;  %v569_v1 = vand.u32 2147483648, %v536_v58  ;;  %v567_v2 = vand.u32 2147483647, %v536_v58  ;;  %vm563_vm11 = vweird.f32 %v536_v58 }
 0x24c   :  { %v570_v3 = vor.u32 1.1754944e-38, %v569_v1  ;;  %vm568_vm13 = vcmp.eq.f32.partialorder %v567_v2, 8.507059e+37 }
 0x250   :  { %v1593_v60 = vpop.eup %1592 }
 0x251   :  { %v559_v62 = vmul.f32 %v1593_v60, %v536_v58  ;;  %v539_v63 = vpop.xlane.xlu0 %538  ;;  %vm564_vm10 = vweird.f32 %v1593_v60 }
 0x252   :  { %1594 = vrcp.f32 %v539_v63  ;;  %vm565_vm12 = vmor %vm563_vm11, %vm564_vm10  ;;  %v584_v12 = vand.u32 2147483648, %v539_v63  ;;  %v582_v14 = vand.u32 2147483647, %v539_v63  ;;  %vm578_vm15 = vweird.f32 %v539_v63 }
 0x253   :  { %v560_v57 = vsub.f32 1.0, %v559_v62 }
 0x254   :  { %v585_v20 = vor.u32 1.1754944e-38, %v584_v12  ;;  %vm583_vm1 = vcmp.eq.f32.partialorder %v582_v14, 8.507059e+37  ;;  %v1076_v12 = vld [vmem:[%s2447_s6 + $0x70] sm:$0xff]  ;;  %v1075_v14 = vld [vmem:[%s2447_s6 + $0x68] sm:$0xff] }
 0x255   :  { %v561_v18 = vmul.f32 %v1593_v60, %v560_v57 }
 0x257   :  { %v562_v4 = vadd.f32 %v1593_v60, %v561_v18 }
 0x258   :  { %v1595_v6 = vpop.eup %1594 }
 0x259   :  { %v566_v23 = vsel %vm565_vm12, %v1593_v60, %v562_v4  ;;  %v574_v40 = vmul.f32 %v1595_v6, %v539_v63  ;;  %v542_v8 = vpop.xlane.xlu1 %541  ;;  %vm579_vm14 = vweird.f32 %v1595_v6 }
 0x25a   :  { %v571_v7 = vsel %vm568_vm13, %v570_v3, %v566_v23  ;;  %1596 = vrcp.f32 %v542_v8  ;;  %vm580_vm0 = vmor %vm578_vm15, %vm579_vm14  ;;  %v599_v33 = vand.u32 2147483648, %v542_v8  ;;  %vm593_vm4 = vweird.f32 %v542_v8  ;;  %v1045_v23 = vld [vmem:[#allocation5 + $0x78] sm:$0xff] }
 0x25b   :  { %v575_v9 = vsub.f32 1.0, %v574_v40  ;;  %v572_v10 = vmul.f32 %v2046_v5, %v571_v7  ;;  %v1044_v40 = vld [vmem:[#allocation5 + $0x70] sm:$0xff]  ;;  %1119 = vmatpush.msra.mxu1 %v1045_v23 }
 0x25c   :  { %v600_v48 = vor.u32 1.1754944e-38, %v599_v33 }
 0x25d   :  { %v576_v13 = vmul.f32 %v1595_v6, %v575_v9  ;;  %678 = vst.msk [vmem:[#allocation8] sm:$0xff] %vm485_vm2, %v572_v10  ;;  %1531 = vmatmul.msk.f32.vlgmr.msra.gmra.mxu2 %vm485_vm2, %v572_v10  ;;  %1532 = vmatmul.msk.f32.vlgmr.msra.gmra.mxu3 %vm485_vm2, %v572_v10  ;;  %v1043_v10 = vld [vmem:[#allocation5 + $0x68] sm:$0xff] }
 0x25e   :  { %810 = vmatpush.msra.mxu3 %v1920_v42  ;;  %790 = vmatpush.msra.mxu2 %v1889_v29  ;;  %v597_v42 = vand.u32 2147483647, %v542_v8 }
 0x25f   :  { %v577_v15 = vadd.f32 %v1595_v6, %v576_v13  ;;  %1120 = vmatpush.msra.mxu1 %v1044_v40 }
 0x260   :  { %v1597_v19 = vpop.eup %1596  ;;  %vm598_vm6 = vcmp.eq.f32.partialorder %v597_v42, 8.507059e+37 }
 0x261   :  { %v581_v5 = vsel %vm580_vm0, %v1595_v6, %v577_v15  ;;  %v589_v21 = vmul.f32 %v1597_v19, %v542_v8  ;;  %v545_v25 = vpop.xlane.xlu2 %544  ;;  %vm594_vm3 = vweird.f32 %v1597_v19  ;;  %1121 = vmatpush.msra.mxu1 %v1043_v10  ;;  %v1034_v10 = vld [vmem:[#allocation5 + $0x20] sm:$0xff] }
 0x262   :  { %v586_v27 = vsel %vm583_vm1, %v585_v20, %v581_v5  ;;  %1598 = vrcp.f32 %v545_v25  ;;  %vm595_vm5 = vmor %vm593_vm4, %vm594_vm3  ;;  %v614_v60 = vand.u32 2147483648, %v545_v25  ;;  %vm608_vm8 = vweird.f32 %v545_v25 }
 0x263   :  { %v590_v30 = vsub.f32 1.0, %v589_v21  ;;  %v587_v32 = vmul.f32 %v2050_v41, %v586_v27  ;;  %v1042_v21 = vld [vmem:[#allocation5 + $0x60] sm:$0xff] }
 0x264   :  { %v615_v57 = vor.u32 1.1754944e-38, %v614_v60  ;;  %1122 = vmatpush.msra.mxu1 %v1042_v21  ;;  %v1032_v21 = vld [vmem:[#allocation5 + $0x10] sm:$0xff] }
 0x265   :  { %v591_v37 = vmul.f32 %v1597_v19, %v590_v30  ;;  %679 = vst.msk [vmem:[#allocation8 + $0x8] sm:$0xff] %vm485_vm2, %v587_v32  ;;  %1533 = vmatmul.msk.f32.vlgmr.msrb.gmra.mxu2 %vm485_vm2, %v587_v32  ;;  %1534 = vmatmul.msk.f32.vlgmr.msrb.gmra.mxu3 %vm485_vm2, %v587_v32  ;;  %v1073_v32 = vld [vmem:[%s2447_s6 + $0x58] sm:$0xff] }
 0x266   :  { %853 = vmatpush.msrb.mxu3 %v1926_v43  ;;  %833 = vmatpush.msrb.mxu2 %v1901_v35  ;;  %v612_v43 = vand.u32 2147483647, %v545_v25 }
 0x267   :  { %v592_v29 = vadd.f32 %v1597_v19, %v591_v37 }
 0x268   :  { %v1599_v38 = vpop.eup %1598  ;;  %vm613_vm10 = vcmp.eq.f32.partialorder %v612_v43, 8.507059e+37  ;;  %v1070_v43 = vld [vmem:[%s2447_s6 + $0x40] sm:$0xff] }
 0x269   :  { %v596_v41 = vsel %vm595_vm5, %v1597_v19, %v592_v29  ;;  %v604_v49 = vmul.f32 %v1599_v38, %v545_v25  ;;  %v548_v51 = vpop.xlane.xlu0 %547  ;;  %vm609_vm7 = vweird.f32 %v1599_v38  ;;  %v1074_v25 = vld [vmem:[%s2447_s6 + $0x60] sm:$0xff]  ;;  %v1040_v29 = vld [vmem:[#allocation5 + $0x50] sm:$0xff] }
 0x26a   :  { %v601_v53 = vsel %vm598_vm6, %v600_v48, %v596_v41  ;;  %1600 = vrcp.f32 %v548_v51  ;;  %vm610_vm9 = vmor %vm608_vm8, %vm609_vm7  ;;  %v629_v3 = vand.u32 2147483648, %v548_v51  ;;  %vm623_vm12 = vweird.f32 %v548_v51 }
 0x26b   :  { %v605_v54 = vsub.f32 1.0, %v604_v49  ;;  %v602_v58 = vmul.f32 %v2054_v11, %v601_v53 }
 0x26c   :  { %v630_v9 = vor.u32 1.1754944e-38, %v629_v3  ;;  %v1036_v3 = vld [vmem:[#allocation5 + $0x30] sm:$0xff] }
 0x26d   :  { %v606_v62 = vmul.f32 %v1599_v38, %v605_v54  ;;  %680 = vst.msk [vmem:[#allocation8 + $0x10] sm:$0xff] %vm485_vm2, %v602_v58  ;;  %1535 = vmatmul.msk.f32.vlgmr.msra.gmra.mxu2 %vm485_vm2, %v602_v58  ;;  %1536 = vmatmul.msk.f32.vlgmr.msra.gmra.mxu3 %vm485_vm2, %v602_v58  ;;  %v1039_v54 = vld [vmem:[#allocation5 + $0x48] sm:$0xff] }
 0x26e   :  { %896 = vmatpush.msra.mxu3 %v1932_v44  ;;  %876 = vmatpush.msra.mxu2 %v1860_v16  ;;  %v627_v16 = vand.u32 2147483647, %v548_v51  ;;  %v1071_v58 = vld [vmem:[%s2447_s6 + $0x48] sm:$0xff] }
 0x26f   :  { %v607_v35 = vadd.f32 %v1599_v38, %v606_v62 }
 0x270   :  { %v1601_v63 = vpop.eup %1600  ;;  %vm628_vm14 = vcmp.eq.f32.partialorder %v627_v16, 8.507059e+37  ;;  %v1068_v16 = vld [vmem:[%s2447_s6 + $0x30] sm:$0xff] }
 0x271   :  { %v611_v11 = vsel %vm610_vm9, %v1599_v38, %v607_v35  ;;  %v619_v1 = vmul.f32 %v1601_v63, %v548_v51  ;;  %v2096_v18 = vpop.xlane.xlu1 %550  ;;  %vm624_vm11 = vweird.f32 %v1601_v63 }
 0x272   :  { %v616_v2 = vsel %vm613_vm10, %v615_v57, %v611_v11  ;;  %1602 = vrcp.f32 %v2096_v18  ;;  %vm625_vm13 = vmor %vm623_vm12, %vm624_vm11  ;;  %v644_v5 = vand.u32 2147483648, %v2096_v18  ;;  %v642_v30 = vand.u32 2147483647, %v2096_v18  ;;  %v1037_v11 = vld [vmem:[#allocation5 + $0x38] sm:$0xff] }
 0x273   :  { %v620_v4 = vsub.f32 1.0, %v619_v1  ;;  %v617_v6 = vmul.f32 %v2058_v17, %v616_v2  ;;  %v1077_v17 = vld [vmem:[%s2447_s6 + $0x78] sm:$0xff]  ;;  %vm638_vm0 = vweird.f32 %v2096_v18 }
 0x274   :  { %1078 = vmatpush.msrb.mxu0 %v1077_v17  ;;  %v645_v42 = vor.u32 1.1754944e-38, %v644_v5  ;;  %vm643_vm3 = vcmp.eq.f32.partialorder %v642_v30, 8.507059e+37  ;;  %v1067_v17 = vld [vmem:[%s2447_s6 + $0x28] sm:$0xff]  ;;  %v1065_v5 = vld [vmem:[%s2447_s6 + $0x18] sm:$0xff] }
 0x275   :  { %v621_v44 = vmul.f32 %v1601_v63, %v620_v4  ;;  %681 = vst.msk [vmem:[#allocation8 + $0x18] sm:$0xff] %vm485_vm2, %v617_v6  ;;  %1537 = vmatmul.msk.f32.vlgmr.msrb.gmra.mxu2 %vm485_vm2, %v617_v6  ;;  %1538 = vmatmul.msk.f32.vlgmr.msrb.gmra.mxu3 %vm485_vm2, %v617_v6  ;;  %v1061_v6 = vld [vmem:[#allocation5 + $0xf8] sm:$0xff]  ;;  %v1055_v30 = vld [vmem:[#allocation5 + $0xc8] sm:$0xff] }
 0x276   :  { %939 = vmatpush.msrb.mxu3 %v1938_v45  ;;  %919 = vmatpush.msrb.mxu2 %v1872_v22 }
 0x277   :  { %v622_v8 = vadd.f32 %v1601_v63, %v621_v44  ;;  %1079 = vmatpush.msrb.mxu0 %v1076_v12 }
 0x278   :  { %v1603_v7 = vpop.eup %1602 }
 0x279   :  { %v626_v45 = vsel %vm625_vm13, %v1601_v63, %v622_v8  ;;  %v634_v22 = vmul.f32 %v1603_v7, %v2096_v18  ;;  %v2112_v13 = vpop.xlane.xlu2 %553  ;;  %1080 = vmatpush.msrb.mxu0 %v1075_v14  ;;  %vm639_vm15 = vweird.f32 %v1603_v7  ;;  %v1035_v8 = vld [vmem:[#allocation5 + $0x28] sm:$0xff]  ;;  %v1033_v14 = vld [vmem:[#allocation5 + $0x18] sm:$0xff] }
 0x27a   :  { %v631_v15 = vsel %vm628_vm14, %v630_v9, %v626_v45  ;;  %1604 = vrcp.f32 %v2112_v13  ;;  %vm640_vm1 = vmor %vm638_vm0, %vm639_vm15  ;;  %v659_v53 = vand.u32 2147483648, %v2112_v13  ;;  %v657_v62 = vand.u32 2147483647, %v2112_v13  ;;  %v1059_v9 = vld [vmem:[#allocation5 + $0xe8] sm:$0xff]  ;;  %v1066_v45 = vld [vmem:[%s2447_s6 + $0x20] sm:$0xff] }
 0x27b   :  { %v635_v19 = vsub.f32 1.0, %v634_v22  ;;  %v632_v20 = vmul.f32 %v2062_v26, %v631_v15  ;;  %v1041_v26 = vld [vmem:[#allocation5 + $0x58] sm:$0xff]  ;;  %1081 = vmatpush.msrb.mxu0 %v1074_v25  ;;  %vm653_vm5 = vweird.f32 %v2112_v13  ;;  %v1056_v25 = vld [vmem:[#allocation5 + $0xd0] sm:$0xff] }
 0x27c   :  { %1123 = vmatpush.msra.mxu1 %v1041_v26  ;;  %v660_v57 = vor.u32 1.1754944e-38, %v659_v53  ;;  %vm658_vm7 = vcmp.eq.f32.partialorder %v657_v62, 8.507059e+37  ;;  %v1063_v26 = vld [vmem:[%s2447_s6 + $0x8] sm:$0xff]  ;;  %v1248_v62 = vld [vmem:[%s2449_s8 + $0xd8] sm:$0xff] }
 0x27d   :  { %v636_v27 = vmul.f32 %v1603_v7, %v635_v19  ;;  %682 = vst.msk [vmem:[#allocation8 + $0x20] sm:$0xff] %vm485_vm2, %v632_v20  ;;  %1539 = vmatmul.msk.f32.vlgmr.msra.gmra.mxu2 %vm485_vm2, %v632_v20  ;;  %1540 = vmatmul.msk.f32.vlgmr.msra.gmra.mxu3 %vm485_vm2, %v632_v20  ;;  %v1057_v20 = vld [vmem:[#allocation5 + $0xd8] sm:$0xff] }
 0x27e   :  { %982 = vmatpush.msra.mxu3 %v1944_v46  ;;  %962 = vmatpush.msra.mxu2 %v1884_v28  ;;  %v1072_v46 = vld [vmem:[%s2447_s6 + $0x50] sm:$0xff] }
 0x27f   :  { %v637_v33 = vadd.f32 %v1603_v7, %v636_v27  ;;  %1082 = vmatpush.msrb.mxu0 %v1073_v32  ;;  %1124 = vmatpush.msra.mxu1 %v1040_v29  ;;  %v1031_v27 = vld [vmem:[#allocation5 + $0x8] sm:$0xff]  ;;  %v1054_v32 = vld [vmem:[#allocation5 + $0xc0] sm:$0xff] }
 0x280   :  { %v1605_v37 = vpop.eup %1604  ;;  %v1050_v29 = vld [vmem:[#allocation5 + $0xa0] sm:$0xff] }
 0x281   :  { %v641_v38 = vsel %vm640_vm1, %v1603_v7, %v637_v33  ;;  %v649_v28 = vmul.f32 %v1605_v37, %v2112_v13  ;;  %v2137_v48 = vpop.xlane.xlu0 %556  ;;  %1083 = vmatpush.msrb.mxu0 %v1072_v46  ;;  %vm654_vm4 = vweird.f32 %v1605_v37  ;;  %1125 = vmatpush.msra.mxu1 %v1039_v54  ;;  %v1058_v13 = vld [vmem:[#allocation5 + $0xe0] sm:$0xff]  ;;  %v1053_v33 = vld [vmem:[#allocation5 + $0xb8] sm:$0xff] }
 0x282   :  { %v646_v41 = vsel %vm643_vm3, %v645_v42, %v641_v38  ;;  %1606 = vrcp.f32 %v2137_v48  ;;  %vm655_vm6 = vmor %vm653_vm5, %vm654_vm4  ;;  %v674_v44 = vand.u32 2147483648, %v2137_v48  ;;  %v672_v40 = vand.u32 2147483647, %v2137_v48  ;;  %v1051_v42 = vld [vmem:[#allocation5 + $0xa8] sm:$0xff]  ;;  %v1049_v46 = vld [vmem:[#allocation5 + $0x98] sm:$0xff] }
 0x283   :  { %v650_v49 = vsub.f32 1.0, %v649_v28  ;;  %v647_v51 = vmul.f32 %v2066_v36, %v646_v41  ;;  %v1038_v36 = vld [vmem:[#allocation5 + $0x40] sm:$0xff]  ;;  %1084 = vmatpush.msrb.mxu0 %v1071_v58  ;;  %vm668_vm9 = vweird.f32 %v2137_v48  ;;  %v1048_v38 = vld [vmem:[#allocation5 + $0x90] sm:$0xff]  ;;  %v1047_v28 = vld [vmem:[#allocation5 + $0x88] sm:$0xff] }
 0x284   :  { %1126 = vmatpush.msra.mxu1 %v1038_v36  ;;  %v675_v12 = vor.u32 1.1754944e-38, %v674_v44  ;;  %vm673_vm11 = vcmp.eq.f32.partialorder %v672_v40, 8.507059e+37  ;;  %v1030_v41 = vld [vmem:[#allocation5] sm:$0xff]  ;;  %v1246_v36 = vld [vmem:[%s2449_s8 + $0xc8] sm:$0xff] }
 0x285   :  { %v651_v60 = vmul.f32 %v1605_v37, %v650_v49  ;;  %683 = vst.msk [vmem:[#allocation8 + $0x28] sm:$0xff] %vm485_vm2, %v647_v51  ;;  %1541 = vmatmul.msk.f32.vlgmr.msrb.gmra.mxu2 %vm485_vm2, %v647_v51  ;;  %1542 = vmatmul.msk.f32.vlgmr.msrb.gmra.mxu3 %vm485_vm2, %v647_v51  ;;  %v1046_v49 = vld [vmem:[#allocation5 + $0x80] sm:$0xff] }
 0x286   :  { %1025 = vmatpush.msrb.mxu3 %v1950_v47  ;;  %1005 = vmatpush.msrb.mxu2 %v1896_v34  ;;  %v1069_v47 = vld [vmem:[%s2447_s6 + $0x38] sm:$0xff] }
 0x287   :  { %v652_v35 = vadd.f32 %v1605_v37, %v651_v60  ;;  %1085 = vmatpush.msrb.mxu0 %v1070_v43  ;;  %1127 = vmatpush.msra.mxu1 %v1037_v11  ;;  %v1245_v43 = vld [vmem:[%s2449_s8 + $0xc0] sm:$0xff]  ;;  %v1243_v11 = vld [vmem:[%s2449_s8 + $0xb0] sm:$0xff] }
 0x288   :  { %v1607_v63 = vpop.eup %1606 }
 0x289   :  { %v656_v1 = vsel %vm655_vm6, %v1605_v37, %v652_v35  ;;  %v664_v34 = vmul.f32 %v1607_v63, %v2137_v48  ;;  %1086 = vmatpush.msrb.mxu0 %v1069_v47  ;;  %vm669_vm8 = vweird.f32 %v1607_v63  ;;  %1128 = vmatpush.msra.mxu1 %v1036_v3  ;;  %v1052_v37 = vld [vmem:[#allocation5 + $0xb0] sm:$0xff]  ;;  %v1062_v48 = vld [vmem:[%s2447_s6] sm:$0xff]  ;;  %v1242_v47 = vld [vmem:[%s2449_s8 + $0xa8] sm:$0xff] }
 0x28a   :  { %v661_v18 = vsel %vm658_vm7, %v660_v57, %v656_v1  ;;  %vm670_vm10 = vmor %vm668_vm9, %vm669_vm8  ;;  %v1244_v57 = vld [vmem:[%s2449_s8 + $0xb8] sm:$0xff]  ;;  %v1241_v1 = vld [vmem:[%s2449_s8 + $0xa0] sm:$0xff] }
 0x28b   :  { %v665_v2 = vsub.f32 1.0, %v664_v34  ;;  %v662_v4 = vmul.f32 %v2070_v50, %v661_v18  ;;  %v1060_v50 = vld [vmem:[#allocation5 + $0xf0] sm:$0xff]  ;;  %1087 = vmatpush.msrb.mxu0 %v1068_v16  ;;  %1129 = vmatpush.msra.mxu1 %v1035_v8  ;;  %v1240_v34 = vld [vmem:[%s2449_s8 + $0x98] sm:$0xff]  ;;  %v1234_v8 = vld [vmem:[%s2449_s8 + $0x68] sm:$0xff] }
 0x28c   :  { %v1239_v18 = vld [vmem:[%s2449_s8 + $0x90] sm:$0xff]  ;;  %v1236_v3 = vld [vmem:[%s2449_s8 + $0x78] sm:$0xff] }
 0x28d   :  { %v666_v23 = vmul.f32 %v1607_v63, %v665_v2  ;;  %684 = vst.msk [vmem:[#allocation8 + $0x30] sm:$0xff] %vm485_vm2, %v662_v4  ;;  %1543 = vmatmul.msk.f32.vlgmr.msra.gmra.mxu2 %vm485_vm2, %v662_v4  ;;  %1544 = vmatmul.msk.f32.vlgmr.msra.gmra.mxu3 %vm485_vm2, %v662_v4  ;;  %v1238_v2 = vld [vmem:[%s2449_s8 + $0x88] sm:$0xff] }
 0x28e   :  { %1160 = vmatpush.msra.mxu2 %v1061_v6  ;;  %1088 = vmatpush.msrb.mxu0 %v1067_v17  ;;  %v1235_v17 = vld [vmem:[%s2449_s8 + $0x70] sm:$0xff] }
 0x28f   :  { %v667_v7 = vadd.f32 %v1607_v63, %v666_v23  ;;  %1130 = vmatpush.msra.mxu1 %v1034_v10  ;;  %v1231_v10 = vld [vmem:[%s2449_s8 + $0x50] sm:$0xff] }
 0x290   :  { %1161 = vmatpush.msra.mxu2 %v1060_v50  ;;  %1089 = vmatpush.msrb.mxu0 %v1066_v45  ;;  %v1237_v50 = vld [vmem:[%s2449_s8 + $0x80] sm:$0xff]  ;;  %v1230_v45 = vld [vmem:[%s2449_s8 + $0x48] sm:$0xff] }
 0x291   :  { %v671_v22 = vsel %vm670_vm10, %v1607_v63, %v667_v7  ;;  %1131 = vmatpush.msra.mxu1 %v1033_v14  ;;  %v1232_v7 = vld [vmem:[%s2449_s8 + $0x58] sm:$0xff]  ;;  %v1225_v14 = vld [vmem:[%s2449_s8 + $0x20] sm:$0xff] }
 0x292   :  { %v676_v15 = vsel %vm673_vm11, %v675_v12, %v671_v22  ;;  %1162 = vmatpush.msra.mxu2 %v1059_v9  ;;  %1090 = vmatpush.msrb.mxu0 %v1065_v5  ;;  %v1233_v9 = vld [vmem:[%s2449_s8 + $0x60] sm:$0xff]  ;;  %v1227_v22 = vld [vmem:[%s2449_s8 + $0x30] sm:$0xff] }
 0x293   :  { %v677_v19 = vmul.f32 %v2074_v56, %v676_v15  ;;  %v1064_v56 = vld [vmem:[%s2447_s6 + $0x10] sm:$0xff]  ;;  %1132 = vmatpush.msra.mxu1 %v1032_v21  ;;  %v1229_v12 = vld [vmem:[%s2449_s8 + $0x40] sm:$0xff]  ;;  %v1226_v15 = vld [vmem:[%s2449_s8 + $0x28] sm:$0xff]  ;;  %s1783_s6 = smov 256  }
 0x294   :  { %1163 = vmatpush.msra.mxu2 %v1058_v13  ;;  %1091 = vmatpush.msrb.mxu0 %v1064_v56  ;;  %v1228_v13 = vld [vmem:[%s2449_s8 + $0x38] sm:$0xff]  ;;  %v1221_v5 = vld [vmem:[%s2449_s8] sm:$0xff]  ;;  %v1222_v21 = vld [vmem:[%s2449_s8 + $0x8] sm:$0xff] }
 0x295   :  { %685 = vst.msk [vmem:[#allocation8 + $0x38] sm:$0xff] %vm485_vm2, %v677_v19  ;;  %1545 = vmatmul.msk.f32.vlgmr.msrb.gmra.mxu2 %vm485_vm2, %v677_v19  ;;  %1546 = vmatmul.msk.f32.vlgmr.msrb.gmra.mxu3 %vm485_vm2, %v677_v19  ;;  %v1223_v19 = vld [vmem:[%s2449_s8 + $0x10] sm:$0xff] }
 0x296   :  { %1164 = vmatpush.msra.mxu2 %v1057_v20  ;;  %1133 = vmatpush.msra.mxu1 %v1031_v27  ;;  %v1224_v20 = vld [vmem:[%s2449_s8 + $0x18] sm:$0xff] }
 0x297   :  { %1092 = vmatpush.msrb.mxu0 %v1063_v26  ;;  %v2299_v26 = vld [vmem:[%s2448_s7] ss:$0 sm:$0xff] }
 0x298   :  { %1165 = vmatpush.msra.mxu2 %v1056_v25  ;;  %1134 = vmatpush.msra.mxu1 %v1030_v41 }
 0x299   :  { %1093 = vmatpush.msrb.mxu0 %v1062_v48 }
 0x29a   :  { %1166 = vmatpush.msra.mxu2 %v1055_v30  ;;  %1094 = vmatmul.f32.vlgmr.msrb.gmra.mxu0 %v1964_v24 }
 0x29c   :  { %1167 = vmatpush.msra.mxu2 %v1054_v32 }
 0x29e   :  { %1168 = vmatpush.msra.mxu2 %v1053_v33 }
 0x2a0   :  { %1169 = vmatpush.msra.mxu2 %v1052_v37 }
 0x2a2   :  { %1170 = vmatpush.msra.mxu2 %v1051_v42  ;;  %1097 = vmatmul.f32.gmra.mxu0 %v1970_v31 }
 0x2a4   :  { %1171 = vmatpush.msra.mxu2 %v1050_v29 }
 0x2a6   :  { %1172 = vmatpush.msra.mxu2 %v1049_v46 }
 0x2a8   :  { %1173 = vmatpush.msra.mxu2 %v1048_v38 }
 0x2aa   :  { %1174 = vmatpush.msra.mxu2 %v1047_v28  ;;  %1100 = vmatmul.f32.gmra.mxu0 %v1976_v39 }
 0x2ac   :  { %1175 = vmatpush.msra.mxu2 %v1046_v49 }
 0x2b2   :  { %1103 = vmatmul.f32.gmra.mxu0 %v1982_v52  ;;  %v1252_v52 = vld [vmem:[%s2449_s8 + $0xf8] sm:$0xff] }
 0x2b3   :  { %1300 = vmatpush.msra.mxu0 %v1252_v52 }
 0x2ba   :  { %1106 = vmatmul.f32.gmra.mxu0 %v1989_v55  ;;  %v1250_v55 = vld [vmem:[%s2449_s8 + $0xe8] sm:$0xff] }
 0x2bb   :  { %1301 = vmatpush.msra.mxu0 %v1250_v55 }
 0x2bd   :  { %1302 = vmatpush.msra.mxu0 %v1248_v62 }
 0x2bf   :  { %1303 = vmatpush.msra.mxu0 %v1246_v36 }
 0x2c1   :  { %1304 = vmatpush.msra.mxu0 %v1244_v57 }
 0x2c2   :  { %1109 = vmatmul.f32.gmra.mxu0 %v1995_v59  ;;  %v1251_v59 = vld [vmem:[%s2449_s8 + $0xf0] sm:$0xff] }
 0x2c3   :  { %1259 = vmatpush.msra.mxu3 %v1251_v59  ;;  %1305 = vmatpush.msra.mxu0 %v1242_v47 }
 0x2c5   :  { %1306 = vmatpush.msra.mxu0 %v1240_v34 }
 0x2c7   :  { %1307 = vmatpush.msra.mxu0 %v1238_v2 }
 0x2c9   :  { %1308 = vmatpush.msra.mxu0 %v1236_v3 }
 0x2ca   :  { %1112 = vmatmul.f32.gmra.mxu0 %v2001_v61  ;;  %v1249_v61 = vld [vmem:[%s2449_s8 + $0xe0] sm:$0xff] }
 0x2cb   :  { %1260 = vmatpush.msra.mxu3 %v1249_v61  ;;  %1309 = vmatpush.msra.mxu0 %v1234_v8 }
 0x2cd   :  { %1310 = vmatpush.msra.mxu0 %v1232_v7 }
 0x2cf   :  { %1311 = vmatpush.msra.mxu0 %v1230_v45 }
 0x2d1   :  { %1312 = vmatpush.msra.mxu0 %v1228_v13  ;;  %v1253_v13 = vld [vmem:[%s2450_s9] sm:$0x3]  ;;  %s1781_s9 = smov [#allocation8]  }
 0x2d2   :  { %1115 = vmatmul.f32.gmra.mxu0 %v2009_v0  ;;  %v1247_v0 = vld [vmem:[%s2449_s8 + $0xd0] sm:$0xff]  ;;  %s1510_s21 = sshll.u32 %s1781_s9, 4  ;;  %s1511_s21 = int_to_ptr.vmem [resolvable:$true] %s1510_s21 }
 0x2d3   :  { %1261 = vmatpush.msra.mxu3 %v1247_v0  ;;  %1313 = vmatpush.msra.mxu0 %v1226_v15  ;;  %v1256_v15 = vperm.slane %v1253_v13, 1  ;;  %1518 = dma.vmem_to_hbm [thread:$0]  %s1511_s21, 1024, %s1513_s24, [#allocation9], %s1777_s25, %s1777_s25, %s1778_s26  }
 0x2d4   :  { %s1497_s25 = sshll.u32 %s1782_s11, 4  ;;  %s1498_s25 = int_to_ptr.vmem [resolvable:$true] %s1497_s25 }
 0x2d5   :  { %1262 = vmatpush.msra.mxu3 %v1245_v43  ;;  %1314 = vmatpush.msra.mxu0 %v1224_v20 }
 0x2d7   :  { %1263 = vmatpush.msra.mxu3 %v1243_v11  ;;  %1315 = vmatpush.msra.mxu0 %v1222_v21 }
 0x2d9   :  { %1264 = vmatpush.msra.mxu3 %v1241_v1 }
 0x2db   :  { %1265 = vmatpush.msra.mxu3 %v1239_v18 }
 0x2dd   :  { %1266 = vmatpush.msra.mxu3 %v1237_v50 }
 0x2df   :  { %1267 = vmatpush.msra.mxu3 %v1235_v17 }
 0x2e0   :  { %v706_v51 = vpop.f32.mrf.mxu2  ;;  %v726_v53 = vpop.f32.mrf.mxu3 }
 0x2e1   :  { %1135 = vmatmul.f32.vlgmr.msra.gmra.mxu1 %v706_v51  ;;  %1176 = vmatmul.f32.vlgmr.msra.gmra.mxu2 %v726_v53 }
 0x2e2   :  { %1268 = vmatpush.msra.mxu3 %v1233_v9 }
 0x2e4   :  { %1269 = vmatpush.msra.mxu3 %v1231_v10 }
 0x2e6   :  { %1270 = vmatpush.msra.mxu3 %v1229_v12 }
 0x2e8   :  { %v749_v54 = vpop.f32.mrf.mxu2  ;;  %v769_v58 = vpop.f32.mrf.mxu3  ;;  %1271 = vmatpush.msra.mxu3 %v1227_v22 }
 0x2e9   :  { %1138 = vmatmul.f32.gmra.mxu1 %v749_v54  ;;  %1179 = vmatmul.f32.gmra.mxu2 %v769_v58 }
 0x2ea   :  { %1272 = vmatpush.msra.mxu3 %v1225_v14 }
 0x2ec   :  { %1273 = vmatpush.msra.mxu3 %v1223_v19  ;;  %v1255_v19 = vperm.slane %v1253_v13, 0 }
 0x2ee   :  { %1274 = vmatpush.msra.mxu3 %v1221_v5 }
 0x2f0   :  { %v792_v60 = vpop.f32.mrf.mxu2  ;;  %v812_v24 = vpop.f32.mrf.mxu3 }
 0x2f1   :  { %1141 = vmatmul.f32.gmra.mxu1 %v792_v60  ;;  %1182 = vmatmul.f32.gmra.mxu2 %v812_v24 }
 0x2f8   :  { %v835_v31 = vpop.f32.mrf.mxu2  ;;  %v855_v39 = vpop.f32.mrf.mxu3 }
 0x2f9   :  { %1144 = vmatmul.f32.gmra.mxu1 %v835_v31  ;;  %1185 = vmatmul.f32.gmra.mxu2 %v855_v39 }
 0x300   :  { %v878_v35 = vpop.f32.mrf.mxu2  ;;  %v898_v63 = vpop.f32.mrf.mxu3 }
 0x301   :  { %1147 = vmatmul.f32.gmra.mxu1 %v878_v35  ;;  %1188 = vmatmul.f32.gmra.mxu2 %v898_v63 }
 0x308   :  { %v921_v4 = vpop.f32.mrf.mxu2  ;;  %v941_v6 = vpop.f32.mrf.mxu3 }
 0x309   :  { %1150 = vmatmul.f32.gmra.mxu1 %v921_v4  ;;  %1191 = vmatmul.f32.gmra.mxu2 %v941_v6 }
 0x310   :  { %v964_v44 = vpop.f32.mrf.mxu2  ;;  %v984_v16 = vpop.f32.mrf.mxu3 }
 0x311   :  { %1153 = vmatmul.f32.gmra.mxu1 %v964_v44  ;;  %1194 = vmatmul.f32.gmra.mxu2 %v984_v16 }
 0x317   :  { %v1095_v25 = vpop.f32.mrf.mxu0 }
 0x318   :  { %v1007_v23 = vpop.f32.mrf.mxu2  ;;  %v1027_v40 = vpop.f32.mrf.mxu3 }
 0x319   :  { %1156 = vmatmul.f32.gmra.mxu1 %v1007_v23  ;;  %1197 = vmatmul.f32.gmra.mxu2 %v1027_v40 }
 0x31f   :  { %v1098_v56 = vpop.f32.mrf.mxu0 }
 0x327   :  { %v1101_v42 = vpop.f32.mrf.mxu0 }
 0x32f   :  { %v1104_v51 = vpop.f32.mrf.mxu0 }
 0x337   :  { %v1107_v39 = vpop.f32.mrf.mxu0 }
 0x33f   :  { %v1110_v35 = vpop.f32.mrf.mxu0 }
 0x347   :  { %v1113_v2 = vpop.f32.mrf.mxu0 }
 0x34f   :  { %v1116_v8 = vpop.f32.mrf.mxu0 }
 0x35e   :  { %v1136_v27 = vpop.f32.mrf.mxu1 }
 0x35f   :  { %v1137_v30 = vadd.f32 %v1136_v27, %v1095_v25 }
 0x364   :  { %v1177_v32 = vpop.f32.mrf.mxu2 }
 0x365   :  { %v1178_v33 = vadd.f32 %v1177_v32, %v1137_v30 }
 0x366   :  { %v1139_v37 = vpop.f32.mrf.mxu1 }
 0x367   :  { %v1205_v29 = vadd.f32 %v2299_v26, %v1178_v33  ;;  %v1140_v46 = vadd.f32 %v1139_v37, %v1098_v56 }
 0x369   :  { %1608 = vtanh.f32 %v1205_v29 }
 0x36c   :  { %v1180_v38 = vpop.f32.mrf.mxu2 }
 0x36d   :  { %v1181_v28 = vadd.f32 %v1180_v38, %v1140_v46 }
 0x36e   :  { %v1142_v48 = vpop.f32.mrf.mxu1 }
 0x36f   :  { %v1609_v41 = vpop.eup %1608  ;;  %v1206_v49 = vadd.f32 %v2299_v26, %v1181_v28  ;;  %v1143_v53 = vadd.f32 %v1142_v48, %v1101_v42 }
 0x370   :  { %1275 = vmatmul.f32.vlgmr.msra.gmra.mxu3 %v1609_v41  ;;  %1316 = vmatmul.f32.vlgmr.msra.gmra.mxu0 %v1609_v41 }
 0x371   :  { %1610 = vtanh.f32 %v1206_v49 }
 0x374   :  { %v1183_v54 = vpop.f32.mrf.mxu2 }
 0x375   :  { %v1184_v58 = vadd.f32 %v1183_v54, %v1143_v53 }
 0x376   :  { %v1145_v60 = vpop.f32.mrf.mxu1 }
 0x377   :  { %v1611_v24 = vpop.eup %1610  ;;  %v1207_v31 = vadd.f32 %v2299_v26, %v1184_v58  ;;  %v1146_v52 = vadd.f32 %v1145_v60, %v1104_v51 }
 0x378   :  { %1278 = vmatmul.f32.gmra.mxu3 %v1611_v24  ;;  %1319 = vmatmul.f32.gmra.mxu0 %v1611_v24 }
 0x379   :  { %1612 = vtanh.f32 %v1207_v31 }
 0x37c   :  { %v1186_v55 = vpop.f32.mrf.mxu2 }
 0x37d   :  { %v1187_v59 = vadd.f32 %v1186_v55, %v1146_v52 }
 0x37e   :  { %v1148_v61 = vpop.f32.mrf.mxu1 }
 0x37f   :  { %v1613_v62 = vpop.eup %1612  ;;  %v1208_v0 = vadd.f32 %v2299_v26, %v1187_v59  ;;  %v1149_v36 = vadd.f32 %v1148_v61, %v1107_v39 }
 0x380   :  { %1281 = vmatmul.f32.gmra.mxu3 %v1613_v62  ;;  %1322 = vmatmul.f32.gmra.mxu0 %v1613_v62 }
 0x381   :  { %1614 = vtanh.f32 %v1208_v0 }
 0x384   :  { %v1189_v43 = vpop.f32.mrf.mxu2 }
 0x385   :  { %v1190_v63 = vadd.f32 %v1189_v43, %v1149_v36 }
 0x386   :  { %v1151_v57 = vpop.f32.mrf.mxu1 }
 0x387   :  { %v1615_v11 = vpop.eup %1614  ;;  %v1209_v47 = vadd.f32 %v2299_v26, %v1190_v63  ;;  %v1152_v1 = vadd.f32 %v1151_v57, %v1110_v35 }
 0x388   :  { %1284 = vmatmul.f32.gmra.mxu3 %v1615_v11  ;;  %1325 = vmatmul.f32.gmra.mxu0 %v1615_v11 }
 0x389   :  { %1616 = vtanh.f32 %v1209_v47 }
 0x38c   :  { %v1192_v34 = vpop.f32.mrf.mxu2 }
 0x38d   :  { %v1193_v18 = vadd.f32 %v1192_v34, %v1152_v1 }
 0x38e   :  { %v1154_v4 = vpop.f32.mrf.mxu1 }
 0x38f   :  { %v1617_v6 = vpop.eup %1616  ;;  %v1210_v3 = vadd.f32 %v2299_v26, %v1193_v18  ;;  %v1155_v44 = vadd.f32 %v1154_v4, %v1113_v2 }
 0x390   :  { %1287 = vmatmul.f32.gmra.mxu3 %v1617_v6  ;;  %1328 = vmatmul.f32.gmra.mxu0 %v1617_v6 }
 0x391   :  { %1618 = vtanh.f32 %v1210_v3 }
 0x394   :  { %v1195_v16 = vpop.f32.mrf.mxu2 }
 0x395   :  { %v1196_v23 = vadd.f32 %v1195_v16, %v1155_v44 }
 0x396   :  { %v1157_v17 = vpop.f32.mrf.mxu1 }
 0x397   :  { %v1619_v40 = vpop.eup %1618  ;;  %v1211_v50 = vadd.f32 %v2299_v26, %v1196_v23  ;;  %v1158_v7 = vadd.f32 %v1157_v17, %v1116_v8 }
 0x398   :  { %1290 = vmatmul.f32.gmra.mxu3 %v1619_v40  ;;  %1331 = vmatmul.f32.gmra.mxu0 %v1619_v40 }
 0x399   :  { %1620 = vtanh.f32 %v1211_v50 }
 0x39c   :  { %v1198_v9 = vpop.f32.mrf.mxu2 }
 0x39d   :  { %v1199_v10 = vadd.f32 %v1198_v9, %v1158_v7 }
 0x39f   :  { %v1621_v12 = vpop.eup %1620  ;;  %v1212_v45 = vadd.f32 %v2299_v26, %v1199_v10 }
 0x3a0   :  { %1293 = vmatmul.f32.gmra.mxu3 %v1621_v12  ;;  %1334 = vmatmul.f32.gmra.mxu0 %v1621_v12 }
 0x3a1   :  { %1622 = vtanh.f32 %v1212_v45 }
 0x3a7   :  { %v1623_v22 = vpop.eup %1622 }
 0x3a8   :  { %1296 = vmatmul.f32.gmra.mxu3 %v1623_v22  ;;  %1337 = vmatmul.f32.gmra.mxu0 %v1623_v22 }
 0x3ed   :  { %v1317_v14 = vpop.f32.mrf.mxu0 }
 0x3ee   :  { %v2312_v5 = vadd.f32 %v1317_v14, %v1256_v15 }
 0x3f3   :  { %v1276_v20 = vpop.f32.mrf.mxu3 }
 0x3f4   :  { %v2314_v21 = vadd.f32 %v1276_v20, %v1255_v19 }
 0x3f5   :  { %v1320_v25 = vpop.f32.mrf.mxu0 }
 0x3f6   :  { %v1341_v56 = vmax.f32 %v2314_v21, %v2312_v5  ;;  %v2318_v30 = vadd.f32 %v1320_v25, %v1256_v15 }
 0x3f8   :  { %1342 = vmax.xlane.f32.xlu1 %v1341_v56 }
 0x3fb   :  { %v1279_v27 = vpop.f32.mrf.mxu3 }
 0x3fc   :  { %v2320_v26 = vadd.f32 %v1279_v27, %v1255_v19 }
 0x3fd   :  { %v1323_v32 = vpop.f32.mrf.mxu0 }
 0x3fe   :  { %v1344_v33 = vmax.f32 %v2320_v26, %v2318_v30  ;;  %v2324_v42 = vadd.f32 %v1323_v32, %v1256_v15 }
 0x400   :  { %1345 = vmax.xlane.f32.xlu2 %v1344_v33 }
 0x403   :  { %v1282_v37 = vpop.f32.mrf.mxu3 }
 0x404   :  { %v2326_v29 = vadd.f32 %v1282_v37, %v1255_v19 }
 0x405   :  { %v1326_v46 = vpop.f32.mrf.mxu0 }
 0x406   :  { %v1347_v38 = vmax.f32 %v2326_v29, %v2324_v42  ;;  %v2330_v48 = vadd.f32 %v1326_v46, %v1256_v15 }
 0x408   :  { %1348 = vmax.xlane.f32.xlu0 %v1347_v38 }
 0x40b   :  { %v1285_v28 = vpop.f32.mrf.mxu3 }
 0x40c   :  { %v2332_v41 = vadd.f32 %v1285_v28, %v1255_v19 }
 0x40d   :  { %v1329_v49 = vpop.f32.mrf.mxu0 }
 0x40e   :  { %v1350_v51 = vmax.f32 %v2332_v41, %v2330_v48  ;;  %v2336_v54 = vadd.f32 %v1329_v49, %v1256_v15 }
 0x410   :  { %1351 = vmax.xlane.f32.xlu1 %v1350_v51 }
 0x413   :  { %v1288_v53 = vpop.f32.mrf.mxu3 }
 0x414   :  { %v2338_v58 = vadd.f32 %v1288_v53, %v1255_v19 }
 0x415   :  { %v1332_v60 = vpop.f32.mrf.mxu0 }
 0x416   :  { %v1353_v24 = vmax.f32 %v2338_v58, %v2336_v54  ;;  %v2342_v39 = vadd.f32 %v1332_v60, %v1256_v15 }
 0x418   :  { %1354 = vmax.xlane.f32.xlu2 %v1353_v24 }
 0x41b   :  { %v1291_v31 = vpop.f32.mrf.mxu3 }
 0x41c   :  { %v2344_v52 = vadd.f32 %v1291_v31, %v1255_v19 }
 0x41d   :  { %v1335_v59 = vpop.f32.mrf.mxu0 }
 0x41e   :  { %v1356_v55 = vmax.f32 %v2344_v52, %v2342_v39  ;;  %v2348_v62 = vadd.f32 %v1335_v59, %v1256_v15 }
 0x420   :  { %1357 = vmax.xlane.f32.xlu0 %v1356_v55 }
 0x423   :  { %v1294_v61 = vpop.f32.mrf.mxu3 }
 0x424   :  { %v2350_v0 = vadd.f32 %v1294_v61, %v1255_v19 }
 0x425   :  { %v1338_v43 = vpop.f32.mrf.mxu0 }
 0x426   :  { %v1359_v36 = vmax.f32 %v2350_v0, %v2348_v62  ;;  %v2354_v63 = vadd.f32 %v1338_v43, %v1256_v15 }
 0x428   :  { %1360 = vmax.xlane.f32.xlu1 %v1359_v36 }
 0x42b   :  { %v1297_v35 = vpop.f32.mrf.mxu3 }
 0x42c   :  { %v2356_v57 = vadd.f32 %v1297_v35, %v1255_v19 }
 0x42e   :  { %v1362_v11 = vmax.f32 %v2356_v57, %v2354_v63 }
 0x430   :  { %1363 = vmax.xlane.f32.xlu2 %v1362_v11 }
 0x46b   :  { %v2360_v47 = vpop.xlane.xlu1 %1342 }
 0x46c   :  { %v1365_v1 = vsub.f32 %v2314_v21, %v2360_v47  ;;  %v1366_v34 = vsub.f32 %v2312_v5, %v2360_v47 }
 0x46e   :  { %v1381_v18 = vmul.f32 1.442695, %v1365_v1  ;;  %v1383_v2 = vmul.f32 1.442695, %v1366_v34 }
 0x470   :  { %1624 = vpow2.f32 %v1381_v18 }
 0x471   :  { %1626 = vpow2.f32 %v1383_v2 }
 0x473   :  { %v2366_v4 = vpop.xlane.xlu2 %1345 }
 0x474   :  { %v1367_v6 = vsub.f32 %v2320_v26, %v2366_v4  ;;  %v1368_v3 = vsub.f32 %v2318_v30, %v2366_v4 }
 0x476   :  { %v1625_v44 = vpop.eup %1624  ;;  %v1385_v16 = vmul.f32 1.442695, %v1367_v6  ;;  %v1387_v23 = vmul.f32 1.442695, %v1368_v3 }
 0x477   :  { %v1627_v40 = vpop.eup %1626 }
 0x478   :  { %1628 = vpow2.f32 %v1385_v16  ;;  %v1413_v50 = vadd.f32 %v1627_v40, %v1625_v44 }
 0x479   :  { %1630 = vpow2.f32 %v1387_v23 }
 0x47a   :  { %1414 = vadd.xlane.f32.xlu0 %v1413_v50 }
 0x47b   :  { %v2372_v8 = vpop.xlane.xlu0 %1348 }
 0x47c   :  { %v1369_v17 = vsub.f32 %v2326_v29, %v2372_v8  ;;  %v1370_v7 = vsub.f32 %v2324_v42, %v2372_v8 }
 0x47e   :  { %v1629_v9 = vpop.eup %1628  ;;  %v1389_v10 = vmul.f32 1.442695, %v1369_v17  ;;  %v1391_v12 = vmul.f32 1.442695, %v1370_v7 }
 0x47f   :  { %v1631_v45 = vpop.eup %1630 }
 0x480   :  { %1632 = vpow2.f32 %v1389_v10  ;;  %v1416_v22 = vadd.f32 %v1631_v45, %v1629_v9 }
 0x481   :  { %1634 = vpow2.f32 %v1391_v12 }
 0x482   :  { %1417 = vadd.xlane.f32.xlu1 %v1416_v22 }
 0x483   :  { %v2378_v13 = vpop.xlane.xlu1 %1351 }
 0x484   :  { %v1371_v14 = vsub.f32 %v2332_v41, %v2378_v13  ;;  %v1372_v15 = vsub.f32 %v2330_v48, %v2378_v13 }
 0x486   :  { %v1633_v19 = vpop.eup %1632  ;;  %v1393_v20 = vmul.f32 1.442695, %v1371_v14  ;;  %v1395_v25 = vmul.f32 1.442695, %v1372_v15 }
 0x487   :  { %v1635_v56 = vpop.eup %1634 }
 0x488   :  { %1636 = vpow2.f32 %v1393_v20  ;;  %v1419_v27 = vadd.f32 %v1635_v56, %v1633_v19 }
 0x489   :  { %1638 = vpow2.f32 %v1395_v25 }
 0x48a   :  { %1420 = vadd.xlane.f32.xlu2 %v1419_v27 }
 0x48b   :  { %v2384_v32 = vpop.xlane.xlu2 %1354 }
 0x48c   :  { %v1373_v33 = vsub.f32 %v2338_v58, %v2384_v32  ;;  %v1374_v37 = vsub.f32 %v2336_v54, %v2384_v32 }
 0x48e   :  { %v1637_v46 = vpop.eup %1636  ;;  %v1397_v38 = vmul.f32 1.442695, %v1373_v33  ;;  %v1399_v28 = vmul.f32 1.442695, %v1374_v37 }
 0x48f   :  { %v1639_v49 = vpop.eup %1638 }
 0x490   :  { %1640 = vpow2.f32 %v1397_v38  ;;  %v1422_v51 = vadd.f32 %v1639_v49, %v1637_v46 }
 0x491   :  { %1642 = vpow2.f32 %v1399_v28 }
 0x492   :  { %1423 = vadd.xlane.f32.xlu0 %v1422_v51 }
 0x493   :  { %v2390_v53 = vpop.xlane.xlu0 %1357 }
 0x494   :  { %v1375_v60 = vsub.f32 %v2344_v52, %v2390_v53  ;;  %v1376_v24 = vsub.f32 %v2342_v39, %v2390_v53 }
 0x496   :  { %v1641_v31 = vpop.eup %1640  ;;  %v1401_v55 = vmul.f32 1.442695, %v1375_v60  ;;  %v1403_v59 = vmul.f32 1.442695, %v1376_v24 }
 0x497   :  { %v1643_v61 = vpop.eup %1642 }
 0x498   :  { %1644 = vpow2.f32 %v1401_v55  ;;  %v1425_v36 = vadd.f32 %v1643_v61, %v1641_v31 }
 0x499   :  { %1646 = vpow2.f32 %v1403_v59 }
 0x49a   :  { %1426 = vadd.xlane.f32.xlu1 %v1425_v36 }
 0x49b   :  { %v2396_v43 = vpop.xlane.xlu1 %1360 }
 0x49c   :  { %v1377_v35 = vsub.f32 %v2350_v0, %v2396_v43  ;;  %v1378_v11 = vsub.f32 %v2348_v62, %v2396_v43 }
 0x49e   :  { %v1645_v1 = vpop.eup %1644  ;;  %v1405_v34 = vmul.f32 1.442695, %v1377_v35  ;;  %v1407_v18 = vmul.f32 1.442695, %v1378_v11 }
 0x49f   :  { %v1647_v2 = vpop.eup %1646 }
 0x4a0   :  { %1648 = vpow2.f32 %v1405_v34  ;;  %v1428_v6 = vadd.f32 %v1647_v2, %v1645_v1 }
 0x4a1   :  { %1650 = vpow2.f32 %v1407_v18 }
 0x4a2   :  { %1429 = vadd.xlane.f32.xlu2 %v1428_v6 }
 0x4a3   :  { %v2402_v3 = vpop.xlane.xlu2 %1363 }
 0x4a4   :  { %v1379_v44 = vsub.f32 %v2356_v57, %v2402_v3  ;;  %v1380_v16 = vsub.f32 %v2354_v63, %v2402_v3 }
 0x4a6   :  { %v1649_v23 = vpop.eup %1648  ;;  %v1409_v40 = vmul.f32 1.442695, %v1379_v44  ;;  %v1411_v50 = vmul.f32 1.442695, %v1380_v16 }
 0x4a7   :  { %v1651_v17 = vpop.eup %1650 }
 0x4a8   :  { %1652 = vpow2.f32 %v1409_v40  ;;  %v1431_v7 = vadd.f32 %v1651_v17, %v1649_v23 }
 0x4a9   :  { %1654 = vpow2.f32 %v1411_v50 }
 0x4aa   :  { %1432 = vadd.xlane.f32.xlu0 %v1431_v7 }
 0x4ae   :  { %v1653_v9 = vpop.eup %1652 }
 0x4af   :  { %v1655_v10 = vpop.eup %1654 }
 0x4b0   :  { %v1434_v12 = vadd.f32 %v1655_v10, %v1653_v9 }
 0x4b2   :  { %1435 = vadd.xlane.f32.xlu1 %v1434_v12 }
 0x4ed   :  { %v1415_v45 = vpop.xlane.xlu0 %1414 }
 0x4ee   :  { %1656 = vlog2.f32 %v1415_v45 }
 0x4f4   :  { %v1657_v22 = vpop.eup %1656 }
 0x4f5   :  { %v1438_v14 = vmul.f32 0.6931472, %v1657_v22  ;;  %v1418_v15 = vpop.xlane.xlu1 %1417 }
 0x4f6   :  { %1658 = vlog2.f32 %v1418_v15 }
 0x4f7   :  { %v1453_v19 = vadd.f32 %v1438_v14, %v2360_v47 }
 0x4f9   :  { %v1461_v20 = vsub.f32 %v2314_v21, %v1453_v19  ;;  %v1462_v25 = vsub.f32 %v2312_v5, %v1453_v19 }
 0x4fb   :  { %1477 = vst [vmem:[#allocation7] sm:$0xff] %v1461_v20 }
 0x4fc   :  { %v1659_v56 = vpop.eup %1658  ;;  %1478 = vst [vmem:[#allocation7 + $0x8] sm:$0xff] %v1462_v25 }
 0x4fd   :  { %v1440_v27 = vmul.f32 0.6931472, %v1659_v56  ;;  %v1421_v33 = vpop.xlane.xlu2 %1420 }
 0x4fe   :  { %1660 = vlog2.f32 %v1421_v33 }
 0x4ff   :  { %v1454_v37 = vadd.f32 %v1440_v27, %v2366_v4 }
 0x501   :  { %v1463_v46 = vsub.f32 %v2320_v26, %v1454_v37  ;;  %v1464_v38 = vsub.f32 %v2318_v30, %v1454_v37 }
 0x503   :  { %1479 = vst [vmem:[#allocation7 + $0x10] sm:$0xff] %v1463_v46 }
 0x504   :  { %v1661_v28 = vpop.eup %1660  ;;  %1480 = vst [vmem:[#allocation7 + $0x18] sm:$0xff] %v1464_v38 }
 0x505   :  { %v1442_v47 = vmul.f32 0.6931472, %v1661_v28  ;;  %v1424_v49 = vpop.xlane.xlu0 %1423 }
 0x506   :  { %1662 = vlog2.f32 %v1424_v49 }
 0x507   :  { %v1455_v5 = vadd.f32 %v1442_v47, %v2372_v8 }
 0x509   :  { %v1465_v21 = vsub.f32 %v2326_v29, %v1455_v5  ;;  %v1466_v51 = vsub.f32 %v2324_v42, %v1455_v5 }
 0x50b   :  { %1481 = vst [vmem:[#allocation7 + $0x20] sm:$0xff] %v1465_v21 }
 0x50c   :  { %v1663_v60 = vpop.eup %1662  ;;  %1482 = vst [vmem:[#allocation7 + $0x28] sm:$0xff] %v1466_v51 }
 0x50d   :  { %v1444_v4 = vmul.f32 0.6931472, %v1663_v60  ;;  %v1427_v24 = vpop.xlane.xlu1 %1426 }
 0x50e   :  { %1664 = vlog2.f32 %v1427_v24 }
 0x50f   :  { %v1456_v30 = vadd.f32 %v1444_v4, %v2378_v13 }
 0x511   :  { %v1467_v26 = vsub.f32 %v2332_v41, %v1456_v30  ;;  %v1468_v31 = vsub.f32 %v2330_v48, %v1456_v30 }
 0x513   :  { %1483 = vst [vmem:[#allocation7 + $0x30] sm:$0xff] %v1467_v26 }
 0x514   :  { %v1665_v55 = vpop.eup %1664  ;;  %1484 = vst [vmem:[#allocation7 + $0x38] sm:$0xff] %v1468_v31 }
 0x515   :  { %v1446_v8 = vmul.f32 0.6931472, %v1665_v55  ;;  %v1430_v59 = vpop.xlane.xlu2 %1429 }
 0x516   :  { %1666 = vlog2.f32 %v1430_v59 }
 0x517   :  { %v1457_v42 = vadd.f32 %v1446_v8, %v2384_v32 }
 0x519   :  { %v1469_v29 = vsub.f32 %v2338_v58, %v1457_v42  ;;  %v1470_v61 = vsub.f32 %v2336_v54, %v1457_v42 }
 0x51b   :  { %1485 = vst [vmem:[#allocation7 + $0x40] sm:$0xff] %v1469_v29 }
 0x51c   :  { %v1667_v36 = vpop.eup %1666  ;;  %1486 = vst [vmem:[#allocation7 + $0x48] sm:$0xff] %v1470_v61 }
 0x51d   :  { %v1448_v13 = vmul.f32 0.6931472, %v1667_v36  ;;  %v1433_v35 = vpop.xlane.xlu0 %1432 }
 0x51e   :  { %1668 = vlog2.f32 %v1433_v35 }
 0x51f   :  { %v1458_v48 = vadd.f32 %v1448_v13, %v2390_v53 }
 0x521   :  { %v1471_v41 = vsub.f32 %v2344_v52, %v1458_v48  ;;  %v1472_v11 = vsub.f32 %v2342_v39, %v1458_v48 }
 0x523   :  { %1487 = vst [vmem:[#allocation7 + $0x50] sm:$0xff] %v1471_v41 }
 0x524   :  { %v1669_v1 = vpop.eup %1668  ;;  %1488 = vst [vmem:[#allocation7 + $0x58] sm:$0xff] %v1472_v11 }
 0x525   :  { %v1450_v32 = vmul.f32 0.6931472, %v1669_v1  ;;  %v1436_v34 = vpop.xlane.xlu1 %1435 }
 0x526   :  { %1670 = vlog2.f32 %v1436_v34 }
 0x527   :  { %v1459_v54 = vadd.f32 %v1450_v32, %v2396_v43 }
 0x529   :  { %v1473_v58 = vsub.f32 %v2350_v0, %v1459_v54  ;;  %v1474_v18 = vsub.f32 %v2348_v62, %v1459_v54 }
 0x52b   :  { %1489 = vst [vmem:[#allocation7 + $0x60] sm:$0xff] %v1473_v58 }
 0x52c   :  { %v1671_v2 = vpop.eup %1670  ;;  %1490 = vst [vmem:[#allocation7 + $0x68] sm:$0xff] %v1474_v18 }
 0x52d   :  { %v1452_v53 = vmul.f32 0.6931472, %v1671_v2 }
 0x52f   :  { %v1460_v39 = vadd.f32 %v1452_v53, %v2402_v3 }
 0x531   :  { %v1475_v52 = vsub.f32 %v2356_v57, %v1460_v39  ;;  %v1476_v43 = vsub.f32 %v2354_v63, %v1460_v39 }
 0x533   :  { %1491 = vst [vmem:[#allocation7 + $0x70] sm:$0xff] %v1475_v52 }
 0x534   :  { %1492 = vst [vmem:[#allocation7 + $0x78] sm:$0xff] %v1476_v43 }
 0x535   :  { %1505 = dma.vmem_to_hbm [thread:$0]  %s1498_s25, 2048, %s1500_s2, [#allocation4], %s1783_s6, %s1783_s6, %s1784_s3  }
 0x536   :  { %1772 = dma.done.wait [#allocation4], 2048  }
 0x537   :  { %1773 = vsyncadd [#allocation4], 4294965248 }
 0x538   :  { %1774 = dma.done.wait [#allocation9], 1024  }
 0x539   :  { %1775 = vsyncadd [#allocation9], 4294966272 }
 0x53a   :  { %1527 = vsyncpa [#allocation3], 1 }
 0x53b   :  { %1528 = vsyncpa [#allocation6], 1 }
 0x53c   :  { %1529 = vsyncpa [#allocation4], 1 }
 0x53d   :  { %1530 = vsyncpa [#allocation9], 1 }

// kernel: seq2seq_forward.3
= control target key start
LH: loop header
LB: loop body
LE: loop exit
PB: predicated region body
PF: predicated region fallthrough
CT: control target
= control target key end

     0   :  { %s2103_s30 = smov [#allocation5]   ;;  %s3236_s0 = inlined_call_operand.vmem [shape: s32[2], index: 0, kind: input, shape index: {}]   ;;  %s3237_s1 = inlined_call_operand.vmem [shape: f32[8,8,128], index: 1, kind: input, shape index: {}]   ;;  %s3238_s2 = inlined_call_operand.hbm [shape: f32[2,128,384], index: 2, kind: input, shape index: {}]   ;;  %s3239_s3 = inlined_call_operand.vmem [shape: f32[2,128,384], index: 3, kind: input, shape index: {}]   ;;  %s3240_s4 = inlined_call_operand.vmem [shape: f32[2,1,384], index: 4, kind: input, shape index: {}]   ;;  %s3241_s5 = inlined_call_operand.vmem [shape: f32[2,1,384], index: 5, kind: input, shape index: {}]   ;;  %s3242_s6 = inlined_call_operand.vmem [shape: f32[2,8,128], index: 6, kind: input, shape index: {}]   ;;  %s3243_s7 = inlined_call_operand.vmem [shape: f32[2,8,8,128], index: 7, kind: output, shape index: {0}]   ;;  %s3244_s8 = inlined_call_operand.vmem [shape: f32[2,8,128], index: 8, kind: output, shape index: {1}]  }
   0x1   :  { %s15_s29 = sshll.u32 %s3236_s0, 4  ;;  %s16_s29 = int_to_ptr.vmem [resolvable:$true] %s15_s29 }
   0x2   :  { %18 = dma.vmem_to_smem %s16_s29, 16, %s2103_s30, [#allocation4] }
   0x3   :  { %2081 = dma.done.wait [#allocation4], 16 }
   0x4   :  { %2082 = vsyncadd [#allocation4], 4294967280 }
   0x5   :  { %21 = sfence }
   0x6   :  { %22 = vsyncpa [#allocation7], 0 }
   0x7   :  { %24 = vsyncpa [#allocation7 + $0x1], 0  ;;  %s2154_s9 = smov 0   ;;  %s2156_s10 = smov 0  }
   0x8   :  { %s2158_s11 = smov 0   ;;  %s2160_s12 = smov 0  }
   0x9 LB: > { %s2173_s0 = sadd.s32 4294967295, %s2101_s12   ;;  %s2176_s13 = sadd.s32 1, %s2101_s12   ;;  %s2101_s12 = sphi %s2160_s12, %s3308_s12   ;;  %s2097_s11 = sphi %s2158_s11, %s3307_s11   ;;  %s2093_s10 = sphi %s2156_s10, %s3306_s10   ;;  %s2089_s9 = sphi %s2154_s9, %s3305_s9  }
   0xa   : > { %s55_s14 = ssub.s32 %s2101_s12, %s2176_s13  ;;  %s58_s15 = sadd.s32 1, %s2097_s11 }
   0xb   : > { %p56_p0 = scmp.eq.s32.totalorder %s55_s14, 0  ;;  %p65_p1 = scmp.ne.s32.totalorder %s2097_s11, %s2093_s10 }
   0xc   : > { %p66_p2 = scmp.eq.s32.totalorder %s2101_s12, 0  ;;  %p71_p3 = scmp.ne.s32.totalorder %s2093_s10, %s2089_s9 }
   0xd   : > { %s2186_s16 = scalar_select %p56_p0, %s2097_s11, %s58_s15  }
   0xe   : > { %p67_p4 = por %p66_p2, %p65_p1  ;;  %p72_p5 = scmp.eq.s32.totalorder %s2173_s0, 0 }
   0xf   : > { %p1859_p6 = scmp.lt.s32.totalorder %s2101_s12, 2  ;;  %s254_s18 = sand.u32 1, %s2097_s11  }
  0x10   : > { %p2190_p7 = por %p72_p5, %p71_p3  ;;  %s1848_s19 = smul.u32 384, %s254_s18 }
  0x11   : > { %s1849_s20 = smul.u32 384, %s2101_s12  ;;  %p2196_p8 = pnand %p1859_p6, %p67_p4 }
  0x12   : > { %s258_s25 = scalar_lea.vmem [#allocation6], %s1848_s19  ;;  %p1799_p9 = scmp.ge.s32.totalorder %s2101_s12, 1 }
  0x13   : > { %s263_s24 = scalar_lea.hbm %s3238_s2, %s1849_s20  ;;  %s266_s26 = sshll.u32 %s258_s25, 4  ;;  %s267_s26 = int_to_ptr.vmem [resolvable:$true] %s266_s26 }
  0x14   : > { %s264_s27 = sshll.u32 %s263_s24, 4  ;;  %s255_s28 = scalar_lea.sflag [#allocation7], %s254_s18  ;;  %s265_s27 = int_to_ptr.hbm [resolvable:$true] %s264_s27 }
  0x15   : > { %s2035_s29 = sshra.s32 %s265_s27, 4  ;;  %p2039_p11 = pneg %p2196_p8  ;;  %s2036_s29 = int_to_ptr.hbm [resolvable:$true] %s2035_s29 }
  0x16   : > { %s2037_s30 = scalar_lea.hbm %s2036_s29, 384  ;;  %s2042_s15 = scalar_lea.hbm %s3238_s2, 768 }
  0x17   : > { %p2038_p10 = scmp.ne.s32.totalorder %s2036_s29, %s2037_s30  ;;  %p2043_p0 = scmp.lt.s32.totalorder %s2036_s29, %s3238_s2 }
  0x18   : > { %p2044_p1 = scmp.lt.s32.totalorder %s2042_s15, %s2037_s30 }
  0x19   : > { %p2040_p12 = pnand %p2039_p11, %p2038_p10 }
  0x1a   : > { %p2045_p2 = por %p2044_p1, %p2043_p0 }
  0x1b   : > { %p2041_p13 = pneg %p2040_p12 }
  0x1d   : > { %p2046_p3 = pnand %p2045_p2, %p2041_p13 }
  0x1f   : > { %2049 = shalt.err (!%p2046_p3)
}
  0x20   : > { %s2104_s18 = smov 384   ;;  %s2105_s22 = smov 24  }
  0x21   : > { %1858 = dma.hbm_to_vmem [thread:$0]  (!%p2196_p8), %s265_s27, 6144, %s267_s26, %s255_s28, %s2104_s18, %s2104_s18, %s2105_s22  }
  0x22   : > { %p303_p4 = scmp.lt.s32.totalorder %s2101_s12, 3 }
  0x24   : > { %p304_p5 = pnand %p1799_p9, %p303_p4 }
  0x26   : > { %307 = sbr.rel (%p304_p5) target bundleno = 1549 (0x60d), region = 44 }
  0x2b   : > { %s309_s23 = sand.u32 1, %s2093_s10  }
  0x2c   : > { %s1850_s24 = smul.u32 384, %s309_s23  ;;  %s310_s25 = scalar_lea.sflag [#allocation7], %s309_s23 }
  0x2e   : > { %s2218_s29 = scalar_lea.vmem [#allocation6], %s1850_s24 }
  0x2f   : > { %2084 = dma.done.wait (%p2190_p7), %s310_s25, 6144  }
  0x30   : > { %2086 = vsyncadd (%p2190_p7), %s310_s25, 4294961152  ;;  %p366_p6 = scmp.lt.s32.totalorder %s2173_s0, 1  ;;  %v446_v0 = vld [vmem:[%s2218_s29 + $0x168] sm:$0xff]  ;;  %v447_v1 = vld [vmem:[%s2218_s29 + $0x170] sm:$0xff] }
  0x31   : > { %v448_v2 = vld [vmem:[%s2218_s29 + $0x178] sm:$0xff]  ;;  %457 = vmatpush.msra.mxu0 %v446_v0  ;;  %498 = vmatpush.msra.mxu1 %v447_v1  ;;  %v443_v3 = vld [vmem:[%s2218_s29 + $0x150] sm:$0xff]  ;;  %v445_v5 = vld [vmem:[%s2218_s29 + $0x160] sm:$0xff] }
  0x32   : > { %v444_v4 = vld [vmem:[%s2218_s29 + $0x158] sm:$0xff]  ;;  %539 = vmatpush.msra.mxu2 %v448_v2  ;;  %v441_v7 = vld [vmem:[%s2218_s29 + $0x140] sm:$0xff]  ;;  %v442_v8 = vld [vmem:[%s2218_s29 + $0x148] sm:$0xff]  ;;  %s2237_s12 = scalar_select %p366_p6, %s2173_s0, 1 }
  0x33   : > { %v440_v6 = vld [vmem:[%s2218_s29 + $0x138] sm:$0xff]  ;;  %458 = vmatpush.msra.mxu0 %v443_v3  ;;  %499 = vmatpush.msra.mxu1 %v444_v4  ;;  %v437_v9 = vld [vmem:[%s2218_s29 + $0x120] sm:$0xff]  ;;  %v438_v10 = vld [vmem:[%s2218_s29 + $0x128] sm:$0xff] }
  0x34   : > { %540 = vmatpush.msra.mxu2 %v445_v5  ;;  %v439_v11 = vld [vmem:[%s2218_s29 + $0x130] sm:$0xff]  ;;  %v434_v12 = vld [vmem:[%s2218_s29 + $0x108] sm:$0xff]  ;;  %v436_v14 = vld [vmem:[%s2218_s29 + $0x118] sm:$0xff]  ;;  %s1851_s17 = smul.u32 384, %s2237_s12  ;;  %s1801_s15 = sshll.u32 %s2237_s12, 3 }
  0x35   : > { %459 = vmatpush.msra.mxu0 %v440_v6  ;;  %500 = vmatpush.msra.mxu1 %v441_v7  ;;  %v435_v13 = vld [vmem:[%s2218_s29 + $0x110] sm:$0xff]  ;;  %v432_v16 = vld [vmem:[%s2218_s29 + $0xf8] sm:$0xff]  ;;  %v433_v17 = vld [vmem:[%s2218_s29 + $0x100] sm:$0xff]  ;;  %s382_s23 = scalar_lea.vmem %s3242_s6, %s1801_s15  ;;  %s1852_s20 = smul.u32 3, %s2237_s12 }
  0x36   : > { %541 = vmatpush.msra.mxu2 %v442_v8  ;;  %v431_v15 = vld [vmem:[%s2218_s29 + $0xf0] sm:$0xff]  ;;  %v428_v18 = vld [vmem:[%s2218_s29 + $0xd8] sm:$0xff]  ;;  %v429_v19 = vld [vmem:[%s2218_s29 + $0xe0] sm:$0xff]  ;;  %s2255_s27 = scalar_lea.vmem %s3239_s3, %s1851_s17  ;;  %s1839_s26 = sshll.u32 %s2237_s12, 6 }
  0x37   : > { %460 = vmatpush.msra.mxu0 %v437_v9  ;;  %501 = vmatpush.msra.mxu1 %v438_v10  ;;  %v430_v20 = vld [vmem:[%s2218_s29 + $0xe8] sm:$0xff]  ;;  %v425_v21 = vld [vmem:[%s2218_s29 + $0xc0] sm:$0xff]  ;;  %v427_v23 = vld [vmem:[%s2218_s29 + $0xd0] sm:$0xff]  ;;  %s374_s22 = scalar_lea.vmem %s3240_s4, %s1852_s20  ;;  %s2707_s9 = scalar_lea.vmem %s3243_s7, %s1839_s26 }
  0x38   : > { %542 = vmatpush.msra.mxu2 %v439_v11  ;;  %v426_v22 = vld [vmem:[%s2218_s29 + $0xc8] sm:$0xff]  ;;  %v423_v25 = vld [vmem:[%s2218_s29 + $0xb0] sm:$0xff]  ;;  %v424_v27 = vld [vmem:[%s2218_s29 + $0xb8] sm:$0xff] }
  0x39   : > { %461 = vmatpush.msra.mxu0 %v434_v12  ;;  %502 = vmatpush.msra.mxu1 %v435_v13  ;;  %v422_v24 = vld [vmem:[%s2218_s29 + $0xa8] sm:$0xff]  ;;  %v2267_v28 = vld [vmem:[%s2255_s27 + $0x150] sm:$0xff]  ;;  %v420_v30 = vld [vmem:[%s2218_s29 + $0x98] sm:$0xff] }
  0x3a   : > { %543 = vmatpush.msra.mxu2 %v436_v14  ;;  %v2263_v26 = vld [vmem:[%s2255_s27 + $0x168] sm:$0xff]  ;;  %v419_v29 = vld [vmem:[%s2218_s29 + $0x90] sm:$0xff]  ;;  %v421_v31 = vld [vmem:[%s2218_s29 + $0xa0] sm:$0xff] }
  0x3b   : > { %462 = vmatpush.msra.mxu0 %v431_v15  ;;  %503 = vmatpush.msra.mxu1 %v432_v16  ;;  %v2274_v32 = vld [vmem:[%s2255_s27 + $0x138] sm:$0xff]  ;;  %v417_v34 = vld [vmem:[%s2218_s29 + $0x80] sm:$0xff]  ;;  %v418_v35 = vld [vmem:[%s2218_s29 + $0x88] sm:$0xff] }
  0x3c   : > { %544 = vmatpush.msra.mxu2 %v433_v17  ;;  %671 = vmatpush.msra.mxu3 %v2263_v26  ;;  %v416_v33 = vld [vmem:[%s2218_s29 + $0x78] sm:$0xff]  ;;  %v2281_v36 = vld [vmem:[%s2255_s27 + $0x120] sm:$0xff]  ;;  %v414_v38 = vld [vmem:[%s2218_s29 + $0x68] sm:$0xff] }
  0x3d   : > { %463 = vmatpush.msra.mxu0 %v428_v18  ;;  %504 = vmatpush.msra.mxu1 %v429_v19  ;;  %v413_v37 = vld [vmem:[%s2218_s29 + $0x60] sm:$0xff]  ;;  %v415_v39 = vld [vmem:[%s2218_s29 + $0x70] sm:$0xff]  ;;  %v2288_v40 = vld [vmem:[%s2255_s27 + $0x108] sm:$0xff] }
  0x3e   : > { %545 = vmatpush.msra.mxu2 %v430_v20  ;;  %672 = vmatpush.msra.mxu3 %v2267_v28  ;;  %v410_v41 = vld [vmem:[%s2218_s29 + $0x48] sm:$0xff]  ;;  %v411_v42 = vld [vmem:[%s2218_s29 + $0x50] sm:$0xff]  ;;  %v412_v43 = vld [vmem:[%s2218_s29 + $0x58] sm:$0xff] }
  0x3f   : > { %464 = vmatpush.msra.mxu0 %v425_v21  ;;  %505 = vmatpush.msra.mxu1 %v426_v22  ;;  %v2295_v44 = vld [vmem:[%s2255_s27 + $0xf0] sm:$0xff]  ;;  %v408_v46 = vld [vmem:[%s2218_s29 + $0x38] sm:$0xff]  ;;  %v409_v47 = vld [vmem:[%s2218_s29 + $0x40] sm:$0xff] }
  0x40   : > { %546 = vmatpush.msra.mxu2 %v427_v23  ;;  %673 = vmatpush.msra.mxu3 %v2274_v32  ;;  %v407_v45 = vld [vmem:[%s2218_s29 + $0x30] sm:$0xff]  ;;  %v2302_v48 = vld [vmem:[%s2255_s27 + $0xd8] sm:$0xff]  ;;  %v405_v50 = vld [vmem:[%s2218_s29 + $0x20] sm:$0xff] }
  0x41   : > { %465 = vmatpush.msra.mxu0 %v422_v24  ;;  %506 = vmatpush.msra.mxu1 %v423_v25  ;;  %v404_v49 = vld [vmem:[%s2218_s29 + $0x18] sm:$0xff]  ;;  %v406_v51 = vld [vmem:[%s2218_s29 + $0x28] sm:$0xff]  ;;  %v2309_v52 = vld [vmem:[%s2255_s27 + $0xc0] sm:$0xff] }
  0x42   : > { %547 = vmatpush.msra.mxu2 %v424_v27  ;;  %674 = vmatpush.msra.mxu3 %v2281_v36  ;;  %v401_v53 = vld [vmem:[%s2218_s29] sm:$0xff]  ;;  %v402_v54 = vld [vmem:[%s2218_s29 + $0x8] sm:$0xff]  ;;  %v403_v55 = vld [vmem:[%s2218_s29 + $0x10] sm:$0xff] }
  0x43   : > { %466 = vmatpush.msra.mxu0 %v419_v29  ;;  %507 = vmatpush.msra.mxu1 %v420_v30  ;;  %v393_v56 = vld [vmem:[%s3237_s1] sm:$0xff]  ;;  %v2320_v57 = vld [vmem:[%s2255_s27 + $0xa8] sm:$0xff]  ;;  %v2323_v58 = vld [vmem:[%s2255_s27 + $0x178] sm:$0xff] }
  0x44   : > { %548 = vmatpush.msra.mxu2 %v421_v31  ;;  %675 = vmatpush.msra.mxu3 %v2288_v40  ;;  %v2326_v59 = vld [vmem:[%s2255_s27 + $0x90] sm:$0xff]  ;;  %v2329_v60 = vld [vmem:[%s2255_s27 + $0x160] sm:$0xff]  ;;  %v2337_v62 = vld [vmem:[%s2255_s27 + $0x78] sm:$0xff] }
  0x45   : > { %467 = vmatpush.msra.mxu0 %v416_v33  ;;  %508 = vmatpush.msra.mxu1 %v417_v34  ;;  %v2333_v61 = vld [vmem:[%s2255_s27 + $0x170] sm:$0xff]  ;;  %v2340_v63 = vld [vmem:[%s2255_s27 + $0x148] sm:$0xff]  ;;  %v2346_v0 = vld [vmem:[%s2255_s27 + $0x158] sm:$0xff] }
  0x46   : > { %549 = vmatpush.msra.mxu2 %v418_v35  ;;  %676 = vmatpush.msra.mxu3 %v2295_v44  ;;  %v394_v1 = vld [vmem:[%s3237_s1 + $0x8] sm:$0xff]  ;;  %v2353_v2 = vld [vmem:[%s2255_s27 + $0x60] sm:$0xff]  ;;  %v2369_v5 = vld [vmem:[%s2255_s27 + $0x30] sm:$0xff] }
  0x47   : > { %468 = vmatpush.msra.mxu0 %v413_v37  ;;  %509 = vmatpush.msra.mxu1 %v414_v38  ;;  %v2359_v3 = vld [vmem:[%s2255_s27 + $0x140] sm:$0xff]  ;;  %v2363_v4 = vld [vmem:[%s2255_s27 + $0x48] sm:$0xff]  ;;  %v2372_v6 = vld [vmem:[%s2255_s27 + $0x130] sm:$0xff] }
  0x48   : > { %550 = vmatpush.msra.mxu2 %v415_v39  ;;  %677 = vmatpush.msra.mxu3 %v2302_v48  ;;  %v2376_v7 = vld [vmem:[%s2255_s27 + $0x128] sm:$0xff]  ;;  %v2380_v8 = vld [vmem:[%s2255_s27 + $0x118] sm:$0xff]  ;;  %v2390_v10 = vld [vmem:[%s2255_s27 + $0x110] sm:$0xff] }
  0x49   : > { %469 = vmatpush.msra.mxu0 %v410_v41  ;;  %510 = vmatpush.msra.mxu1 %v411_v42  ;;  %v2383_v9 = vld [vmem:[%s2255_s27 + $0x18] sm:$0xff]  ;;  %v395_v11 = vld [vmem:[%s3237_s1 + $0x10] sm:$0xff]  ;;  %v2397_v12 = vld [vmem:[%s2255_s27] sm:$0xff] }
  0x4a   : > { %551 = vmatpush.msra.mxu2 %v412_v43  ;;  %678 = vmatpush.msra.mxu3 %v2309_v52  ;;  %3273 = vst [vmem:[#allocation10_spill] sm:$0xff] %v2383_v9  ;;  %v2403_v13 = vld [vmem:[%s2255_s27 + $0xf8] sm:$0xff]  ;;  %v2413_v14 = vld [vmem:[%s382_s23] sm:$0xff]  ;;  %v2421_v16 = vld [vmem:[%s2255_s27 + $0xe8] sm:$0xff]  ;;  %s2669_s23 = sld [smem:[#allocation5 + %s2173_s0]]  ;;  %s378_s0 = scalar_lea.vmem %s3241_s5, %s1852_s20 }
  0x4b   : > { %470 = vmatpush.msra.mxu0 %v407_v45  ;;  %511 = vmatpush.msra.mxu1 %v408_v46  ;;  %3274 = vst [vmem:[#allocation11_spill] sm:$0xff] %v2397_v12  ;;  %v2416_v15 = vld [vmem:[%s2255_s27 + $0x100] sm:$0xff]  ;;  %v396_v18 = vld [vmem:[%s3237_s1 + $0x18] sm:$0xff]  ;;  %v2437_v19 = vld [vmem:[%s2255_s27 + $0xc8] sm:$0xff] }
  0x4c   : > { %552 = vmatpush.msra.mxu2 %v409_v47  ;;  %679 = vmatpush.msra.mxu3 %v2320_v57  ;;  %v2427_v17 = vld [vmem:[%s2255_s27 + $0xe0] sm:$0xff]  ;;  %v2443_v20 = vld [vmem:[%s2255_s27 + $0xd0] sm:$0xff]  ;;  %v2446_v21 = vld [vmem:[%s2255_s27 + $0xb8] sm:$0xff] }
  0x4d   : > { %471 = vmatpush.msra.mxu0 %v404_v49  ;;  %512 = vmatpush.msra.mxu1 %v405_v50  ;;  %v2450_v22 = vld [vmem:[%s2255_s27 + $0xb0] sm:$0xff]  ;;  %v2454_v23 = vld [vmem:[%s2255_s27 + $0xa0] sm:$0xff]  ;;  %v2460_v24 = vld [vmem:[%s2255_s27 + $0x98] sm:$0xff] }
  0x4e   : > { %553 = vmatpush.msra.mxu2 %v406_v51  ;;  %680 = vmatpush.msra.mxu3 %v2326_v59  ;;  %v397_v25 = vld [vmem:[%s3237_s1 + $0x20] sm:$0xff]  ;;  %v2474_v29 = vld [vmem:[%s2255_s27 + $0x88] sm:$0xff]  ;;  %v2480_v30 = vld [vmem:[%s2255_s27 + $0x70] sm:$0xff] }
  0x4f   : > { %472 = vmatpush.msra.mxu0 %v401_v53  ;;  %513 = vmatpush.msra.mxu1 %v402_v54  ;;  %v2470_v27 = vld [vmem:[%s2255_s27 + $0x80] sm:$0xff]  ;;  %v2484_v31 = vld [vmem:[%s2255_s27 + $0x68] sm:$0xff]  ;;  %v2488_v33 = vld [vmem:[%s2255_s27 + $0x58] sm:$0xff] }
  0x50   : > { %554 = vmatpush.msra.mxu2 %v403_v55  ;;  %473 = vmatmul.f32.vlgmr.msra.gmra.mxu0 %v393_v56  ;;  %v2494_v34 = vld [vmem:[%s2255_s27 + $0x50] sm:$0xff]  ;;  %v398_v35 = vld [vmem:[%s3237_s1 + $0x28] sm:$0xff]  ;;  %v2504_v37 = vld [vmem:[%s2255_s27 + $0x38] sm:$0xff]  ;;  %p655_p7 = scmp.gt.s32.totalorder %s2669_s23, 0 }
  0x51   : > { %514 = vmatmul.f32.vlgmr.msra.gmra.mxu1 %v393_v56  ;;  %555 = vmatmul.f32.vlgmr.msra.gmra.mxu2 %v393_v56  ;;  %3275 = vst [vmem:[#allocation12_spill] sm:$0xff] %v2504_v37  ;;  %v2508_v38 = vld [vmem:[%s2255_s27 + $0x40] sm:$0xff]  ;;  %v2514_v39 = vld [vmem:[%s2255_s27 + $0x28] sm:$0xff]  ;;  %v2522_v42 = vld [vmem:[%s2255_s27 + $0x10] sm:$0xff] }
  0x52   : > { %711 = vmatpush.msrb.mxu0 %v2323_v58  ;;  %790 = vmatpush.msrb.mxu1 %v2263_v26  ;;  %3276 = vst [vmem:[#allocation13_spill] sm:$0xff] %v2514_v39  ;;  %v2518_v41 = vld [vmem:[%s2255_s27 + $0x20] sm:$0xff]  ;;  %v2528_v43 = vld [vmem:[%s2255_s27 + $0x8] sm:$0xff]  ;;  %v399_v45 = vld [vmem:[%s3237_s1 + $0x30] sm:$0xff]  ;;  %s2682_s29 = scalar_select %p655_p7, 7, 0 }
  0x53   : > { %810 = vmatpush.msrb.mxu2 %v2333_v61  ;;  %681 = vmatpush.msra.mxu3 %v2337_v62  ;;  %3277 = vst [vmem:[#allocation14_spill] sm:$0xff] %v2518_v41  ;;  %v400_v46 = vld [vmem:[%s3237_s1 + $0x38] sm:$0xff]  ;;  %v449_v47 = vld [vmem:[%s374_s22] sm:$0x7]  ;;  %s2768_s19 = scalar_select %p655_p7, 6, 1 }
  0x54   : > { %712 = vmatpush.msrb.mxu0 %v2329_v60  ;;  %791 = vmatpush.msrb.mxu1 %v2267_v28  ;;  %3278 = vst [vmem:[#allocation15_spill] sm:$0xff] %v2522_v42  ;;  %v2645_v49 = vperm.slane %v449_v47, 0  ;;  %v2647_v50 = vperm.slane %v449_v47, 1  ;;  %v2651_v56 = vperm.slane %v449_v47, 2  ;;  %s1840_s17 = smul.u32 24, %s2682_s29  ;;  %s1808_s14 = sshll.u32 %s2682_s29, 3 }
  0x55   : > { %811 = vmatpush.msrb.mxu2 %v2346_v0  ;;  %682 = vmatpush.msra.mxu3 %v2353_v2  ;;  %3279 = vst [vmem:[#allocation16_spill] sm:$0xff] %v2528_v43  ;;  %s780_s20 = scalar_lea.vmem %s2707_s9, %s1808_s14  ;;  %s1841_s18 = smul.u32 24, %s2768_s19 }
  0x56   : > { %713 = vmatpush.msrb.mxu0 %v2340_v63  ;;  %792 = vmatpush.msrb.mxu1 %v2274_v32  ;;  %s2695_s21 = scalar_lea.vmem [#allocation2], %s1840_s17  ;;  %s1812_s24 = sshll.u32 %s2768_s19, 3 }
  0x57   : > { %812 = vmatpush.msrb.mxu2 %v2359_v3  ;;  %683 = vmatpush.msra.mxu3 %v2363_v4  ;;  %s2772_s22 = scalar_lea.vmem [#allocation2], %s1841_s18  ;;  %s899_s25 = scalar_lea.vmem %s2707_s9, %s1812_s24 }
  0x58   : > { %476 = vmatmul.f32.gmra.mxu0 %v394_v1  ;;  %793 = vmatpush.msrb.mxu1 %v2281_v36  ;;  %s3052_s28 = scalar_select %p655_p7, 4, 3 }
  0x59   : > { %517 = vmatmul.f32.gmra.mxu1 %v394_v1  ;;  %558 = vmatmul.f32.gmra.mxu2 %v394_v1  ;;  %s3122_s19 = scalar_select %p655_p7, 3, 4 }
  0x5a   : > { %714 = vmatpush.msrb.mxu0 %v2372_v6  ;;  %813 = vmatpush.msrb.mxu2 %v2376_v7  ;;  %s1843_s30 = smul.u32 24, %s3052_s28 }
  0x5b   : > { %684 = vmatpush.msra.mxu3 %v2369_v5  ;;  %794 = vmatpush.msrb.mxu1 %v2288_v40  ;;  %s1844_s18 = smul.u32 24, %s3122_s19  ;;  %s1824_s24 = sshll.u32 %s3122_s19, 3 }
  0x5c   : > { %715 = vmatpush.msrb.mxu0 %v2380_v8  ;;  %814 = vmatpush.msrb.mxu2 %v2390_v10  ;;  %s3056_s14 = scalar_lea.vmem [#allocation2], %s1843_s30 }
  0x5d   : > { %685 = vmatpush.msra.mxu3 %v2383_v9  ;;  %795 = vmatpush.msrb.mxu1 %v2295_v44  ;;  %s3204_s19 = scalar_select %p655_p7, 0, 7 }
  0x5e   : > { %815 = vmatpush.msrb.mxu2 %v2403_v13  ;;  %716 = vmatpush.msrb.mxu0 %v2416_v15 }
  0x5f   : > { %686 = vmatpush.msra.mxu3 %v2397_v12  ;;  %796 = vmatpush.msrb.mxu1 %v2302_v48  ;;  %s1836_s23 = sshll.u32 %s3204_s19, 3 }
  0x60   : > { %479 = vmatmul.f32.gmra.mxu0 %v395_v11  ;;  %687 = vmatmul.f32.vlgmr.msra.gmra.mxu3 %v2413_v14 }
  0x61   : > { %520 = vmatmul.f32.gmra.mxu1 %v395_v11  ;;  %561 = vmatmul.f32.gmra.mxu2 %v395_v11 }
  0x62   : > { %691 = vmatpush.msrb.mxu3 %v2333_v61  ;;  %717 = vmatpush.msrb.mxu0 %v2421_v16 }
  0x63   : > { %816 = vmatpush.msrb.mxu2 %v2427_v17  ;;  %797 = vmatpush.msrb.mxu1 %v2309_v52 }
  0x64   : > { %692 = vmatpush.msrb.mxu3 %v2346_v0  ;;  %718 = vmatpush.msrb.mxu0 %v2443_v20 }
  0x65   : > { %817 = vmatpush.msrb.mxu2 %v2437_v19  ;;  %798 = vmatpush.msrb.mxu1 %v2320_v57 }
  0x66   : > { %693 = vmatpush.msrb.mxu3 %v2359_v3  ;;  %719 = vmatpush.msrb.mxu0 %v2446_v21 }
  0x67   : > { %818 = vmatpush.msrb.mxu2 %v2450_v22  ;;  %799 = vmatpush.msrb.mxu1 %v2326_v59 }
  0x68   : > { %482 = vmatmul.f32.gmra.mxu0 %v396_v18  ;;  %694 = vmatpush.msrb.mxu3 %v2376_v7 }
  0x69   : > { %523 = vmatmul.f32.gmra.mxu1 %v396_v18  ;;  %564 = vmatmul.f32.gmra.mxu2 %v396_v18 }
  0x6a   : > { %695 = vmatpush.msrb.mxu3 %v2390_v10  ;;  %819 = vmatpush.msrb.mxu2 %v2460_v24 }
  0x6b   : > { %800 = vmatpush.msrb.mxu1 %v2337_v62  ;;  %720 = vmatpush.msrb.mxu0 %v2454_v23 }
  0x6c   : > { %696 = vmatpush.msrb.mxu3 %v2403_v13  ;;  %820 = vmatpush.msrb.mxu2 %v2470_v27 }
  0x6d   : > { %801 = vmatpush.msrb.mxu1 %v2353_v2  ;;  %721 = vmatpush.msrb.mxu0 %v2474_v29 }
  0x6e   : > { %697 = vmatpush.msrb.mxu3 %v2427_v17  ;;  %821 = vmatpush.msrb.mxu2 %v2484_v31 }
  0x6f   : > { %802 = vmatpush.msrb.mxu1 %v2363_v4  ;;  %722 = vmatpush.msrb.mxu0 %v2480_v30 }
  0x70   : > { %485 = vmatmul.f32.gmra.mxu0 %v397_v25  ;;  %698 = vmatpush.msrb.mxu3 %v2437_v19 }
  0x71   : > { %526 = vmatmul.f32.gmra.mxu1 %v397_v25  ;;  %567 = vmatmul.f32.gmra.mxu2 %v397_v25 }
  0x72   : > { %699 = vmatpush.msrb.mxu3 %v2450_v22  ;;  %822 = vmatpush.msrb.mxu2 %v2494_v34 }
  0x73   : > { %803 = vmatpush.msrb.mxu1 %v2369_v5  ;;  %723 = vmatpush.msrb.mxu0 %v2488_v33 }
  0x74   : > { %700 = vmatpush.msrb.mxu3 %v2460_v24  ;;  %823 = vmatpush.msrb.mxu2 %v2504_v37 }
  0x75   : > { %804 = vmatpush.msrb.mxu1 %v2383_v9  ;;  %724 = vmatpush.msrb.mxu0 %v2508_v38 }
  0x76   : > { %701 = vmatpush.msrb.mxu3 %v2470_v27  ;;  %824 = vmatpush.msrb.mxu2 %v2518_v41 }
  0x77   : > { %805 = vmatpush.msrb.mxu1 %v2397_v12  ;;  %725 = vmatpush.msrb.mxu0 %v2514_v39 }
  0x78   : > { %488 = vmatmul.f32.gmra.mxu0 %v398_v35  ;;  %702 = vmatpush.msrb.mxu3 %v2484_v31 }
  0x79   : > { %529 = vmatmul.f32.gmra.mxu1 %v398_v35  ;;  %570 = vmatmul.f32.gmra.mxu2 %v398_v35 }
  0x7a   : > { %703 = vmatpush.msrb.mxu3 %v2494_v34  ;;  %825 = vmatpush.msrb.mxu2 %v2528_v43 }
  0x7b   : > { %929 = vmatpush.msra.mxu1 %v2333_v61  ;;  %726 = vmatpush.msrb.mxu0 %v2522_v42 }
  0x7c   : > { %704 = vmatpush.msrb.mxu3 %v2504_v37  ;;  %949 = vmatpush.msra.mxu2 %v2323_v58 }
  0x7d   : > { %909 = vmatpush.msra.mxu0 %v2263_v26  ;;  %930 = vmatpush.msra.mxu1 %v2346_v0 }
  0x7e   : > { %705 = vmatpush.msrb.mxu3 %v2518_v41  ;;  %950 = vmatpush.msra.mxu2 %v2329_v60 }
  0x7f   : > { %910 = vmatpush.msra.mxu0 %v2267_v28  ;;  %931 = vmatpush.msra.mxu1 %v2359_v3 }
  0x80   : > { %491 = vmatmul.f32.gmra.mxu0 %v399_v45  ;;  %706 = vmatpush.msrb.mxu3 %v2528_v43 }
  0x81   : > { %532 = vmatmul.f32.gmra.mxu1 %v399_v45  ;;  %573 = vmatmul.f32.gmra.mxu2 %v399_v45 }
  0x82   : > { %707 = vmatmul.f32.vlgmr.msrb.gmra.mxu3 %v2413_v14  ;;  %911 = vmatpush.msra.mxu0 %v2274_v32 }
  0x83   : > { %830 = vmatpush.msra.mxu3 %v2323_v58  ;;  %951 = vmatpush.msra.mxu2 %v2340_v63 }
  0x84   : > { %912 = vmatpush.msra.mxu0 %v2281_v36  ;;  %932 = vmatpush.msra.mxu1 %v2376_v7 }
  0x85   : > { %831 = vmatpush.msra.mxu3 %v2329_v60  ;;  %952 = vmatpush.msra.mxu2 %v2372_v6 }
  0x86   : > { %913 = vmatpush.msra.mxu0 %v2288_v40  ;;  %933 = vmatpush.msra.mxu1 %v2390_v10 }
  0x87   : > { %832 = vmatpush.msra.mxu3 %v2340_v63  ;;  %953 = vmatpush.msra.mxu2 %v2380_v8 }
  0x88   : > { %494 = vmatmul.f32.gmra.mxu0 %v400_v46  ;;  %934 = vmatpush.msra.mxu1 %v2403_v13 }
  0x89   : > { %535 = vmatmul.f32.gmra.mxu1 %v400_v46  ;;  %576 = vmatmul.f32.gmra.mxu2 %v400_v46 }
  0x8a   : > { %833 = vmatpush.msra.mxu3 %v2372_v6  ;;  %914 = vmatpush.msra.mxu0 %v2295_v44 }
  0x8b   : > { %954 = vmatpush.msra.mxu2 %v2416_v15  ;;  %935 = vmatpush.msra.mxu1 %v2427_v17 }
  0x8c   : > { %834 = vmatpush.msra.mxu3 %v2380_v8  ;;  %915 = vmatpush.msra.mxu0 %v2302_v48 }
  0x8d   : > { %955 = vmatpush.msra.mxu2 %v2421_v16  ;;  %936 = vmatpush.msra.mxu1 %v2437_v19 }
  0x8e   : > { %835 = vmatpush.msra.mxu3 %v2416_v15  ;;  %916 = vmatpush.msra.mxu0 %v2309_v52 }
  0x8f   : > { %956 = vmatpush.msra.mxu2 %v2443_v20  ;;  %937 = vmatpush.msra.mxu1 %v2450_v22 }
  0x90   : > { %727 = vmatmul.f32.vlgmr.msrb.gmra.mxu0 %v2413_v14  ;;  %836 = vmatpush.msra.mxu3 %v2421_v16 }
  0x91   : > { %917 = vmatpush.msra.mxu0 %v2320_v57  ;;  %957 = vmatpush.msra.mxu2 %v2446_v21 }
  0x92   : > { %837 = vmatpush.msra.mxu3 %v2443_v20  ;;  %938 = vmatpush.msra.mxu1 %v2460_v24 }
  0x93   : > { %918 = vmatpush.msra.mxu0 %v2326_v59  ;;  %958 = vmatpush.msra.mxu2 %v2454_v23 }
  0x94   : > { %838 = vmatpush.msra.mxu3 %v2446_v21  ;;  %939 = vmatpush.msra.mxu1 %v2470_v27 }
  0x95   : > { %919 = vmatpush.msra.mxu0 %v2337_v62  ;;  %959 = vmatpush.msra.mxu2 %v2474_v29 }
  0x96   : > { %839 = vmatpush.msra.mxu3 %v2454_v23  ;;  %940 = vmatpush.msra.mxu1 %v2484_v31 }
  0x97   : > { %920 = vmatpush.msra.mxu0 %v2353_v2  ;;  %960 = vmatpush.msra.mxu2 %v2480_v30 }
  0x98   : > { %840 = vmatpush.msra.mxu3 %v2474_v29  ;;  %941 = vmatpush.msra.mxu1 %v2494_v34 }
  0x99   : > { %921 = vmatpush.msra.mxu0 %v2363_v4  ;;  %961 = vmatpush.msra.mxu2 %v2488_v33 }
  0x9a   : > { %841 = vmatpush.msra.mxu3 %v2480_v30  ;;  %942 = vmatpush.msra.mxu1 %v2504_v37 }
  0x9b   : > { %922 = vmatpush.msra.mxu0 %v2369_v5  ;;  %962 = vmatpush.msra.mxu2 %v2508_v38 }
  0x9c   : > { %842 = vmatpush.msra.mxu3 %v2488_v33  ;;  %943 = vmatpush.msra.mxu1 %v2518_v41 }
  0x9d   : > { %923 = vmatpush.msra.mxu0 %v2383_v9  ;;  %963 = vmatpush.msra.mxu2 %v2514_v39 }
  0x9e   : > { %843 = vmatpush.msra.mxu3 %v2508_v38  ;;  %944 = vmatpush.msra.mxu1 %v2528_v43 }
  0x9f   : > { %924 = vmatpush.msra.mxu0 %v2397_v12  ;;  %964 = vmatpush.msra.mxu2 %v2522_v42 }
  0xa0   : > { %844 = vmatpush.msra.mxu3 %v2514_v39 }
  0xa1   : > { %1048 = vmatpush.msrb.mxu0 %v2333_v61 }
  0xa2   : > { %845 = vmatpush.msra.mxu3 %v2522_v42 }
  0xa3   : > { %1049 = vmatpush.msrb.mxu0 %v2346_v0 }
  0xa4   : > { %1028 = vmatpush.msrb.mxu3 %v2263_v26 }
  0xa5   : > { %1050 = vmatpush.msrb.mxu0 %v2359_v3 }
  0xa6   : > { %1029 = vmatpush.msrb.mxu3 %v2267_v28 }
  0xa7   : > { %1051 = vmatpush.msrb.mxu0 %v2376_v7 }
  0xa8   : > { %1030 = vmatpush.msrb.mxu3 %v2274_v32 }
  0xa9   : > { %1052 = vmatpush.msrb.mxu0 %v2390_v10 }
  0xaa   : > { %1031 = vmatpush.msrb.mxu3 %v2281_v36 }
  0xab   : > { %1053 = vmatpush.msrb.mxu0 %v2403_v13 }
  0xac   : > { %1032 = vmatpush.msrb.mxu3 %v2288_v40 }
  0xad   : > { %1054 = vmatpush.msrb.mxu0 %v2427_v17 }
  0xae   : > { %1033 = vmatpush.msrb.mxu3 %v2295_v44 }
  0xaf   : > { %1055 = vmatpush.msrb.mxu0 %v2437_v19 }
  0xb0   : > { %1034 = vmatpush.msrb.mxu3 %v2302_v48 }
  0xb1   : > { %1056 = vmatpush.msrb.mxu0 %v2450_v22 }
  0xb2   : > { %1035 = vmatpush.msrb.mxu3 %v2309_v52 }
  0xb3   : > { %1057 = vmatpush.msrb.mxu0 %v2460_v24 }
  0xb4   : > { %1036 = vmatpush.msrb.mxu3 %v2320_v57 }
  0xb5   : > { %1058 = vmatpush.msrb.mxu0 %v2470_v27 }
  0xb6   : > { %1037 = vmatpush.msrb.mxu3 %v2326_v59 }
  0xb7   : > { %1059 = vmatpush.msrb.mxu0 %v2484_v31 }
  0xb8   : > { %1038 = vmatpush.msrb.mxu3 %v2337_v62 }
  0xb9   : > { %1060 = vmatpush.msrb.mxu0 %v2494_v34 }
  0xba   : > { %1039 = vmatpush.msrb.mxu3 %v2353_v2 }
  0xbb   : > { %1061 = vmatpush.msrb.mxu0 %v2504_v37 }
  0xbc   : > { %1040 = vmatpush.msrb.mxu3 %v2363_v4 }
  0xbd   : > { %1062 = vmatpush.msrb.mxu0 %v2518_v41 }
  0xbe   : > { %1041 = vmatpush.msrb.mxu3 %v2369_v5 }
  0xbf   : > { %1063 = vmatpush.msrb.mxu0 %v2528_v43 }
  0xc0   : > { %1042 = vmatpush.msrb.mxu3 %v2383_v9 }
  0xc2   : > { %1043 = vmatpush.msrb.mxu3 %v2397_v12 }
  0xcd   : > { %v474_v51 = vpop.f32.mrf.mxu0 }
  0xce   : > { %v475_v53 = vadd.f32 %v474_v51, %v2645_v49  ;;  %v515_v54 = vpop.f32.mrf.mxu1 }
  0xcf   : > { %v516_v55 = vadd.f32 %v515_v54, %v2647_v50 }
  0xd0   : > { %580 = vst [vmem:[#allocation2] sm:$0xff] %v475_v53 }
  0xd1   : > { %581 = vst [vmem:[#allocation2 + $0x8] sm:$0xff] %v516_v55 }
  0xd4   : > { %v556_v1 = vpop.f32.mrf.mxu2 }
  0xd5   : > { %v557_v11 = vadd.f32 %v556_v1, %v2651_v56  ;;  %v477_v18 = vpop.f32.mrf.mxu0 }
  0xd6   : > { %v478_v25 = vadd.f32 %v477_v18, %v2645_v49  ;;  %v518_v35 = vpop.f32.mrf.mxu1 }
  0xd7   : > { %582 = vst [vmem:[#allocation2 + $0x10] sm:$0xff] %v557_v11  ;;  %v519_v45 = vadd.f32 %v518_v35, %v2647_v50 }
  0xd8   : > { %583 = vst [vmem:[#allocation2 + $0x18] sm:$0xff] %v478_v25 }
  0xd9   : > { %584 = vst [vmem:[#allocation2 + $0x20] sm:$0xff] %v519_v45 }
  0xdc   : > { %v559_v46 = vpop.f32.mrf.mxu2 }
  0xdd   : > { %v560_v51 = vadd.f32 %v559_v46, %v2651_v56  ;;  %v480_v54 = vpop.f32.mrf.mxu0 }
  0xde   : > { %v481_v53 = vadd.f32 %v480_v54, %v2645_v49  ;;  %v521_v47 = vpop.f32.mrf.mxu1 }
  0xdf   : > { %585 = vst [vmem:[#allocation2 + $0x28] sm:$0xff] %v560_v51  ;;  %v522_v55 = vadd.f32 %v521_v47, %v2647_v50 }
  0xe0   : > { %586 = vst [vmem:[#allocation2 + $0x30] sm:$0xff] %v481_v53 }
  0xe1   : > { %587 = vst [vmem:[#allocation2 + $0x38] sm:$0xff] %v522_v55 }
  0xe4   : > { %v562_v1 = vpop.f32.mrf.mxu2 }
  0xe5   : > { %v563_v18 = vadd.f32 %v562_v1, %v2651_v56  ;;  %v483_v11 = vpop.f32.mrf.mxu0 }
  0xe6   : > { %v484_v35 = vadd.f32 %v483_v11, %v2645_v49  ;;  %v524_v25 = vpop.f32.mrf.mxu1 }
  0xe7   : > { %588 = vst [vmem:[#allocation2 + $0x40] sm:$0xff] %v563_v18  ;;  %v525_v45 = vadd.f32 %v524_v25, %v2647_v50 }
  0xe8   : > { %589 = vst [vmem:[#allocation2 + $0x48] sm:$0xff] %v484_v35 }
  0xe9   : > { %590 = vst [vmem:[#allocation2 + $0x50] sm:$0xff] %v525_v45 }
  0xec   : > { %v565_v46 = vpop.f32.mrf.mxu2 }
  0xed   : > { %v566_v54 = vadd.f32 %v565_v46, %v2651_v56  ;;  %v486_v51 = vpop.f32.mrf.mxu0 }
  0xee   : > { %v487_v53 = vadd.f32 %v486_v51, %v2645_v49  ;;  %v527_v47 = vpop.f32.mrf.mxu1 }
  0xef   : > { %591 = vst [vmem:[#allocation2 + $0x58] sm:$0xff] %v566_v54  ;;  %v528_v55 = vadd.f32 %v527_v47, %v2647_v50 }
  0xf0   : > { %592 = vst [vmem:[#allocation2 + $0x60] sm:$0xff] %v487_v53 }
  0xf1   : > { %593 = vst [vmem:[#allocation2 + $0x68] sm:$0xff] %v528_v55 }
  0xf4   : > { %v568_v1 = vpop.f32.mrf.mxu2 }
  0xf5   : > { %v569_v18 = vadd.f32 %v568_v1, %v2651_v56  ;;  %v489_v11 = vpop.f32.mrf.mxu0  ;;  %v688_v1 = vpop.f32.mrf.mxu3 }
  0xf6   : > { %v490_v35 = vadd.f32 %v489_v11, %v2645_v49  ;;  %v530_v25 = vpop.f32.mrf.mxu1 }
  0xf7   : > { %594 = vst [vmem:[#allocation2 + $0x70] sm:$0xff] %v569_v18  ;;  %v531_v45 = vadd.f32 %v530_v25, %v2647_v50  ;;  %v652_v25 = vld [vmem:[%s378_s0] sm:$0x7]  ;;  %s2889_s0 = scalar_select %p655_p7, 5, 2 }
  0xf8   : > { %595 = vst [vmem:[#allocation2 + $0x78] sm:$0xff] %v490_v35  ;;  %v2699_v41 = vperm.slane %v652_v25, 2 }
  0xf9   : > { %596 = vst [vmem:[#allocation2 + $0x80] sm:$0xff] %v531_v45  ;;  %s1842_s29 = smul.u32 24, %s2889_s0 }
  0xfb   : > { %s2894_s17 = scalar_lea.vmem [#allocation2], %s1842_s29 }
  0xfc   : > { %v571_v46 = vpop.f32.mrf.mxu2 }
  0xfd   : > { %v572_v54 = vadd.f32 %v571_v46, %v2651_v56  ;;  %v492_v51 = vpop.f32.mrf.mxu0 }
  0xfe   : > { %v493_v53 = vadd.f32 %v492_v51, %v2645_v49  ;;  %v533_v47 = vpop.f32.mrf.mxu1  ;;  %v2688_v51 = vperm.slane %v652_v25, 0 }
  0xff   : > { %597 = vst [vmem:[#allocation2 + $0x88] sm:$0xff] %v572_v54  ;;  %v534_v55 = vadd.f32 %v533_v47, %v2647_v50 }
 0x100   : > { %598 = vst [vmem:[#allocation2 + $0x90] sm:$0xff] %v493_v53  ;;  %v2690_v53 = vperm.slane %v652_v25, 1 }
 0x101   : > { %599 = vst [vmem:[#allocation2 + $0x98] sm:$0xff] %v534_v55  ;;  %v689_v55 = vadd.f32 %v688_v1, %v2688_v51 }
 0x102   : > { %3280 = vst [vmem:[#allocation17_spill] sm:$0xff] %v2688_v51 }
 0x103   : > { %3281 = vst [vmem:[#allocation18_spill] sm:$0xff] %v2690_v53 }
 0x104   : > { %v574_v18 = vpop.f32.mrf.mxu2 }
 0x105   : > { %v575_v11 = vadd.f32 %v574_v18, %v2651_v56  ;;  %v495_v35 = vpop.f32.mrf.mxu0  ;;  %v708_v47 = vpop.f32.mrf.mxu3 }
 0x106   : > { %v496_v45 = vadd.f32 %v495_v35, %v2645_v49  ;;  %v536_v46 = vpop.f32.mrf.mxu1  ;;  %v709_v12 = vadd.f32 %v708_v47, %v2690_v53 }
 0x107   : > { %600 = vst [vmem:[#allocation2 + $0xa0] sm:$0xff] %v575_v11  ;;  %v537_v54 = vadd.f32 %v536_v46, %v2647_v50 }
 0x108   : > { %601 = vst [vmem:[#allocation2 + $0xa8] sm:$0xff] %v496_v45 }
 0x109   : > { %602 = vst [vmem:[#allocation2 + $0xb0] sm:$0xff] %v537_v54 }
 0x10c   : > { %v577_v43 = vpop.f32.mrf.mxu2 }
 0x10d   : > { %v578_v18 = vadd.f32 %v577_v43, %v2651_v56 }
 0x110   : > { %v661_v49 = vld [vmem:[%s2695_s21] sm:$0xff] }
 0x111   : > { %603 = vst [vmem:[#allocation2 + $0xb8] sm:$0xff] %v578_v18  ;;  %v731_v50 = vadd.f32 %v689_v55, %v661_v49  ;;  %v728_v49 = vpop.f32.mrf.mxu0 }
 0x113   : > { %v1806_v45 = vmul.f32 -1.442695, %v731_v50 }
 0x115   : > { %1895 = vpow2.f32 %v1806_v45  ;;  %v729_v45 = vadd.f32 %v728_v49, %v2699_v41 }
 0x118   : > { %v662_v11 = vld [vmem:[%s2695_s21 + $0x8] sm:$0xff] }
 0x119   : > { %v751_v35 = vadd.f32 %v709_v12, %v662_v11 }
 0x11b   : > { %v1807_v46 = vmul.f32 -1.442695, %v751_v35  ;;  %v1896_v54 = vpop.eup %1895 }
 0x11c   : > { %v735_v51 = vadd.f32 1.0, %v1896_v54 }
 0x11d   : > { %1897 = vpow2.f32 %v1807_v46 }
 0x11e   : > { %1899 = vrcp.f32 %v735_v51  ;;  %v747_v12 = vand.u32 2147483648, %v735_v51  ;;  %v745_v11 = vand.u32 2147483647, %v735_v51  ;;  %vm741_vm1 = vweird.f32 %v735_v51 }
 0x120   : > { %v748_v54 = vor.u32 1.1754944e-38, %v747_v12  ;;  %vm746_vm3 = vcmp.eq.f32.partialorder %v745_v11, 8.507059e+37 }
 0x123   : > { %v1898_v1 = vpop.eup %1897 }
 0x124   : > { %v755_v42 = vadd.f32 1.0, %v1898_v1  ;;  %v1900_v43 = vpop.eup %1899 }
 0x125   : > { %v737_v47 = vmul.f32 %v1900_v43, %v735_v51  ;;  %vm742_vm0 = vweird.f32 %v1900_v43 }
 0x126   : > { %1901 = vrcp.f32 %v755_v42  ;;  %vm743_vm2 = vmor %vm741_vm1, %vm742_vm0  ;;  %vm761_vm5 = vweird.f32 %v755_v42  ;;  %v765_v39 = vand.u32 2147483647, %v755_v42 }
 0x127   : > { %v738_v18 = vsub.f32 1.0, %v737_v47  ;;  %v767_v47 = vand.u32 2147483648, %v755_v42 }
 0x128   : > { %vm766_vm7 = vcmp.eq.f32.partialorder %v765_v39, 8.507059e+37 }
 0x129   : > { %v739_v50 = vmul.f32 %v1900_v43, %v738_v18  ;;  %v663_v18 = vld [vmem:[%s2695_s21 + $0x10] sm:$0xff]  ;;  %v768_v49 = vor.u32 1.1754944e-38, %v767_v47  ;;  %s1816_s21 = sshll.u32 %s2889_s0, 3 }
 0x12a   : > { %s1018_s26 = scalar_lea.vmem %s2707_s9, %s1816_s21 }
 0x12b   : > { %v740_v46 = vadd.f32 %v1900_v43, %v739_v50  ;;  %s3160_s0 = scalar_select %p655_p7, 2, 5 }
 0x12c   : > { %v1902_v56 = vpop.eup %1901 }
 0x12d   : > { %v757_v53 = vmul.f32 %v1902_v56, %v755_v42  ;;  %v744_v1 = vsel %vm743_vm2, %v1900_v43, %v740_v46  ;;  %vm762_vm4 = vweird.f32 %v1902_v56  ;;  %s1845_s29 = smul.u32 24, %s3160_s0  ;;  %s1828_s21 = sshll.u32 %s3160_s0, 3 }
 0x12e   : > { %v749_v25 = vsel %vm746_vm3, %v748_v54, %v744_v1  ;;  %vm763_vm6 = vmor %vm761_vm5, %vm762_vm4 }
 0x12f   : > { %v758_v55 = vsub.f32 1.0, %v757_v53  ;;  %v771_v9 = vmul.f32 %v749_v25, %v729_v45 }
 0x131   : > { %v759_v35 = vmul.f32 %v1902_v56, %v758_v55  ;;  %v772_v55 = vadd.f32 %v771_v9, %v663_v18 }
 0x133   : > { %v760_v53 = vadd.f32 %v1902_v56, %v759_v35  ;;  %1903 = vtanh.f32 %v772_v55 }
 0x135   : > { %v764_v37 = vsel %vm763_vm6, %v1902_v56, %v760_v53 }
 0x136   : > { %v769_v51 = vsel %vm766_vm7, %v768_v49, %v764_v37  ;;  %v788_v37 = vld [vmem:[%s2772_s22 + $0x8] sm:$0xff] }
 0x137   : > { %v774_v43 = vsub.f32 1.0, %v769_v51  ;;  %v776_v42 = vmul.f32 %v769_v51, %v2413_v14 }
 0x139   : > { %v1904_v12 = vpop.eup %1903 }
 0x13a   : > { %v775_v50 = vmul.f32 %v1904_v12, %v774_v43 }
 0x13c   : > { %v2712_v9 = vadd.f32 %v776_v42, %v775_v50 }
 0x13e   : > { %781 = vst [vmem:[%s780_s20] sm:$0xff] %v2712_v9  ;;  %806 = vmatmul.f32.vlgmr.msrb.gmra.mxu1 %v2712_v9  ;;  %826 = vmatmul.f32.vlgmr.msrb.gmra.mxu2 %v2712_v9 }
 0x13f   : > { %846 = vmatmul.f32.vlgmr.msra.gmra.mxu3 %v2712_v9  ;;  %1068 = vmatpush.msrb.mxu1 %v2323_v58 }
 0x140   : > { %1147 = vmatpush.msrb.mxu2 %v2263_v26  ;;  %1167 = vmatpush.msra.mxu3 %v2333_v61  ;;  %v3282_v26 = vld [vmem:[#allocation12_spill] sm:$0xff] }
 0x141   : > { %1069 = vmatpush.msrb.mxu1 %v2329_v60 }
 0x142   : > { %1148 = vmatpush.msrb.mxu2 %v2267_v28  ;;  %1168 = vmatpush.msra.mxu3 %v2346_v0  ;;  %v3283_v28 = vld [vmem:[#allocation13_spill] sm:$0xff] }
 0x143   : > { %1070 = vmatpush.msrb.mxu1 %v2340_v63 }
 0x144   : > { %1149 = vmatpush.msrb.mxu2 %v2274_v32  ;;  %1169 = vmatpush.msra.mxu3 %v2359_v3  ;;  %v3284_v32 = vld [vmem:[#allocation10_spill] sm:$0xff] }
 0x145   : > { %1071 = vmatpush.msrb.mxu1 %v2372_v6 }
 0x146   : > { %1150 = vmatpush.msrb.mxu2 %v2281_v36  ;;  %1170 = vmatpush.msra.mxu3 %v2376_v7  ;;  %v3285_v36 = vld [vmem:[#allocation14_spill] sm:$0xff] }
 0x147   : > { %1072 = vmatpush.msrb.mxu1 %v2380_v8 }
 0x148   : > { %1151 = vmatpush.msrb.mxu2 %v2288_v40  ;;  %1171 = vmatpush.msra.mxu3 %v2390_v10  ;;  %v3286_v40 = vld [vmem:[#allocation15_spill] sm:$0xff] }
 0x149   : > { %1073 = vmatpush.msrb.mxu1 %v2416_v15 }
 0x14a   : > { %1152 = vmatpush.msrb.mxu2 %v2295_v44  ;;  %1172 = vmatpush.msra.mxu3 %v2403_v13  ;;  %v3287_v44 = vld [vmem:[#allocation11_spill] sm:$0xff] }
 0x14b   : > { %1074 = vmatpush.msrb.mxu1 %v2421_v16 }
 0x14c   : > { %1153 = vmatpush.msrb.mxu2 %v2302_v48  ;;  %1173 = vmatpush.msra.mxu3 %v2427_v17  ;;  %v3288_v48 = vld [vmem:[#allocation16_spill] sm:$0xff] }
 0x14d   : > { %1075 = vmatpush.msrb.mxu1 %v2443_v20 }
 0x14e   : > { %1154 = vmatpush.msrb.mxu2 %v2309_v52  ;;  %1174 = vmatpush.msra.mxu3 %v2437_v19 }
 0x14f   : > { %1076 = vmatpush.msrb.mxu1 %v2446_v21 }
 0x150   : > { %1155 = vmatpush.msrb.mxu2 %v2320_v57  ;;  %1175 = vmatpush.msra.mxu3 %v2450_v22  ;;  %v3289_v57 = vld [vmem:[#allocation17_spill] sm:$0xff] }
 0x151   : > { %1077 = vmatpush.msrb.mxu1 %v2454_v23 }
 0x152   : > { %1156 = vmatpush.msrb.mxu2 %v2326_v59  ;;  %1176 = vmatpush.msra.mxu3 %v2460_v24  ;;  %v787_v59 = vld [vmem:[%s2772_s22] sm:$0xff] }
 0x153   : > { %1078 = vmatpush.msrb.mxu1 %v2474_v29 }
 0x154   : > { %1157 = vmatpush.msrb.mxu2 %v2337_v62  ;;  %1177 = vmatpush.msra.mxu3 %v2470_v27 }
 0x155   : > { %1079 = vmatpush.msrb.mxu1 %v2480_v30 }
 0x156   : > { %1158 = vmatpush.msrb.mxu2 %v2353_v2  ;;  %1178 = vmatpush.msra.mxu3 %v2484_v31 }
 0x157   : > { %1080 = vmatpush.msrb.mxu1 %v2488_v33 }
 0x158   : > { %1159 = vmatpush.msrb.mxu2 %v2363_v4  ;;  %1179 = vmatpush.msra.mxu3 %v2494_v34 }
 0x159   : > { %1081 = vmatpush.msrb.mxu1 %v2508_v38 }
 0x15a   : > { %1160 = vmatpush.msrb.mxu2 %v2369_v5  ;;  %1180 = vmatpush.msra.mxu3 %v3282_v26  ;;  %v3290_v5 = vld [vmem:[#allocation18_spill] sm:$0xff] }
 0x15b   : > { %1082 = vmatpush.msrb.mxu1 %v3283_v28 }
 0x15c   : > { %1161 = vmatpush.msrb.mxu2 %v3284_v32  ;;  %1181 = vmatpush.msra.mxu3 %v3285_v36 }
 0x15d   : > { %1083 = vmatpush.msrb.mxu1 %v3286_v40 }
 0x15e   : > { %1162 = vmatpush.msrb.mxu2 %v3287_v44  ;;  %1182 = vmatpush.msra.mxu3 %v3288_v48 }
 0x1bb   : > { %v807_v52 = vpop.f32.mrf.mxu1 }
 0x1bc   : > { %v808_v58 = vadd.f32 %v807_v52, %v3289_v57 }
 0x1be   : > { %v850_v62 = vadd.f32 %v808_v58, %v787_v59 }
 0x1c0   : > { %v1810_v2 = vmul.f32 -1.442695, %v850_v62  ;;  %v789_v62 = vld [vmem:[%s2772_s22 + $0x10] sm:$0xff]  ;;  %s3127_s22 = scalar_lea.vmem [#allocation2], %s1844_s18  ;;  %s1847_s18 = smul.u32 24, %s3204_s19 }
 0x1c1   : > { %v827_v4 = vpop.f32.mrf.mxu2 }
 0x1c2   : > { %1905 = vpow2.f32 %v1810_v2  ;;  %v828_v14 = vadd.f32 %v827_v4, %v3290_v5  ;;  %v847_v49 = vpop.f32.mrf.mxu3 }
 0x1c3   : > { %v848_v42 = vadd.f32 %v847_v49, %v2699_v41 }
 0x1c4   : > { %v870_v39 = vadd.f32 %v828_v14, %v788_v37 }
 0x1c6   : > { %v1811_v56 = vmul.f32 -1.442695, %v870_v39 }
 0x1c8   : > { %v1906_v11 = vpop.eup %1905  ;;  %1907 = vpow2.f32 %v1811_v56 }
 0x1c9   : > { %v854_v35 = vadd.f32 1.0, %v1906_v11 }
 0x1cb   : > { %1909 = vrcp.f32 %v854_v35  ;;  %v866_v53 = vand.u32 2147483648, %v854_v35  ;;  %v864_v18 = vand.u32 2147483647, %v854_v35  ;;  %vm860_vm9 = vweird.f32 %v854_v35 }
 0x1cd   : > { %v867_v12 = vor.u32 1.1754944e-38, %v866_v53  ;;  %vm865_vm11 = vcmp.eq.f32.partialorder %v864_v18, 8.507059e+37  ;;  %v2805_v53 = vld [vmem:[%s2255_s27 + $0x138] sm:$0xff] }
 0x1ce   : > { %v1908_v45 = vpop.eup %1907 }
 0x1cf   : > { %v874_v46 = vadd.f32 1.0, %v1908_v45 }
 0x1d1   : > { %v1910_v54 = vpop.eup %1909  ;;  %1911 = vrcp.f32 %v874_v46  ;;  %v886_v58 = vand.u32 2147483648, %v874_v46  ;;  %v884_v2 = vand.u32 2147483647, %v874_v46  ;;  %vm880_vm13 = vweird.f32 %v874_v46 }
 0x1d2   : > { %v856_v1 = vmul.f32 %v1910_v54, %v854_v35  ;;  %vm861_vm8 = vweird.f32 %v1910_v54 }
 0x1d3   : > { %vm862_vm10 = vmor %vm860_vm9, %vm861_vm8  ;;  %v887_v37 = vor.u32 1.1754944e-38, %v886_v58  ;;  %vm885_vm15 = vcmp.eq.f32.partialorder %v884_v2, 8.507059e+37  ;;  %v908_v2 = vld [vmem:[%s2894_s17 + $0x10] sm:$0xff] }
 0x1d4   : > { %v857_v25 = vsub.f32 1.0, %v856_v1  ;;  %v2789_v1 = vld [vmem:[%s2255_s27 + $0x178] sm:$0xff] }
 0x1d6   : > { %v858_v47 = vmul.f32 %v1910_v54, %v857_v25  ;;  %v2793_v25 = vld [vmem:[%s2255_s27 + $0x168] sm:$0xff] }
 0x1d7   : > { %v1912_v55 = vpop.eup %1911 }
 0x1d8   : > { %v876_v51 = vmul.f32 %v1912_v55, %v874_v46  ;;  %v859_v43 = vadd.f32 %v1910_v54, %v858_v47  ;;  %vm881_vm12 = vweird.f32 %v1912_v55 }
 0x1d9   : > { %vm882_vm14 = vmor %vm880_vm13, %vm881_vm12 }
 0x1da   : > { %v877_v50 = vsub.f32 1.0, %v876_v51  ;;  %v863_v32 = vsel %vm862_vm10, %v1910_v54, %v859_v43 }
 0x1db   : > { %v868_v44 = vsel %vm865_vm11, %v867_v12, %v863_v32 }
 0x1dc   : > { %v878_v52 = vmul.f32 %v1912_v55, %v877_v50  ;;  %v890_v59 = vmul.f32 %v868_v44, %v848_v42 }
 0x1de   : > { %v879_v4 = vadd.f32 %v1912_v55, %v878_v52  ;;  %v891_v14 = vadd.f32 %v890_v59, %v789_v62 }
 0x1e0   : > { %v883_v39 = vsel %vm882_vm14, %v1912_v55, %v879_v4  ;;  %1913 = vtanh.f32 %v891_v14 }
 0x1e1   : > { %v888_v56 = vsel %vm885_vm15, %v887_v37, %v883_v39 }
 0x1e2   : > { %v893_v11 = vsub.f32 1.0, %v888_v56  ;;  %v895_v54 = vmul.f32 %v888_v56, %v2712_v9  ;;  %v2799_v9 = vld [vmem:[%s2255_s27 + $0x150] sm:$0xff] }
 0x1e6   : > { %v1914_v35 = vpop.eup %1913 }
 0x1e7   : > { %v894_v45 = vmul.f32 %v1914_v35, %v893_v11 }
 0x1e9   : > { %v2782_v46 = vadd.f32 %v895_v54, %v894_v45 }
 0x1eb   : > { %900 = vst [vmem:[%s899_s25] sm:$0xff] %v2782_v46  ;;  %925 = vmatmul.f32.vlgmr.msra.gmra.mxu0 %v2782_v46  ;;  %945 = vmatmul.f32.vlgmr.msra.gmra.mxu1 %v2782_v46  ;;  %s1256_s25 = scalar_lea.vmem %s2707_s9, %s1824_s24  ;;  %s1613_s24 = scalar_lea.vmem %s2707_s9, %s1836_s23 }
 0x1ec   : > { %965 = vmatmul.f32.vlgmr.msra.gmra.mxu2 %v2782_v46  ;;  %1187 = vmatpush.msra.mxu0 %v2789_v1 }
 0x1ed   : > { %1266 = vmatpush.msra.mxu1 %v2793_v25  ;;  %1286 = vmatpush.msra.mxu2 %v2333_v61  ;;  %v2811_v61 = vld [vmem:[%s2255_s27 + $0x120] sm:$0xff] }
 0x1ee   : > { %1188 = vmatpush.msra.mxu0 %v2329_v60  ;;  %v2817_v60 = vld [vmem:[%s2255_s27 + $0x108] sm:$0xff] }
 0x1ef   : > { %1267 = vmatpush.msra.mxu1 %v2799_v9  ;;  %1287 = vmatpush.msra.mxu2 %v2346_v0  ;;  %v2829_v0 = vld [vmem:[%s2255_s27 + $0xd8] sm:$0xff] }
 0x1f0   : > { %1189 = vmatpush.msra.mxu0 %v2340_v63  ;;  %v2823_v63 = vld [vmem:[%s2255_s27 + $0xf0] sm:$0xff] }
 0x1f1   : > { %1268 = vmatpush.msra.mxu1 %v2805_v53  ;;  %1288 = vmatpush.msra.mxu2 %v2359_v3  ;;  %v2835_v3 = vld [vmem:[%s2255_s27 + $0xc0] sm:$0xff] }
 0x1f2   : > { %1190 = vmatpush.msra.mxu0 %v2372_v6  ;;  %v2841_v6 = vld [vmem:[%s2255_s27 + $0xa8] sm:$0xff] }
 0x1f3   : > { %1269 = vmatpush.msra.mxu1 %v2811_v61  ;;  %1289 = vmatpush.msra.mxu2 %v2376_v7  ;;  %v2847_v7 = vld [vmem:[%s2255_s27 + $0x90] sm:$0xff] }
 0x1f4   : > { %1191 = vmatpush.msra.mxu0 %v2380_v8  ;;  %v2853_v8 = vld [vmem:[%s2255_s27 + $0x78] sm:$0xff] }
 0x1f5   : > { %1270 = vmatpush.msra.mxu1 %v2817_v60  ;;  %1290 = vmatpush.msra.mxu2 %v2390_v10  ;;  %v2859_v10 = vld [vmem:[%s2255_s27 + $0x60] sm:$0xff] }
 0x1f6   : > { %1192 = vmatpush.msra.mxu0 %v2416_v15  ;;  %v2871_v15 = vld [vmem:[%s2255_s27 + $0x30] sm:$0xff] }
 0x1f7   : > { %1271 = vmatpush.msra.mxu1 %v2823_v63  ;;  %1291 = vmatpush.msra.mxu2 %v2403_v13  ;;  %v2865_v13 = vld [vmem:[%s2255_s27 + $0x48] sm:$0xff] }
 0x1f8   : > { %1193 = vmatpush.msra.mxu0 %v2421_v16  ;;  %v2877_v16 = vld [vmem:[%s2255_s27 + $0x18] sm:$0xff] }
 0x1f9   : > { %1272 = vmatpush.msra.mxu1 %v2829_v0  ;;  %1292 = vmatpush.msra.mxu2 %v2427_v17  ;;  %3291 = vst [vmem:[#allocation12_spill] sm:$0xff] %v2877_v16  ;;  %v2883_v17 = vld [vmem:[%s2255_s27] sm:$0xff] }
 0x1fa   : > { %1194 = vmatpush.msra.mxu0 %v2443_v20  ;;  %3292 = vst [vmem:[#allocation13_spill] sm:$0xff] %v2883_v17 }
 0x1fb   : > { %1273 = vmatpush.msra.mxu1 %v2835_v3  ;;  %1293 = vmatpush.msra.mxu2 %v2437_v19 }
 0x1fc   : > { %1195 = vmatpush.msra.mxu0 %v2446_v21 }
 0x1fd   : > { %1274 = vmatpush.msra.mxu1 %v2841_v6  ;;  %1294 = vmatpush.msra.mxu2 %v2450_v22 }
 0x1fe   : > { %1196 = vmatpush.msra.mxu0 %v2454_v23  ;;  %v906_v23 = vld [vmem:[%s2894_s17] sm:$0xff] }
 0x1ff   : > { %1275 = vmatpush.msra.mxu1 %v2847_v7  ;;  %1295 = vmatpush.msra.mxu2 %v2460_v24  ;;  %v907_v24 = vld [vmem:[%s2894_s17 + $0x8] sm:$0xff]  ;;  %s3164_s17 = scalar_lea.vmem [#allocation2], %s1845_s29  ;;  %s391_s29 = scalar_lea.vmem %s3244_s8, %s1801_s15 }
 0x200   : > { %1197 = vmatpush.msra.mxu0 %v2474_v29 }
 0x201   : > { %1276 = vmatpush.msra.mxu1 %v2853_v8  ;;  %1296 = vmatpush.msra.mxu2 %v2470_v27 }
 0x202   : > { %1198 = vmatpush.msra.mxu0 %v2480_v30 }
 0x203   : > { %1277 = vmatpush.msra.mxu1 %v2859_v10  ;;  %1297 = vmatpush.msra.mxu2 %v2484_v31 }
 0x204   : > { %1199 = vmatpush.msra.mxu0 %v2488_v33 }
 0x205   : > { %1278 = vmatpush.msra.mxu1 %v2865_v13  ;;  %1298 = vmatpush.msra.mxu2 %v2494_v34 }
 0x206   : > { %1200 = vmatpush.msra.mxu0 %v2508_v38 }
 0x207   : > { %1279 = vmatpush.msra.mxu1 %v2871_v15  ;;  %1299 = vmatpush.msra.mxu2 %v3282_v26 }
 0x208   : > { %1201 = vmatpush.msra.mxu0 %v3283_v28 }
 0x209   : > { %1280 = vmatpush.msra.mxu1 %v2877_v16  ;;  %1300 = vmatpush.msra.mxu2 %v3285_v36 }
 0x20a   : > { %1202 = vmatpush.msra.mxu0 %v3286_v40 }
 0x20b   : > { %1281 = vmatpush.msra.mxu1 %v2883_v17  ;;  %1301 = vmatpush.msra.mxu2 %v3288_v48 }
 0x268   : > { %v926_v19 = vpop.f32.mrf.mxu0  ;;  %v946_v20 = vpop.f32.mrf.mxu1 }
 0x269   : > { %v927_v21 = vadd.f32 %v926_v19, %v3289_v57  ;;  %v947_v22 = vadd.f32 %v946_v20, %v3290_v5  ;;  %v2916_v20 = vld [vmem:[%s2255_s27 + $0x160] sm:$0xff] }
 0x26b   : > { %v969_v27 = vadd.f32 %v927_v21, %v906_v23  ;;  %v989_v29 = vadd.f32 %v947_v22, %v907_v24  ;;  %v2921_v21 = vld [vmem:[%s2255_s27 + $0x158] sm:$0xff]  ;;  %v2925_v22 = vld [vmem:[%s2255_s27 + $0x148] sm:$0xff]  ;;  %v2930_v23 = vld [vmem:[%s2255_s27 + $0x140] sm:$0xff] }
 0x26c   : > { %v2934_v24 = vld [vmem:[%s2255_s27 + $0x130] sm:$0xff] }
 0x26d   : > { %v1814_v30 = vmul.f32 -1.442695, %v969_v27  ;;  %v1815_v31 = vmul.f32 -1.442695, %v989_v29  ;;  %v2939_v27 = vld [vmem:[%s2255_s27 + $0x128] sm:$0xff]  ;;  %v2943_v29 = vld [vmem:[%s2255_s27 + $0x118] sm:$0xff] }
 0x26f   : > { %1915 = vpow2.f32 %v1814_v30  ;;  %v966_v12 = vpop.f32.mrf.mxu2  ;;  %v2948_v30 = vld [vmem:[%s2255_s27 + $0x110] sm:$0xff] }
 0x270   : > { %1917 = vpow2.f32 %v1815_v31  ;;  %v967_v32 = vadd.f32 %v966_v12, %v2699_v41  ;;  %v2952_v31 = vld [vmem:[%s2255_s27 + $0x100] sm:$0xff]  ;;  %v3020_v12 = vld [vmem:[%s2255_s27 + $0x50] sm:$0xff] }
 0x275   : > { %v1916_v33 = vpop.eup %1915 }
 0x276   : > { %v1918_v34 = vpop.eup %1917  ;;  %v973_v38 = vadd.f32 1.0, %v1916_v33  ;;  %v2957_v33 = vld [vmem:[%s2255_s27 + $0xf8] sm:$0xff] }
 0x277   : > { %v993_v26 = vadd.f32 1.0, %v1918_v34  ;;  %v2961_v34 = vld [vmem:[%s2255_s27 + $0xe8] sm:$0xff] }
 0x278   : > { %1919 = vrcp.f32 %v973_v38  ;;  %v985_v55 = vand.u32 2147483648, %v973_v38  ;;  %v983_v51 = vand.u32 2147483647, %v973_v38  ;;  %vm979_vm1 = vweird.f32 %v973_v38 }
 0x279   : > { %1921 = vrcp.f32 %v993_v26  ;;  %v1005_v59 = vand.u32 2147483648, %v993_v26  ;;  %vm999_vm5 = vweird.f32 %v993_v26  ;;  %v1003_v4 = vand.u32 2147483647, %v993_v26 }
 0x27a   : > { %v986_v42 = vor.u32 1.1754944e-38, %v985_v55  ;;  %vm984_vm3 = vcmp.eq.f32.partialorder %v983_v51, 8.507059e+37  ;;  %v3002_v55 = vld [vmem:[%s2255_s27 + $0x80] sm:$0xff]  ;;  %v3011_v51 = vld [vmem:[%s2255_s27 + $0x68] sm:$0xff] }
 0x27b   : > { %v1006_v39 = vor.u32 1.1754944e-38, %v1005_v59  ;;  %vm1004_vm7 = vcmp.eq.f32.partialorder %v1003_v4, 8.507059e+37 }
 0x27e   : > { %v1920_v28 = vpop.eup %1919 }
 0x27f   : > { %v1922_v36 = vpop.eup %1921  ;;  %v975_v40 = vmul.f32 %v1920_v28, %v973_v38  ;;  %vm980_vm0 = vweird.f32 %v1920_v28  ;;  %v2966_v38 = vld [vmem:[%s2255_s27 + $0xe0] sm:$0xff] }
 0x280   : > { %v995_v48 = vmul.f32 %v1922_v36, %v993_v26  ;;  %vm981_vm2 = vmor %vm979_vm1, %vm980_vm0  ;;  %vm1000_vm4 = vweird.f32 %v1922_v36  ;;  %v2970_v26 = vld [vmem:[%s2255_s27 + $0xd0] sm:$0xff] }
 0x281   : > { %v976_v47 = vsub.f32 1.0, %v975_v40  ;;  %vm1001_vm6 = vmor %vm999_vm5, %vm1000_vm4  ;;  %v2984_v40 = vld [vmem:[%s2255_s27 + $0xb0] sm:$0xff] }
 0x282   : > { %v996_v18 = vsub.f32 1.0, %v995_v48  ;;  %v2988_v48 = vld [vmem:[%s2255_s27 + $0xa0] sm:$0xff] }
 0x283   : > { %v977_v49 = vmul.f32 %v1920_v28, %v976_v47  ;;  %v2993_v47 = vld [vmem:[%s2255_s27 + $0x98] sm:$0xff] }
 0x284   : > { %v997_v43 = vmul.f32 %v1922_v36, %v996_v18  ;;  %v2997_v18 = vld [vmem:[%s2255_s27 + $0x88] sm:$0xff] }
 0x285   : > { %v978_v50 = vadd.f32 %v1920_v28, %v977_v49  ;;  %v3006_v49 = vld [vmem:[%s2255_s27 + $0x70] sm:$0xff] }
 0x286   : > { %v998_v58 = vadd.f32 %v1922_v36, %v997_v43  ;;  %v3015_v43 = vld [vmem:[%s2255_s27 + $0x58] sm:$0xff] }
 0x287   : > { %v982_v44 = vsel %vm981_vm2, %v1920_v28, %v978_v50  ;;  %v2975_v28 = vld [vmem:[%s2255_s27 + $0xc8] sm:$0xff]  ;;  %v3024_v50 = vld [vmem:[%s2255_s27 + $0x40] sm:$0xff] }
 0x288   : > { %v987_v52 = vsel %vm984_vm3, %v986_v42, %v982_v44  ;;  %v1002_v37 = vsel %vm1001_vm6, %v1922_v36, %v998_v58  ;;  %v2979_v36 = vld [vmem:[%s2255_s27 + $0xb8] sm:$0xff]  ;;  %v3038_v44 = vld [vmem:[%s2255_s27 + $0x20] sm:$0xff]  ;;  %v3047_v58 = vld [vmem:[%s2255_s27 + $0x8] sm:$0xff] }
 0x289   : > { %v1009_v62 = vmul.f32 %v987_v52, %v967_v32  ;;  %v1007_v56 = vsel %vm1004_vm7, %v1006_v39, %v1002_v37  ;;  %v3029_v42 = vld [vmem:[%s2255_s27 + $0x38] sm:$0xff]  ;;  %v3033_v32 = vld [vmem:[%s2255_s27 + $0x28] sm:$0xff]  ;;  %3294 = vst [vmem:[#allocation14_spill] sm:$0xff] %v3038_v44  ;;  %v3042_v52 = vld [vmem:[%s2255_s27 + $0x10] sm:$0xff] }
 0x28a   : > { %v1012_v11 = vsub.f32 1.0, %v1007_v56  ;;  %v1014_v54 = vmul.f32 %v1007_v56, %v2782_v46  ;;  %v2912_v46 = vld [vmem:[%s2255_s27 + $0x170] sm:$0xff]  ;;  %3293 = vst [vmem:[#allocation10_spill] sm:$0xff] %v3033_v32  ;;  %v1025_v56 = vld [vmem:[%s3056_s14] sm:$0xff]  ;;  %s1820_s27 = sshll.u32 %s3052_s28, 3 }
 0x28b   : > { %v1010_v14 = vadd.f32 %v1009_v62, %v908_v2  ;;  %3295 = vst [vmem:[#allocation15_spill] sm:$0xff] %v3042_v52  ;;  %v1026_v2 = vld [vmem:[%s3056_s14 + $0x8] sm:$0xff]  ;;  %s1137_s20 = scalar_lea.vmem %s2707_s9, %s1820_s27 }
 0x28c   : > { %3296 = vst [vmem:[#allocation11_spill] sm:$0xff] %v3047_v58  ;;  %s3182_s28 = scalar_select %p655_p7, 1, 6 }
 0x28d   : > { %1923 = vtanh.f32 %v1010_v14 }
 0x28e   : > { %s1846_s30 = smul.u32 24, %s3182_s28  ;;  %s1832_s27 = sshll.u32 %s3182_s28, 3 }
 0x293   : > { %v1924_v35 = vpop.eup %1923 }
 0x294   : > { %v1013_v45 = vmul.f32 %v1924_v35, %v1012_v11 }
 0x296   : > { %v2903_v19 = vadd.f32 %v1014_v54, %v1013_v45 }
 0x298   : > { %1019 = vst [vmem:[%s1018_s26] sm:$0xff] %v2903_v19  ;;  %1044 = vmatmul.f32.vlgmr.msrb.gmra.mxu3 %v2903_v19  ;;  %1064 = vmatmul.f32.vlgmr.msrb.gmra.mxu0 %v2903_v19  ;;  %s1375_s26 = scalar_lea.vmem %s2707_s9, %s1828_s21 }
 0x299   : > { %1084 = vmatmul.f32.vlgmr.msrb.gmra.mxu1 %v2903_v19  ;;  %1306 = vmatpush.msrb.mxu3 %v2789_v1 }
 0x29a   : > { %1385 = vmatpush.msrb.mxu0 %v2793_v25  ;;  %1405 = vmatpush.msrb.mxu1 %v2912_v46 }
 0x29b   : > { %1307 = vmatpush.msrb.mxu3 %v2916_v20 }
 0x29c   : > { %1386 = vmatpush.msrb.mxu0 %v2799_v9  ;;  %1406 = vmatpush.msrb.mxu1 %v2921_v21 }
 0x29d   : > { %1308 = vmatpush.msrb.mxu3 %v2925_v22 }
 0x29e   : > { %1387 = vmatpush.msrb.mxu0 %v2805_v53  ;;  %1407 = vmatpush.msrb.mxu1 %v2930_v23 }
 0x29f   : > { %1309 = vmatpush.msrb.mxu3 %v2934_v24 }
 0x2a0   : > { %1388 = vmatpush.msrb.mxu0 %v2811_v61  ;;  %1408 = vmatpush.msrb.mxu1 %v2939_v27 }
 0x2a1   : > { %1310 = vmatpush.msrb.mxu3 %v2943_v29 }
 0x2a2   : > { %1389 = vmatpush.msrb.mxu0 %v2817_v60  ;;  %1409 = vmatpush.msrb.mxu1 %v2948_v30 }
 0x2a3   : > { %1311 = vmatpush.msrb.mxu3 %v2952_v31 }
 0x2a4   : > { %1390 = vmatpush.msrb.mxu0 %v2823_v63  ;;  %1410 = vmatpush.msrb.mxu1 %v2957_v33 }
 0x2a5   : > { %1312 = vmatpush.msrb.mxu3 %v2961_v34 }
 0x2a6   : > { %1391 = vmatpush.msrb.mxu0 %v2829_v0  ;;  %1411 = vmatpush.msrb.mxu1 %v2966_v38 }
 0x2a7   : > { %1313 = vmatpush.msrb.mxu3 %v2970_v26 }
 0x2a8   : > { %1392 = vmatpush.msrb.mxu0 %v2835_v3  ;;  %1412 = vmatpush.msrb.mxu1 %v2975_v28 }
 0x2a9   : > { %1314 = vmatpush.msrb.mxu3 %v2979_v36 }
 0x2aa   : > { %1393 = vmatpush.msrb.mxu0 %v2841_v6  ;;  %1413 = vmatpush.msrb.mxu1 %v2984_v40 }
 0x2ab   : > { %1315 = vmatpush.msrb.mxu3 %v2988_v48 }
 0x2ac   : > { %1394 = vmatpush.msrb.mxu0 %v2847_v7  ;;  %1414 = vmatpush.msrb.mxu1 %v2993_v47 }
 0x2ad   : > { %1316 = vmatpush.msrb.mxu3 %v2997_v18 }
 0x2ae   : > { %1395 = vmatpush.msrb.mxu0 %v2853_v8  ;;  %1415 = vmatpush.msrb.mxu1 %v3002_v55 }
 0x2af   : > { %1317 = vmatpush.msrb.mxu3 %v3006_v49 }
 0x2b0   : > { %1396 = vmatpush.msrb.mxu0 %v2859_v10  ;;  %1416 = vmatpush.msrb.mxu1 %v3011_v51 }
 0x2b1   : > { %1318 = vmatpush.msrb.mxu3 %v3015_v43 }
 0x2b2   : > { %1397 = vmatpush.msrb.mxu0 %v2865_v13  ;;  %1417 = vmatpush.msrb.mxu1 %v3020_v12 }
 0x2b3   : > { %1319 = vmatpush.msrb.mxu3 %v3024_v50 }
 0x2b4   : > { %1398 = vmatpush.msrb.mxu0 %v2871_v15  ;;  %1418 = vmatpush.msrb.mxu1 %v3029_v42 }
 0x2b5   : > { %1320 = vmatpush.msrb.mxu3 %v3033_v32 }
 0x2b6   : > { %1399 = vmatpush.msrb.mxu0 %v2877_v16  ;;  %1419 = vmatpush.msrb.mxu1 %v3038_v44 }
 0x2b7   : > { %1321 = vmatpush.msrb.mxu3 %v3042_v52 }
 0x2b8   : > { %1400 = vmatpush.msrb.mxu0 %v2883_v17  ;;  %1420 = vmatpush.msrb.mxu1 %v3047_v58 }
 0x315   : > { %v1065_v59 = vpop.f32.mrf.mxu0 }
 0x316   : > { %v1066_v62 = vadd.f32 %v1065_v59, %v3290_v5 }
 0x318   : > { %v1108_v4 = vadd.f32 %v1066_v62, %v1026_v2 }
 0x31a   : > { %v1819_v14 = vmul.f32 -1.442695, %v1108_v4 }
 0x31b   : > { %v1045_v37 = vpop.f32.mrf.mxu3 }
 0x31c   : > { %1925 = vpow2.f32 %v1819_v14  ;;  %v1046_v39 = vadd.f32 %v1045_v37, %v3289_v57 }
 0x31e   : > { %v1088_v11 = vadd.f32 %v1046_v39, %v1025_v56  ;;  %v1085_v56 = vpop.f32.mrf.mxu1 }
 0x320   : > { %v1818_v35 = vmul.f32 -1.442695, %v1088_v11 }
 0x322   : > { %v1926_v45 = vpop.eup %1925  ;;  %1927 = vpow2.f32 %v1818_v35 }
 0x323   : > { %v1112_v54 = vadd.f32 1.0, %v1926_v45 }
 0x325   : > { %1929 = vrcp.f32 %v1112_v54  ;;  %vm1118_vm13 = vweird.f32 %v1112_v54  ;;  %v1122_v32 = vand.u32 2147483647, %v1112_v54 }
 0x327   : > { %vm1123_vm15 = vcmp.eq.f32.partialorder %v1122_v32, 8.507059e+37 }
 0x328   : > { %v1928_v58 = vpop.eup %1927 }
 0x329   : > { %v1092_v59 = vadd.f32 1.0, %v1928_v58  ;;  %v1086_v58 = vadd.f32 %v1085_v56, %v2699_v41 }
 0x32b   : > { %1931 = vrcp.f32 %v1092_v59  ;;  %v1930_v5 = vpop.eup %1929  ;;  %v1104_v4 = vand.u32 2147483648, %v1092_v59  ;;  %v1102_v37 = vand.u32 2147483647, %v1092_v59  ;;  %vm1098_vm9 = vweird.f32 %v1092_v59 }
 0x32c   : > { %v1114_v17 = vmul.f32 %v1930_v5, %v1112_v54  ;;  %vm1119_vm12 = vweird.f32 %v1930_v5 }
 0x32d   : > { %v1105_v35 = vor.u32 1.1754944e-38, %v1104_v4  ;;  %vm1103_vm11 = vcmp.eq.f32.partialorder %v1102_v37, 8.507059e+37  ;;  %vm1120_vm14 = vmor %vm1118_vm13, %vm1119_vm12 }
 0x32e   : > { %v1115_v62 = vsub.f32 1.0, %v1114_v17 }
 0x330   : > { %v1116_v39 = vmul.f32 %v1930_v5, %v1115_v62 }
 0x331   : > { %v1932_v52 = vpop.eup %1931 }
 0x332   : > { %v1094_v44 = vmul.f32 %v1932_v52, %v1092_v59  ;;  %vm1099_vm8 = vweird.f32 %v1932_v52  ;;  %v1117_v17 = vadd.f32 %v1930_v5, %v1116_v39 }
 0x333   : > { %vm1100_vm10 = vmor %vm1098_vm9, %vm1099_vm8 }
 0x334   : > { %v1095_v2 = vsub.f32 1.0, %v1094_v44  ;;  %v1124_v44 = vand.u32 2147483648, %v1112_v54 }
 0x336   : > { %v1096_v14 = vmul.f32 %v1932_v52, %v1095_v2  ;;  %v1027_v2 = vld [vmem:[%s3056_s14 + $0x10] sm:$0xff]  ;;  %v1125_v59 = vor.u32 1.1754944e-38, %v1124_v44  ;;  %s3187_s14 = scalar_lea.vmem [#allocation2], %s1846_s30 }
 0x338   : > { %v1097_v11 = vadd.f32 %v1932_v52, %v1096_v14  ;;  %v1121_v14 = vsel %vm1120_vm14, %v1930_v5, %v1117_v17  ;;  %v3298_v5 = vld [vmem:[#allocation12_spill] sm:$0xff] }
 0x339   : > { %v1126_v4 = vsel %vm1123_vm15, %v1125_v59, %v1121_v14  ;;  %v1146_v14 = vld [vmem:[%s3127_s22 + $0x10] sm:$0xff] }
 0x33a   : > { %v1101_v45 = vsel %vm1100_vm10, %v1932_v52, %v1097_v11  ;;  %v1131_v52 = vsub.f32 1.0, %v1126_v4  ;;  %v1133_v11 = vmul.f32 %v1126_v4, %v2903_v19 }
 0x33b   : > { %v1106_v57 = vsel %vm1103_vm11, %v1105_v35, %v1101_v45 }
 0x33c   : > { %v1128_v16 = vmul.f32 %v1106_v57, %v1086_v58  ;;  %v3297_v57 = vld [vmem:[#allocation10_spill] sm:$0xff] }
 0x33e   : > { %v1129_v62 = vadd.f32 %v1128_v16, %v1027_v2 }
 0x340   : > { %1933 = vtanh.f32 %v1129_v62 }
 0x346   : > { %v1934_v37 = vpop.eup %1933 }
 0x347   : > { %v1132_v56 = vmul.f32 %v1934_v37, %v1131_v52 }
 0x349   : > { %v3066_v39 = vadd.f32 %v1133_v11, %v1132_v56 }
 0x34b   : > { %1138 = vst [vmem:[%s1137_s20] sm:$0xff] %v3066_v39  ;;  %1163 = vmatmul.f32.vlgmr.msrb.gmra.mxu2 %v3066_v39  ;;  %1183 = vmatmul.f32.vlgmr.msra.gmra.mxu3 %v3066_v39  ;;  %s1494_s20 = scalar_lea.vmem %s2707_s9, %s1832_s27 }
 0x34c   : > { %1203 = vmatmul.f32.vlgmr.msra.gmra.mxu0 %v3066_v39  ;;  %1425 = vmatpush.msrb.mxu2 %v2789_v1 }
 0x34d   : > { %1504 = vmatpush.msra.mxu3 %v2793_v25  ;;  %1524 = vmatpush.msra.mxu0 %v2912_v46  ;;  %v3299_v25 = vld [vmem:[#allocation14_spill] sm:$0xff] }
 0x34e   : > { %1426 = vmatpush.msrb.mxu2 %v2916_v20 }
 0x34f   : > { %1505 = vmatpush.msra.mxu3 %v2799_v9  ;;  %1525 = vmatpush.msra.mxu0 %v2921_v21  ;;  %v3300_v9 = vld [vmem:[#allocation15_spill] sm:$0xff] }
 0x350   : > { %1427 = vmatpush.msrb.mxu2 %v2925_v22 }
 0x351   : > { %1506 = vmatpush.msra.mxu3 %v2805_v53  ;;  %1526 = vmatpush.msra.mxu0 %v2930_v23  ;;  %v3301_v53 = vld [vmem:[#allocation13_spill] sm:$0xff] }
 0x352   : > { %1428 = vmatpush.msrb.mxu2 %v2934_v24 }
 0x353   : > { %1507 = vmatpush.msra.mxu3 %v2811_v61  ;;  %1527 = vmatpush.msra.mxu0 %v2939_v27  ;;  %v3302_v61 = vld [vmem:[#allocation11_spill] sm:$0xff] }
 0x354   : > { %1429 = vmatpush.msrb.mxu2 %v2943_v29 }
 0x355   : > { %1508 = vmatpush.msra.mxu3 %v2817_v60  ;;  %1528 = vmatpush.msra.mxu0 %v2948_v30 }
 0x356   : > { %1430 = vmatpush.msrb.mxu2 %v2952_v31 }
 0x357   : > { %1509 = vmatpush.msra.mxu3 %v2823_v63  ;;  %1529 = vmatpush.msra.mxu0 %v2957_v33 }
 0x358   : > { %1431 = vmatpush.msrb.mxu2 %v2961_v34 }
 0x359   : > { %1510 = vmatpush.msra.mxu3 %v2829_v0  ;;  %1530 = vmatpush.msra.mxu0 %v2966_v38  ;;  %v3303_v0 = vld [vmem:[#allocation17_spill] sm:$0xff] }
 0x35a   : > { %1432 = vmatpush.msrb.mxu2 %v2970_v26 }
 0x35b   : > { %1511 = vmatpush.msra.mxu3 %v2835_v3  ;;  %1531 = vmatpush.msra.mxu0 %v2975_v28 }
 0x35c   : > { %1433 = vmatpush.msrb.mxu2 %v2979_v36 }
 0x35d   : > { %1512 = vmatpush.msra.mxu3 %v2841_v6  ;;  %1532 = vmatpush.msra.mxu0 %v2984_v40  ;;  %v3304_v6 = vld [vmem:[#allocation18_spill] sm:$0xff] }
 0x35e   : > { %1434 = vmatpush.msrb.mxu2 %v2988_v48 }
 0x35f   : > { %1513 = vmatpush.msra.mxu3 %v2847_v7  ;;  %1533 = vmatpush.msra.mxu0 %v2993_v47 }
 0x360   : > { %1435 = vmatpush.msrb.mxu2 %v2997_v18 }
 0x361   : > { %1514 = vmatpush.msra.mxu3 %v2853_v8  ;;  %1534 = vmatpush.msra.mxu0 %v3002_v55  ;;  %v1144_v8 = vld [vmem:[%s3127_s22] sm:$0xff] }
 0x362   : > { %1436 = vmatpush.msrb.mxu2 %v3006_v49 }
 0x363   : > { %1515 = vmatpush.msra.mxu3 %v2859_v10  ;;  %1535 = vmatpush.msra.mxu0 %v3011_v51  ;;  %v1145_v10 = vld [vmem:[%s3127_s22 + $0x8] sm:$0xff]  ;;  %s3208_s22 = scalar_lea.vmem [#allocation2], %s1847_s18 }
 0x364   : > { %1437 = vmatpush.msrb.mxu2 %v3015_v43 }
 0x365   : > { %1516 = vmatpush.msra.mxu3 %v2865_v13  ;;  %1536 = vmatpush.msra.mxu0 %v3020_v12 }
 0x366   : > { %1438 = vmatpush.msrb.mxu2 %v3024_v50 }
 0x367   : > { %1517 = vmatpush.msra.mxu3 %v2871_v15  ;;  %1537 = vmatpush.msra.mxu0 %v3029_v42 }
 0x368   : > { %1439 = vmatpush.msrb.mxu2 %v3297_v57 }
 0x369   : > { %1518 = vmatpush.msra.mxu3 %v3298_v5  ;;  %1538 = vmatpush.msra.mxu0 %v3299_v25 }
 0x36a   : > { %1440 = vmatpush.msrb.mxu2 %v3300_v9 }
 0x36b   : > { %1519 = vmatpush.msra.mxu3 %v3301_v53  ;;  %1539 = vmatpush.msra.mxu0 %v3302_v61 }
 0x3c9   : > { %v1204_v42 = vpop.f32.mrf.mxu0 }
 0x3ca   : > { %v1205_v58 = vadd.f32 %v1204_v42, %v2699_v41 }
 0x3ce   : > { %v1164_v60 = vpop.f32.mrf.mxu2  ;;  %v1184_v63 = vpop.f32.mrf.mxu3 }
 0x3cf   : > { %v1165_v3 = vadd.f32 %v1164_v60, %v3303_v0  ;;  %v1185_v7 = vadd.f32 %v1184_v63, %v3304_v6 }
 0x3d1   : > { %v1207_v13 = vadd.f32 %v1165_v3, %v1144_v8  ;;  %v1227_v15 = vadd.f32 %v1185_v7, %v1145_v10 }
 0x3d3   : > { %v1822_v16 = vmul.f32 -1.442695, %v1207_v13  ;;  %v1823_v19 = vmul.f32 -1.442695, %v1227_v15 }
 0x3d5   : > { %1935 = vpow2.f32 %v1822_v16 }
 0x3d6   : > { %1937 = vpow2.f32 %v1823_v19 }
 0x3db   : > { %v1936_v46 = vpop.eup %1935 }
 0x3dc   : > { %v1938_v21 = vpop.eup %1937  ;;  %v1211_v23 = vadd.f32 1.0, %v1936_v46 }
 0x3dd   : > { %v1231_v27 = vadd.f32 1.0, %v1938_v21 }
 0x3de   : > { %1939 = vrcp.f32 %v1211_v23  ;;  %v1223_v47 = vand.u32 2147483648, %v1211_v23  ;;  %v1221_v12 = vand.u32 2147483647, %v1211_v23  ;;  %vm1217_vm1 = vweird.f32 %v1211_v23 }
 0x3df   : > { %1941 = vrcp.f32 %v1231_v27  ;;  %v1243_v62 = vand.u32 2147483648, %v1231_v27  ;;  %vm1237_vm5 = vweird.f32 %v1231_v27  ;;  %v1241_v59 = vand.u32 2147483647, %v1231_v27 }
 0x3e0   : > { %v1224_v35 = vor.u32 1.1754944e-38, %v1223_v47  ;;  %vm1222_vm3 = vcmp.eq.f32.partialorder %v1221_v12, 8.507059e+37 }
 0x3e1   : > { %v1244_v37 = vor.u32 1.1754944e-38, %v1243_v62  ;;  %vm1242_vm7 = vcmp.eq.f32.partialorder %v1241_v59, 8.507059e+37  ;;  %v1383_v62 = vld [vmem:[%s3187_s14 + $0x8] sm:$0xff] }
 0x3e4   : > { %v1940_v30 = vpop.eup %1939 }
 0x3e5   : > { %v1942_v33 = vpop.eup %1941  ;;  %v1213_v38 = vmul.f32 %v1940_v30, %v1211_v23  ;;  %vm1218_vm0 = vweird.f32 %v1940_v30 }
 0x3e6   : > { %v1233_v28 = vmul.f32 %v1942_v33, %v1231_v27  ;;  %vm1219_vm2 = vmor %vm1217_vm1, %vm1218_vm0  ;;  %vm1238_vm4 = vweird.f32 %v1942_v33 }
 0x3e7   : > { %v1214_v40 = vsub.f32 1.0, %v1213_v38  ;;  %vm1239_vm6 = vmor %vm1237_vm5, %vm1238_vm4 }
 0x3e8   : > { %v1234_v55 = vsub.f32 1.0, %v1233_v28 }
 0x3e9   : > { %v1215_v51 = vmul.f32 %v1940_v30, %v1214_v40 }
 0x3ea   : > { %v1235_v32 = vmul.f32 %v1942_v33, %v1234_v55 }
 0x3eb   : > { %v1216_v54 = vadd.f32 %v1940_v30, %v1215_v51 }
 0x3ec   : > { %v1236_v44 = vadd.f32 %v1942_v33, %v1235_v32 }
 0x3ed   : > { %v1220_v45 = vsel %vm1219_vm2, %v1940_v30, %v1216_v54 }
 0x3ee   : > { %v1225_v17 = vsel %vm1222_vm3, %v1224_v35, %v1220_v45  ;;  %v1240_v52 = vsel %vm1239_vm6, %v1942_v33, %v1236_v44  ;;  %v1265_v33 = vld [vmem:[%s3164_s17 + $0x10] sm:$0xff] }
 0x3ef   : > { %v1247_v2 = vmul.f32 %v1225_v17, %v1205_v58  ;;  %v1245_v56 = vsel %vm1242_vm7, %v1244_v37, %v1240_v52 }
 0x3f0   : > { %v1250_v11 = vsub.f32 1.0, %v1245_v56  ;;  %v1252_v53 = vmul.f32 %v1245_v56, %v3066_v39 }
 0x3f1   : > { %v1248_v4 = vadd.f32 %v1247_v2, %v1146_v14  ;;  %v1382_v2 = vld [vmem:[%s3187_s14] sm:$0xff] }
 0x3f3   : > { %1943 = vtanh.f32 %v1248_v4 }
 0x3f9   : > { %v1944_v5 = vpop.eup %1943 }
 0x3fa   : > { %v1251_v25 = vmul.f32 %v1944_v5, %v1250_v11 }
 0x3fc   : > { %v3136_v61 = vadd.f32 %v1252_v53, %v1251_v25 }
 0x3fe   : > { %1257 = vst [vmem:[%s1256_s25] sm:$0xff] %v3136_v61  ;;  %1282 = vmatmul.f32.vlgmr.msra.gmra.mxu1 %v3136_v61  ;;  %1302 = vmatmul.f32.vlgmr.msra.gmra.mxu2 %v3136_v61 }
 0x3ff   : > { %1322 = vmatmul.f32.vlgmr.msrb.gmra.mxu3 %v3136_v61  ;;  %1544 = vmatpush.msra.mxu1 %v2789_v1 }
 0x401   : > { %1545 = vmatpush.msra.mxu1 %v2916_v20 }
 0x403   : > { %1546 = vmatpush.msra.mxu1 %v2925_v22  ;;  %v1263_v22 = vld [vmem:[%s3164_s17] sm:$0xff] }
 0x405   : > { %1547 = vmatpush.msra.mxu1 %v2934_v24 }
 0x407   : > { %1548 = vmatpush.msra.mxu1 %v2943_v29 }
 0x409   : > { %1549 = vmatpush.msra.mxu1 %v2952_v31 }
 0x40b   : > { %1550 = vmatpush.msra.mxu1 %v2961_v34 }
 0x40d   : > { %1551 = vmatpush.msra.mxu1 %v2970_v26  ;;  %v1264_v26 = vld [vmem:[%s3164_s17 + $0x8] sm:$0xff] }
 0x40f   : > { %1552 = vmatpush.msra.mxu1 %v2979_v36 }
 0x411   : > { %1553 = vmatpush.msra.mxu1 %v2988_v48 }
 0x413   : > { %1554 = vmatpush.msra.mxu1 %v2997_v18 }
 0x415   : > { %1555 = vmatpush.msra.mxu1 %v3006_v49 }
 0x417   : > { %1556 = vmatpush.msra.mxu1 %v3015_v43 }
 0x419   : > { %1557 = vmatpush.msra.mxu1 %v3024_v50 }
 0x41b   : > { %1558 = vmatpush.msra.mxu1 %v3297_v57 }
 0x41d   : > { %1559 = vmatpush.msra.mxu1 %v3300_v9 }
 0x47b   : > { %v1283_v1 = vpop.f32.mrf.mxu1 }
 0x47c   : > { %v1284_v20 = vadd.f32 %v1283_v1, %v3303_v0 }
 0x47e   : > { %v1326_v24 = vadd.f32 %v1284_v20, %v1263_v22 }
 0x480   : > { %v1826_v29 = vmul.f32 -1.442695, %v1326_v24 }
 0x481   : > { %v1303_v31 = vpop.f32.mrf.mxu2 }
 0x482   : > { %1945 = vpow2.f32 %v1826_v29  ;;  %v1304_v34 = vadd.f32 %v1303_v31, %v3304_v6  ;;  %v1323_v8 = vpop.f32.mrf.mxu3 }
 0x483   : > { %v1324_v19 = vadd.f32 %v1323_v8, %v2699_v41 }
 0x484   : > { %v1346_v36 = vadd.f32 %v1304_v34, %v1264_v26 }
 0x486   : > { %v1827_v48 = vmul.f32 -1.442695, %v1346_v36 }
 0x488   : > { %v1946_v18 = vpop.eup %1945  ;;  %1947 = vpow2.f32 %v1827_v48 }
 0x489   : > { %v1330_v49 = vadd.f32 1.0, %v1946_v18 }
 0x48b   : > { %1949 = vrcp.f32 %v1330_v49  ;;  %v1342_v60 = vand.u32 2147483648, %v1330_v49  ;;  %v1340_v3 = vand.u32 2147483647, %v1330_v49  ;;  %vm1336_vm9 = vweird.f32 %v1330_v49 }
 0x48d   : > { %v1343_v15 = vor.u32 1.1754944e-38, %v1342_v60  ;;  %vm1341_vm11 = vcmp.eq.f32.partialorder %v1340_v3, 8.507059e+37 }
 0x48e   : > { %v1948_v43 = vpop.eup %1947 }
 0x48f   : > { %v1350_v50 = vadd.f32 1.0, %v1948_v43 }
 0x491   : > { %v1950_v39 = vpop.eup %1949  ;;  %1951 = vrcp.f32 %v1350_v50  ;;  %v1362_v27 = vand.u32 2147483648, %v1350_v50  ;;  %v1360_v38 = vand.u32 2147483647, %v1350_v50  ;;  %vm1356_vm13 = vweird.f32 %v1350_v50 }
 0x492   : > { %v1332_v57 = vmul.f32 %v1950_v39, %v1330_v49  ;;  %vm1337_vm8 = vweird.f32 %v1950_v39 }
 0x493   : > { %vm1338_vm10 = vmor %vm1336_vm9, %vm1337_vm8  ;;  %v1363_v47 = vor.u32 1.1754944e-38, %v1362_v27  ;;  %vm1361_vm15 = vcmp.eq.f32.partialorder %v1360_v38, 8.507059e+37 }
 0x494   : > { %v1333_v9 = vsub.f32 1.0, %v1332_v57 }
 0x496   : > { %v1334_v63 = vmul.f32 %v1950_v39, %v1333_v9  ;;  %v1384_v9 = vld [vmem:[%s3187_s14 + $0x10] sm:$0xff] }
 0x497   : > { %v1952_v7 = vpop.eup %1951 }
 0x498   : > { %v1352_v10 = vmul.f32 %v1952_v7, %v1350_v50  ;;  %v1335_v13 = vadd.f32 %v1950_v39, %v1334_v63  ;;  %vm1357_vm12 = vweird.f32 %v1952_v7 }
 0x499   : > { %vm1358_vm14 = vmor %vm1356_vm13, %vm1357_vm12 }
 0x49a   : > { %v1353_v16 = vsub.f32 1.0, %v1352_v10  ;;  %v1339_v46 = vsel %vm1338_vm10, %v1950_v39, %v1335_v13 }
 0x49b   : > { %v1344_v21 = vsel %vm1341_vm11, %v1343_v15, %v1339_v46 }
 0x49c   : > { %v1354_v23 = vmul.f32 %v1952_v7, %v1353_v16  ;;  %v1366_v30 = vmul.f32 %v1344_v21, %v1324_v19 }
 0x49e   : > { %v1355_v28 = vadd.f32 %v1952_v7, %v1354_v23  ;;  %v1367_v40 = vadd.f32 %v1366_v30, %v1265_v33  ;;  %v1502_v23 = vld [vmem:[%s3208_s22 + $0x8] sm:$0xff] }
 0x4a0   : > { %v1359_v55 = vsel %vm1358_vm14, %v1952_v7, %v1355_v28  ;;  %1953 = vtanh.f32 %v1367_v40  ;;  %v1501_v28 = vld [vmem:[%s3208_s22] sm:$0xff] }
 0x4a1   : > { %v1364_v51 = vsel %vm1361_vm15, %v1363_v47, %v1359_v55 }
 0x4a2   : > { %v1369_v12 = vsub.f32 1.0, %v1364_v51  ;;  %v1371_v54 = vmul.f32 %v1364_v51, %v3136_v61 }
 0x4a6   : > { %v1954_v42 = vpop.eup %1953 }
 0x4a7   : > { %v1370_v32 = vmul.f32 %v1954_v42, %v1369_v12 }
 0x4a9   : > { %v3174_v35 = vadd.f32 %v1371_v54, %v1370_v32 }
 0x4ab   : > { %1376 = vst [vmem:[%s1375_s26] sm:$0xff] %v3174_v35  ;;  %1401 = vmatmul.f32.vlgmr.msrb.gmra.mxu0 %v3174_v35  ;;  %1421 = vmatmul.f32.vlgmr.msrb.gmra.mxu1 %v3174_v35 }
 0x4ac   : > { %1441 = vmatmul.f32.vlgmr.msrb.gmra.mxu2 %v3174_v35 }
 0x528   : > { %v1402_v58 = vpop.f32.mrf.mxu0  ;;  %v1422_v45 = vpop.f32.mrf.mxu1 }
 0x529   : > { %v1403_v17 = vadd.f32 %v1402_v58, %v3303_v0  ;;  %v1423_v44 = vadd.f32 %v1422_v45, %v3304_v6 }
 0x52b   : > { %v1445_v14 = vadd.f32 %v1403_v17, %v1382_v2  ;;  %v1465_v59 = vadd.f32 %v1423_v44, %v1383_v62 }
 0x52d   : > { %v1830_v4 = vmul.f32 -1.442695, %v1445_v14  ;;  %v1831_v52 = vmul.f32 -1.442695, %v1465_v59 }
 0x52f   : > { %1955 = vpow2.f32 %v1830_v4  ;;  %v1442_v26 = vpop.f32.mrf.mxu2 }
 0x530   : > { %1957 = vpow2.f32 %v1831_v52  ;;  %v1443_v18 = vadd.f32 %v1442_v26, %v2699_v41 }
 0x535   : > { %v1956_v37 = vpop.eup %1955 }
 0x536   : > { %v1958_v56 = vpop.eup %1957  ;;  %v1449_v11 = vadd.f32 1.0, %v1956_v37 }
 0x537   : > { %v1469_v5 = vadd.f32 1.0, %v1958_v56 }
 0x538   : > { %1959 = vrcp.f32 %v1449_v11  ;;  %v1461_v24 = vand.u32 2147483648, %v1449_v11  ;;  %v1459_v31 = vand.u32 2147483647, %v1449_v11  ;;  %vm1455_vm1 = vweird.f32 %v1449_v11 }
 0x539   : > { %1961 = vrcp.f32 %v1469_v5  ;;  %v1481_v39 = vand.u32 2147483648, %v1469_v5  ;;  %vm1475_vm5 = vweird.f32 %v1469_v5  ;;  %v1479_v60 = vand.u32 2147483647, %v1469_v5 }
 0x53a   : > { %v1462_v48 = vor.u32 1.1754944e-38, %v1461_v24  ;;  %vm1460_vm3 = vcmp.eq.f32.partialorder %v1459_v31, 8.507059e+37 }
 0x53b   : > { %v1482_v7 = vor.u32 1.1754944e-38, %v1481_v39  ;;  %vm1480_vm7 = vcmp.eq.f32.partialorder %v1479_v60, 8.507059e+37 }
 0x53e   : > { %v1960_v25 = vpop.eup %1959 }
 0x53f   : > { %v1962_v53 = vpop.eup %1961  ;;  %v1451_v61 = vmul.f32 %v1960_v25, %v1449_v11  ;;  %vm1456_vm0 = vweird.f32 %v1960_v25 }
 0x540   : > { %v1471_v1 = vmul.f32 %v1962_v53, %v1469_v5  ;;  %vm1457_vm2 = vmor %vm1455_vm1, %vm1456_vm0  ;;  %vm1476_vm4 = vweird.f32 %v1962_v53 }
 0x541   : > { %v1452_v20 = vsub.f32 1.0, %v1451_v61  ;;  %vm1477_vm6 = vmor %vm1475_vm5, %vm1476_vm4 }
 0x542   : > { %v1472_v22 = vsub.f32 1.0, %v1471_v1 }
 0x543   : > { %v1453_v29 = vmul.f32 %v1960_v25, %v1452_v20 }
 0x544   : > { %v1473_v34 = vmul.f32 %v1962_v53, %v1472_v22 }
 0x545   : > { %v1454_v36 = vadd.f32 %v1960_v25, %v1453_v29 }
 0x546   : > { %v1474_v50 = vadd.f32 %v1962_v53, %v1473_v34 }
 0x547   : > { %v1458_v49 = vsel %vm1457_vm2, %v1960_v25, %v1454_v36  ;;  %v1503_v25 = vld [vmem:[%s3208_s22 + $0x10] sm:$0xff] }
 0x548   : > { %v1463_v43 = vsel %vm1460_vm3, %v1462_v48, %v1458_v49  ;;  %v1478_v3 = vsel %vm1477_vm6, %v1962_v53, %v1474_v50 }
 0x549   : > { %v1485_v57 = vmul.f32 %v1463_v43, %v1443_v18  ;;  %v1483_v8 = vsel %vm1480_vm7, %v1482_v7, %v1478_v3 }
 0x54a   : > { %v1488_v10 = vsub.f32 1.0, %v1483_v8  ;;  %v1490_v16 = vmul.f32 %v1483_v8, %v3174_v35 }
 0x54b   : > { %v1486_v63 = vadd.f32 %v1485_v57, %v1384_v9 }
 0x54d   : > { %1963 = vtanh.f32 %v1486_v63 }
 0x553   : > { %v1964_v13 = vpop.eup %1963 }
 0x554   : > { %v1489_v15 = vmul.f32 %v1964_v13, %v1488_v10 }
 0x556   : > { %v3196_v19 = vadd.f32 %v1490_v16, %v1489_v15 }
 0x558   : > { %1495 = vst [vmem:[%s1494_s20] sm:$0xff] %v3196_v19  ;;  %1520 = vmatmul.f32.vlgmr.msra.gmra.mxu3 %v3196_v19  ;;  %1540 = vmatmul.f32.vlgmr.msra.gmra.mxu0 %v3196_v19 }
 0x559   : > { %1560 = vmatmul.f32.vlgmr.msra.gmra.mxu1 %v3196_v19 }
 0x5d5   : > { %v1541_v46 = vpop.f32.mrf.mxu0 }
 0x5d6   : > { %v1542_v21 = vadd.f32 %v1541_v46, %v3304_v6  ;;  %v1561_v62 = vpop.f32.mrf.mxu1 }
 0x5d7   : > { %v1562_v4 = vadd.f32 %v1561_v62, %v2699_v41 }
 0x5d8   : > { %v1584_v27 = vadd.f32 %v1542_v21, %v1502_v23 }
 0x5da   : > { %v1835_v30 = vmul.f32 -1.442695, %v1584_v27 }
 0x5db   : > { %v1521_v33 = vpop.f32.mrf.mxu3 }
 0x5dc   : > { %1965 = vpow2.f32 %v1835_v30  ;;  %v1522_v38 = vadd.f32 %v1521_v33, %v3303_v0 }
 0x5de   : > { %v1564_v40 = vadd.f32 %v1522_v38, %v1501_v28 }
 0x5e0   : > { %v1834_v47 = vmul.f32 -1.442695, %v1564_v40 }
 0x5e2   : > { %v1966_v55 = vpop.eup %1965  ;;  %1967 = vpow2.f32 %v1834_v47 }
 0x5e3   : > { %v1588_v51 = vadd.f32 1.0, %v1966_v55 }
 0x5e5   : > { %1969 = vrcp.f32 %v1588_v51  ;;  %v1600_v11 = vand.u32 2147483648, %v1588_v51  ;;  %vm1594_vm13 = vweird.f32 %v1588_v51  ;;  %v1598_v53 = vand.u32 2147483647, %v1588_v51 }
 0x5e7   : > { %v1601_v20 = vor.u32 1.1754944e-38, %v1600_v11  ;;  %vm1599_vm15 = vcmp.eq.f32.partialorder %v1598_v53, 8.507059e+37 }
 0x5e8   : > { %v1968_v12 = vpop.eup %1967 }
 0x5e9   : > { %v1568_v6 = vadd.f32 1.0, %v1968_v12 }
 0x5eb   : > { %1971 = vrcp.f32 %v1568_v6  ;;  %v1970_v42 = vpop.eup %1969  ;;  %v1580_v17 = vand.u32 2147483648, %v1568_v6  ;;  %v1578_v0 = vand.u32 2147483647, %v1568_v6  ;;  %vm1574_vm9 = vweird.f32 %v1568_v6 }
 0x5ec   : > { %v1590_v32 = vmul.f32 %v1970_v42, %v1588_v51  ;;  %vm1595_vm12 = vweird.f32 %v1970_v42 }
 0x5ed   : > { %v1581_v59 = vor.u32 1.1754944e-38, %v1580_v17  ;;  %vm1579_vm11 = vcmp.eq.f32.partialorder %v1578_v0, 8.507059e+37  ;;  %vm1596_vm14 = vmor %vm1594_vm13, %vm1595_vm12 }
 0x5ee   : > { %v1591_v58 = vsub.f32 1.0, %v1590_v32 }
 0x5f0   : > { %v1592_v2 = vmul.f32 %v1970_v42, %v1591_v58 }
 0x5f1   : > { %v1972_v54 = vpop.eup %1971 }
 0x5f2   : > { %v1570_v35 = vmul.f32 %v1972_v54, %v1568_v6  ;;  %vm1575_vm8 = vweird.f32 %v1972_v54  ;;  %v1593_v37 = vadd.f32 %v1970_v42, %v1592_v2 }
 0x5f3   : > { %vm1576_vm10 = vmor %vm1574_vm9, %vm1575_vm8 }
 0x5f4   : > { %v1571_v45 = vsub.f32 1.0, %v1570_v35  ;;  %v1597_v1 = vsel %vm1596_vm14, %v1970_v42, %v1593_v37 }
 0x5f5   : > { %v1602_v41 = vsel %vm1599_vm15, %v1601_v20, %v1597_v1 }
 0x5f6   : > { %v1572_v44 = vmul.f32 %v1972_v54, %v1571_v45  ;;  %v1607_v22 = vsub.f32 1.0, %v1602_v41  ;;  %v1609_v29 = vmul.f32 %v1602_v41, %v3196_v19 }
 0x5f8   : > { %v1573_v14 = vadd.f32 %v1972_v54, %v1572_v44 }
 0x5fa   : > { %v1577_v52 = vsel %vm1576_vm10, %v1972_v54, %v1573_v14 }
 0x5fb   : > { %v1582_v56 = vsel %vm1579_vm11, %v1581_v59, %v1577_v52 }
 0x5fc   : > { %v1604_v5 = vmul.f32 %v1582_v56, %v1562_v4 }
 0x5fe   : > { %v1605_v61 = vadd.f32 %v1604_v5, %v1503_v25 }
 0x600   : > { %1973 = vtanh.f32 %v1605_v61 }
 0x606   : > { %v1974_v24 = vpop.eup %1973 }
 0x607   : > { %v1608_v31 = vmul.f32 %v1974_v24, %v1607_v22 }
 0x609   : > { %v1610_v34 = vadd.f32 %v1609_v29, %v1608_v31 }
 0x60b   : > { %1614 = vst [vmem:[%s1613_s24] sm:$0xff] %v1610_v34 }
 0x60c   : > { %1616 = vst [vmem:[%s391_s29] sm:$0xff] %v1610_v34 }
 0x60d PF: > { %p27_p8 = scmp.ge.s32.totalorder %s2176_s13, 4   ;;  %s3305_s9 = smov %s2093_s10 }
 0x60e   : > { %s3306_s10 = smov %s2097_s11  ;;  %s3307_s11 = smov %s2186_s16 }
 0x60f   : > { %s3308_s12 = smov %s2176_s13  ;;  %29 = sbr.rel (!%p27_p8) target bundleno = 9 (0x9), region = 124 }
 0x614   :  { %1652 = vsyncpa [#allocation7], 1 }
 0x615   :  { %1654 = vsyncpa [#allocation7 + $0x1], 1 }

// kernel: seq2seq_forward.4
= control target key start
LH: loop header
LB: loop body
LE: loop exit
PB: predicated region body
PF: predicated region fallthrough
CT: control target
= control target key end

     0   :  { %s2836_s0 = inlined_call_operand.<no memory space> [shape: s32[1], index: 0, kind: input, shape index: {}]   ;;  %s2837_s1 = inlined_call_operand.vmem [shape: f32[8,8,128], index: 1, kind: input, shape index: {}]   ;;  %s2838_s2 = inlined_call_operand.vmem [shape: f32[1,128,384], index: 2, kind: input, shape index: {}]   ;;  %s2839_s3 = inlined_call_operand.vmem [shape: f32[1,128,384], index: 3, kind: input, shape index: {}]   ;;  %s2840_s4 = inlined_call_operand.vmem [shape: f32[1,1,384], index: 4, kind: input, shape index: {}]   ;;  %s2841_s5 = inlined_call_operand.vmem [shape: f32[1,1,384], index: 5, kind: input, shape index: {}]   ;;  %s2842_s6 = inlined_call_operand.vmem [shape: f32[1,8,128], index: 6, kind: input, shape index: {}]   ;;  %s2843_s7 = inlined_call_operand.vmem [shape: f32[1,8,8,128], index: 7, kind: output, shape index: {0}]   ;;  %s2844_s8 = inlined_call_operand.hbm [shape: f32[1,8,128], index: 8, kind: output, shape index: {1}]  }
   0x1   :  { %v82_v0 = vld [vmem:[%s2838_s2 + $0x168] sm:$0xff]  ;;  %v83_v1 = vld [vmem:[%s2838_s2 + $0x170] sm:$0xff]  ;;  %v84_v2 = vld [vmem:[%s2838_s2 + $0x178] sm:$0xff] }
   0x2   :  { %93 = vmatpush.msra.mxu0 %v82_v0  ;;  %134 = vmatpush.msra.mxu1 %v83_v1  ;;  %v79_v3 = vld [vmem:[%s2838_s2 + $0x150] sm:$0xff]  ;;  %v80_v4 = vld [vmem:[%s2838_s2 + $0x158] sm:$0xff]  ;;  %v81_v5 = vld [vmem:[%s2838_s2 + $0x160] sm:$0xff] }
   0x3   :  { %175 = vmatpush.msra.mxu2 %v84_v2  ;;  %v76_v6 = vld [vmem:[%s2838_s2 + $0x138] sm:$0xff]  ;;  %v77_v7 = vld [vmem:[%s2838_s2 + $0x140] sm:$0xff]  ;;  %v78_v8 = vld [vmem:[%s2838_s2 + $0x148] sm:$0xff] }
   0x4   :  { %94 = vmatpush.msra.mxu0 %v79_v3  ;;  %135 = vmatpush.msra.mxu1 %v80_v4  ;;  %v73_v9 = vld [vmem:[%s2838_s2 + $0x120] sm:$0xff]  ;;  %v74_v10 = vld [vmem:[%s2838_s2 + $0x128] sm:$0xff]  ;;  %v75_v11 = vld [vmem:[%s2838_s2 + $0x130] sm:$0xff] }
   0x5   :  { %176 = vmatpush.msra.mxu2 %v81_v5  ;;  %v70_v12 = vld [vmem:[%s2838_s2 + $0x108] sm:$0xff]  ;;  %v71_v13 = vld [vmem:[%s2838_s2 + $0x110] sm:$0xff]  ;;  %v72_v14 = vld [vmem:[%s2838_s2 + $0x118] sm:$0xff] }
   0x6   :  { %95 = vmatpush.msra.mxu0 %v76_v6  ;;  %136 = vmatpush.msra.mxu1 %v77_v7  ;;  %v67_v15 = vld [vmem:[%s2838_s2 + $0xf0] sm:$0xff]  ;;  %v68_v16 = vld [vmem:[%s2838_s2 + $0xf8] sm:$0xff]  ;;  %v69_v17 = vld [vmem:[%s2838_s2 + $0x100] sm:$0xff] }
   0x7   :  { %177 = vmatpush.msra.mxu2 %v78_v8  ;;  %v64_v18 = vld [vmem:[%s2838_s2 + $0xd8] sm:$0xff]  ;;  %v65_v19 = vld [vmem:[%s2838_s2 + $0xe0] sm:$0xff]  ;;  %v66_v20 = vld [vmem:[%s2838_s2 + $0xe8] sm:$0xff] }
   0x8   :  { %96 = vmatpush.msra.mxu0 %v73_v9  ;;  %137 = vmatpush.msra.mxu1 %v74_v10  ;;  %v61_v21 = vld [vmem:[%s2838_s2 + $0xc0] sm:$0xff]  ;;  %v62_v22 = vld [vmem:[%s2838_s2 + $0xc8] sm:$0xff]  ;;  %v63_v23 = vld [vmem:[%s2838_s2 + $0xd0] sm:$0xff] }
   0x9   :  { %178 = vmatpush.msra.mxu2 %v75_v11  ;;  %v58_v24 = vld [vmem:[%s2838_s2 + $0xa8] sm:$0xff]  ;;  %v59_v25 = vld [vmem:[%s2838_s2 + $0xb0] sm:$0xff]  ;;  %v60_v27 = vld [vmem:[%s2838_s2 + $0xb8] sm:$0xff] }
   0xa   :  { %97 = vmatpush.msra.mxu0 %v70_v12  ;;  %138 = vmatpush.msra.mxu1 %v71_v13  ;;  %v1627_v26 = vld [vmem:[%s2839_s3 + $0x168] sm:$0xff]  ;;  %v1635_v28 = vld [vmem:[%s2839_s3 + $0x150] sm:$0xff]  ;;  %v56_v30 = vld [vmem:[%s2838_s2 + $0x98] sm:$0xff] }
   0xb   :  { %179 = vmatpush.msra.mxu2 %v72_v14  ;;  %v55_v29 = vld [vmem:[%s2838_s2 + $0x90] sm:$0xff]  ;;  %307 = vmatpush.msra.mxu3 %v1627_v26  ;;  %v57_v31 = vld [vmem:[%s2838_s2 + $0xa0] sm:$0xff]  ;;  %v1650_v32 = vld [vmem:[%s2839_s3 + $0x138] sm:$0xff] }
   0xc   :  { %98 = vmatpush.msra.mxu0 %v67_v15  ;;  %139 = vmatpush.msra.mxu1 %v68_v16  ;;  %v52_v33 = vld [vmem:[%s2838_s2 + $0x78] sm:$0xff]  ;;  %v53_v34 = vld [vmem:[%s2838_s2 + $0x80] sm:$0xff]  ;;  %v54_v35 = vld [vmem:[%s2838_s2 + $0x88] sm:$0xff] }
   0xd   :  { %180 = vmatpush.msra.mxu2 %v69_v17  ;;  %308 = vmatpush.msra.mxu3 %v1635_v28  ;;  %v1665_v36 = vld [vmem:[%s2839_s3 + $0x120] sm:$0xff]  ;;  %v50_v38 = vld [vmem:[%s2838_s2 + $0x68] sm:$0xff]  ;;  %v51_v39 = vld [vmem:[%s2838_s2 + $0x70] sm:$0xff] }
   0xe   :  { %99 = vmatpush.msra.mxu0 %v64_v18  ;;  %140 = vmatpush.msra.mxu1 %v65_v19  ;;  %v49_v37 = vld [vmem:[%s2838_s2 + $0x60] sm:$0xff]  ;;  %v1680_v40 = vld [vmem:[%s2839_s3 + $0x108] sm:$0xff]  ;;  %v47_v42 = vld [vmem:[%s2838_s2 + $0x50] sm:$0xff] }
   0xf   :  { %181 = vmatpush.msra.mxu2 %v66_v20  ;;  %309 = vmatpush.msra.mxu3 %v1650_v32  ;;  %v46_v41 = vld [vmem:[%s2838_s2 + $0x48] sm:$0xff] }
  0x10   :  { %100 = vmatpush.msra.mxu0 %v61_v21  ;;  %141 = vmatpush.msra.mxu1 %v62_v22 }
  0x11   :  { %182 = vmatpush.msra.mxu2 %v63_v23  ;;  %310 = vmatpush.msra.mxu3 %v1665_v36 }
  0x12   :  { %101 = vmatpush.msra.mxu0 %v58_v24  ;;  %142 = vmatpush.msra.mxu1 %v59_v25 }
  0x13   :  { %183 = vmatpush.msra.mxu2 %v60_v27 }
  0x14   :  { %102 = vmatpush.msra.mxu0 %v55_v29  ;;  %143 = vmatpush.msra.mxu1 %v56_v30 }
  0x15   :  { %184 = vmatpush.msra.mxu2 %v57_v31 }
  0x16   :  { %103 = vmatpush.msra.mxu0 %v52_v33  ;;  %144 = vmatpush.msra.mxu1 %v53_v34 }
  0x17   :  { %185 = vmatpush.msra.mxu2 %v54_v35 }
  0x18   :  { %15 = vsyncpa [#allocation7], 0  ;;  %104 = vmatpush.msra.mxu0 %v49_v37  ;;  %145 = vmatpush.msra.mxu1 %v50_v38  ;;  %v48_v43 = vld [vmem:[%s2838_s2 + $0x58] sm:$0xff]  ;;  %v1695_v44 = vld [vmem:[%s2839_s3 + $0xf0] sm:$0xff]  ;;  %p291_p0 = scmp.gt.s32.totalorder %s2836_s0, 0 }
  0x19   :  { %186 = vmatpush.msra.mxu2 %v51_v39  ;;  %v43_v45 = vld [vmem:[%s2838_s2 + $0x30] sm:$0xff]  ;;  %v44_v46 = vld [vmem:[%s2838_s2 + $0x38] sm:$0xff]  ;;  %311 = vmatpush.msra.mxu3 %v1680_v40  ;;  %v45_v47 = vld [vmem:[%s2838_s2 + $0x40] sm:$0xff] }
  0x1a   :  { %105 = vmatpush.msra.mxu0 %v46_v41  ;;  %146 = vmatpush.msra.mxu1 %v47_v42  ;;  %v1710_v48 = vld [vmem:[%s2839_s3 + $0xd8] sm:$0xff]  ;;  %v41_v50 = vld [vmem:[%s2838_s2 + $0x20] sm:$0xff]  ;;  %v42_v51 = vld [vmem:[%s2838_s2 + $0x28] sm:$0xff]  ;;  %s2174_s13 = scalar_select %p291_p0, 7, 0 }
  0x1b   :  { %187 = vmatpush.msra.mxu2 %v48_v43  ;;  %v40_v49 = vld [vmem:[%s2838_s2 + $0x18] sm:$0xff]  ;;  %312 = vmatpush.msra.mxu3 %v1695_v44  ;;  %v1725_v52 = vld [vmem:[%s2839_s3 + $0xc0] sm:$0xff]  ;;  %v38_v54 = vld [vmem:[%s2838_s2 + $0x8] sm:$0xff]  ;;  %s2261_s23 = scalar_select %p291_p0, 6, 1 }
  0x1c   :  { %106 = vmatpush.msra.mxu0 %v43_v45  ;;  %147 = vmatpush.msra.mxu1 %v44_v46  ;;  %v37_v53 = vld [vmem:[%s2838_s2] sm:$0xff]  ;;  %v39_v55 = vld [vmem:[%s2838_s2 + $0x10] sm:$0xff]  ;;  %v1744_v57 = vld [vmem:[%s2839_s3 + $0xa8] sm:$0xff]  ;;  %s1337_s16 = smul.u32 24, %s2174_s13  ;;  %s1308_s17 = sshll.u32 %s2174_s13, 3 }
  0x1d   :  { %188 = vmatpush.msra.mxu2 %v45_v47  ;;  %313 = vmatpush.msra.mxu3 %v1710_v48  ;;  %v29_v56 = vld [vmem:[%s2837_s1] sm:$0xff]  ;;  %v1749_v58 = vld [vmem:[%s2839_s3 + $0x178] sm:$0xff]  ;;  %v1754_v59 = vld [vmem:[%s2839_s3 + $0x90] sm:$0xff]  ;;  %s416_s20 = scalar_lea.vmem %s2843_s7, %s1308_s17  ;;  %s1338_s24 = smul.u32 24, %s2261_s23 }
  0x1e   :  { %107 = vmatpush.msra.mxu0 %v40_v49  ;;  %148 = vmatpush.msra.mxu1 %v41_v50  ;;  %v1759_v60 = vld [vmem:[%s2839_s3 + $0x160] sm:$0xff]  ;;  %v1765_v61 = vld [vmem:[%s2839_s3 + $0x170] sm:$0xff]  ;;  %v1771_v62 = vld [vmem:[%s2839_s3 + $0x78] sm:$0xff]  ;;  %s1312_s26 = sshll.u32 %s2261_s23, 3 }
  0x1f   :  { %189 = vmatpush.msra.mxu2 %v42_v51  ;;  %314 = vmatpush.msra.mxu3 %v1725_v52  ;;  %v1776_v63 = vld [vmem:[%s2839_s3 + $0x148] sm:$0xff]  ;;  %v1784_v0 = vld [vmem:[%s2839_s3 + $0x158] sm:$0xff]  ;;  %v1793_v2 = vld [vmem:[%s2839_s3 + $0x60] sm:$0xff]  ;;  %s2265_s25 = scalar_lea.vmem [#allocation2], %s1338_s24  ;;  %s535_s29 = scalar_lea.vmem %s2843_s7, %s1312_s26 }
  0x20   :  { %108 = vmatpush.msra.mxu0 %v37_v53  ;;  %149 = vmatpush.msra.mxu1 %v38_v54  ;;  %v30_v1 = vld [vmem:[%s2837_s1 + $0x8] sm:$0xff]  ;;  %v1801_v3 = vld [vmem:[%s2839_s3 + $0x140] sm:$0xff]  ;;  %v1815_v5 = vld [vmem:[%s2839_s3 + $0x30] sm:$0xff]  ;;  %s2723_s12 = scalar_select %p291_p0, 3, 4 }
  0x21   :  { %190 = vmatpush.msra.mxu2 %v39_v55  ;;  %109 = vmatmul.f32.vlgmr.msra.gmra.mxu0 %v29_v56  ;;  %v1807_v4 = vld [vmem:[%s2839_s3 + $0x48] sm:$0xff]  ;;  %2875 = vst [vmem:[#allocation9_spill] sm:$0xff] %v1815_v5  ;;  %v1820_v6 = vld [vmem:[%s2839_s3 + $0x130] sm:$0xff]  ;;  %v1832_v8 = vld [vmem:[%s2839_s3 + $0x118] sm:$0xff]  ;;  %s2765_s19 = scalar_select %p291_p0, 2, 5 }
  0x22   :  { %150 = vmatmul.f32.vlgmr.msra.gmra.mxu1 %v29_v56  ;;  %191 = vmatmul.f32.vlgmr.msra.gmra.mxu2 %v29_v56  ;;  %v1826_v7 = vld [vmem:[%s2839_s3 + $0x128] sm:$0xff]  ;;  %v1837_v9 = vld [vmem:[%s2839_s3 + $0x18] sm:$0xff]  ;;  %v1845_v10 = vld [vmem:[%s2839_s3 + $0x110] sm:$0xff]  ;;  %s1341_s2 = smul.u32 24, %s2723_s12  ;;  %s1324_s14 = sshll.u32 %s2723_s12, 3 }
  0x23   :  { %315 = vmatpush.msra.mxu3 %v1744_v57  ;;  %347 = vmatpush.msrb.mxu0 %v1749_v58  ;;  %2876 = vst [vmem:[#allocation10_spill] sm:$0xff] %v1837_v9  ;;  %v31_v11 = vld [vmem:[%s2837_s1 + $0x10] sm:$0xff]  ;;  %v1854_v12 = vld [vmem:[%s2839_s3] sm:$0xff]  ;;  %v1862_v13 = vld [vmem:[%s2839_s3 + $0xf8] sm:$0xff]  ;;  %s1328_s22 = sshll.u32 %s2765_s19, 3 }
  0x24   :  { %426 = vmatpush.msrb.mxu1 %v1627_v26  ;;  %446 = vmatpush.msrb.mxu2 %v1765_v61  ;;  %2877 = vst [vmem:[#allocation11_spill] sm:$0xff] %v1854_v12  ;;  %v1870_v14 = vld [vmem:[%s2842_s6] sm:$0xff]  ;;  %v1882_v16 = vld [vmem:[%s2839_s3 + $0xe8] sm:$0xff]  ;;  %v32_v18 = vld [vmem:[%s2837_s1 + $0x18] sm:$0xff]  ;;  %s2791_s28 = scalar_select %p291_p0, 1, 6 }
  0x25   :  { %316 = vmatpush.msra.mxu3 %v1754_v59  ;;  %348 = vmatpush.msrb.mxu0 %v1759_v60  ;;  %v1875_v15 = vld [vmem:[%s2839_s3 + $0x100] sm:$0xff]  ;;  %v1902_v19 = vld [vmem:[%s2839_s3 + $0xc8] sm:$0xff]  ;;  %v1910_v20 = vld [vmem:[%s2839_s3 + $0xd0] sm:$0xff] }
  0x26   :  { %427 = vmatpush.msrb.mxu1 %v1635_v28  ;;  %447 = vmatpush.msrb.mxu2 %v1784_v0  ;;  %v1890_v17 = vld [vmem:[%s2839_s3 + $0xe0] sm:$0xff]  ;;  %v1915_v21 = vld [vmem:[%s2839_s3 + $0xb8] sm:$0xff]  ;;  %v1921_v22 = vld [vmem:[%s2839_s3 + $0xb0] sm:$0xff] }
  0x27   :  { %317 = vmatpush.msra.mxu3 %v1771_v62  ;;  %349 = vmatpush.msrb.mxu0 %v1776_v63  ;;  %v1927_v23 = vld [vmem:[%s2839_s3 + $0xa0] sm:$0xff]  ;;  %v1935_v24 = vld [vmem:[%s2839_s3 + $0x98] sm:$0xff]  ;;  %v1953_v29 = vld [vmem:[%s2839_s3 + $0x88] sm:$0xff] }
  0x28   :  { %428 = vmatpush.msrb.mxu1 %v1650_v32  ;;  %448 = vmatpush.msrb.mxu2 %v1801_v3  ;;  %v33_v25 = vld [vmem:[%s2837_s1 + $0x20] sm:$0xff]  ;;  %v1961_v30 = vld [vmem:[%s2839_s3 + $0x70] sm:$0xff]  ;;  %v1967_v31 = vld [vmem:[%s2839_s3 + $0x68] sm:$0xff] }
  0x29   :  { %112 = vmatmul.f32.gmra.mxu0 %v30_v1  ;;  %318 = vmatpush.msra.mxu3 %v1793_v2  ;;  %v1947_v27 = vld [vmem:[%s2839_s3 + $0x80] sm:$0xff]  ;;  %v1973_v33 = vld [vmem:[%s2839_s3 + $0x58] sm:$0xff]  ;;  %v1981_v34 = vld [vmem:[%s2839_s3 + $0x50] sm:$0xff] }
  0x2a   :  { %153 = vmatmul.f32.gmra.mxu1 %v30_v1  ;;  %194 = vmatmul.f32.gmra.mxu2 %v30_v1  ;;  %v34_v35 = vld [vmem:[%s2837_s1 + $0x28] sm:$0xff]  ;;  %v1993_v37 = vld [vmem:[%s2839_s3 + $0x38] sm:$0xff]  ;;  %v1999_v38 = vld [vmem:[%s2839_s3 + $0x40] sm:$0xff] }
  0x2b   :  { %319 = vmatpush.msra.mxu3 %v1807_v4  ;;  %350 = vmatpush.msrb.mxu0 %v1820_v6  ;;  %2878 = vst [vmem:[#allocation12_spill] sm:$0xff] %v1993_v37  ;;  %v2007_v39 = vld [vmem:[%s2839_s3 + $0x28] sm:$0xff]  ;;  %v2013_v41 = vld [vmem:[%s2839_s3 + $0x20] sm:$0xff]  ;;  %v2019_v42 = vld [vmem:[%s2839_s3 + $0x10] sm:$0xff] }
  0x2c   :  { %429 = vmatpush.msrb.mxu1 %v1665_v36  ;;  %449 = vmatpush.msrb.mxu2 %v1826_v7  ;;  %2879 = vst [vmem:[#allocation13_spill] sm:$0xff] %v2007_v39  ;;  %v2027_v43 = vld [vmem:[%s2839_s3 + $0x8] sm:$0xff]  ;;  %v35_v45 = vld [vmem:[%s2837_s1 + $0x30] sm:$0xff]  ;;  %v36_v46 = vld [vmem:[%s2837_s1 + $0x38] sm:$0xff]  ;;  %s2405_s1 = scalar_select %p291_p0, 5, 2 }
  0x2d   :  { %320 = vmatpush.msra.mxu3 %v1815_v5  ;;  %351 = vmatpush.msrb.mxu0 %v1832_v8  ;;  %2880 = vst [vmem:[#allocation14_spill] sm:$0xff] %v2013_v41  ;;  %v85_v47 = vld [vmem:[%s2840_s4] sm:$0x7] }
  0x2e   :  { %430 = vmatpush.msrb.mxu1 %v1680_v40  ;;  %450 = vmatpush.msrb.mxu2 %v1845_v10  ;;  %2881 = vst [vmem:[#allocation15_spill] sm:$0xff] %v2019_v42  ;;  %v2141_v49 = vperm.slane %v85_v47, 0  ;;  %v2143_v50 = vperm.slane %v85_v47, 1  ;;  %v2147_v56 = vperm.slane %v85_v47, 2  ;;  %s1339_s6 = smul.u32 24, %s2405_s1  ;;  %s1316_s11 = sshll.u32 %s2405_s1, 3 }
  0x2f   :  { %321 = vmatpush.msra.mxu3 %v1837_v9  ;;  %352 = vmatpush.msrb.mxu0 %v1875_v15  ;;  %2882 = vst [vmem:[#allocation16_spill] sm:$0xff] %v2027_v43  ;;  %s654_s13 = scalar_lea.vmem %s2843_s7, %s1316_s11 }
  0x30   :  { %431 = vmatpush.msrb.mxu1 %v1695_v44  ;;  %451 = vmatpush.msrb.mxu2 %v1862_v13  ;;  %s2410_s4 = scalar_lea.vmem [#allocation2], %s1339_s6 }
  0x31   :  { %115 = vmatmul.f32.gmra.mxu0 %v31_v11  ;;  %322 = vmatpush.msra.mxu3 %v1854_v12  ;;  %s2817_s11 = scalar_select %p291_p0, 0, 7 }
  0x32   :  { %156 = vmatmul.f32.gmra.mxu1 %v31_v11  ;;  %197 = vmatmul.f32.gmra.mxu2 %v31_v11 }
  0x33   :  { %327 = vmatpush.msrb.mxu3 %v1765_v61  ;;  %432 = vmatpush.msrb.mxu1 %v1710_v48  ;;  %s1344_s12 = smul.u32 24, %s2817_s11  ;;  %s1336_s0 = sshll.u32 %s2817_s11, 3 }
  0x34   :  { %323 = vmatmul.f32.vlgmr.msra.gmra.mxu3 %v1870_v14  ;;  %353 = vmatpush.msrb.mxu0 %v1882_v16 }
  0x35   :  { %328 = vmatpush.msrb.mxu3 %v1784_v0  ;;  %452 = vmatpush.msrb.mxu2 %v1890_v17 }
  0x36   :  { %433 = vmatpush.msrb.mxu1 %v1725_v52  ;;  %354 = vmatpush.msrb.mxu0 %v1910_v20 }
  0x37   :  { %329 = vmatpush.msrb.mxu3 %v1801_v3  ;;  %453 = vmatpush.msrb.mxu2 %v1902_v19 }
  0x38   :  { %434 = vmatpush.msrb.mxu1 %v1744_v57  ;;  %355 = vmatpush.msrb.mxu0 %v1915_v21 }
  0x39   :  { %118 = vmatmul.f32.gmra.mxu0 %v32_v18  ;;  %330 = vmatpush.msrb.mxu3 %v1826_v7 }
  0x3a   :  { %159 = vmatmul.f32.gmra.mxu1 %v32_v18  ;;  %200 = vmatmul.f32.gmra.mxu2 %v32_v18 }
  0x3b   :  { %331 = vmatpush.msrb.mxu3 %v1845_v10  ;;  %454 = vmatpush.msrb.mxu2 %v1921_v22 }
  0x3c   :  { %435 = vmatpush.msrb.mxu1 %v1754_v59  ;;  %356 = vmatpush.msrb.mxu0 %v1927_v23 }
  0x3d   :  { %332 = vmatpush.msrb.mxu3 %v1862_v13  ;;  %455 = vmatpush.msrb.mxu2 %v1935_v24 }
  0x3e   :  { %436 = vmatpush.msrb.mxu1 %v1771_v62  ;;  %357 = vmatpush.msrb.mxu0 %v1953_v29 }
  0x3f   :  { %333 = vmatpush.msrb.mxu3 %v1890_v17  ;;  %456 = vmatpush.msrb.mxu2 %v1947_v27 }
  0x40   :  { %437 = vmatpush.msrb.mxu1 %v1793_v2  ;;  %358 = vmatpush.msrb.mxu0 %v1961_v30 }
  0x41   :  { %121 = vmatmul.f32.gmra.mxu0 %v33_v25  ;;  %334 = vmatpush.msrb.mxu3 %v1902_v19 }
  0x42   :  { %162 = vmatmul.f32.gmra.mxu1 %v33_v25  ;;  %203 = vmatmul.f32.gmra.mxu2 %v33_v25 }
  0x43   :  { %335 = vmatpush.msrb.mxu3 %v1921_v22  ;;  %457 = vmatpush.msrb.mxu2 %v1967_v31 }
  0x44   :  { %438 = vmatpush.msrb.mxu1 %v1807_v4  ;;  %359 = vmatpush.msrb.mxu0 %v1973_v33 }
  0x45   :  { %336 = vmatpush.msrb.mxu3 %v1935_v24  ;;  %458 = vmatpush.msrb.mxu2 %v1981_v34 }
  0x46   :  { %439 = vmatpush.msrb.mxu1 %v1815_v5  ;;  %360 = vmatpush.msrb.mxu0 %v1999_v38 }
  0x47   :  { %337 = vmatpush.msrb.mxu3 %v1947_v27  ;;  %459 = vmatpush.msrb.mxu2 %v1993_v37 }
  0x48   :  { %440 = vmatpush.msrb.mxu1 %v1837_v9  ;;  %361 = vmatpush.msrb.mxu0 %v2007_v39 }
  0x49   :  { %124 = vmatmul.f32.gmra.mxu0 %v34_v35  ;;  %338 = vmatpush.msrb.mxu3 %v1967_v31 }
  0x4a   :  { %165 = vmatmul.f32.gmra.mxu1 %v34_v35  ;;  %206 = vmatmul.f32.gmra.mxu2 %v34_v35 }
  0x4b   :  { %339 = vmatpush.msrb.mxu3 %v1981_v34  ;;  %460 = vmatpush.msrb.mxu2 %v2013_v41 }
  0x4c   :  { %441 = vmatpush.msrb.mxu1 %v1854_v12  ;;  %362 = vmatpush.msrb.mxu0 %v2019_v42 }
  0x4d   :  { %340 = vmatpush.msrb.mxu3 %v1993_v37  ;;  %461 = vmatpush.msrb.mxu2 %v2027_v43 }
  0x4e   :  { %565 = vmatpush.msra.mxu1 %v1765_v61  ;;  %545 = vmatpush.msra.mxu0 %v1627_v26 }
  0x4f   :  { %341 = vmatpush.msrb.mxu3 %v2013_v41  ;;  %585 = vmatpush.msra.mxu2 %v1749_v58 }
  0x50   :  { %546 = vmatpush.msra.mxu0 %v1635_v28  ;;  %566 = vmatpush.msra.mxu1 %v1784_v0 }
  0x51   :  { %127 = vmatmul.f32.gmra.mxu0 %v35_v45  ;;  %342 = vmatpush.msrb.mxu3 %v2027_v43 }
  0x52   :  { %168 = vmatmul.f32.gmra.mxu1 %v35_v45  ;;  %209 = vmatmul.f32.gmra.mxu2 %v35_v45 }
  0x53   :  { %343 = vmatmul.f32.vlgmr.msrb.gmra.mxu3 %v1870_v14  ;;  %586 = vmatpush.msra.mxu2 %v1759_v60 }
  0x54   :  { %466 = vmatpush.msra.mxu3 %v1749_v58  ;;  %547 = vmatpush.msra.mxu0 %v1650_v32 }
  0x55   :  { %567 = vmatpush.msra.mxu1 %v1801_v3  ;;  %587 = vmatpush.msra.mxu2 %v1776_v63 }
  0x56   :  { %467 = vmatpush.msra.mxu3 %v1759_v60  ;;  %548 = vmatpush.msra.mxu0 %v1665_v36 }
  0x57   :  { %568 = vmatpush.msra.mxu1 %v1826_v7  ;;  %588 = vmatpush.msra.mxu2 %v1820_v6 }
  0x58   :  { %468 = vmatpush.msra.mxu3 %v1776_v63  ;;  %549 = vmatpush.msra.mxu0 %v1680_v40 }
  0x59   :  { %130 = vmatmul.f32.gmra.mxu0 %v36_v46  ;;  %569 = vmatpush.msra.mxu1 %v1845_v10 }
  0x5a   :  { %171 = vmatmul.f32.gmra.mxu1 %v36_v46  ;;  %212 = vmatmul.f32.gmra.mxu2 %v36_v46 }
  0x5b   :  { %469 = vmatpush.msra.mxu3 %v1820_v6  ;;  %589 = vmatpush.msra.mxu2 %v1832_v8 }
  0x5c   :  { %550 = vmatpush.msra.mxu0 %v1695_v44  ;;  %570 = vmatpush.msra.mxu1 %v1862_v13 }
  0x5d   :  { %470 = vmatpush.msra.mxu3 %v1832_v8  ;;  %590 = vmatpush.msra.mxu2 %v1875_v15 }
  0x5e   :  { %551 = vmatpush.msra.mxu0 %v1710_v48  ;;  %571 = vmatpush.msra.mxu1 %v1890_v17 }
  0x5f   :  { %471 = vmatpush.msra.mxu3 %v1875_v15  ;;  %591 = vmatpush.msra.mxu2 %v1882_v16 }
  0x60   :  { %552 = vmatpush.msra.mxu0 %v1725_v52  ;;  %572 = vmatpush.msra.mxu1 %v1902_v19 }
  0x61   :  { %363 = vmatmul.f32.vlgmr.msrb.gmra.mxu0 %v1870_v14  ;;  %472 = vmatpush.msra.mxu3 %v1882_v16 }
  0x62   :  { %592 = vmatpush.msra.mxu2 %v1910_v20  ;;  %553 = vmatpush.msra.mxu0 %v1744_v57 }
  0x63   :  { %473 = vmatpush.msra.mxu3 %v1910_v20  ;;  %573 = vmatpush.msra.mxu1 %v1921_v22 }
  0x64   :  { %593 = vmatpush.msra.mxu2 %v1915_v21  ;;  %554 = vmatpush.msra.mxu0 %v1754_v59 }
  0x65   :  { %474 = vmatpush.msra.mxu3 %v1915_v21  ;;  %574 = vmatpush.msra.mxu1 %v1935_v24 }
  0x66   :  { %594 = vmatpush.msra.mxu2 %v1927_v23  ;;  %555 = vmatpush.msra.mxu0 %v1771_v62 }
  0x67   :  { %475 = vmatpush.msra.mxu3 %v1927_v23  ;;  %575 = vmatpush.msra.mxu1 %v1947_v27 }
  0x68   :  { %595 = vmatpush.msra.mxu2 %v1953_v29  ;;  %556 = vmatpush.msra.mxu0 %v1793_v2 }
  0x69   :  { %476 = vmatpush.msra.mxu3 %v1953_v29  ;;  %576 = vmatpush.msra.mxu1 %v1967_v31 }
  0x6a   :  { %596 = vmatpush.msra.mxu2 %v1961_v30  ;;  %557 = vmatpush.msra.mxu0 %v1807_v4 }
  0x6b   :  { %477 = vmatpush.msra.mxu3 %v1961_v30  ;;  %577 = vmatpush.msra.mxu1 %v1981_v34 }
  0x6c   :  { %597 = vmatpush.msra.mxu2 %v1973_v33  ;;  %558 = vmatpush.msra.mxu0 %v1815_v5 }
  0x6d   :  { %478 = vmatpush.msra.mxu3 %v1973_v33  ;;  %578 = vmatpush.msra.mxu1 %v1993_v37 }
  0x6e   :  { %598 = vmatpush.msra.mxu2 %v1999_v38  ;;  %559 = vmatpush.msra.mxu0 %v1837_v9 }
  0x6f   :  { %479 = vmatpush.msra.mxu3 %v1999_v38  ;;  %579 = vmatpush.msra.mxu1 %v2013_v41 }
  0x70   :  { %599 = vmatpush.msra.mxu2 %v2007_v39  ;;  %560 = vmatpush.msra.mxu0 %v1854_v12 }
  0x71   :  { %480 = vmatpush.msra.mxu3 %v2007_v39  ;;  %580 = vmatpush.msra.mxu1 %v2027_v43 }
  0x72   :  { %600 = vmatpush.msra.mxu2 %v2019_v42  ;;  %684 = vmatpush.msrb.mxu0 %v1765_v61 }
  0x73   :  { %481 = vmatpush.msra.mxu3 %v2019_v42 }
  0x74   :  { %685 = vmatpush.msrb.mxu0 %v1784_v0 }
  0x75   :  { %664 = vmatpush.msrb.mxu3 %v1627_v26 }
  0x76   :  { %686 = vmatpush.msrb.mxu0 %v1801_v3 }
  0x77   :  { %665 = vmatpush.msrb.mxu3 %v1635_v28 }
  0x78   :  { %687 = vmatpush.msrb.mxu0 %v1826_v7 }
  0x79   :  { %666 = vmatpush.msrb.mxu3 %v1650_v32 }
  0x7a   :  { %688 = vmatpush.msrb.mxu0 %v1845_v10 }
  0x7b   :  { %667 = vmatpush.msrb.mxu3 %v1665_v36 }
  0x7c   :  { %689 = vmatpush.msrb.mxu0 %v1862_v13 }
  0x7d   :  { %668 = vmatpush.msrb.mxu3 %v1680_v40 }
  0x7e   :  { %690 = vmatpush.msrb.mxu0 %v1890_v17 }
  0x7f   :  { %669 = vmatpush.msrb.mxu3 %v1695_v44 }
  0x80   :  { %691 = vmatpush.msrb.mxu0 %v1902_v19 }
  0x81   :  { %670 = vmatpush.msrb.mxu3 %v1710_v48 }
  0x82   :  { %692 = vmatpush.msrb.mxu0 %v1921_v22 }
  0x83   :  { %671 = vmatpush.msrb.mxu3 %v1725_v52 }
  0x84   :  { %693 = vmatpush.msrb.mxu0 %v1935_v24 }
  0x85   :  { %672 = vmatpush.msrb.mxu3 %v1744_v57 }
  0x86   :  { %694 = vmatpush.msrb.mxu0 %v1947_v27 }
  0x87   :  { %673 = vmatpush.msrb.mxu3 %v1754_v59 }
  0x88   :  { %695 = vmatpush.msrb.mxu0 %v1967_v31 }
  0x89   :  { %674 = vmatpush.msrb.mxu3 %v1771_v62 }
  0x8a   :  { %696 = vmatpush.msrb.mxu0 %v1981_v34 }
  0x8b   :  { %675 = vmatpush.msrb.mxu3 %v1793_v2 }
  0x8c   :  { %697 = vmatpush.msrb.mxu0 %v1993_v37 }
  0x8d   :  { %676 = vmatpush.msrb.mxu3 %v1807_v4 }
  0x8e   :  { %698 = vmatpush.msrb.mxu0 %v2013_v41 }
  0x8f   :  { %677 = vmatpush.msrb.mxu3 %v1815_v5 }
  0x90   :  { %699 = vmatpush.msrb.mxu0 %v2027_v43 }
  0x91   :  { %678 = vmatpush.msrb.mxu3 %v1837_v9 }
  0x93   :  { %679 = vmatpush.msrb.mxu3 %v1854_v12 }
  0x9e   :  { %v110_v51 = vpop.f32.mrf.mxu0 }
  0x9f   :  { %v111_v53 = vadd.f32 %v110_v51, %v2141_v49  ;;  %v151_v54 = vpop.f32.mrf.mxu1 }
  0xa0   :  { %v152_v55 = vadd.f32 %v151_v54, %v2143_v50 }
  0xa1   :  { %216 = vst [vmem:[#allocation2] sm:$0xff] %v111_v53 }
  0xa2   :  { %217 = vst [vmem:[#allocation2 + $0x8] sm:$0xff] %v152_v55 }
  0xa5   :  { %v192_v1 = vpop.f32.mrf.mxu2 }
  0xa6   :  { %v193_v11 = vadd.f32 %v192_v1, %v2147_v56  ;;  %v113_v18 = vpop.f32.mrf.mxu0 }
  0xa7   :  { %v114_v25 = vadd.f32 %v113_v18, %v2141_v49  ;;  %v154_v35 = vpop.f32.mrf.mxu1 }
  0xa8   :  { %218 = vst [vmem:[#allocation2 + $0x10] sm:$0xff] %v193_v11  ;;  %v155_v45 = vadd.f32 %v154_v35, %v2143_v50 }
  0xa9   :  { %219 = vst [vmem:[#allocation2 + $0x18] sm:$0xff] %v114_v25 }
  0xaa   :  { %220 = vst [vmem:[#allocation2 + $0x20] sm:$0xff] %v155_v45 }
  0xad   :  { %v195_v46 = vpop.f32.mrf.mxu2 }
  0xae   :  { %v196_v51 = vadd.f32 %v195_v46, %v2147_v56  ;;  %v116_v54 = vpop.f32.mrf.mxu0 }
  0xaf   :  { %v117_v53 = vadd.f32 %v116_v54, %v2141_v49  ;;  %v157_v47 = vpop.f32.mrf.mxu1 }
  0xb0   :  { %221 = vst [vmem:[#allocation2 + $0x28] sm:$0xff] %v196_v51  ;;  %v158_v55 = vadd.f32 %v157_v47, %v2143_v50 }
  0xb1   :  { %222 = vst [vmem:[#allocation2 + $0x30] sm:$0xff] %v117_v53 }
  0xb2   :  { %223 = vst [vmem:[#allocation2 + $0x38] sm:$0xff] %v158_v55 }
  0xb5   :  { %v198_v1 = vpop.f32.mrf.mxu2 }
  0xb6   :  { %v199_v18 = vadd.f32 %v198_v1, %v2147_v56  ;;  %v119_v11 = vpop.f32.mrf.mxu0 }
  0xb7   :  { %v120_v35 = vadd.f32 %v119_v11, %v2141_v49  ;;  %v160_v25 = vpop.f32.mrf.mxu1 }
  0xb8   :  { %224 = vst [vmem:[#allocation2 + $0x40] sm:$0xff] %v199_v18  ;;  %v161_v45 = vadd.f32 %v160_v25, %v2143_v50 }
  0xb9   :  { %225 = vst [vmem:[#allocation2 + $0x48] sm:$0xff] %v120_v35 }
  0xba   :  { %226 = vst [vmem:[#allocation2 + $0x50] sm:$0xff] %v161_v45 }
  0xbd   :  { %v201_v46 = vpop.f32.mrf.mxu2 }
  0xbe   :  { %v202_v54 = vadd.f32 %v201_v46, %v2147_v56  ;;  %v122_v51 = vpop.f32.mrf.mxu0 }
  0xbf   :  { %v123_v47 = vadd.f32 %v122_v51, %v2141_v49  ;;  %v163_v53 = vpop.f32.mrf.mxu1 }
  0xc0   :  { %227 = vst [vmem:[#allocation2 + $0x58] sm:$0xff] %v202_v54  ;;  %v164_v55 = vadd.f32 %v163_v53, %v2143_v50 }
  0xc1   :  { %228 = vst [vmem:[#allocation2 + $0x60] sm:$0xff] %v123_v47 }
  0xc2   :  { %229 = vst [vmem:[#allocation2 + $0x68] sm:$0xff] %v164_v55 }
  0xc5   :  { %v204_v1 = vpop.f32.mrf.mxu2 }
  0xc6   :  { %v205_v11 = vadd.f32 %v204_v1, %v2147_v56  ;;  %v125_v18 = vpop.f32.mrf.mxu0  ;;  %v324_v1 = vpop.f32.mrf.mxu3 }
  0xc7   :  { %v126_v25 = vadd.f32 %v125_v18, %v2141_v49  ;;  %v166_v35 = vpop.f32.mrf.mxu1 }
  0xc8   :  { %230 = vst [vmem:[#allocation2 + $0x70] sm:$0xff] %v205_v11  ;;  %v167_v45 = vadd.f32 %v166_v35, %v2143_v50  ;;  %v288_v35 = vld [vmem:[%s2841_s5] sm:$0x7]  ;;  %s2190_s5 = scalar_lea.vmem [#allocation2], %s1337_s16 }
  0xc9   :  { %231 = vst [vmem:[#allocation2 + $0x78] sm:$0xff] %v126_v25  ;;  %v2194_v41 = vperm.slane %v288_v35, 2 }
  0xca   :  { %232 = vst [vmem:[#allocation2 + $0x80] sm:$0xff] %v167_v45 }
  0xcd   :  { %v207_v46 = vpop.f32.mrf.mxu2 }
  0xce   :  { %v208_v51 = vadd.f32 %v207_v46, %v2147_v56  ;;  %v128_v54 = vpop.f32.mrf.mxu0 }
  0xcf   :  { %v129_v53 = vadd.f32 %v128_v54, %v2141_v49  ;;  %v169_v47 = vpop.f32.mrf.mxu1  ;;  %v2183_v54 = vperm.slane %v288_v35, 0 }
  0xd0   :  { %233 = vst [vmem:[#allocation2 + $0x88] sm:$0xff] %v208_v51  ;;  %v170_v55 = vadd.f32 %v169_v47, %v2143_v50 }
  0xd1   :  { %234 = vst [vmem:[#allocation2 + $0x90] sm:$0xff] %v129_v53  ;;  %v2185_v53 = vperm.slane %v288_v35, 1 }
  0xd2   :  { %235 = vst [vmem:[#allocation2 + $0x98] sm:$0xff] %v170_v55  ;;  %v325_v55 = vadd.f32 %v324_v1, %v2183_v54 }
  0xd3   :  { %2883 = vst [vmem:[#allocation17_spill] sm:$0xff] %v2183_v54 }
  0xd4   :  { %2884 = vst [vmem:[#allocation18_spill] sm:$0xff] %v2185_v53 }
  0xd5   :  { %v210_v11 = vpop.f32.mrf.mxu2 }
  0xd6   :  { %v211_v18 = vadd.f32 %v210_v11, %v2147_v56  ;;  %v131_v25 = vpop.f32.mrf.mxu0  ;;  %v344_v47 = vpop.f32.mrf.mxu3 }
  0xd7   :  { %v132_v45 = vadd.f32 %v131_v25, %v2141_v49  ;;  %v172_v46 = vpop.f32.mrf.mxu1  ;;  %v345_v12 = vadd.f32 %v344_v47, %v2185_v53 }
  0xd8   :  { %236 = vst [vmem:[#allocation2 + $0xa0] sm:$0xff] %v211_v18  ;;  %v173_v51 = vadd.f32 %v172_v46, %v2143_v50 }
  0xd9   :  { %237 = vst [vmem:[#allocation2 + $0xa8] sm:$0xff] %v132_v45 }
  0xda   :  { %238 = vst [vmem:[#allocation2 + $0xb0] sm:$0xff] %v173_v51 }
  0xdd   :  { %v213_v11 = vpop.f32.mrf.mxu2 }
  0xde   :  { %v214_v43 = vadd.f32 %v213_v11, %v2147_v56 }
  0xe1   :  { %v297_v49 = vld [vmem:[%s2190_s5] sm:$0xff] }
  0xe2   :  { %239 = vst [vmem:[#allocation2 + $0xb8] sm:$0xff] %v214_v43  ;;  %v367_v50 = vadd.f32 %v325_v55, %v297_v49  ;;  %v364_v49 = vpop.f32.mrf.mxu0 }
  0xe4   :  { %v1306_v45 = vmul.f32 -1.442695, %v367_v50 }
  0xe6   :  { %1346 = vpow2.f32 %v1306_v45  ;;  %v365_v45 = vadd.f32 %v364_v49, %v2194_v41 }
  0xe9   :  { %v298_v18 = vld [vmem:[%s2190_s5 + $0x8] sm:$0xff] }
  0xea   :  { %v387_v25 = vadd.f32 %v345_v12, %v298_v18 }
  0xec   :  { %v1307_v46 = vmul.f32 -1.442695, %v387_v25  ;;  %v1347_v51 = vpop.eup %1346 }
  0xed   :  { %v371_v54 = vadd.f32 1.0, %v1347_v51 }
  0xee   :  { %1348 = vpow2.f32 %v1307_v46 }
  0xef   :  { %1350 = vrcp.f32 %v371_v54  ;;  %v383_v12 = vand.u32 2147483648, %v371_v54  ;;  %v381_v18 = vand.u32 2147483647, %v371_v54  ;;  %vm377_vm1 = vweird.f32 %v371_v54 }
  0xf1   :  { %v384_v51 = vor.u32 1.1754944e-38, %v383_v12  ;;  %vm382_vm3 = vcmp.eq.f32.partialorder %v381_v18, 8.507059e+37 }
  0xf4   :  { %v1349_v1 = vpop.eup %1348 }
  0xf5   :  { %v391_v42 = vadd.f32 1.0, %v1349_v1  ;;  %v1351_v56 = vpop.eup %1350 }
  0xf6   :  { %v373_v11 = vmul.f32 %v1351_v56, %v371_v54  ;;  %vm378_vm0 = vweird.f32 %v1351_v56 }
  0xf7   :  { %1352 = vrcp.f32 %v391_v42  ;;  %vm379_vm2 = vmor %vm377_vm1, %vm378_vm0  ;;  %vm397_vm5 = vweird.f32 %v391_v42  ;;  %v401_v39 = vand.u32 2147483647, %v391_v42 }
  0xf8   :  { %v374_v43 = vsub.f32 1.0, %v373_v11 }
  0xf9   :  { %vm402_vm7 = vcmp.eq.f32.partialorder %v401_v39, 8.507059e+37  ;;  %v424_v39 = vld [vmem:[%s2265_s25 + $0x8] sm:$0xff] }
  0xfa   :  { %v375_v50 = vmul.f32 %v1351_v56, %v374_v43  ;;  %v299_v43 = vld [vmem:[%s2190_s5 + $0x10] sm:$0xff]  ;;  %s892_s5 = scalar_lea.vmem %s2843_s7, %s1324_s14 }
  0xfc   :  { %v376_v46 = vadd.f32 %v1351_v56, %v375_v50 }
  0xfd   :  { %v1353_v47 = vpop.eup %1352 }
  0xfe   :  { %v393_v53 = vmul.f32 %v1353_v47, %v391_v42  ;;  %v380_v1 = vsel %vm379_vm2, %v1351_v56, %v376_v46  ;;  %vm398_vm4 = vweird.f32 %v1353_v47 }
  0xff   :  { %v385_v35 = vsel %vm382_vm3, %v384_v51, %v380_v1  ;;  %vm399_vm6 = vmor %vm397_vm5, %vm398_vm4 }
 0x100   :  { %v394_v55 = vsub.f32 1.0, %v393_v53  ;;  %v403_v53 = vand.u32 2147483648, %v391_v42  ;;  %v407_v9 = vmul.f32 %v385_v35, %v365_v45 }
 0x102   :  { %v395_v25 = vmul.f32 %v1353_v47, %v394_v55  ;;  %v408_v37 = vadd.f32 %v407_v9, %v299_v43  ;;  %v404_v5 = vor.u32 1.1754944e-38, %v403_v53 }
 0x104   :  { %v396_v11 = vadd.f32 %v1353_v47, %v395_v25  ;;  %1354 = vtanh.f32 %v408_v37 }
 0x106   :  { %v400_v55 = vsel %vm399_vm6, %v1353_v47, %v396_v11 }
 0x107   :  { %v405_v54 = vsel %vm402_vm7, %v404_v5, %v400_v55 }
 0x108   :  { %v410_v49 = vsub.f32 1.0, %v405_v54  ;;  %v412_v50 = vmul.f32 %v405_v54, %v1870_v14  ;;  %v2894_v14 = vld [vmem:[#allocation18_spill] sm:$0xff] }
 0x10a   :  { %v1355_v56 = vpop.eup %1354 }
 0x10b   :  { %v411_v12 = vmul.f32 %v1355_v56, %v410_v49 }
 0x10d   :  { %v2203_v18 = vadd.f32 %v412_v50, %v411_v12 }
 0x10f   :  { %442 = vmatmul.f32.vlgmr.msrb.gmra.mxu1 %v2203_v18  ;;  %417 = vst [vmem:[%s416_s20] sm:$0xff] %v2203_v18  ;;  %462 = vmatmul.f32.vlgmr.msrb.gmra.mxu2 %v2203_v18  ;;  %s1342_s20 = smul.u32 24, %s2765_s19  ;;  %s1249_s19 = scalar_lea.vmem %s2843_s7, %s1336_s0 }
 0x110   :  { %482 = vmatmul.f32.vlgmr.msra.gmra.mxu3 %v2203_v18  ;;  %704 = vmatpush.msrb.mxu1 %v1749_v58 }
 0x111   :  { %783 = vmatpush.msrb.mxu2 %v1627_v26  ;;  %803 = vmatpush.msra.mxu3 %v1765_v61  ;;  %v2885_v26 = vld [vmem:[#allocation9_spill] sm:$0xff]  ;;  %s2769_s21 = scalar_lea.vmem [#allocation2], %s1342_s20 }
 0x112   :  { %705 = vmatpush.msrb.mxu1 %v1759_v60 }
 0x113   :  { %784 = vmatpush.msrb.mxu2 %v1635_v28  ;;  %804 = vmatpush.msra.mxu3 %v1784_v0  ;;  %v2886_v28 = vld [vmem:[#allocation12_spill] sm:$0xff] }
 0x114   :  { %706 = vmatpush.msrb.mxu1 %v1776_v63 }
 0x115   :  { %785 = vmatpush.msrb.mxu2 %v1650_v32  ;;  %805 = vmatpush.msra.mxu3 %v1801_v3  ;;  %v2887_v32 = vld [vmem:[#allocation13_spill] sm:$0xff] }
 0x116   :  { %707 = vmatpush.msrb.mxu1 %v1820_v6 }
 0x117   :  { %786 = vmatpush.msrb.mxu2 %v1665_v36  ;;  %806 = vmatpush.msra.mxu3 %v1826_v7  ;;  %v2888_v36 = vld [vmem:[#allocation10_spill] sm:$0xff] }
 0x118   :  { %708 = vmatpush.msrb.mxu1 %v1832_v8 }
 0x119   :  { %787 = vmatpush.msrb.mxu2 %v1680_v40  ;;  %807 = vmatpush.msra.mxu3 %v1845_v10  ;;  %v2889_v40 = vld [vmem:[#allocation14_spill] sm:$0xff] }
 0x11a   :  { %709 = vmatpush.msrb.mxu1 %v1875_v15 }
 0x11b   :  { %788 = vmatpush.msrb.mxu2 %v1695_v44  ;;  %808 = vmatpush.msra.mxu3 %v1862_v13  ;;  %v2890_v44 = vld [vmem:[#allocation15_spill] sm:$0xff] }
 0x11c   :  { %710 = vmatpush.msrb.mxu1 %v1882_v16 }
 0x11d   :  { %789 = vmatpush.msrb.mxu2 %v1710_v48  ;;  %809 = vmatpush.msra.mxu3 %v1890_v17  ;;  %v2891_v48 = vld [vmem:[#allocation11_spill] sm:$0xff] }
 0x11e   :  { %711 = vmatpush.msrb.mxu1 %v1910_v20 }
 0x11f   :  { %790 = vmatpush.msrb.mxu2 %v1725_v52  ;;  %810 = vmatpush.msra.mxu3 %v1902_v19  ;;  %v2892_v52 = vld [vmem:[#allocation16_spill] sm:$0xff] }
 0x120   :  { %712 = vmatpush.msrb.mxu1 %v1915_v21 }
 0x121   :  { %791 = vmatpush.msrb.mxu2 %v1744_v57  ;;  %811 = vmatpush.msra.mxu3 %v1921_v22 }
 0x122   :  { %713 = vmatpush.msrb.mxu1 %v1927_v23 }
 0x123   :  { %792 = vmatpush.msrb.mxu2 %v1754_v59  ;;  %812 = vmatpush.msra.mxu3 %v1935_v24  ;;  %v2893_v59 = vld [vmem:[#allocation17_spill] sm:$0xff] }
 0x124   :  { %714 = vmatpush.msrb.mxu1 %v1953_v29 }
 0x125   :  { %793 = vmatpush.msrb.mxu2 %v1771_v62  ;;  %813 = vmatpush.msra.mxu3 %v1947_v27 }
 0x126   :  { %715 = vmatpush.msrb.mxu1 %v1961_v30 }
 0x127   :  { %794 = vmatpush.msrb.mxu2 %v1793_v2  ;;  %814 = vmatpush.msra.mxu3 %v1967_v31  ;;  %v423_v2 = vld [vmem:[%s2265_s25] sm:$0xff] }
 0x128   :  { %716 = vmatpush.msrb.mxu1 %v1973_v33 }
 0x129   :  { %795 = vmatpush.msrb.mxu2 %v1807_v4  ;;  %815 = vmatpush.msra.mxu3 %v1981_v34 }
 0x12a   :  { %717 = vmatpush.msrb.mxu1 %v1999_v38 }
 0x12b   :  { %796 = vmatpush.msrb.mxu2 %v2885_v26  ;;  %816 = vmatpush.msra.mxu3 %v2886_v28 }
 0x12c   :  { %718 = vmatpush.msrb.mxu1 %v2887_v32 }
 0x12d   :  { %797 = vmatpush.msrb.mxu2 %v2888_v36  ;;  %817 = vmatpush.msra.mxu3 %v2889_v40 }
 0x12e   :  { %719 = vmatpush.msrb.mxu1 %v2890_v44 }
 0x12f   :  { %798 = vmatpush.msrb.mxu2 %v2891_v48  ;;  %818 = vmatpush.msra.mxu3 %v2892_v52 }
 0x18c   :  { %v443_v57 = vpop.f32.mrf.mxu1 }
 0x18d   :  { %v444_v62 = vadd.f32 %v443_v57, %v2893_v59 }
 0x18f   :  { %v486_v4 = vadd.f32 %v444_v62, %v423_v2 }
 0x191   :  { %v1310_v5 = vmul.f32 -1.442695, %v486_v4 }
 0x192   :  { %v463_v9 = vpop.f32.mrf.mxu2 }
 0x193   :  { %1356 = vpow2.f32 %v1310_v5  ;;  %v464_v37 = vadd.f32 %v463_v9, %v2894_v14  ;;  %v483_v49 = vpop.f32.mrf.mxu3 }
 0x194   :  { %v484_v57 = vadd.f32 %v483_v49, %v2194_v41 }
 0x195   :  { %v506_v42 = vadd.f32 %v464_v37, %v424_v39  ;;  %v425_v37 = vld [vmem:[%s2265_s25 + $0x10] sm:$0xff]  ;;  %s1011_s25 = scalar_lea.vmem %s2843_s7, %s1328_s22 }
 0x197   :  { %v1311_v47 = vmul.f32 -1.442695, %v506_v42 }
 0x199   :  { %v1357_v25 = vpop.eup %1356  ;;  %1358 = vpow2.f32 %v1311_v47 }
 0x19a   :  { %v490_v45 = vadd.f32 1.0, %v1357_v25 }
 0x19c   :  { %1360 = vrcp.f32 %v490_v45  ;;  %v502_v53 = vand.u32 2147483648, %v490_v45  ;;  %v500_v55 = vand.u32 2147483647, %v490_v45  ;;  %vm496_vm9 = vweird.f32 %v490_v45 }
 0x19e   :  { %v503_v50 = vor.u32 1.1754944e-38, %v502_v53  ;;  %vm501_vm11 = vcmp.eq.f32.partialorder %v500_v55, 8.507059e+37 }
 0x19f   :  { %v1359_v46 = vpop.eup %1358 }
 0x1a0   :  { %v510_v51 = vadd.f32 1.0, %v1359_v46 }
 0x1a2   :  { %v1361_v1 = vpop.eup %1360  ;;  %1362 = vrcp.f32 %v510_v51  ;;  %v522_v5 = vand.u32 2147483648, %v510_v51  ;;  %v520_v39 = vand.u32 2147483647, %v510_v51  ;;  %vm516_vm13 = vweird.f32 %v510_v51 }
 0x1a3   :  { %v492_v35 = vmul.f32 %v1361_v1, %v490_v45  ;;  %vm497_vm8 = vweird.f32 %v1361_v1 }
 0x1a4   :  { %vm498_vm10 = vmor %vm496_vm9, %vm497_vm8  ;;  %v523_v25 = vor.u32 1.1754944e-38, %v522_v5  ;;  %vm521_vm15 = vcmp.eq.f32.partialorder %v520_v39, 8.507059e+37  ;;  %v544_v5 = vld [vmem:[%s2410_s4 + $0x10] sm:$0xff] }
 0x1a5   :  { %v493_v11 = vsub.f32 1.0, %v492_v35 }
 0x1a7   :  { %v494_v43 = vmul.f32 %v1361_v1, %v493_v11 }
 0x1a8   :  { %v1363_v54 = vpop.eup %1362 }
 0x1a9   :  { %v512_v56 = vmul.f32 %v1363_v54, %v510_v51  ;;  %v495_v12 = vadd.f32 %v1361_v1, %v494_v43  ;;  %vm517_vm12 = vweird.f32 %v1363_v54  ;;  %v2295_v51 = vld [vmem:[%s2839_s3 + $0x150] sm:$0xff] }
 0x1aa   :  { %vm518_vm14 = vmor %vm516_vm13, %vm517_vm12 }
 0x1ab   :  { %v513_v26 = vsub.f32 1.0, %v512_v56  ;;  %v499_v62 = vsel %vm498_vm10, %v1361_v1, %v495_v12 }
 0x1ac   :  { %v504_v2 = vsel %vm501_vm11, %v503_v50, %v499_v62 }
 0x1ad   :  { %v514_v4 = vmul.f32 %v1363_v54, %v513_v26  ;;  %v526_v9 = vmul.f32 %v504_v2, %v484_v57 }
 0x1af   :  { %v515_v42 = vadd.f32 %v1363_v54, %v514_v4  ;;  %v527_v47 = vadd.f32 %v526_v9, %v425_v37 }
 0x1b1   :  { %v519_v45 = vsel %vm518_vm14, %v1363_v54, %v515_v42  ;;  %1364 = vtanh.f32 %v527_v47 }
 0x1b2   :  { %v524_v46 = vsel %vm521_vm15, %v523_v25, %v519_v45 }
 0x1b3   :  { %v529_v1 = vsub.f32 1.0, %v524_v46  ;;  %v531_v53 = vmul.f32 %v524_v46, %v2203_v18  ;;  %v2287_v18 = vld [vmem:[%s2839_s3 + $0x168] sm:$0xff] }
 0x1b7   :  { %v1365_v35 = vpop.eup %1364 }
 0x1b8   :  { %v530_v11 = vmul.f32 %v1365_v35, %v529_v1 }
 0x1ba   :  { %v2277_v43 = vadd.f32 %v531_v53, %v530_v11  ;;  %v2430_v11 = vld [vmem:[%s2839_s3 + $0x178] sm:$0xff]  ;;  %v2437_v53 = vld [vmem:[%s2839_s3 + $0x170] sm:$0xff] }
 0x1bc   :  { %536 = vst [vmem:[%s535_s29] sm:$0xff] %v2277_v43  ;;  %561 = vmatmul.f32.vlgmr.msra.gmra.mxu0 %v2277_v43  ;;  %581 = vmatmul.f32.vlgmr.msra.gmra.mxu1 %v2277_v43  ;;  %s2649_s29 = scalar_select %p291_p0, 4, 3 }
 0x1bd   :  { %601 = vmatmul.f32.vlgmr.msra.gmra.mxu2 %v2277_v43  ;;  %823 = vmatpush.msra.mxu0 %v1749_v58  ;;  %v2303_v58 = vld [vmem:[%s2839_s3 + $0x138] sm:$0xff] }
 0x1be   :  { %902 = vmatpush.msra.mxu1 %v2287_v18  ;;  %922 = vmatpush.msra.mxu2 %v1765_v61  ;;  %v2319_v61 = vld [vmem:[%s2839_s3 + $0x108] sm:$0xff]  ;;  %s1340_s30 = smul.u32 24, %s2649_s29 }
 0x1bf   :  { %824 = vmatpush.msra.mxu0 %v1759_v60  ;;  %v2311_v60 = vld [vmem:[%s2839_s3 + $0x120] sm:$0xff] }
 0x1c0   :  { %903 = vmatpush.msra.mxu1 %v2295_v51  ;;  %923 = vmatpush.msra.mxu2 %v1784_v0  ;;  %v2335_v0 = vld [vmem:[%s2839_s3 + $0xd8] sm:$0xff]  ;;  %s2653_s9 = scalar_lea.vmem [#allocation2], %s1340_s30 }
 0x1c1   :  { %825 = vmatpush.msra.mxu0 %v1776_v63  ;;  %v2327_v63 = vld [vmem:[%s2839_s3 + $0xf0] sm:$0xff] }
 0x1c2   :  { %904 = vmatpush.msra.mxu1 %v2303_v58  ;;  %924 = vmatpush.msra.mxu2 %v1801_v3  ;;  %v2343_v3 = vld [vmem:[%s2839_s3 + $0xc0] sm:$0xff] }
 0x1c3   :  { %826 = vmatpush.msra.mxu0 %v1820_v6  ;;  %v2351_v6 = vld [vmem:[%s2839_s3 + $0xa8] sm:$0xff] }
 0x1c4   :  { %905 = vmatpush.msra.mxu1 %v2311_v60  ;;  %925 = vmatpush.msra.mxu2 %v1826_v7  ;;  %v2359_v7 = vld [vmem:[%s2839_s3 + $0x90] sm:$0xff] }
 0x1c5   :  { %827 = vmatpush.msra.mxu0 %v1832_v8  ;;  %v2367_v8 = vld [vmem:[%s2839_s3 + $0x78] sm:$0xff] }
 0x1c6   :  { %906 = vmatpush.msra.mxu1 %v2319_v61  ;;  %926 = vmatpush.msra.mxu2 %v1845_v10  ;;  %v2375_v10 = vld [vmem:[%s2839_s3 + $0x60] sm:$0xff] }
 0x1c7   :  { %828 = vmatpush.msra.mxu0 %v1875_v15  ;;  %v2391_v15 = vld [vmem:[%s2839_s3 + $0x30] sm:$0xff] }
 0x1c8   :  { %907 = vmatpush.msra.mxu1 %v2327_v63  ;;  %927 = vmatpush.msra.mxu2 %v1862_v13  ;;  %v2383_v13 = vld [vmem:[%s2839_s3 + $0x48] sm:$0xff] }
 0x1c9   :  { %829 = vmatpush.msra.mxu0 %v1882_v16 }
 0x1ca   :  { %908 = vmatpush.msra.mxu1 %v2335_v0  ;;  %928 = vmatpush.msra.mxu2 %v1890_v17 }
 0x1cb   :  { %830 = vmatpush.msra.mxu0 %v1910_v20 }
 0x1cc   :  { %909 = vmatpush.msra.mxu1 %v2343_v3  ;;  %929 = vmatpush.msra.mxu2 %v1902_v19 }
 0x1cd   :  { %831 = vmatpush.msra.mxu0 %v1915_v21  ;;  %v542_v21 = vld [vmem:[%s2410_s4] sm:$0xff] }
 0x1ce   :  { %910 = vmatpush.msra.mxu1 %v2351_v6  ;;  %930 = vmatpush.msra.mxu2 %v1921_v22  ;;  %v543_v22 = vld [vmem:[%s2410_s4 + $0x8] sm:$0xff] }
 0x1cf   :  { %832 = vmatpush.msra.mxu0 %v1927_v23 }
 0x1d0   :  { %911 = vmatpush.msra.mxu1 %v2359_v7  ;;  %931 = vmatpush.msra.mxu2 %v1935_v24 }
 0x1d1   :  { %833 = vmatpush.msra.mxu0 %v1953_v29 }
 0x1d2   :  { %912 = vmatpush.msra.mxu1 %v2367_v8  ;;  %932 = vmatpush.msra.mxu2 %v1947_v27 }
 0x1d3   :  { %834 = vmatpush.msra.mxu0 %v1961_v30 }
 0x1d4   :  { %913 = vmatpush.msra.mxu1 %v2375_v10  ;;  %933 = vmatpush.msra.mxu2 %v1967_v31 }
 0x1d5   :  { %835 = vmatpush.msra.mxu0 %v1973_v33 }
 0x1d6   :  { %914 = vmatpush.msra.mxu1 %v2383_v13  ;;  %934 = vmatpush.msra.mxu2 %v1981_v34 }
 0x1d7   :  { %836 = vmatpush.msra.mxu0 %v1999_v38 }
 0x1d8   :  { %915 = vmatpush.msra.mxu1 %v2391_v15  ;;  %935 = vmatpush.msra.mxu2 %v2886_v28 }
 0x1d9   :  { %837 = vmatpush.msra.mxu0 %v2887_v32 }
 0x1da   :  { %916 = vmatpush.msra.mxu1 %v2888_v36  ;;  %936 = vmatpush.msra.mxu2 %v2889_v40 }
 0x1db   :  { %838 = vmatpush.msra.mxu0 %v2890_v44 }
 0x1dc   :  { %917 = vmatpush.msra.mxu1 %v2891_v48  ;;  %937 = vmatpush.msra.mxu2 %v2892_v52 }
 0x239   :  { %v562_v16 = vpop.f32.mrf.mxu0  ;;  %v582_v17 = vpop.f32.mrf.mxu1 }
 0x23a   :  { %v563_v19 = vadd.f32 %v562_v16, %v2893_v59  ;;  %v583_v20 = vadd.f32 %v582_v17, %v2894_v14  ;;  %v2450_v16 = vld [vmem:[%s2839_s3 + $0x158] sm:$0xff]  ;;  %v2456_v17 = vld [vmem:[%s2839_s3 + $0x148] sm:$0xff] }
 0x23c   :  { %v605_v23 = vadd.f32 %v563_v19, %v542_v21  ;;  %v625_v24 = vadd.f32 %v583_v20, %v543_v22  ;;  %v2463_v19 = vld [vmem:[%s2839_s3 + $0x140] sm:$0xff]  ;;  %v2469_v20 = vld [vmem:[%s2839_s3 + $0x130] sm:$0xff]  ;;  %v2476_v21 = vld [vmem:[%s2839_s3 + $0x128] sm:$0xff] }
 0x23d   :  { %v2482_v22 = vld [vmem:[%s2839_s3 + $0x118] sm:$0xff] }
 0x23e   :  { %v1314_v27 = vmul.f32 -1.442695, %v605_v23  ;;  %v1315_v29 = vmul.f32 -1.442695, %v625_v24  ;;  %v2489_v23 = vld [vmem:[%s2839_s3 + $0x110] sm:$0xff]  ;;  %v2495_v24 = vld [vmem:[%s2839_s3 + $0x100] sm:$0xff] }
 0x240   :  { %1366 = vpow2.f32 %v1314_v27  ;;  %v602_v49 = vpop.f32.mrf.mxu2  ;;  %v2502_v27 = vld [vmem:[%s2839_s3 + $0xf8] sm:$0xff] }
 0x241   :  { %1368 = vpow2.f32 %v1315_v29  ;;  %v603_v50 = vadd.f32 %v602_v49, %v2194_v41  ;;  %v2508_v29 = vld [vmem:[%s2839_s3 + $0xe8] sm:$0xff]  ;;  %v2606_v49 = vld [vmem:[%s2839_s3 + $0x38] sm:$0xff] }
 0x242   :  { %2895 = vst [vmem:[#allocation9_spill] sm:$0xff] %v2606_v49 }
 0x246   :  { %v1367_v30 = vpop.eup %1366 }
 0x247   :  { %v1369_v31 = vpop.eup %1368  ;;  %v609_v33 = vadd.f32 1.0, %v1367_v30  ;;  %v2515_v30 = vld [vmem:[%s2839_s3 + $0xe0] sm:$0xff] }
 0x248   :  { %v629_v34 = vadd.f32 1.0, %v1369_v31  ;;  %v2521_v31 = vld [vmem:[%s2839_s3 + $0xd0] sm:$0xff] }
 0x249   :  { %1370 = vrcp.f32 %v609_v33  ;;  %v621_v48 = vand.u32 2147483648, %v609_v33  ;;  %v619_v55 = vand.u32 2147483647, %v609_v33  ;;  %vm615_vm1 = vweird.f32 %v609_v33 }
 0x24a   :  { %1372 = vrcp.f32 %v629_v34  ;;  %v641_v2 = vand.u32 2147483648, %v629_v34  ;;  %vm635_vm5 = vweird.f32 %v629_v34  ;;  %v639_v9 = vand.u32 2147483647, %v629_v34 }
 0x24b   :  { %v622_v12 = vor.u32 1.1754944e-38, %v621_v48  ;;  %vm620_vm3 = vcmp.eq.f32.partialorder %v619_v55, 8.507059e+37  ;;  %v2580_v48 = vld [vmem:[%s2839_s3 + $0x68] sm:$0xff]  ;;  %v2593_v55 = vld [vmem:[%s2839_s3 + $0x50] sm:$0xff] }
 0x24c   :  { %v642_v42 = vor.u32 1.1754944e-38, %v641_v2  ;;  %vm640_vm7 = vcmp.eq.f32.partialorder %v639_v9, 8.507059e+37 }
 0x24f   :  { %v1371_v38 = vpop.eup %1370 }
 0x250   :  { %v1373_v28 = vpop.eup %1372  ;;  %v611_v32 = vmul.f32 %v1371_v38, %v609_v33  ;;  %vm616_vm0 = vweird.f32 %v1371_v38  ;;  %v2528_v33 = vld [vmem:[%s2839_s3 + $0xc8] sm:$0xff] }
 0x251   :  { %v631_v36 = vmul.f32 %v1373_v28, %v629_v34  ;;  %vm617_vm2 = vmor %vm615_vm1, %vm616_vm0  ;;  %vm636_vm4 = vweird.f32 %v1373_v28  ;;  %v2534_v34 = vld [vmem:[%s2839_s3 + $0xb8] sm:$0xff] }
 0x252   :  { %v612_v40 = vsub.f32 1.0, %v611_v32  ;;  %vm637_vm6 = vmor %vm635_vm5, %vm636_vm4  ;;  %v2554_v32 = vld [vmem:[%s2839_s3 + $0x98] sm:$0xff] }
 0x253   :  { %v632_v44 = vsub.f32 1.0, %v631_v36  ;;  %v2560_v36 = vld [vmem:[%s2839_s3 + $0x88] sm:$0xff] }
 0x254   :  { %v613_v52 = vmul.f32 %v1371_v38, %v612_v40  ;;  %v2567_v40 = vld [vmem:[%s2839_s3 + $0x80] sm:$0xff] }
 0x255   :  { %v633_v54 = vmul.f32 %v1373_v28, %v632_v44  ;;  %v2573_v44 = vld [vmem:[%s2839_s3 + $0x70] sm:$0xff] }
 0x256   :  { %v614_v56 = vadd.f32 %v1371_v38, %v613_v52  ;;  %v2586_v52 = vld [vmem:[%s2839_s3 + $0x58] sm:$0xff] }
 0x257   :  { %v634_v62 = vadd.f32 %v1373_v28, %v633_v54  ;;  %v2599_v54 = vld [vmem:[%s2839_s3 + $0x40] sm:$0xff] }
 0x258   :  { %v618_v26 = vsel %vm617_vm2, %v1371_v38, %v614_v56  ;;  %v2541_v38 = vld [vmem:[%s2839_s3 + $0xb0] sm:$0xff]  ;;  %v2612_v56 = vld [vmem:[%s2839_s3 + $0x28] sm:$0xff] }
 0x259   :  { %v623_v57 = vsel %vm620_vm3, %v622_v12, %v618_v26  ;;  %v638_v39 = vsel %vm637_vm6, %v1373_v28, %v634_v62  ;;  %v2547_v28 = vld [vmem:[%s2839_s3 + $0xa0] sm:$0xff]  ;;  %2896 = vst [vmem:[#allocation12_spill] sm:$0xff] %v2612_v56  ;;  %v2618_v12 = vld [vmem:[%s2839_s3 + $0x18] sm:$0xff]  ;;  %v2630_v26 = vld [vmem:[%s2839_s3 + $0x10] sm:$0xff] }
 0x25a   :  { %v645_v4 = vmul.f32 %v623_v57, %v603_v50  ;;  %v643_v47 = vsel %vm640_vm7, %v642_v42, %v638_v39  ;;  %2897 = vst [vmem:[#allocation13_spill] sm:$0xff] %v2618_v12  ;;  %v2624_v50 = vld [vmem:[%s2839_s3 + $0x20] sm:$0xff]  ;;  %v2642_v62 = vld [vmem:[%s2839_s3 + $0x8] sm:$0xff] }
 0x25b   :  { %v648_v25 = vsub.f32 1.0, %v643_v47  ;;  %v650_v1 = vmul.f32 %v643_v47, %v2277_v43  ;;  %v2443_v43 = vld [vmem:[%s2839_s3 + $0x160] sm:$0xff]  ;;  %2898 = vst [vmem:[#allocation10_spill] sm:$0xff] %v2624_v50 }
 0x25c   :  { %v646_v37 = vadd.f32 %v645_v4, %v544_v5  ;;  %2899 = vst [vmem:[#allocation14_spill] sm:$0xff] %v2630_v26  ;;  %v2636_v57 = vld [vmem:[%s2839_s3] sm:$0xff]  ;;  %v662_v5 = vld [vmem:[%s2653_s9 + $0x8] sm:$0xff]  ;;  %s1320_s3 = sshll.u32 %s2649_s29, 3  ;;  %s1343_s29 = smul.u32 24, %s2791_s28 }
 0x25d   :  { %2900 = vst [vmem:[#allocation15_spill] sm:$0xff] %v2636_v57  ;;  %v661_v47 = vld [vmem:[%s2653_s9] sm:$0xff]  ;;  %s773_s6 = scalar_lea.vmem %s2843_s7, %s1320_s3 }
 0x25e   :  { %1374 = vtanh.f32 %v646_v37  ;;  %2901 = vst [vmem:[#allocation11_spill] sm:$0xff] %v2642_v62  ;;  %s2796_s30 = scalar_lea.vmem [#allocation2], %s1343_s29 }
 0x264   :  { %v1375_v45 = vpop.eup %1374 }
 0x265   :  { %v649_v46 = vmul.f32 %v1375_v45, %v648_v25 }
 0x267   :  { %v2421_v35 = vadd.f32 %v650_v1, %v649_v46 }
 0x269   :  { %655 = vst [vmem:[%s654_s13] sm:$0xff] %v2421_v35  ;;  %680 = vmatmul.f32.vlgmr.msrb.gmra.mxu3 %v2421_v35  ;;  %700 = vmatmul.f32.vlgmr.msrb.gmra.mxu0 %v2421_v35  ;;  %s2728_s13 = scalar_lea.vmem [#allocation2], %s1341_s2  ;;  %s2821_s2 = scalar_lea.vmem [#allocation2], %s1344_s12 }
 0x26a   :  { %720 = vmatmul.f32.vlgmr.msrb.gmra.mxu1 %v2421_v35  ;;  %942 = vmatpush.msrb.mxu3 %v2430_v11 }
 0x26b   :  { %1021 = vmatpush.msrb.mxu0 %v2287_v18  ;;  %1041 = vmatpush.msrb.mxu1 %v2437_v53 }
 0x26c   :  { %943 = vmatpush.msrb.mxu3 %v2443_v43 }
 0x26d   :  { %1022 = vmatpush.msrb.mxu0 %v2295_v51  ;;  %1042 = vmatpush.msrb.mxu1 %v2450_v16 }
 0x26e   :  { %944 = vmatpush.msrb.mxu3 %v2456_v17 }
 0x26f   :  { %1023 = vmatpush.msrb.mxu0 %v2303_v58  ;;  %1043 = vmatpush.msrb.mxu1 %v2463_v19 }
 0x270   :  { %945 = vmatpush.msrb.mxu3 %v2469_v20 }
 0x271   :  { %1024 = vmatpush.msrb.mxu0 %v2311_v60  ;;  %1044 = vmatpush.msrb.mxu1 %v2476_v21 }
 0x272   :  { %946 = vmatpush.msrb.mxu3 %v2482_v22 }
 0x273   :  { %1025 = vmatpush.msrb.mxu0 %v2319_v61  ;;  %1045 = vmatpush.msrb.mxu1 %v2489_v23 }
 0x274   :  { %947 = vmatpush.msrb.mxu3 %v2495_v24 }
 0x275   :  { %1026 = vmatpush.msrb.mxu0 %v2327_v63  ;;  %1046 = vmatpush.msrb.mxu1 %v2502_v27 }
 0x276   :  { %948 = vmatpush.msrb.mxu3 %v2508_v29 }
 0x277   :  { %1027 = vmatpush.msrb.mxu0 %v2335_v0  ;;  %1047 = vmatpush.msrb.mxu1 %v2515_v30 }
 0x278   :  { %949 = vmatpush.msrb.mxu3 %v2521_v31 }
 0x279   :  { %1028 = vmatpush.msrb.mxu0 %v2343_v3  ;;  %1048 = vmatpush.msrb.mxu1 %v2528_v33 }
 0x27a   :  { %950 = vmatpush.msrb.mxu3 %v2534_v34 }
 0x27b   :  { %1029 = vmatpush.msrb.mxu0 %v2351_v6  ;;  %1049 = vmatpush.msrb.mxu1 %v2541_v38 }
 0x27c   :  { %951 = vmatpush.msrb.mxu3 %v2547_v28 }
 0x27d   :  { %1030 = vmatpush.msrb.mxu0 %v2359_v7  ;;  %1050 = vmatpush.msrb.mxu1 %v2554_v32 }
 0x27e   :  { %952 = vmatpush.msrb.mxu3 %v2560_v36 }
 0x27f   :  { %1031 = vmatpush.msrb.mxu0 %v2367_v8  ;;  %1051 = vmatpush.msrb.mxu1 %v2567_v40 }
 0x280   :  { %953 = vmatpush.msrb.mxu3 %v2573_v44 }
 0x281   :  { %1032 = vmatpush.msrb.mxu0 %v2375_v10  ;;  %1052 = vmatpush.msrb.mxu1 %v2580_v48 }
 0x282   :  { %954 = vmatpush.msrb.mxu3 %v2586_v52 }
 0x283   :  { %1033 = vmatpush.msrb.mxu0 %v2383_v13  ;;  %1053 = vmatpush.msrb.mxu1 %v2593_v55 }
 0x284   :  { %955 = vmatpush.msrb.mxu3 %v2599_v54 }
 0x285   :  { %1034 = vmatpush.msrb.mxu0 %v2391_v15  ;;  %1054 = vmatpush.msrb.mxu1 %v2606_v49 }
 0x286   :  { %956 = vmatpush.msrb.mxu3 %v2612_v56 }
 0x287   :  { %1035 = vmatpush.msrb.mxu0 %v2618_v12  ;;  %1055 = vmatpush.msrb.mxu1 %v2624_v50 }
 0x288   :  { %957 = vmatpush.msrb.mxu3 %v2630_v26 }
 0x289   :  { %1036 = vmatpush.msrb.mxu0 %v2636_v57  ;;  %1056 = vmatpush.msrb.mxu1 %v2642_v62 }
 0x2e6   :  { %v701_v2 = vpop.f32.mrf.mxu0 }
 0x2e7   :  { %v702_v4 = vadd.f32 %v701_v2, %v2894_v14 }
 0x2e9   :  { %v744_v9 = vadd.f32 %v702_v4, %v662_v5 }
 0x2eb   :  { %v1319_v37 = vmul.f32 -1.442695, %v744_v9 }
 0x2ec   :  { %v681_v39 = vpop.f32.mrf.mxu3 }
 0x2ed   :  { %1376 = vpow2.f32 %v1319_v37  ;;  %v682_v42 = vadd.f32 %v681_v39, %v2893_v59 }
 0x2ef   :  { %v724_v25 = vadd.f32 %v682_v42, %v661_v47  ;;  %v721_v47 = vpop.f32.mrf.mxu1 }
 0x2f1   :  { %v1318_v45 = vmul.f32 -1.442695, %v724_v25 }
 0x2f3   :  { %v1377_v46 = vpop.eup %1376  ;;  %1378 = vpow2.f32 %v1318_v45 }
 0x2f4   :  { %v748_v1 = vadd.f32 1.0, %v1377_v46 }
 0x2f6   :  { %1380 = vrcp.f32 %v748_v1  ;;  %vm754_vm13 = vweird.f32 %v748_v1  ;;  %v758_v56 = vand.u32 2147483647, %v748_v1 }
 0x2f8   :  { %vm759_vm15 = vcmp.eq.f32.partialorder %v758_v56, 8.507059e+37 }
 0x2f9   :  { %v1379_v62 = vpop.eup %1378 }
 0x2fa   :  { %v728_v2 = vadd.f32 1.0, %v1379_v62  ;;  %v722_v62 = vadd.f32 %v721_v47, %v2194_v41 }
 0x2fc   :  { %1382 = vrcp.f32 %v728_v2  ;;  %v1381_v14 = vpop.eup %1380  ;;  %v740_v9 = vand.u32 2147483648, %v728_v2  ;;  %v738_v39 = vand.u32 2147483647, %v728_v2  ;;  %vm734_vm9 = vweird.f32 %v728_v2 }
 0x2fd   :  { %v750_v57 = vmul.f32 %v1381_v14, %v748_v1  ;;  %vm755_vm12 = vweird.f32 %v1381_v14 }
 0x2fe   :  { %v741_v45 = vor.u32 1.1754944e-38, %v740_v9  ;;  %vm739_vm11 = vcmp.eq.f32.partialorder %v738_v39, 8.507059e+37  ;;  %vm756_vm14 = vmor %vm754_vm13, %vm755_vm12 }
 0x2ff   :  { %v751_v4 = vsub.f32 1.0, %v750_v57 }
 0x301   :  { %v752_v42 = vmul.f32 %v1381_v14, %v751_v4 }
 0x302   :  { %v1383_v26 = vpop.eup %1382 }
 0x303   :  { %v730_v50 = vmul.f32 %v1383_v26, %v728_v2  ;;  %vm735_vm8 = vweird.f32 %v1383_v26  ;;  %v753_v57 = vadd.f32 %v1381_v14, %v752_v42 }
 0x304   :  { %vm736_vm10 = vmor %vm734_vm9, %vm735_vm8 }
 0x305   :  { %v731_v5 = vsub.f32 1.0, %v730_v50  ;;  %v760_v50 = vand.u32 2147483648, %v748_v1  ;;  %v757_v49 = vsel %vm756_vm14, %v1381_v14, %v753_v57  ;;  %v2902_v14 = vld [vmem:[#allocation9_spill] sm:$0xff] }
 0x307   :  { %v732_v37 = vmul.f32 %v1383_v26, %v731_v5  ;;  %v663_v5 = vld [vmem:[%s2653_s9 + $0x10] sm:$0xff]  ;;  %s1332_s9 = sshll.u32 %s2791_s28, 3 }
 0x308   :  { %s1130_s1 = scalar_lea.vmem %s2843_s7, %s1332_s9 }
 0x309   :  { %v733_v25 = vadd.f32 %v1383_v26, %v732_v37  ;;  %v761_v37 = vor.u32 1.1754944e-38, %v760_v50 }
 0x30b   :  { %v737_v46 = vsel %vm736_vm10, %v1383_v26, %v733_v25  ;;  %v762_v2 = vsel %vm759_vm15, %v761_v37, %v757_v49  ;;  %v782_v37 = vld [vmem:[%s2728_s13 + $0x10] sm:$0xff] }
 0x30c   :  { %v742_v59 = vsel %vm739_vm11, %v741_v45, %v737_v46  ;;  %v767_v9 = vsub.f32 1.0, %v762_v2  ;;  %v769_v47 = vmul.f32 %v762_v2, %v2421_v35 }
 0x30d   :  { %v764_v12 = vmul.f32 %v742_v59, %v722_v62 }
 0x30f   :  { %v765_v4 = vadd.f32 %v764_v12, %v663_v5 }
 0x311   :  { %1384 = vtanh.f32 %v765_v4 }
 0x317   :  { %v1385_v26 = vpop.eup %1384 }
 0x318   :  { %v768_v39 = vmul.f32 %v1385_v26, %v767_v9 }
 0x31a   :  { %v2665_v59 = vadd.f32 %v769_v47, %v768_v39 }
 0x31c   :  { %774 = vst [vmem:[%s773_s6] sm:$0xff] %v2665_v59  ;;  %799 = vmatmul.f32.vlgmr.msrb.gmra.mxu2 %v2665_v59  ;;  %819 = vmatmul.f32.vlgmr.msra.gmra.mxu3 %v2665_v59 }
 0x31d   :  { %839 = vmatmul.f32.vlgmr.msra.gmra.mxu0 %v2665_v59  ;;  %1061 = vmatpush.msrb.mxu2 %v2430_v11 }
 0x31e   :  { %1140 = vmatpush.msra.mxu3 %v2287_v18  ;;  %1160 = vmatpush.msra.mxu0 %v2437_v53  ;;  %v2903_v18 = vld [vmem:[#allocation12_spill] sm:$0xff] }
 0x31f   :  { %1062 = vmatpush.msrb.mxu2 %v2443_v43 }
 0x320   :  { %1141 = vmatpush.msra.mxu3 %v2295_v51  ;;  %1161 = vmatpush.msra.mxu0 %v2450_v16  ;;  %v2904_v51 = vld [vmem:[#allocation13_spill] sm:$0xff] }
 0x321   :  { %1063 = vmatpush.msrb.mxu2 %v2456_v17 }
 0x322   :  { %1142 = vmatpush.msra.mxu3 %v2303_v58  ;;  %1162 = vmatpush.msra.mxu0 %v2463_v19  ;;  %v2905_v58 = vld [vmem:[#allocation10_spill] sm:$0xff] }
 0x323   :  { %1064 = vmatpush.msrb.mxu2 %v2469_v20 }
 0x324   :  { %1143 = vmatpush.msra.mxu3 %v2311_v60  ;;  %1163 = vmatpush.msra.mxu0 %v2476_v21  ;;  %v2906_v60 = vld [vmem:[#allocation14_spill] sm:$0xff] }
 0x325   :  { %1065 = vmatpush.msrb.mxu2 %v2482_v22 }
 0x326   :  { %1144 = vmatpush.msra.mxu3 %v2319_v61  ;;  %1164 = vmatpush.msra.mxu0 %v2489_v23  ;;  %v2907_v61 = vld [vmem:[#allocation15_spill] sm:$0xff] }
 0x327   :  { %1066 = vmatpush.msrb.mxu2 %v2495_v24 }
 0x328   :  { %1145 = vmatpush.msra.mxu3 %v2327_v63  ;;  %1165 = vmatpush.msra.mxu0 %v2502_v27  ;;  %v2908_v63 = vld [vmem:[#allocation11_spill] sm:$0xff] }
 0x329   :  { %1067 = vmatpush.msrb.mxu2 %v2508_v29 }
 0x32a   :  { %1146 = vmatpush.msra.mxu3 %v2335_v0  ;;  %1166 = vmatpush.msra.mxu0 %v2515_v30 }
 0x32b   :  { %1068 = vmatpush.msrb.mxu2 %v2521_v31 }
 0x32c   :  { %1147 = vmatpush.msra.mxu3 %v2343_v3  ;;  %1167 = vmatpush.msra.mxu0 %v2528_v33 }
 0x32d   :  { %1069 = vmatpush.msrb.mxu2 %v2534_v34 }
 0x32e   :  { %1148 = vmatpush.msra.mxu3 %v2351_v6  ;;  %1168 = vmatpush.msra.mxu0 %v2541_v38  ;;  %v2909_v6 = vld [vmem:[#allocation17_spill] sm:$0xff] }
 0x32f   :  { %1070 = vmatpush.msrb.mxu2 %v2547_v28 }
 0x330   :  { %1149 = vmatpush.msra.mxu3 %v2359_v7  ;;  %1169 = vmatpush.msra.mxu0 %v2554_v32 }
 0x331   :  { %1071 = vmatpush.msrb.mxu2 %v2560_v36 }
 0x332   :  { %1150 = vmatpush.msra.mxu3 %v2367_v8  ;;  %1170 = vmatpush.msra.mxu0 %v2567_v40  ;;  %v2910_v8 = vld [vmem:[#allocation18_spill] sm:$0xff] }
 0x333   :  { %1072 = vmatpush.msrb.mxu2 %v2573_v44 }
 0x334   :  { %1151 = vmatpush.msra.mxu3 %v2375_v10  ;;  %1171 = vmatpush.msra.mxu0 %v2580_v48 }
 0x335   :  { %1073 = vmatpush.msrb.mxu2 %v2586_v52 }
 0x336   :  { %1152 = vmatpush.msra.mxu3 %v2383_v13  ;;  %1172 = vmatpush.msra.mxu0 %v2593_v55  ;;  %v780_v13 = vld [vmem:[%s2728_s13] sm:$0xff] }
 0x337   :  { %1074 = vmatpush.msrb.mxu2 %v2599_v54 }
 0x338   :  { %1153 = vmatpush.msra.mxu3 %v2391_v15  ;;  %1173 = vmatpush.msra.mxu0 %v2902_v14  ;;  %v781_v15 = vld [vmem:[%s2728_s13 + $0x8] sm:$0xff]  ;;  %s1500_s13 = smov [#allocation6]  }
 0x339   :  { %1075 = vmatpush.msrb.mxu2 %v2903_v18  ;;  %s1260_s14 = sshll.u32 %s1500_s13, 4  ;;  %s1261_s14 = int_to_ptr.vmem [resolvable:$true] %s1260_s14 }
 0x33a   :  { %1154 = vmatpush.msra.mxu3 %v2904_v51  ;;  %1174 = vmatpush.msra.mxu0 %v2905_v58 }
 0x33b   :  { %1076 = vmatpush.msrb.mxu2 %v2906_v60 }
 0x33c   :  { %1155 = vmatpush.msra.mxu3 %v2907_v61  ;;  %1175 = vmatpush.msra.mxu0 %v2908_v63 }
 0x39a   :  { %v840_v1 = vpop.f32.mrf.mxu0 }
 0x39b   :  { %v841_v62 = vadd.f32 %v840_v1, %v2194_v41 }
 0x39f   :  { %v800_v0 = vpop.f32.mrf.mxu2  ;;  %v820_v3 = vpop.f32.mrf.mxu3 }
 0x3a0   :  { %v801_v7 = vadd.f32 %v800_v0, %v2909_v6  ;;  %v821_v10 = vadd.f32 %v820_v3, %v2910_v8 }
 0x3a2   :  { %v843_v35 = vadd.f32 %v801_v7, %v780_v13  ;;  %v863_v53 = vadd.f32 %v821_v10, %v781_v15 }
 0x3a4   :  { %v1322_v16 = vmul.f32 -1.442695, %v843_v35  ;;  %v1323_v19 = vmul.f32 -1.442695, %v863_v53 }
 0x3a6   :  { %1386 = vpow2.f32 %v1322_v16 }
 0x3a7   :  { %1388 = vpow2.f32 %v1323_v19 }
 0x3ac   :  { %v1387_v21 = vpop.eup %1386 }
 0x3ad   :  { %v1389_v23 = vpop.eup %1388  ;;  %v847_v27 = vadd.f32 1.0, %v1387_v21 }
 0x3ae   :  { %v867_v30 = vadd.f32 1.0, %v1389_v23 }
 0x3af   :  { %1390 = vrcp.f32 %v847_v27  ;;  %v859_v55 = vand.u32 2147483648, %v847_v27  ;;  %v857_v12 = vand.u32 2147483647, %v847_v27  ;;  %vm853_vm1 = vweird.f32 %v847_v27 }
 0x3b0   :  { %1392 = vrcp.f32 %v867_v30  ;;  %v879_v4 = vand.u32 2147483648, %v867_v30  ;;  %vm873_vm5 = vweird.f32 %v867_v30  ;;  %v877_v2 = vand.u32 2147483647, %v867_v30 }
 0x3b1   :  { %v860_v45 = vor.u32 1.1754944e-38, %v859_v55  ;;  %vm858_vm3 = vcmp.eq.f32.partialorder %v857_v12, 8.507059e+37 }
 0x3b2   :  { %v880_v39 = vor.u32 1.1754944e-38, %v879_v4  ;;  %vm878_vm7 = vcmp.eq.f32.partialorder %v877_v2, 8.507059e+37  ;;  %v1019_v4 = vld [vmem:[%s2796_s30 + $0x8] sm:$0xff] }
 0x3b5   :  { %v1391_v33 = vpop.eup %1390 }
 0x3b6   :  { %v1393_v38 = vpop.eup %1392  ;;  %v849_v32 = vmul.f32 %v1391_v33, %v847_v27  ;;  %vm854_vm0 = vweird.f32 %v1391_v33 }
 0x3b7   :  { %v869_v40 = vmul.f32 %v1393_v38, %v867_v30  ;;  %vm855_vm2 = vmor %vm853_vm1, %vm854_vm0  ;;  %vm874_vm4 = vweird.f32 %v1393_v38 }
 0x3b8   :  { %v850_v48 = vsub.f32 1.0, %v849_v32  ;;  %vm875_vm6 = vmor %vm873_vm5, %vm874_vm4 }
 0x3b9   :  { %v870_v49 = vsub.f32 1.0, %v869_v40 }
 0x3ba   :  { %v851_v56 = vmul.f32 %v1391_v33, %v850_v48 }
 0x3bb   :  { %v871_v42 = vmul.f32 %v1393_v38, %v870_v49 }
 0x3bc   :  { %v852_v25 = vadd.f32 %v1391_v33, %v851_v56 }
 0x3bd   :  { %v872_v50 = vadd.f32 %v1393_v38, %v871_v42 }
 0x3be   :  { %v856_v46 = vsel %vm855_vm2, %v1391_v33, %v852_v25 }
 0x3bf   :  { %v861_v57 = vsel %vm858_vm3, %v860_v45, %v856_v46  ;;  %v876_v26 = vsel %vm875_vm6, %v1393_v38, %v872_v50  ;;  %v901_v38 = vld [vmem:[%s2769_s21 + $0x10] sm:$0xff] }
 0x3c0   :  { %v883_v5 = vmul.f32 %v861_v57, %v841_v62  ;;  %v881_v47 = vsel %vm878_vm7, %v880_v39, %v876_v26 }
 0x3c1   :  { %v886_v14 = vsub.f32 1.0, %v881_v47  ;;  %v888_v61 = vmul.f32 %v881_v47, %v2665_v59 }
 0x3c2   :  { %v884_v9 = vadd.f32 %v883_v5, %v782_v37  ;;  %v1018_v5 = vld [vmem:[%s2796_s30] sm:$0xff] }
 0x3c4   :  { %1394 = vtanh.f32 %v884_v9 }
 0x3ca   :  { %v1395_v51 = vpop.eup %1394 }
 0x3cb   :  { %v887_v58 = vmul.f32 %v1395_v51, %v886_v14 }
 0x3cd   :  { %v2739_v63 = vadd.f32 %v888_v61, %v887_v58 }
 0x3cf   :  { %893 = vst [vmem:[%s892_s5] sm:$0xff] %v2739_v63  ;;  %918 = vmatmul.f32.vlgmr.msra.gmra.mxu1 %v2739_v63  ;;  %938 = vmatmul.f32.vlgmr.msra.gmra.mxu2 %v2739_v63  ;;  %s1262_s5 = sshll.u32 %s2844_s8, 4  ;;  %s1263_s5 = int_to_ptr.hbm [resolvable:$true] %s1262_s5 }
 0x3d0   :  { %958 = vmatmul.f32.vlgmr.msrb.gmra.mxu3 %v2739_v63  ;;  %1180 = vmatpush.msra.mxu1 %v2430_v11 }
 0x3d2   :  { %1181 = vmatpush.msra.mxu1 %v2443_v43 }
 0x3d4   :  { %1182 = vmatpush.msra.mxu1 %v2456_v17  ;;  %v899_v17 = vld [vmem:[%s2769_s21] sm:$0xff] }
 0x3d6   :  { %1183 = vmatpush.msra.mxu1 %v2469_v20 }
 0x3d8   :  { %1184 = vmatpush.msra.mxu1 %v2482_v22 }
 0x3da   :  { %1185 = vmatpush.msra.mxu1 %v2495_v24 }
 0x3dc   :  { %1186 = vmatpush.msra.mxu1 %v2508_v29 }
 0x3de   :  { %1187 = vmatpush.msra.mxu1 %v2521_v31  ;;  %v900_v31 = vld [vmem:[%s2769_s21 + $0x8] sm:$0xff] }
 0x3e0   :  { %1188 = vmatpush.msra.mxu1 %v2534_v34 }
 0x3e2   :  { %1189 = vmatpush.msra.mxu1 %v2547_v28 }
 0x3e4   :  { %1190 = vmatpush.msra.mxu1 %v2560_v36 }
 0x3e6   :  { %1191 = vmatpush.msra.mxu1 %v2573_v44 }
 0x3e8   :  { %1192 = vmatpush.msra.mxu1 %v2586_v52 }
 0x3ea   :  { %1193 = vmatpush.msra.mxu1 %v2599_v54 }
 0x3ec   :  { %1194 = vmatpush.msra.mxu1 %v2903_v18 }
 0x3ee   :  { %1195 = vmatpush.msra.mxu1 %v2906_v60 }
 0x44c   :  { %v919_v11 = vpop.f32.mrf.mxu1 }
 0x44d   :  { %v920_v43 = vadd.f32 %v919_v11, %v2909_v6 }
 0x44f   :  { %v962_v20 = vadd.f32 %v920_v43, %v899_v17 }
 0x451   :  { %v1326_v22 = vmul.f32 -1.442695, %v962_v20 }
 0x452   :  { %v939_v24 = vpop.f32.mrf.mxu2 }
 0x453   :  { %1396 = vpow2.f32 %v1326_v22  ;;  %v940_v29 = vadd.f32 %v939_v24, %v2910_v8  ;;  %v959_v13 = vpop.f32.mrf.mxu3 }
 0x454   :  { %v960_v19 = vadd.f32 %v959_v13, %v2194_v41 }
 0x455   :  { %v982_v34 = vadd.f32 %v940_v29, %v900_v31 }
 0x457   :  { %v1327_v28 = vmul.f32 -1.442695, %v982_v34 }
 0x459   :  { %v1397_v36 = vpop.eup %1396  ;;  %1398 = vpow2.f32 %v1327_v28 }
 0x45a   :  { %v966_v44 = vadd.f32 1.0, %v1397_v36 }
 0x45c   :  { %1400 = vrcp.f32 %v966_v44  ;;  %v978_v0 = vand.u32 2147483648, %v966_v44  ;;  %v976_v7 = vand.u32 2147483647, %v966_v44  ;;  %vm972_vm9 = vweird.f32 %v966_v44 }
 0x45e   :  { %v979_v53 = vor.u32 1.1754944e-38, %v978_v0  ;;  %vm977_vm11 = vcmp.eq.f32.partialorder %v976_v7, 8.507059e+37 }
 0x45f   :  { %v1399_v52 = vpop.eup %1398 }
 0x460   :  { %v986_v54 = vadd.f32 1.0, %v1399_v52 }
 0x462   :  { %v1401_v59 = vpop.eup %1400  ;;  %1402 = vrcp.f32 %v986_v54  ;;  %v998_v30 = vand.u32 2147483648, %v986_v54  ;;  %v996_v32 = vand.u32 2147483647, %v986_v54  ;;  %vm992_vm13 = vweird.f32 %v986_v54 }
 0x463   :  { %v968_v18 = vmul.f32 %v1401_v59, %v966_v44  ;;  %vm973_vm8 = vweird.f32 %v1401_v59 }
 0x464   :  { %vm974_vm10 = vmor %vm972_vm9, %vm973_vm8  ;;  %v999_v55 = vor.u32 1.1754944e-38, %v998_v30  ;;  %vm997_vm15 = vcmp.eq.f32.partialorder %v996_v32, 8.507059e+37 }
 0x465   :  { %v969_v60 = vsub.f32 1.0, %v968_v18 }
 0x467   :  { %v970_v3 = vmul.f32 %v1401_v59, %v969_v60  ;;  %v1020_v60 = vld [vmem:[%s2796_s30 + $0x10] sm:$0xff] }
 0x468   :  { %v1403_v10 = vpop.eup %1402 }
 0x469   :  { %v988_v15 = vmul.f32 %v1403_v10, %v986_v54  ;;  %v971_v35 = vadd.f32 %v1401_v59, %v970_v3  ;;  %vm993_vm12 = vweird.f32 %v1403_v10 }
 0x46a   :  { %vm994_vm14 = vmor %vm992_vm13, %vm993_vm12 }
 0x46b   :  { %v989_v16 = vsub.f32 1.0, %v988_v15  ;;  %v975_v21 = vsel %vm974_vm10, %v1401_v59, %v971_v35 }
 0x46c   :  { %v980_v23 = vsel %vm977_vm11, %v979_v53, %v975_v21 }
 0x46d   :  { %v990_v27 = vmul.f32 %v1403_v10, %v989_v16  ;;  %v1002_v33 = vmul.f32 %v980_v23, %v960_v19 }
 0x46f   :  { %v991_v40 = vadd.f32 %v1403_v10, %v990_v27  ;;  %v1003_v48 = vadd.f32 %v1002_v33, %v901_v38  ;;  %v1138_v27 = vld [vmem:[%s2821_s2 + $0x8] sm:$0xff] }
 0x471   :  { %v995_v49 = vsel %vm994_vm14, %v1403_v10, %v991_v40  ;;  %1404 = vtanh.f32 %v1003_v48  ;;  %v1137_v40 = vld [vmem:[%s2821_s2] sm:$0xff] }
 0x472   :  { %v1000_v56 = vsel %vm997_vm15, %v999_v55, %v995_v49 }
 0x473   :  { %v1005_v12 = vsub.f32 1.0, %v1000_v56  ;;  %v1007_v25 = vmul.f32 %v1000_v56, %v2739_v63 }
 0x477   :  { %v1405_v1 = vpop.eup %1404 }
 0x478   :  { %v1006_v42 = vmul.f32 %v1405_v1, %v1005_v12 }
 0x47a   :  { %v2781_v45 = vadd.f32 %v1007_v25, %v1006_v42 }
 0x47c   :  { %1012 = vst [vmem:[%s1011_s25] sm:$0xff] %v2781_v45  ;;  %1037 = vmatmul.f32.vlgmr.msrb.gmra.mxu0 %v2781_v45  ;;  %1057 = vmatmul.f32.vlgmr.msrb.gmra.mxu1 %v2781_v45 }
 0x47d   :  { %1077 = vmatmul.f32.vlgmr.msrb.gmra.mxu2 %v2781_v45 }
 0x4f9   :  { %v1038_v62 = vpop.f32.mrf.mxu0  ;;  %v1058_v46 = vpop.f32.mrf.mxu1 }
 0x4fa   :  { %v1039_v57 = vadd.f32 %v1038_v62, %v2909_v6  ;;  %v1059_v50 = vadd.f32 %v1058_v46, %v2910_v8 }
 0x4fc   :  { %v1081_v37 = vadd.f32 %v1039_v57, %v1018_v5  ;;  %v1101_v2 = vadd.f32 %v1059_v50, %v1019_v4 }
 0x4fe   :  { %v1330_v9 = vmul.f32 -1.442695, %v1081_v37  ;;  %v1331_v26 = vmul.f32 -1.442695, %v1101_v2 }
 0x500   :  { %1406 = vpow2.f32 %v1330_v9  ;;  %v1078_v31 = vpop.f32.mrf.mxu2 }
 0x501   :  { %1408 = vpow2.f32 %v1331_v26  ;;  %v1079_v36 = vadd.f32 %v1078_v31, %v2194_v41 }
 0x506   :  { %v1407_v39 = vpop.eup %1406 }
 0x507   :  { %v1409_v47 = vpop.eup %1408  ;;  %v1085_v14 = vadd.f32 1.0, %v1407_v39 }
 0x508   :  { %v1105_v51 = vadd.f32 1.0, %v1409_v47 }
 0x509   :  { %1410 = vrcp.f32 %v1085_v14  ;;  %v1097_v20 = vand.u32 2147483648, %v1085_v14  ;;  %v1095_v24 = vand.u32 2147483647, %v1085_v14  ;;  %vm1091_vm1 = vweird.f32 %v1085_v14 }
 0x50a   :  { %1412 = vrcp.f32 %v1105_v51  ;;  %v1117_v59 = vand.u32 2147483648, %v1105_v51  ;;  %vm1111_vm5 = vweird.f32 %v1105_v51  ;;  %v1115_v0 = vand.u32 2147483647, %v1105_v51 }
 0x50b   :  { %v1098_v28 = vor.u32 1.1754944e-38, %v1097_v20  ;;  %vm1096_vm3 = vcmp.eq.f32.partialorder %v1095_v24, 8.507059e+37 }
 0x50c   :  { %v1118_v10 = vor.u32 1.1754944e-38, %v1117_v59  ;;  %vm1116_vm7 = vcmp.eq.f32.partialorder %v1115_v0, 8.507059e+37 }
 0x50f   :  { %v1411_v58 = vpop.eup %1410 }
 0x510   :  { %v1413_v61 = vpop.eup %1412  ;;  %v1087_v63 = vmul.f32 %v1411_v58, %v1085_v14  ;;  %vm1092_vm0 = vweird.f32 %v1411_v58 }
 0x511   :  { %v1107_v11 = vmul.f32 %v1413_v61, %v1105_v51  ;;  %vm1093_vm2 = vmor %vm1091_vm1, %vm1092_vm0  ;;  %vm1112_vm4 = vweird.f32 %v1413_v61 }
 0x512   :  { %v1088_v43 = vsub.f32 1.0, %v1087_v63  ;;  %vm1113_vm6 = vmor %vm1111_vm5, %vm1112_vm4 }
 0x513   :  { %v1108_v17 = vsub.f32 1.0, %v1107_v11 }
 0x514   :  { %v1089_v22 = vmul.f32 %v1411_v58, %v1088_v43 }
 0x515   :  { %v1109_v29 = vmul.f32 %v1413_v61, %v1108_v17 }
 0x516   :  { %v1090_v34 = vadd.f32 %v1411_v58, %v1089_v22 }
 0x517   :  { %v1110_v54 = vadd.f32 %v1413_v61, %v1109_v29 }
 0x518   :  { %v1094_v44 = vsel %vm1093_vm2, %v1411_v58, %v1090_v34  ;;  %v1139_v58 = vld [vmem:[%s2821_s2 + $0x10] sm:$0xff] }
 0x519   :  { %v1099_v52 = vsel %vm1096_vm3, %v1098_v28, %v1094_v44  ;;  %v1114_v7 = vsel %vm1113_vm6, %v1413_v61, %v1110_v54 }
 0x51a   :  { %v1121_v18 = vmul.f32 %v1099_v52, %v1079_v36  ;;  %v1119_v13 = vsel %vm1116_vm7, %v1118_v10, %v1114_v7 }
 0x51b   :  { %v1124_v15 = vsub.f32 1.0, %v1119_v13  ;;  %v1126_v16 = vmul.f32 %v1119_v13, %v2781_v45 }
 0x51c   :  { %v1122_v3 = vadd.f32 %v1121_v18, %v1020_v60 }
 0x51e   :  { %1414 = vtanh.f32 %v1122_v3 }
 0x524   :  { %v1415_v35 = vpop.eup %1414 }
 0x525   :  { %v1125_v53 = vmul.f32 %v1415_v35, %v1124_v15 }
 0x527   :  { %v2807_v19 = vadd.f32 %v1126_v16, %v1125_v53 }
 0x529   :  { %1131 = vst [vmem:[%s1130_s1] sm:$0xff] %v2807_v19  ;;  %1156 = vmatmul.f32.vlgmr.msra.gmra.mxu3 %v2807_v19  ;;  %1176 = vmatmul.f32.vlgmr.msra.gmra.mxu0 %v2807_v19 }
 0x52a   :  { %1196 = vmatmul.f32.vlgmr.msra.gmra.mxu1 %v2807_v19 }
 0x5a6   :  { %v1177_v21 = vpop.f32.mrf.mxu0 }
 0x5a7   :  { %v1178_v23 = vadd.f32 %v1177_v21, %v2910_v8  ;;  %v1197_v5 = vpop.f32.mrf.mxu1 }
 0x5a8   :  { %v1198_v9 = vadd.f32 %v1197_v5, %v2194_v41 }
 0x5a9   :  { %v1220_v30 = vadd.f32 %v1178_v23, %v1138_v27 }
 0x5ab   :  { %v1335_v33 = vmul.f32 -1.442695, %v1220_v30 }
 0x5ac   :  { %v1157_v38 = vpop.f32.mrf.mxu3 }
 0x5ad   :  { %1416 = vpow2.f32 %v1335_v33  ;;  %v1158_v32 = vadd.f32 %v1157_v38, %v2909_v6 }
 0x5af   :  { %v1200_v48 = vadd.f32 %v1158_v32, %v1137_v40 }
 0x5b1   :  { %v1334_v55 = vmul.f32 -1.442695, %v1200_v48 }
 0x5b3   :  { %v1417_v49 = vpop.eup %1416  ;;  %1418 = vpow2.f32 %v1334_v55 }
 0x5b4   :  { %v1224_v56 = vadd.f32 1.0, %v1417_v49 }
 0x5b6   :  { %1420 = vrcp.f32 %v1224_v56  ;;  %v1236_v14 = vand.u32 2147483648, %v1224_v56  ;;  %vm1230_vm13 = vweird.f32 %v1224_v56  ;;  %v1234_v61 = vand.u32 2147483647, %v1224_v56 }
 0x5b8   :  { %v1237_v43 = vor.u32 1.1754944e-38, %v1236_v14  ;;  %vm1235_vm15 = vcmp.eq.f32.partialorder %v1234_v61, 8.507059e+37 }
 0x5b9   :  { %v1419_v12 = vpop.eup %1418 }
 0x5ba   :  { %v1204_v8 = vadd.f32 1.0, %v1419_v12 }
 0x5bc   :  { %1422 = vrcp.f32 %v1204_v8  ;;  %v1421_v1 = vpop.eup %1420  ;;  %v1216_v57 = vand.u32 2147483648, %v1204_v8  ;;  %v1214_v6 = vand.u32 2147483647, %v1204_v8  ;;  %vm1210_vm9 = vweird.f32 %v1204_v8 }
 0x5bd   :  { %v1226_v42 = vmul.f32 %v1421_v1, %v1224_v56  ;;  %vm1231_vm12 = vweird.f32 %v1421_v1 }
 0x5be   :  { %v1217_v2 = vor.u32 1.1754944e-38, %v1216_v57  ;;  %vm1215_vm11 = vcmp.eq.f32.partialorder %v1214_v6, 8.507059e+37  ;;  %vm1232_vm14 = vmor %vm1230_vm13, %vm1231_vm12 }
 0x5bf   :  { %v1227_v62 = vsub.f32 1.0, %v1226_v42 }
 0x5c1   :  { %v1228_v4 = vmul.f32 %v1421_v1, %v1227_v62 }
 0x5c2   :  { %v1423_v25 = vpop.eup %1422 }
 0x5c3   :  { %v1206_v45 = vmul.f32 %v1423_v25, %v1204_v8  ;;  %vm1211_vm8 = vweird.f32 %v1423_v25  ;;  %v1229_v47 = vadd.f32 %v1421_v1, %v1228_v4 }
 0x5c4   :  { %vm1212_vm10 = vmor %vm1210_vm9, %vm1211_vm8 }
 0x5c5   :  { %v1207_v46 = vsub.f32 1.0, %v1206_v45  ;;  %v1233_v11 = vsel %vm1232_vm14, %v1421_v1, %v1229_v47 }
 0x5c6   :  { %v1238_v17 = vsel %vm1235_vm15, %v1237_v43, %v1233_v11 }
 0x5c7   :  { %v1208_v50 = vmul.f32 %v1423_v25, %v1207_v46  ;;  %v1243_v41 = vsub.f32 1.0, %v1238_v17  ;;  %v1245_v24 = vmul.f32 %v1238_v17, %v2807_v19 }
 0x5c9   :  { %v1209_v37 = vadd.f32 %v1423_v25, %v1208_v50 }
 0x5cb   :  { %v1213_v26 = vsel %vm1212_vm10, %v1423_v25, %v1209_v37 }
 0x5cc   :  { %v1218_v39 = vsel %vm1215_vm11, %v1217_v2, %v1213_v26 }
 0x5cd   :  { %v1240_v51 = vmul.f32 %v1218_v39, %v1198_v9 }
 0x5cf   :  { %v1241_v63 = vadd.f32 %v1240_v51, %v1139_v58 }
 0x5d1   :  { %1424 = vtanh.f32 %v1241_v63 }
 0x5d7   :  { %v1425_v20 = vpop.eup %1424 }
 0x5d8   :  { %v1244_v22 = vmul.f32 %v1425_v20, %v1243_v41 }
 0x5da   :  { %v1246_v29 = vadd.f32 %v1245_v24, %v1244_v22 }
 0x5dc   :  { %1250 = vst [vmem:[%s1249_s19] sm:$0xff] %v1246_v29 }
 0x5dd   :  { %1252 = vst [vmem:[#allocation6] sm:$0xff] %v1246_v29 }
 0x5de   :  { %1265 = dma.vmem_to_hbm [thread:$0]  %s1261_s14, 128, %s1263_s5, [#allocation7]  }
 0x5df   :  { %1498 = dma.done.wait [#allocation7], 128  }
 0x5e0   :  { %1499 = vsyncadd [#allocation7], 4294967168 }
 0x5e1   :  { %1272 = vsyncpa [#allocation7], 1 }

</bundles_post_ra>
